<compile_context>
chip_gen: v7x
topology: tpu7x:2x2x1
jax: 0.10.0
libtpu: 0.0.40
codegen_flags: <defaults>
</compile_context>

<pallas_src>
import functools
import numpy as np
import jax
import jax.numpy as jnp
from jax import lax
from jax.experimental import pallas as pl
from jax.experimental.pallas import tpu as pltpu


# --------------------------------------------------------------------------- #
# Fused Pallas kernel: squeeze'd slab -> step_num FlowSteps, slab stays in VMEM
# --------------------------------------------------------------------------- #
def _flowblock_kernel(x_ref, masks_ref, pmat_ref, w1_ref, b1_ref, w2_ref, b2_ref,
                      w3_ref, b3_ref, bsum_ref, out_ref, logdet_ref,
                      *, B, H, W, C, S):
    Ca = C // 2
    N = B * H * W

    # Shift validity masks (shared by all steps / both 3x3 convs), built once.
    masks = masks_ref[...]                                  # (N, 9), 1.0 = tap in-bounds
    mcols = [masks[:, k:k + 1] for k in range(9)]           # (N, 1) each
    inv_mask = 1.0 - masks                                  # (N, 9), 1.0 = tap in padding
    offs = [((k // 3) - 1) * W + ((k % 3) - 1) for k in range(9)]

    def im2col(v):
        # 3x3 SAME neighborhood of the (b,h,w)-row-major slab, zero outside bounds.
        cols = []
        for k in range(9):
            shifted = v if offs[k] == 0 else pltpu.roll(v, (-offs[k]) % N, axis=0)
            cols.append(shifted * mcols[k])
        return jnp.concatenate(cols, axis=1)                # (N, 9*Cin)

    z = x_ref[...]                                          # (N, C), resident in VMEM
    logdet = jnp.zeros((1, 1), jnp.float32)

    for s in range(S):                                      # fused FlowSteps (unrolled)
        # ---------------- ActNorm (data-dependent init), two-pass ----------------
        mean = jnp.sum(z, axis=0, keepdims=True) * (1.0 / N)
        d = z - mean
        var = jnp.maximum(jnp.sum(d * d, axis=0, keepdims=True) / (N - 1), 0.0)
        scale = 1.0 / (jnp.sqrt(var) + 1e-6)
        zn = d * scale                                      # (N, C)
        logdet = (H * W) * jnp.sum(jnp.log(jnp.abs(scale)), axis=1, keepdims=True)

        # ------ channel shuffle folded into a 0/1 permutation matrix (MXU, exact) ------
        zp = jnp.dot(zn, pmat_ref[s], preferred_element_type=jnp.float32)
        x_a, x_b = zp[:, :Ca], zp[:, Ca:]

        # ------ Conv3x3 (Ca->C, zero pad) + ReLU: one im2col matmul (K = 9*Ca) ------
        h1 = jnp.dot(im2col(x_a), w1_ref[s], preferred_element_type=jnp.float32)
        h1 = jnp.maximum(h1 + b1_ref[s], 0.0)               # (N, C)

        # ------ Conv1x1 (C->C) + ReLU: one matmul ------
        h2 = jnp.dot(h1, w2_ref[s], preferred_element_type=jnp.float32)
        h2 = jnp.maximum(h2 + b2_ref[s], 0.0)               # (N, C)

        # ------ ZeroConv2d: pad-with-1.0 == zero-pad conv + border bias ------
        net = jnp.dot(im2col(h2), w3_ref[s], preferred_element_type=jnp.float32)
        net = net + jnp.dot(inv_mask, bsum_ref[s], preferred_element_type=jnp.float32)
        net = net + b3_ref[s]                               # (N, Ca)

        # ------ additive coupling: single 16-wide value; only the last hits HBM ------
        z = jnp.concatenate([x_a, x_b - net], axis=1)

    out_ref[...] = z
    logdet_ref[...] = logdet


def _flowblock_call(z, masks, prep, B, H, W, C):
    S = prep['w1'].shape[0]
    kern = functools.partial(_flowblock_kernel, B=B, H=H, W=W, C=C, S=S)
    vmem = pl.BlockSpec(memory_space=pltpu.MemorySpace.VMEM)
    out, logdet = pl.pallas_call(
        kern,
        out_shape=(jax.ShapeDtypeStruct((B * H * W, C), jnp.float32),
                   jax.ShapeDtypeStruct((1, 1), jnp.float32)),
        in_specs=[vmem] * 10,
        out_specs=(vmem, vmem),
    )(z, masks, prep['pmat'], prep['w1'], prep['b1'], prep['w2'], prep['b2'],
      prep['w3'], prep['b3'], prep['bsum'])
    return out, logdet[0, 0]


# --------------------------------------------------------------------------- #
# One-time parameter preparation (hoisted out of the forward path)
# --------------------------------------------------------------------------- #
def prepare_params(step_params, perms, C):
    Ca = C // 2
    pmats, w1s, b1s, w2s, b2s, w3s, b3s, bsums = [], [], [], [], [], [], [], []
    for p, perm in zip(step_params, perms):
        pm = np.zeros((C, C), np.float32)
        pm[np.asarray(perm, np.int64), np.arange(C)] = 1.0   # zp = zn @ pm == zn[:, perm]
        pmats.append(jnp.asarray(pm))
        # Conv3x3 Ca->C as an im2col (9*Ca, C) matrix (tap-major, HWIO order).
        w1s.append(jnp.transpose(p['w1'], (2, 3, 1, 0)).reshape(9 * Ca, C))
        b1s.append(p['b1'].reshape(1, C))
        w2s.append(jnp.transpose(p['w2'][:, :, 0, 0], (1, 0)))         # (Cin, Cout)
        b2s.append(p['b2'].reshape(1, C))
        # ZeroConv2d: fold exp(3*zscale) into weights/bias; per-tap column sums for the
        # pad-with-1.0 border-bias trick.
        zs = jnp.exp(3.0 * p['zscale'].reshape(Ca))
        w3 = jnp.transpose(p['w3'], (2, 3, 1, 0)) * zs                  # (3,3,C,Ca)
        w3s.append(w3.reshape(9 * C, Ca))
        b3s.append((p['b3'] * zs).reshape(1, Ca))
        bsums.append(jnp.sum(w3, axis=2).reshape(9, Ca))                # (9, Ca)
    stack = lambda xs: jnp.stack(xs, axis=0)
    return dict(pmat=stack(pmats), w1=stack(w1s), b1=stack(b1s), w2=stack(w2s),
                b2=stack(b2s), w3=stack(w3s), b3=stack(b3s), bsum=stack(bsums))


def _shift_masks(B, H, W):
    """(N, 9) f32: 1.0 where the 3x3 tap (dh,dw) of a (b,h,w)-row is in-bounds."""
    N = B * H * W
    r = np.arange(N)
    h = (r // W) % H
    w = r % W
    cols = []
    for k in range(9):
        dh, dw = k // 3 - 1, k % 3 - 1
        valid = (h + dh >= 0) & (h + dh < H) & (w + dw >= 0) & (w + dw < W)
        cols.append(valid.astype(np.float32))
    return np.stack(cols, axis=1)


# --------------------------------------------------------------------------- #
# Wrapper: squeeze2d + single fused kernel call
# --------------------------------------------------------------------------- #
def _squeeze2d(x, factor=2):
    B, C, H, W = x.shape
    x = x.reshape(B, C, H // factor, factor, W // factor, factor)
    x = jnp.transpose(x, (0, 1, 3, 5, 2, 4))
    return x.reshape(B, C * factor * factor, H // factor, W // factor)


def flowblock_forward(x_nchw, prep, logdet=0.0):
    """FlowBlock.normal_flow.  `logdet` is overwritten by every ActNorm (exact PyTorch
    semantics), so the returned logdet is the LAST step's."""
    x = _squeeze2d(x_nchw.astype(jnp.float32), 2)                 # (B, 4*C0, H/2, W/2)
    B, C, H, W = x.shape
    z = jnp.transpose(x, (0, 2, 3, 1)).reshape(B * H * W, C)      # NCHW -> (N, C) slab
    masks = jnp.asarray(_shift_masks(B, H, W))                    # trace-time constant
    out2d, logdet_out = _flowblock_call(z, masks, prep, B, H, W, C)
    out = jnp.transpose(out2d.reshape(B, H, W, C), (0, 3, 1, 2))  # back to NCHW
    return out, logdet_out


# --------------------------------------------------------------------------- #
# Pure-JAX reference of the PyTorch forward (for verification)
# --------------------------------------------------------------------------- #
def flowblock_reference(x, step_params, perms, logdet=0.0):
    x = _squeeze2d(x.astype(jnp.float32), 2)
    B, C, H, W = x.shape
    Ca = C // 2
    dn = ('NCHW', 'OIHW', 'NCHW')
    for s, p in enumerate(step_params):
        flat = jnp.transpose(x, (1, 0, 2, 3)).reshape(C, -1)
        mean = jnp.mean(flat, axis=1)
        std = jnp.std(flat, axis=1, ddof=1)
        scale = 1.0 / (std + 1e-6)
        x = scale[None, :, None, None] * (x - mean[None, :, None, None])
        logdet = H * W * jnp.sum(jnp.log(jnp.abs(scale)))
        z = x[:, jnp.asarray(perms[s]), :, :]
        x_a, x_b = z[:, :Ca], z[:, Ca:]
        h = lax.conv_general_dilated(x_a, p['w1'], (1, 1), 'SAME',
                                     dimension_numbers=dn) + p['b1'][None, :, None, None]
        h = jnp.maximum(h, 0.0)
        h = lax.conv_general_dilated(h, p['w2'], (1, 1), 'VALID',
                                     dimension_numbers=dn) + p['b2'][None, :, None, None]
        h = jnp.maximum(h, 0.0)
        hp = jnp.pad(h, ((0, 0), (0, 0), (1, 1), (1, 1)), constant_values=1.0)
        h = lax.conv_general_dilated(hp, p['w3'], (1, 1), 'VALID',
                                     dimension_numbers=dn) + p['b3'][None, :, None, None]
        h = h * jnp.exp(3.0 * p['zscale'])
        x = jnp.concatenate([x_a, x_b - h], axis=1)
    return x, logdet


if __name__ == "__main__":
    # FlowBlock(in_channel=16, step_num=2): input has 16/4 = 4 channels pre-squeeze.
    B, C0, H0, W0 = 2, 4, 16, 16
    step_num = 2
    C, Ca = 4 * C0, 2 * C0                      # post-squeeze: C=16, Ca=8, H=W=8

    key = jax.random.PRNGKey(0)
    kx, key = jax.random.split(key)
    x = jax.random.normal(kx, (B, C0, H0, W0), jnp.float32)

    # Deterministic parameter init (shapes from the module's __init__).
    # NOTE: PyTorch zero-initializes ZeroConv2d weights/bias/scale; small nonzero
    # values are used here so the coupling-net path is actually exercised.
    # TODO(synk): set w3/b3/zscale to zeros to byte-match a freshly constructed module.
    rng = np.random.RandomState(0)
    step_params, perms = [], []
    for s in range(step_num):
        ks = jax.random.split(jax.random.fold_in(key, s), 7)
        step_params.append({
            'w1': 0.1 * jax.random.normal(ks[0], (C, Ca, 3, 3), jnp.float32),
            'b1': 0.1 * jax.random.normal(ks[1], (C,), jnp.float32),
            'w2': 0.1 * jax.random.normal(ks[2], (C, C, 1, 1), jnp.float32),
            'b2': 0.1 * jax.random.normal(ks[3], (C,), jnp.float32),
            'w3': 0.05 * jax.random.normal(ks[4], (Ca, C, 3, 3), jnp.float32),
            'b3': 0.05 * jax.random.normal(ks[5], (Ca,), jnp.float32),
            'zscale': 0.1 * jax.random.normal(ks[6], (1, Ca, 1, 1), jnp.float32),
        })
        # Permute2d(shuffle=True): a frozen, deterministic random permutation per step.
        perms.append(tuple(int(i) for i in rng.permutation(C)))
    perms = tuple(perms)

    # One-time parameter prep (transposes, exp(3*zscale) folding, perm matrices).
    prep = prepare_params(step_params, perms, C)

    fwd = jax.jit(flowblock_forward)
    out, logdet = fwd(x, prep)
    out = jax.block_until_ready(out)
    logdet = jax.block_until_ready(logdet)

    out_ref, logdet_ref = flowblock_reference(x, step_params, perms)
    assert jnp.allclose(out, out_ref, atol=1e-4, rtol=1e-4), \
        float(jnp.max(jnp.abs(out - out_ref)))
    assert jnp.allclose(logdet, logdet_ref, atol=1e-4, rtol=1e-4), \
        (float(logdet), float(logdet_ref))
    print("KERNEL_OK")
</pallas_src>

<mosaic_0001>
module attributes {stable_mosaic.version = 11 : i64} {
  func.func @_flowblock_kernel(%arg0: memref<128x16xf32, #tpu.memory_space<vmem>>, %arg1: memref<128x9xf32, #tpu.memory_space<vmem>>, %arg2: memref<2x16x16xf32, #tpu.memory_space<vmem>>, %arg3: memref<2x72x16xf32, #tpu.memory_space<vmem>>, %arg4: memref<2x1x16xf32, #tpu.memory_space<vmem>>, %arg5: memref<2x16x16xf32, #tpu.memory_space<vmem>>, %arg6: memref<2x1x16xf32, #tpu.memory_space<vmem>>, %arg7: memref<2x144x8xf32, #tpu.memory_space<vmem>>, %arg8: memref<2x1x8xf32, #tpu.memory_space<vmem>>, %arg9: memref<2x9x8xf32, #tpu.memory_space<vmem>>, %arg10: memref<128x16xf32, #tpu.memory_space<vmem>>, %arg11: memref<1x1xf32, #tpu.memory_space<vmem>>) attributes {dimension_semantics = [], scalar_prefetch = 0 : i64, scratch_operands = 0 : i64, tpu.core_type = #tpu.core_type<tc>} {
    %c0 = arith.constant 0 : index
    %c0_0 = arith.constant 0 : index
    %0 = vector.load %arg1[%c0, %c0_0] : memref<128x9xf32, #tpu.memory_space<vmem>>, vector<128x9xf32>
    %1 = vector.extract_strided_slice %0 {offsets = [0, 0], sizes = [128, 1], strides = [1, 1]} : vector<128x9xf32> to vector<128x1xf32>
    %2 = vector.extract_strided_slice %0 {offsets = [0, 1], sizes = [128, 1], strides = [1, 1]} : vector<128x9xf32> to vector<128x1xf32>
    %3 = vector.extract_strided_slice %0 {offsets = [0, 2], sizes = [128, 1], strides = [1, 1]} : vector<128x9xf32> to vector<128x1xf32>
    %4 = vector.extract_strided_slice %0 {offsets = [0, 3], sizes = [128, 1], strides = [1, 1]} : vector<128x9xf32> to vector<128x1xf32>
    %5 = vector.extract_strided_slice %0 {offsets = [0, 4], sizes = [128, 1], strides = [1, 1]} : vector<128x9xf32> to vector<128x1xf32>
    %6 = vector.extract_strided_slice %0 {offsets = [0, 5], sizes = [128, 1], strides = [1, 1]} : vector<128x9xf32> to vector<128x1xf32>
    %7 = vector.extract_strided_slice %0 {offsets = [0, 6], sizes = [128, 1], strides = [1, 1]} : vector<128x9xf32> to vector<128x1xf32>
    %8 = vector.extract_strided_slice %0 {offsets = [0, 7], sizes = [128, 1], strides = [1, 1]} : vector<128x9xf32> to vector<128x1xf32>
    %9 = vector.extract_strided_slice %0 {offsets = [0, 8], sizes = [128, 1], strides = [1, 1]} : vector<128x9xf32> to vector<128x1xf32>
    %cst = arith.constant 1.000000e+00 : f32
    %10 = vector.broadcast %cst : f32 to vector<128x9xf32>
    %11 = arith.subf %10, %0 : vector<128x9xf32>
    %c0_1 = arith.constant 0 : index
    %c0_2 = arith.constant 0 : index
    %12 = vector.load %arg0[%c0_1, %c0_2] : memref<128x16xf32, #tpu.memory_space<vmem>>, vector<128x16xf32>
    %cst_3 = arith.constant dense<0.000000e+00> : vector<16xf32>
    %13 = vector.multi_reduction <add>, %12, %cst_3 [0] : vector<128x16xf32> to vector<16xf32>
    %14 = vector.shape_cast %13 : vector<16xf32> to vector<1x16xf32>
    %cst_4 = arith.constant 7.812500e-03 : f32
    %15 = vector.broadcast %cst_4 : f32 to vector<1x16xf32>
    %16 = arith.mulf %14, %15 : vector<1x16xf32>
    %17 = vector.broadcast %16 : vector<1x16xf32> to vector<128x16xf32>
    %18 = arith.subf %12, %17 : vector<128x16xf32>
    %19 = arith.mulf %18, %18 : vector<128x16xf32>
    %cst_5 = arith.constant dense<0.000000e+00> : vector<16xf32>
    %20 = vector.multi_reduction <add>, %19, %cst_5 [0] : vector<128x16xf32> to vector<16xf32>
    %21 = vector.shape_cast %20 : vector<16xf32> to vector<1x16xf32>
    %cst_6 = arith.constant 1.270000e+02 : f32
    %22 = vector.broadcast %cst_6 : f32 to vector<1x16xf32>
    %23 = arith.divf %21, %22 : vector<1x16xf32>
    %cst_7 = arith.constant 0.000000e+00 : f32
    %24 = vector.broadcast %cst_7 : f32 to vector<1x16xf32>
    %25 = arith.maximumf %23, %24 : vector<1x16xf32>
    %26 = math.sqrt %25 : vector<1x16xf32>
    %cst_8 = arith.constant 9.99999997E-7 : f32
    %27 = vector.broadcast %cst_8 : f32 to vector<1x16xf32>
    %28 = arith.addf %26, %27 : vector<1x16xf32>
    %cst_9 = arith.constant 1.000000e+00 : f32
    %29 = vector.broadcast %cst_9 : f32 to vector<1x16xf32>
    %30 = arith.divf %29, %28 : vector<1x16xf32>
    %31 = vector.broadcast %30 : vector<1x16xf32> to vector<128x16xf32>
    %32 = arith.mulf %18, %31 : vector<128x16xf32>
    %c0_10 = arith.constant 0 : index
    %c0_11 = arith.constant 0 : index
    %c0_12 = arith.constant 0 : index
    %33 = vector.load %arg2[%c0_10, %c0_11, %c0_12] : memref<2x16x16xf32, #tpu.memory_space<vmem>>, vector<1x16x16xf32>
    %34 = vector.shape_cast %33 : vector<1x16x16xf32> to vector<16x16xf32>
    %cst_13 = arith.constant dense<0.000000e+00> : vector<128x16xf32>
    %35 = tpu.matmul %32, %34, %cst_13 {dimension_numbers = #tpu.dot_dimension_numbers<[1], [0], [0], [1], [0, 0, 1, 1], [], []>} : vector<128x16xf32>, vector<16x16xf32>, vector<128x16xf32> -> vector<128x16xf32>
    %36 = vector.extract_strided_slice %35 {offsets = [0, 0], sizes = [128, 8], strides = [1, 1]} : vector<128x16xf32> to vector<128x8xf32>
    %37 = vector.extract_strided_slice %35 {offsets = [0, 8], sizes = [128, 8], strides = [1, 1]} : vector<128x16xf32> to vector<128x8xf32>
    %c9_i32 = arith.constant 9 : i32
    %38 = tpu.dynamic_rotate %36 by %c9_i32 dim 0 : vector<128x8xf32>, i32 -> vector<128x8xf32>
    %39 = vector.broadcast %1 : vector<128x1xf32> to vector<128x8xf32>
    %40 = arith.mulf %38, %39 : vector<128x8xf32>
    %c8_i32 = arith.constant 8 : i32
    %41 = tpu.dynamic_rotate %36 by %c8_i32 dim 0 : vector<128x8xf32>, i32 -> vector<128x8xf32>
    %42 = vector.broadcast %2 : vector<128x1xf32> to vector<128x8xf32>
    %43 = arith.mulf %41, %42 : vector<128x8xf32>
    %c7_i32 = arith.constant 7 : i32
    %44 = tpu.dynamic_rotate %36 by %c7_i32 dim 0 : vector<128x8xf32>, i32 -> vector<128x8xf32>
    %45 = vector.broadcast %3 : vector<128x1xf32> to vector<128x8xf32>
    %46 = arith.mulf %44, %45 : vector<128x8xf32>
    %c1_i32 = arith.constant 1 : i32
    %47 = tpu.dynamic_rotate %36 by %c1_i32 dim 0 : vector<128x8xf32>, i32 -> vector<128x8xf32>
    %48 = vector.broadcast %4 : vector<128x1xf32> to vector<128x8xf32>
    %49 = arith.mulf %47, %48 : vector<128x8xf32>
    %50 = vector.broadcast %5 : vector<128x1xf32> to vector<128x8xf32>
    %51 = arith.mulf %36, %50 : vector<128x8xf32>
    %c127_i32 = arith.constant 127 : i32
    %52 = tpu.dynamic_rotate %36 by %c127_i32 dim 0 : vector<128x8xf32>, i32 -> vector<128x8xf32>
    %53 = vector.broadcast %6 : vector<128x1xf32> to vector<128x8xf32>
    %54 = arith.mulf %52, %53 : vector<128x8xf32>
    %c121_i32 = arith.constant 121 : i32
    %55 = tpu.dynamic_rotate %36 by %c121_i32 dim 0 : vector<128x8xf32>, i32 -> vector<128x8xf32>
    %56 = vector.broadcast %7 : vector<128x1xf32> to vector<128x8xf32>
    %57 = arith.mulf %55, %56 : vector<128x8xf32>
    %c120_i32 = arith.constant 120 : i32
    %58 = tpu.dynamic_rotate %36 by %c120_i32 dim 0 : vector<128x8xf32>, i32 -> vector<128x8xf32>
    %59 = vector.broadcast %8 : vector<128x1xf32> to vector<128x8xf32>
    %60 = arith.mulf %58, %59 : vector<128x8xf32>
    %c119_i32 = arith.constant 119 : i32
    %61 = tpu.dynamic_rotate %36 by %c119_i32 dim 0 : vector<128x8xf32>, i32 -> vector<128x8xf32>
    %62 = vector.broadcast %9 : vector<128x1xf32> to vector<128x8xf32>
    %63 = arith.mulf %61, %62 : vector<128x8xf32>
    %64 = tpu.concatenate %40, %43, %46, %49, %51, %54, %57, %60, %63 in 1 : vector<128x8xf32>, vector<128x8xf32>, vector<128x8xf32>, vector<128x8xf32>, vector<128x8xf32>, vector<128x8xf32>, vector<128x8xf32>, vector<128x8xf32>, vector<128x8xf32> -> vector<128x72xf32>
    %c0_14 = arith.constant 0 : index
    %c0_15 = arith.constant 0 : index
    %c0_16 = arith.constant 0 : index
    %65 = vector.load %arg3[%c0_14, %c0_15, %c0_16] : memref<2x72x16xf32, #tpu.memory_space<vmem>>, vector<1x72x16xf32>
    %66 = vector.shape_cast %65 : vector<1x72x16xf32> to vector<72x16xf32>
    %cst_17 = arith.constant dense<0.000000e+00> : vector<128x16xf32>
    %67 = tpu.matmul %64, %66, %cst_17 {dimension_numbers = #tpu.dot_dimension_numbers<[1], [0], [0], [1], [0, 0, 1, 1], [], []>} : vector<128x72xf32>, vector<72x16xf32>, vector<128x16xf32> -> vector<128x16xf32>
    %c0_18 = arith.constant 0 : index
    %c0_19 = arith.constant 0 : index
    %c0_20 = arith.constant 0 : index
    %68 = vector.load %arg4[%c0_18, %c0_19, %c0_20] : memref<2x1x16xf32, #tpu.memory_space<vmem>>, vector<1x1x16xf32>
    %69 = vector.shape_cast %68 : vector<1x1x16xf32> to vector<1x16xf32>
    %70 = vector.broadcast %69 : vector<1x16xf32> to vector<128x16xf32>
    %71 = arith.addf %67, %70 : vector<128x16xf32>
    %cst_21 = arith.constant 0.000000e+00 : f32
    %72 = vector.broadcast %cst_21 : f32 to vector<128x16xf32>
    %73 = arith.maximumf %71, %72 : vector<128x16xf32>
    %c0_22 = arith.constant 0 : index
    %c0_23 = arith.constant 0 : index
    %c0_24 = arith.constant 0 : index
    %74 = vector.load %arg5[%c0_22, %c0_23, %c0_24] : memref<2x16x16xf32, #tpu.memory_space<vmem>>, vector<1x16x16xf32>
    %75 = vector.shape_cast %74 : vector<1x16x16xf32> to vector<16x16xf32>
    %cst_25 = arith.constant dense<0.000000e+00> : vector<128x16xf32>
    %76 = tpu.matmul %73, %75, %cst_25 {dimension_numbers = #tpu.dot_dimension_numbers<[1], [0], [0], [1], [0, 0, 1, 1], [], []>} : vector<128x16xf32>, vector<16x16xf32>, vector<128x16xf32> -> vector<128x16xf32>
    %c0_26 = arith.constant 0 : index
    %c0_27 = arith.constant 0 : index
    %c0_28 = arith.constant 0 : index
    %77 = vector.load %arg6[%c0_26, %c0_27, %c0_28] : memref<2x1x16xf32, #tpu.memory_space<vmem>>, vector<1x1x16xf32>
    %78 = vector.shape_cast %77 : vector<1x1x16xf32> to vector<1x16xf32>
    %79 = vector.broadcast %78 : vector<1x16xf32> to vector<128x16xf32>
    %80 = arith.addf %76, %79 : vector<128x16xf32>
    %cst_29 = arith.constant 0.000000e+00 : f32
    %81 = vector.broadcast %cst_29 : f32 to vector<128x16xf32>
    %82 = arith.maximumf %80, %81 : vector<128x16xf32>
    %c9_i32_30 = arith.constant 9 : i32
    %83 = tpu.dynamic_rotate %82 by %c9_i32_30 dim 0 : vector<128x16xf32>, i32 -> vector<128x16xf32>
    %84 = vector.broadcast %1 : vector<128x1xf32> to vector<128x16xf32>
    %85 = arith.mulf %83, %84 : vector<128x16xf32>
    %c8_i32_31 = arith.constant 8 : i32
    %86 = tpu.dynamic_rotate %82 by %c8_i32_31 dim 0 : vector<128x16xf32>, i32 -> vector<128x16xf32>
    %87 = vector.broadcast %2 : vector<128x1xf32> to vector<128x16xf32>
    %88 = arith.mulf %86, %87 : vector<128x16xf32>
    %c7_i32_32 = arith.constant 7 : i32
    %89 = tpu.dynamic_rotate %82 by %c7_i32_32 dim 0 : vector<128x16xf32>, i32 -> vector<128x16xf32>
    %90 = vector.broadcast %3 : vector<128x1xf32> to vector<128x16xf32>
    %91 = arith.mulf %89, %90 : vector<128x16xf32>
    %c1_i32_33 = arith.constant 1 : i32
    %92 = tpu.dynamic_rotate %82 by %c1_i32_33 dim 0 : vector<128x16xf32>, i32 -> vector<128x16xf32>
    %93 = vector.broadcast %4 : vector<128x1xf32> to vector<128x16xf32>
    %94 = arith.mulf %92, %93 : vector<128x16xf32>
    %95 = vector.broadcast %5 : vector<128x1xf32> to vector<128x16xf32>
    %96 = arith.mulf %82, %95 : vector<128x16xf32>
    %c127_i32_34 = arith.constant 127 : i32
    %97 = tpu.dynamic_rotate %82 by %c127_i32_34 dim 0 : vector<128x16xf32>, i32 -> vector<128x16xf32>
    %98 = vector.broadcast %6 : vector<128x1xf32> to vector<128x16xf32>
    %99 = arith.mulf %97, %98 : vector<128x16xf32>
    %c121_i32_35 = arith.constant 121 : i32
    %100 = tpu.dynamic_rotate %82 by %c121_i32_35 dim 0 : vector<128x16xf32>, i32 -> vector<128x16xf32>
    %101 = vector.broadcast %7 : vector<128x1xf32> to vector<128x16xf32>
    %102 = arith.mulf %100, %101 : vector<128x16xf32>
    %c120_i32_36 = arith.constant 120 : i32
    %103 = tpu.dynamic_rotate %82 by %c120_i32_36 dim 0 : vector<128x16xf32>, i32 -> vector<128x16xf32>
    %104 = vector.broadcast %8 : vector<128x1xf32> to vector<128x16xf32>
    %105 = arith.mulf %103, %104 : vector<128x16xf32>
    %c119_i32_37 = arith.constant 119 : i32
    %106 = tpu.dynamic_rotate %82 by %c119_i32_37 dim 0 : vector<128x16xf32>, i32 -> vector<128x16xf32>
    %107 = vector.broadcast %9 : vector<128x1xf32> to vector<128x16xf32>
    %108 = arith.mulf %106, %107 : vector<128x16xf32>
    %109 = tpu.concatenate %85, %88, %91, %94, %96, %99, %102, %105, %108 in 1 : vector<128x16xf32>, vector<128x16xf32>, vector<128x16xf32>, vector<128x16xf32>, vector<128x16xf32>, vector<128x16xf32>, vector<128x16xf32>, vector<128x16xf32>, vector<128x16xf32> -> vector<128x144xf32>
    %c0_38 = arith.constant 0 : index
    %c0_39 = arith.constant 0 : index
    %c0_40 = arith.constant 0 : index
    %110 = vector.load %arg7[%c0_38, %c0_39, %c0_40] : memref<2x144x8xf32, #tpu.memory_space<vmem>>, vector<1x144x8xf32>
    %111 = vector.shape_cast %110 : vector<1x144x8xf32> to vector<144x8xf32>
    %cst_41 = arith.constant dense<0.000000e+00> : vector<128x8xf32>
    %112 = tpu.matmul %109, %111, %cst_41 {dimension_numbers = #tpu.dot_dimension_numbers<[1], [0], [0], [1], [0, 0, 1, 1], [], []>} : vector<128x144xf32>, vector<144x8xf32>, vector<128x8xf32> -> vector<128x8xf32>
    %c0_42 = arith.constant 0 : index
    %c0_43 = arith.constant 0 : index
    %c0_44 = arith.constant 0 : index
    %113 = vector.load %arg9[%c0_42, %c0_43, %c0_44] : memref<2x9x8xf32, #tpu.memory_space<vmem>>, vector<1x9x8xf32>
    %114 = vector.shape_cast %113 : vector<1x9x8xf32> to vector<9x8xf32>
    %cst_45 = arith.constant dense<0.000000e+00> : vector<128x8xf32>
    %115 = tpu.matmul %11, %114, %cst_45 {dimension_numbers = #tpu.dot_dimension_numbers<[1], [0], [0], [1], [0, 0, 1, 1], [], []>} : vector<128x9xf32>, vector<9x8xf32>, vector<128x8xf32> -> vector<128x8xf32>
    %116 = arith.addf %112, %115 : vector<128x8xf32>
    %c0_46 = arith.constant 0 : index
    %c0_47 = arith.constant 0 : index
    %c0_48 = arith.constant 0 : index
    %117 = vector.load %arg8[%c0_46, %c0_47, %c0_48] : memref<2x1x8xf32, #tpu.memory_space<vmem>>, vector<1x1x8xf32>
    %118 = vector.shape_cast %117 : vector<1x1x8xf32> to vector<1x8xf32>
    %119 = vector.broadcast %118 : vector<1x8xf32> to vector<128x8xf32>
    %120 = arith.addf %116, %119 : vector<128x8xf32>
    %121 = arith.subf %37, %120 : vector<128x8xf32>
    %122 = tpu.concatenate %36, %121 in 1 : vector<128x8xf32>, vector<128x8xf32> -> vector<128x16xf32>
    %cst_49 = arith.constant dense<0.000000e+00> : vector<16xf32>
    %123 = vector.multi_reduction <add>, %122, %cst_49 [0] : vector<128x16xf32> to vector<16xf32>
    %124 = vector.shape_cast %123 : vector<16xf32> to vector<1x16xf32>
    %cst_50 = arith.constant 7.812500e-03 : f32
    %125 = vector.broadcast %cst_50 : f32 to vector<1x16xf32>
    %126 = arith.mulf %124, %125 : vector<1x16xf32>
    %127 = vector.broadcast %126 : vector<1x16xf32> to vector<128x16xf32>
    %128 = arith.subf %122, %127 : vector<128x16xf32>
    %129 = arith.mulf %128, %128 : vector<128x16xf32>
    %cst_51 = arith.constant dense<0.000000e+00> : vector<16xf32>
    %130 = vector.multi_reduction <add>, %129, %cst_51 [0] : vector<128x16xf32> to vector<16xf32>
    %131 = vector.shape_cast %130 : vector<16xf32> to vector<1x16xf32>
    %cst_52 = arith.constant 1.270000e+02 : f32
    %132 = vector.broadcast %cst_52 : f32 to vector<1x16xf32>
    %133 = arith.divf %131, %132 : vector<1x16xf32>
    %cst_53 = arith.constant 0.000000e+00 : f32
    %134 = vector.broadcast %cst_53 : f32 to vector<1x16xf32>
    %135 = arith.maximumf %133, %134 : vector<1x16xf32>
    %136 = math.sqrt %135 : vector<1x16xf32>
    %cst_54 = arith.constant 9.99999997E-7 : f32
    %137 = vector.broadcast %cst_54 : f32 to vector<1x16xf32>
    %138 = arith.addf %136, %137 : vector<1x16xf32>
    %cst_55 = arith.constant 1.000000e+00 : f32
    %139 = vector.broadcast %cst_55 : f32 to vector<1x16xf32>
    %140 = arith.divf %139, %138 : vector<1x16xf32>
    %141 = vector.broadcast %140 : vector<1x16xf32> to vector<128x16xf32>
    %142 = arith.mulf %128, %141 : vector<128x16xf32>
    %143 = math.absf %140 : vector<1x16xf32>
    %144 = math.log %143 : vector<1x16xf32>
    %cst_56 = arith.constant dense<0.000000e+00> : vector<1xf32>
    %145 = vector.multi_reduction <add>, %144, %cst_56 [1] : vector<1x16xf32> to vector<1xf32>
    %146 = vector.shape_cast %145 : vector<1xf32> to vector<1x1xf32>
    %cst_57 = arith.constant 6.400000e+01 : f32
    %147 = vector.broadcast %cst_57 : f32 to vector<1x1xf32>
    %148 = arith.mulf %147, %146 : vector<1x1xf32>
    %c1 = arith.constant 1 : index
    %c0_58 = arith.constant 0 : index
    %c0_59 = arith.constant 0 : index
    %149 = vector.load %arg2[%c1, %c0_58, %c0_59] : memref<2x16x16xf32, #tpu.memory_space<vmem>>, vector<1x16x16xf32>
    %150 = vector.shape_cast %149 : vector<1x16x16xf32> to vector<16x16xf32>
    %cst_60 = arith.constant dense<0.000000e+00> : vector<128x16xf32>
    %151 = tpu.matmul %142, %150, %cst_60 {dimension_numbers = #tpu.dot_dimension_numbers<[1], [0], [0], [1], [0, 0, 1, 1], [], []>} : vector<128x16xf32>, vector<16x16xf32>, vector<128x16xf32> -> vector<128x16xf32>
    %152 = vector.extract_strided_slice %151 {offsets = [0, 0], sizes = [128, 8], strides = [1, 1]} : vector<128x16xf32> to vector<128x8xf32>
    %153 = vector.extract_strided_slice %151 {offsets = [0, 8], sizes = [128, 8], strides = [1, 1]} : vector<128x16xf32> to vector<128x8xf32>
    %c9_i32_61 = arith.constant 9 : i32
    %154 = tpu.dynamic_rotate %152 by %c9_i32_61 dim 0 : vector<128x8xf32>, i32 -> vector<128x8xf32>
    %155 = vector.broadcast %1 : vector<128x1xf32> to vector<128x8xf32>
    %156 = arith.mulf %154, %155 : vector<128x8xf32>
    %c8_i32_62 = arith.constant 8 : i32
    %157 = tpu.dynamic_rotate %152 by %c8_i32_62 dim 0 : vector<128x8xf32>, i32 -> vector<128x8xf32>
    %158 = vector.broadcast %2 : vector<128x1xf32> to vector<128x8xf32>
    %159 = arith.mulf %157, %158 : vector<128x8xf32>
    %c7_i32_63 = arith.constant 7 : i32
    %160 = tpu.dynamic_rotate %152 by %c7_i32_63 dim 0 : vector<128x8xf32>, i32 -> vector<128x8xf32>
    %161 = vector.broadcast %3 : vector<128x1xf32> to vector<128x8xf32>
    %162 = arith.mulf %160, %161 : vector<128x8xf32>
    %c1_i32_64 = arith.constant 1 : i32
    %163 = tpu.dynamic_rotate %152 by %c1_i32_64 dim 0 : vector<128x8xf32>, i32 -> vector<128x8xf32>
    %164 = vector.broadcast %4 : vector<128x1xf32> to vector<128x8xf32>
    %165 = arith.mulf %163, %164 : vector<128x8xf32>
    %166 = vector.broadcast %5 : vector<128x1xf32> to vector<128x8xf32>
    %167 = arith.mulf %152, %166 : vector<128x8xf32>
    %c127_i32_65 = arith.constant 127 : i32
    %168 = tpu.dynamic_rotate %152 by %c127_i32_65 dim 0 : vector<128x8xf32>, i32 -> vector<128x8xf32>
    %169 = vector.broadcast %6 : vector<128x1xf32> to vector<128x8xf32>
    %170 = arith.mulf %168, %169 : vector<128x8xf32>
    %c121_i32_66 = arith.constant 121 : i32
    %171 = tpu.dynamic_rotate %152 by %c121_i32_66 dim 0 : vector<128x8xf32>, i32 -> vector<128x8xf32>
    %172 = vector.broadcast %7 : vector<128x1xf32> to vector<128x8xf32>
    %173 = arith.mulf %171, %172 : vector<128x8xf32>
    %c120_i32_67 = arith.constant 120 : i32
    %174 = tpu.dynamic_rotate %152 by %c120_i32_67 dim 0 : vector<128x8xf32>, i32 -> vector<128x8xf32>
    %175 = vector.broadcast %8 : vector<128x1xf32> to vector<128x8xf32>
    %176 = arith.mulf %174, %175 : vector<128x8xf32>
    %c119_i32_68 = arith.constant 119 : i32
    %177 = tpu.dynamic_rotate %152 by %c119_i32_68 dim 0 : vector<128x8xf32>, i32 -> vector<128x8xf32>
    %178 = vector.broadcast %9 : vector<128x1xf32> to vector<128x8xf32>
    %179 = arith.mulf %177, %178 : vector<128x8xf32>
    %180 = tpu.concatenate %156, %159, %162, %165, %167, %170, %173, %176, %179 in 1 : vector<128x8xf32>, vector<128x8xf32>, vector<128x8xf32>, vector<128x8xf32>, vector<128x8xf32>, vector<128x8xf32>, vector<128x8xf32>, vector<128x8xf32>, vector<128x8xf32> -> vector<128x72xf32>
    %c1_69 = arith.constant 1 : index
    %c0_70 = arith.constant 0 : index
    %c0_71 = arith.constant 0 : index
    %181 = vector.load %arg3[%c1_69, %c0_70, %c0_71] : memref<2x72x16xf32, #tpu.memory_space<vmem>>, vector<1x72x16xf32>
    %182 = vector.shape_cast %181 : vector<1x72x16xf32> to vector<72x16xf32>
    %cst_72 = arith.constant dense<0.000000e+00> : vector<128x16xf32>
    %183 = tpu.matmul %180, %182, %cst_72 {dimension_numbers = #tpu.dot_dimension_numbers<[1], [0], [0], [1], [0, 0, 1, 1], [], []>} : vector<128x72xf32>, vector<72x16xf32>, vector<128x16xf32> -> vector<128x16xf32>
    %c1_73 = arith.constant 1 : index
    %c0_74 = arith.constant 0 : index
    %c0_75 = arith.constant 0 : index
    %184 = vector.load %arg4[%c1_73, %c0_74, %c0_75] : memref<2x1x16xf32, #tpu.memory_space<vmem>>, vector<1x1x16xf32>
    %185 = vector.shape_cast %184 : vector<1x1x16xf32> to vector<1x16xf32>
    %186 = vector.broadcast %185 : vector<1x16xf32> to vector<128x16xf32>
    %187 = arith.addf %183, %186 : vector<128x16xf32>
    %cst_76 = arith.constant 0.000000e+00 : f32
    %188 = vector.broadcast %cst_76 : f32 to vector<128x16xf32>
    %189 = arith.maximumf %187, %188 : vector<128x16xf32>
    %c1_77 = arith.constant 1 : index
    %c0_78 = arith.constant 0 : index
    %c0_79 = arith.constant 0 : index
    %190 = vector.load %arg5[%c1_77, %c0_78, %c0_79] : memref<2x16x16xf32, #tpu.memory_space<vmem>>, vector<1x16x16xf32>
    %191 = vector.shape_cast %190 : vector<1x16x16xf32> to vector<16x16xf32>
    %cst_80 = arith.constant dense<0.000000e+00> : vector<128x16xf32>
    %192 = tpu.matmul %189, %191, %cst_80 {dimension_numbers = #tpu.dot_dimension_numbers<[1], [0], [0], [1], [0, 0, 1, 1], [], []>} : vector<128x16xf32>, vector<16x16xf32>, vector<128x16xf32> -> vector<128x16xf32>
    %c1_81 = arith.constant 1 : index
    %c0_82 = arith.constant 0 : index
    %c0_83 = arith.constant 0 : index
    %193 = vector.load %arg6[%c1_81, %c0_82, %c0_83] : memref<2x1x16xf32, #tpu.memory_space<vmem>>, vector<1x1x16xf32>
    %194 = vector.shape_cast %193 : vector<1x1x16xf32> to vector<1x16xf32>
    %195 = vector.broadcast %194 : vector<1x16xf32> to vector<128x16xf32>
    %196 = arith.addf %192, %195 : vector<128x16xf32>
    %cst_84 = arith.constant 0.000000e+00 : f32
    %197 = vector.broadcast %cst_84 : f32 to vector<128x16xf32>
    %198 = arith.maximumf %196, %197 : vector<128x16xf32>
    %c9_i32_85 = arith.constant 9 : i32
    %199 = tpu.dynamic_rotate %198 by %c9_i32_85 dim 0 : vector<128x16xf32>, i32 -> vector<128x16xf32>
    %200 = vector.broadcast %1 : vector<128x1xf32> to vector<128x16xf32>
    %201 = arith.mulf %199, %200 : vector<128x16xf32>
    %c8_i32_86 = arith.constant 8 : i32
    %202 = tpu.dynamic_rotate %198 by %c8_i32_86 dim 0 : vector<128x16xf32>, i32 -> vector<128x16xf32>
    %203 = vector.broadcast %2 : vector<128x1xf32> to vector<128x16xf32>
    %204 = arith.mulf %202, %203 : vector<128x16xf32>
    %c7_i32_87 = arith.constant 7 : i32
    %205 = tpu.dynamic_rotate %198 by %c7_i32_87 dim 0 : vector<128x16xf32>, i32 -> vector<128x16xf32>
    %206 = vector.broadcast %3 : vector<128x1xf32> to vector<128x16xf32>
    %207 = arith.mulf %205, %206 : vector<128x16xf32>
    %c1_i32_88 = arith.constant 1 : i32
    %208 = tpu.dynamic_rotate %198 by %c1_i32_88 dim 0 : vector<128x16xf32>, i32 -> vector<128x16xf32>
    %209 = vector.broadcast %4 : vector<128x1xf32> to vector<128x16xf32>
    %210 = arith.mulf %208, %209 : vector<128x16xf32>
    %211 = vector.broadcast %5 : vector<128x1xf32> to vector<128x16xf32>
    %212 = arith.mulf %198, %211 : vector<128x16xf32>
    %c127_i32_89 = arith.constant 127 : i32
    %213 = tpu.dynamic_rotate %198 by %c127_i32_89 dim 0 : vector<128x16xf32>, i32 -> vector<128x16xf32>
    %214 = vector.broadcast %6 : vector<128x1xf32> to vector<128x16xf32>
    %215 = arith.mulf %213, %214 : vector<128x16xf32>
    %c121_i32_90 = arith.constant 121 : i32
    %216 = tpu.dynamic_rotate %198 by %c121_i32_90 dim 0 : vector<128x16xf32>, i32 -> vector<128x16xf32>
    %217 = vector.broadcast %7 : vector<128x1xf32> to vector<128x16xf32>
    %218 = arith.mulf %216, %217 : vector<128x16xf32>
    %c120_i32_91 = arith.constant 120 : i32
    %219 = tpu.dynamic_rotate %198 by %c120_i32_91 dim 0 : vector<128x16xf32>, i32 -> vector<128x16xf32>
    %220 = vector.broadcast %8 : vector<128x1xf32> to vector<128x16xf32>
    %221 = arith.mulf %219, %220 : vector<128x16xf32>
    %c119_i32_92 = arith.constant 119 : i32
    %222 = tpu.dynamic_rotate %198 by %c119_i32_92 dim 0 : vector<128x16xf32>, i32 -> vector<128x16xf32>
    %223 = vector.broadcast %9 : vector<128x1xf32> to vector<128x16xf32>
    %224 = arith.mulf %222, %223 : vector<128x16xf32>
    %225 = tpu.concatenate %201, %204, %207, %210, %212, %215, %218, %221, %224 in 1 : vector<128x16xf32>, vector<128x16xf32>, vector<128x16xf32>, vector<128x16xf32>, vector<128x16xf32>, vector<128x16xf32>, vector<128x16xf32>, vector<128x16xf32>, vector<128x16xf32> -> vector<128x144xf32>
    %c1_93 = arith.constant 1 : index
    %c0_94 = arith.constant 0 : index
    %c0_95 = arith.constant 0 : index
    %226 = vector.load %arg7[%c1_93, %c0_94, %c0_95] : memref<2x144x8xf32, #tpu.memory_space<vmem>>, vector<1x144x8xf32>
    %227 = vector.shape_cast %226 : vector<1x144x8xf32> to vector<144x8xf32>
    %cst_96 = arith.constant dense<0.000000e+00> : vector<128x8xf32>
    %228 = tpu.matmul %225, %227, %cst_96 {dimension_numbers = #tpu.dot_dimension_numbers<[1], [0], [0], [1], [0, 0, 1, 1], [], []>} : vector<128x144xf32>, vector<144x8xf32>, vector<128x8xf32> -> vector<128x8xf32>
    %c1_97 = arith.constant 1 : index
    %c0_98 = arith.constant 0 : index
    %c0_99 = arith.constant 0 : index
    %229 = vector.load %arg9[%c1_97, %c0_98, %c0_99] : memref<2x9x8xf32, #tpu.memory_space<vmem>>, vector<1x9x8xf32>
    %230 = vector.shape_cast %229 : vector<1x9x8xf32> to vector<9x8xf32>
    %cst_100 = arith.constant dense<0.000000e+00> : vector<128x8xf32>
    %231 = tpu.matmul %11, %230, %cst_100 {dimension_numbers = #tpu.dot_dimension_numbers<[1], [0], [0], [1], [0, 0, 1, 1], [], []>} : vector<128x9xf32>, vector<9x8xf32>, vector<128x8xf32> -> vector<128x8xf32>
    %232 = arith.addf %228, %231 : vector<128x8xf32>
    %c1_101 = arith.constant 1 : index
    %c0_102 = arith.constant 0 : index
    %c0_103 = arith.constant 0 : index
    %233 = vector.load %arg8[%c1_101, %c0_102, %c0_103] : memref<2x1x8xf32, #tpu.memory_space<vmem>>, vector<1x1x8xf32>
    %234 = vector.shape_cast %233 : vector<1x1x8xf32> to vector<1x8xf32>
    %235 = vector.broadcast %234 : vector<1x8xf32> to vector<128x8xf32>
    %236 = arith.addf %232, %235 : vector<128x8xf32>
    %237 = arith.subf %153, %236 : vector<128x8xf32>
    %238 = tpu.concatenate %152, %237 in 1 : vector<128x8xf32>, vector<128x8xf32> -> vector<128x16xf32>
    %c0_104 = arith.constant 0 : index
    %c0_105 = arith.constant 0 : index
    %239 = vector.load %arg10[%c0_104, %c0_105] : memref<128x16xf32, #tpu.memory_space<vmem>>, vector<128x16xf32>
    tpu.vector_store %arg10[%c0_104, %c0_105], %238 {strides = array<i32>} : memref<128x16xf32, #tpu.memory_space<vmem>>, vector<128x16xf32>,
    %c0_106 = arith.constant 0 : index
    %c0_107 = arith.constant 0 : index
    %240 = vector.load %arg11[%c0_106, %c0_107] : memref<1x1xf32, #tpu.memory_space<vmem>>, vector<1x1xf32>
    tpu.vector_store %arg11[%c0_106, %c0_107], %148 {strides = array<i32>} : memref<1x1xf32, #tpu.memory_space<vmem>>, vector<1x1xf32>,
    return
  }
}

</mosaic_0001>

<bundles_post_ra>
// kernel: flowblock_forward.1
= control target key start
LH: loop header
LB: loop body
LE: loop exit
PB: predicated region body
PF: predicated region fallthrough
CT: control target
= control target key end

     0   :  { %17 = vsyncpa [#allocation3], 0  ;;  %v14202_v1 = vmov 2   ;;  %vm87_vm0 = vcmask 130048   ;;  %v14204_v21 = vmov 3   ;;  %s14187_s0 = inlined_call_operand.vmem [shape: f32[128,16], index: 0, kind: input, shape index: {}]   ;;  %s14188_s1 = inlined_call_operand.vmem [shape: f32[128,9], index: 1, kind: input, shape index: {}]   ;;  %s14189_s2 = inlined_call_operand.vmem [shape: f32[2,16,16], index: 2, kind: input, shape index: {}]   ;;  %s14190_s3 = inlined_call_operand.vmem [shape: f32[2,72,16], index: 3, kind: input, shape index: {}]   ;;  %s14191_s4 = inlined_call_operand.vmem [shape: f32[2,1,16], index: 4, kind: input, shape index: {}]   ;;  %s14192_s5 = inlined_call_operand.vmem [shape: f32[2,16,16], index: 5, kind: input, shape index: {}]   ;;  %s14193_s6 = inlined_call_operand.vmem [shape: f32[2,1,16], index: 6, kind: input, shape index: {}]   ;;  %s14194_s7 = inlined_call_operand.vmem [shape: f32[2,144,8], index: 7, kind: input, shape index: {}]   ;;  %s14195_s8 = inlined_call_operand.vmem [shape: f32[2,1,8], index: 8, kind: input, shape index: {}]   ;;  %s14196_s9 = inlined_call_operand.vmem [shape: f32[2,9,8], index: 9, kind: input, shape index: {}]   ;;  %s14197_s10 = inlined_call_operand.hbm [shape: f32[128,16], index: 10, kind: output, shape index: {0}]   ;;  %s14198_s11 = inlined_call_operand.hbm [shape: f32[1,1], index: 11, kind: output, shape index: {1}]  }
   0x1   :  { %v8093_v0 = vld [vmem:[%s14188_s1] sm:$0xff]  ;;  %7300 = vset.pattern.permute.xlu1 %v14202_v1  ;;  %7325 = vset.pattern.permute.xlu0 %v14202_v1  ;;  %v8101_v2 = vld [vmem:[%s14188_s1 + $0x30] sm:$0xff]  ;;  %v8106_v3 = vld [vmem:[%s14188_s1 + $0x8] sm:$0xff] }
   0x2   :  { %664 = vperm.xlu1 %7300, %v8093_v0   ;;  %688 = vperm.xlu0 %7325, %v8101_v2   ;;  %v8112_v4 = vld [vmem:[%s14188_s1 + $0x38] sm:$0xff]  ;;  %v224_v5 = vld [vmem:[%s14189_s2] sm:$0xff]  ;;  %v225_v6 = vld [vmem:[%s14189_s2 + $0x8] sm:$0xff] }
   0x3   :  { %v7161_v7 = vpack.c.bf16 %v225_v6, %v224_v5  ;;  %v8123_v8 = vld [vmem:[%s14187_s0] sm:$0xff]  ;;  %v8128_v9 = vld [vmem:[%s14187_s0 + $0x8] sm:$0xff]  ;;  %v8133_v10 = vld [vmem:[%s14187_s0 + $0x10] sm:$0xff] }
   0x4   :  { %v8139_v11 = vld [vmem:[%s14187_s0 + $0x18] sm:$0xff]  ;;  %v88_v12 = vsel %vm87_vm0, %v8123_v8, 0.0  ;;  %v89_v13 = vsel %vm87_vm0, %v8128_v9, 0.0  ;;  %v91_v14 = vsel %vm87_vm0, %v8133_v10, 0.0  ;;  %v8151_v15 = vld [vmem:[%s14187_s0 + $0x20] sm:$0xff]  ;;  %v8163_v19 = vld [vmem:[%s14187_s0 + $0x28] sm:$0xff] }
   0x5   :  { %7162 = vmatprep.subr.bf16.mxu1 %v7161_v7  ;;  %v90_v16 = vadd.f32 %v89_v13, %v88_v12  ;;  %v8156_v17 = vld [vmem:[%s14188_s1 + $0x60] sm:$0xff]  ;;  %v93_v18 = vsel %vm87_vm0, %v8139_v11, 0.0  ;;  %v95_v22 = vsel %vm87_vm0, %v8151_v15, 0.0 }
   0x6   :  { %668 = vperm.xlu1 %7300, %v8106_v3   ;;  %692 = vperm.xlu0 %7325, %v8112_v4  }
   0x7   :  { %7164 = vmatpush3.bf16.msra.mxu1 %v7161_v7  ;;  %v92_v20 = vadd.f32 %v91_v14, %v90_v16 }
   0xa   :  { %7301 = vset.pattern.permute.xlu1 %v14204_v21 }
   0xb   :  { %18 = vsyncpa [#allocation5], 0  ;;  %748 = vperm.xlu1 %7301, %v8106_v3   ;;  %712 = vperm.xlu0 %7325, %v8156_v17   ;;  %v8173_v23 = vld [vmem:[%s14187_s0 + $0x30] sm:$0xff]  ;;  %v94_v24 = vadd.f32 %v93_v18, %v92_v20  ;;  %v8178_v25 = vld [vmem:[%s14188_s1 + $0x68] sm:$0xff]  ;;  %v97_v26 = vsel %vm87_vm0, %v8163_v19, 0.0  ;;  %v14210_v30 = vmov 4  }
   0xc   :  { %v8185_v27 = vld [vmem:[%s14187_s0 + $0x38] sm:$0xff]  ;;  %v99_v29 = vsel %vm87_vm0, %v8173_v23, 0.0  ;;  %v8194_v31 = vld [vmem:[%s14187_s0 + $0x40] sm:$0xff]  ;;  %v8202_v34 = vld [vmem:[%s14187_s0 + $0x48] sm:$0xff]  ;;  %v14206_v46 = vmov 5   ;;  %v14200_v62 = vmov 6  }
   0xd   :  { %v96_v28 = vadd.f32 %v95_v22, %v94_v24  ;;  %v101_v33 = vsel %vm87_vm0, %v8185_v27, 0.0  ;;  %v103_v36 = vsel %vm87_vm0, %v8194_v31, 0.0  ;;  %v8209_v37 = vld [vmem:[%s14188_s1 + $0x18] sm:$0xff]  ;;  %v8215_v38 = vld [vmem:[%s14187_s0 + $0x50] sm:$0xff]  ;;  %v105_v40 = vsel %vm87_vm0, %v8202_v34, 0.0  ;;  %v8231_v44 = vld [vmem:[%s14187_s0 + $0x60] sm:$0xff] }
   0xe   :  { %v8224_v41 = vld [vmem:[%s14187_s0 + $0x58] sm:$0xff]  ;;  %v107_v43 = vsel %vm87_vm0, %v8215_v38, 0.0  ;;  %v8241_v48 = vld [vmem:[%s14188_s1 + $0x48] sm:$0xff]  ;;  %v111_v51 = vsel %vm87_vm0, %v8231_v44, 0.0  ;;  %v8253_v52 = vld [vmem:[%s14188_s1 + $0x10] sm:$0xff]  ;;  %v14224_v5 = vmov 1  }
   0xf   :  { %7302 = vset.pattern.permute.xlu1 %v14210_v30  ;;  %716 = vperm.xlu0 %7325, %v8178_v25   ;;  %v98_v32 = vadd.f32 %v97_v26, %v96_v28  ;;  %v109_v47 = vsel %vm87_vm0, %v8224_v41, 0.0  ;;  %v8246_v49 = vld [vmem:[%s14187_s0 + $0x68] sm:$0xff]  ;;  %v8258_v53 = vld [vmem:[%s14187_s0 + $0x70] sm:$0xff]  ;;  %v8267_v56 = vld [vmem:[%s14187_s0 + $0x78] sm:$0xff]  ;;  %v14214_v18 = vmov 7   ;;  %s8014_s27 = smov 8  }
  0x10   :  { %824 = vperm.xlu1 %7302, %v8093_v0   ;;  %v113_v55 = vsel %vm87_vm0, %v8246_v49, 0.0  ;;  %v115_v58 = vsel %vm87_vm0, %v8258_v53, 0.0  ;;  %v117_v60 = vsel %vm87_vm0, %v8267_v56, 0.0  ;;  %v8305_v28 = vld [vmem:[%s14188_s1 + $0x28] sm:$0xff]  ;;  %s8015_s28 = smov 16   ;;  %s8016_s12 = smov 32  }
  0x11   :  { %v100_v35 = vadd.f32 %v99_v29, %v98_v32  ;;  %s8017_s14 = smov 40   ;;  %s8018_s15 = smov 48   ;;  %vm1735_vm5 = vcmask 64512   ;;  %vm1768_vm6 = vcmask 195584   ;;  %vm1785_vm7 = vcmask 261120  }
  0x12   :  { %s8019_s18 = smov 24   ;;  %s8020_s19 = smov 56   ;;  %vm1802_vm8 = vcmask 326656   ;;  %vm1819_vm9 = vcmask 392192   ;;  %vm1836_vm10 = vcmask 457728   ;;  %vm1853_vm11 = vcmask 523264  }
  0x13   :  { %7359 = vset.pattern.permute.xlu0 %v14210_v30  ;;  %v102_v39 = vadd.f32 %v101_v33, %v100_v35  ;;  %s8021_s22 = smov 64   ;;  %vm1886_vm12 = vcmask 588800   ;;  %s8022_s29 = smov 112   ;;  %vm3154_vm13 = vcmask 1040384   ;;  %vm8026_vm14 = vmmov 1  }
  0x14   :  { %828 = vperm.xlu1 %7302, %v8106_v3   ;;  %836 = vperm.xlu0 %7359, %v8209_v37   ;;  %s8023_s30 = smov 96   ;;  %s8024_s13 = smov 80   ;;  %vm10631_vm15 = vmpackc.low %vm3154_vm13, %vm8026_vm14  ;;  %vm14565_vm13 = vcmask 785408   ;;  %vm14564_vm14 = vcmask 916480  }
  0x15   :  { %v104_v42 = vadd.f32 %v103_v36, %v102_v39  ;;  %v8343_v36 = vld [vmem:[%s14188_s1 + $0x58] sm:$0xff]  ;;  %v14208_v39 = vmov 8  }
  0x17   :  { %v106_v45 = vadd.f32 %v105_v40, %v104_v42 }
  0x18   :  { %7303 = vset.pattern.permute.xlu1 %v14206_v46  ;;  %848 = vperm.xlu0 %7359, %v8101_v2  }
  0x19   :  { %904 = vperm.xlu1 %7303, %v8093_v0   ;;  %v108_v50 = vadd.f32 %v107_v43, %v106_v45 }
  0x1b   :  { %v110_v54 = vadd.f32 %v109_v47, %v108_v50 }
  0x1c   :  { %860 = vperm.xlu0 %7359, %v8241_v48  }
  0x1d   :  { %7304 = vset.pattern.permute.xlu1 %v14202_v1  ;;  %v112_v57 = vadd.f32 %v111_v51, %v110_v54  ;;  %v8363_v51 = vld [vmem:[%s14188_s1 + $0x20] sm:$0xff] }
  0x1e   :  { %672 = vperm.xlu1 %7304, %v8253_v52  }
  0x1f   :  { %v114_v59 = vadd.f32 %v113_v55, %v112_v57  ;;  %v8368_v55 = vld [vmem:[%s14188_s1 + $0x70] sm:$0xff] }
  0x20   :  { %872 = vperm.xlu0 %7359, %v8156_v17  }
  0x21   :  { %v116_v61 = vadd.f32 %v115_v58, %v114_v59 }
  0x22   :  { %7305 = vset.pattern.permute.xlu1 %v14200_v62 }
  0x23   :  { %984 = vperm.xlu1 %7305, %v8093_v0   ;;  %v118_v63 = vadd.f32 %v117_v60, %v116_v61 }
  0x24   :  { %7363 = vset.pattern.permute.xlu0 %v14224_v5 }
  0x25   :  { %551 = vperm.xlu0 %7363, %v8093_v0   ;;  %v119_v6 = vrot.slane %v118_v63, 4 }
  0x27   :  { %7306 = vset.pattern.permute.xlu1 %v14202_v1  ;;  %v120_v7 = vadd.f32 %v119_v6, %v118_v63 }
  0x28   :  { %676 = vperm.xlu1 %7306, %v8209_v37  }
  0x29   :  { %555 = vperm.xlu0 %7363, %v8106_v3   ;;  %v121_v12 = vrot.slane %v120_v7, 2 }
  0x2b   :  { %v122_v13 = vadd.f32 %v121_v12, %v120_v7 }
  0x2c   :  { %7307 = vset.pattern.permute.xlu1 %v14200_v62 }
  0x2d   :  { %988 = vperm.xlu1 %7307, %v8106_v3   ;;  %559 = vperm.xlu0 %7363, %v8253_v52   ;;  %v123_v14 = vrot.slane %v122_v13, 1 }
  0x2f   :  { %v124_v16 = vadd.f32 %v123_v14, %v122_v13 }
  0x31   :  { %7308 = vset.pattern.permute.xlu1 %v14214_v18  ;;  %v8286_v20 = vmul.f32 0.0078125, %v124_v16  ;;  %563 = vperm.xlu0 %7363, %v8209_v37  }
  0x32   :  { %1064 = vperm.xlu1 %7308, %v8093_v0  }
  0x33   :  { %v8292_v22 = vsub.f32 %v8123_v8, %v8286_v20  ;;  %v8296_v24 = vsub.f32 %v8128_v9, %v8286_v20  ;;  %v8300_v26 = vsub.f32 %v8133_v10, %v8286_v20  ;;  %v8309_v29 = vsub.f32 %v8139_v11, %v8286_v20  ;;  %v8316_v8 = vld [vmem:[%s14188_s1 + $0x40] sm:$0xff] }
  0x34   :  { %v8321_v9 = vsub.f32 %v8151_v15, %v8286_v20  ;;  %v8331_v33 = vsub.f32 %v8163_v19, %v8286_v20  ;;  %v8338_v15 = vsub.f32 %v8173_v23, %v8286_v20  ;;  %v8354_v45 = vsub.f32 %v8185_v27, %v8286_v20 }
  0x35   :  { %571 = vperm.xlu0 %7363, %v8305_v28   ;;  %v142_v10 = vmul.f32 %v8292_v22, %v8292_v22  ;;  %v143_v11 = vmul.f32 %v8296_v24, %v8296_v24  ;;  %v144_v32 = vmul.f32 %v8300_v26, %v8300_v26  ;;  %v145_v35 = vmul.f32 %v8309_v29, %v8309_v29 }
  0x36   :  { %7309 = vset.pattern.permute.xlu1 %v14210_v30  ;;  %v146_v19 = vmul.f32 %v8321_v9, %v8321_v9  ;;  %v147_v47 = vmul.f32 %v8331_v33, %v8331_v33  ;;  %v8372_v27 = vsub.f32 %v8194_v31, %v8286_v20  ;;  %v148_v57 = vmul.f32 %v8338_v15, %v8338_v15 }
  0x37   :  { %832 = vperm.xlu1 %7309, %v8253_v52   ;;  %v158_v40 = vsel %vm87_vm0, %v142_v10, 0.0  ;;  %v159_v42 = vsel %vm87_vm0, %v143_v11, 0.0  ;;  %v161_v43 = vsel %vm87_vm0, %v144_v32, 0.0  ;;  %v163_v50 = vsel %vm87_vm0, %v145_v35, 0.0 }
  0x38   :  { %v160_v23 = vadd.f32 %v159_v42, %v158_v40  ;;  %v165_v58 = vsel %vm87_vm0, %v146_v19, 0.0  ;;  %v8381_v60 = vsub.f32 %v8202_v34, %v8286_v20  ;;  %v149_v61 = vmul.f32 %v8354_v45, %v8354_v45 }
  0x39   :  { %583 = vperm.xlu0 %7363, %v8316_v8   ;;  %v167_v31 = vsel %vm87_vm0, %v147_v47, 0.0  ;;  %v8389_v6 = vsub.f32 %v8215_v38, %v8286_v20  ;;  %v150_v7 = vmul.f32 %v8372_v27, %v8372_v27  ;;  %v169_v12 = vsel %vm87_vm0, %v148_v57, 0.0 }
  0x3a   :  { %v162_v54 = vadd.f32 %v161_v43, %v160_v23  ;;  %v8397_v34 = vsub.f32 %v8224_v41, %v8286_v20  ;;  %v151_v14 = vmul.f32 %v8381_v60, %v8381_v60  ;;  %v171_v16 = vsel %vm87_vm0, %v149_v61, 0.0 }
  0x3b   :  { %7310 = vset.pattern.permute.xlu1 %v14208_v39  ;;  %v8407_v10 = vsub.f32 %v8231_v44, %v8286_v20  ;;  %v152_v41 = vmul.f32 %v8389_v6, %v8389_v6  ;;  %v173_v11 = vsel %vm87_vm0, %v150_v7, 0.0  ;;  %v8414_v35 = vsub.f32 %v8246_v49, %v8286_v20 }
  0x3c   :  { %1144 = vperm.xlu1 %7310, %v8093_v0   ;;  %v164_v59 = vadd.f32 %v163_v50, %v162_v54  ;;  %v153_v19 = vmul.f32 %v8397_v34, %v8397_v34  ;;  %v175_v40 = vsel %vm87_vm0, %v151_v14, 0.0  ;;  %v8424_v44 = vsub.f32 %v8258_v53, %v8286_v20 }
  0x3d   :  { %595 = vperm.xlu0 %7363, %v8343_v36   ;;  %v154_v49 = vmul.f32 %v8407_v10, %v8407_v10  ;;  %v177_v43 = vsel %vm87_vm0, %v152_v41, 0.0  ;;  %v8431_v47 = vsub.f32 %v8267_v56, %v8286_v20  ;;  %v155_v50 = vmul.f32 %v8414_v35, %v8414_v35 }
  0x3e   :  { %v166_v63 = vadd.f32 %v165_v58, %v164_v59  ;;  %v179_v54 = vsel %vm87_vm0, %v153_v19, 0.0  ;;  %v156_v53 = vmul.f32 %v8424_v44, %v8424_v44 }
  0x3f   :  { %v181_v58 = vsel %vm87_vm0, %v154_v49, 0.0  ;;  %v157_v56 = vmul.f32 %v8431_v47, %v8431_v47  ;;  %v183_v20 = vsel %vm87_vm0, %v155_v50, 0.0 }
  0x40   :  { %7311 = vset.pattern.permute.xlu1 %v14224_v5  ;;  %v168_v13 = vadd.f32 %v167_v31, %v166_v63  ;;  %v185_v31 = vsel %vm87_vm0, %v156_v53, 0.0 }
  0x41   :  { %567 = vperm.xlu1 %7311, %v8363_v51   ;;  %607 = vperm.xlu0 %7363, %v8368_v55   ;;  %v187_v7 = vsel %vm87_vm0, %v157_v56, 0.0 }
  0x42   :  { %v170_v38 = vadd.f32 %v169_v12, %v168_v13 }
  0x44   :  { %v172_v32 = vadd.f32 %v171_v16, %v170_v38 }
  0x45   :  { %7312 = vset.pattern.permute.xlu1 %v14206_v46  ;;  %7366 = vset.pattern.permute.xlu0 %v14208_v39 }
  0x46   :  { %912 = vperm.xlu1 %7312, %v8253_v52   ;;  %1152 = vperm.xlu0 %7366, %v8253_v52   ;;  %v174_v42 = vadd.f32 %v173_v11, %v172_v32 }
  0x48   :  { %v176_v23 = vadd.f32 %v175_v40, %v174_v42 }
  0x4a   :  { %7313 = vset.pattern.permute.xlu1 %v14208_v39  ;;  %1164 = vperm.xlu0 %7366, %v8305_v28   ;;  %v178_v57 = vadd.f32 %v177_v43, %v176_v23  ;;  %v8474_v43 = vld [vmem:[%s14188_s1 + $0x78] sm:$0xff] }
  0x4b   :  { %1148 = vperm.xlu1 %7313, %v8106_v3  }
  0x4c   :  { %v180_v59 = vadd.f32 %v179_v54, %v178_v57 }
  0x4e   :  { %1176 = vperm.xlu0 %7366, %v8316_v8   ;;  %v182_v61 = vadd.f32 %v181_v58, %v180_v59 }
  0x4f   :  { %7314 = vset.pattern.permute.xlu1 %v14202_v1 }
  0x50   :  { %680 = vperm.xlu1 %7314, %v8363_v51   ;;  %v184_v63 = vadd.f32 %v183_v20, %v182_v61 }
  0x52   :  { %1188 = vperm.xlu0 %7366, %v8343_v36   ;;  %v186_v12 = vadd.f32 %v185_v31, %v184_v63  ;;  %v8499_v31 = vld [vmem:[%s14188_s1 + $0x50] sm:$0xff] }
  0x53   :  { %14660 = vst [vmem:[#allocation10_spill] sm:$0xff] %v8499_v31 }
  0x54   :  { %7315 = vset.pattern.permute.xlu1 %v14206_v46  ;;  %v188_v13 = vadd.f32 %v187_v7, %v186_v12 }
  0x55   :  { %916 = vperm.xlu1 %7315, %v8209_v37  }
  0x56   :  { %7369 = vset.pattern.permute.xlu0 %v14204_v21  ;;  %v189_v14 = vrot.slane %v188_v13, 4 }
  0x57   :  { %744 = vperm.xlu0 %7369, %v8093_v0  }
  0x58   :  { %v190_v16 = vadd.f32 %v189_v14, %v188_v13 }
  0x59   :  { %7316 = vset.pattern.permute.xlu1 %v14202_v1 }
  0x5a   :  { %684 = vperm.xlu1 %7316, %v8305_v28   ;;  %v191_v38 = vrot.slane %v190_v16, 2 }
  0x5b   :  { %752 = vperm.xlu0 %7369, %v8253_v52  }
  0x5c   :  { %v192_v41 = vadd.f32 %v191_v38, %v190_v16 }
  0x5e   :  { %7317 = vset.pattern.permute.xlu1 %v14204_v21  ;;  %v193_v11 = vrot.slane %v192_v41, 1 }
  0x5f   :  { %760 = vperm.xlu1 %7317, %v8363_v51   ;;  %756 = vperm.xlu0 %7369, %v8209_v37  }
  0x60   :  { %v194_v32 = vadd.f32 %v193_v11, %v192_v41 }
  0x62   :  { %v196_v19 = vmul.f32 0.007874016, %v194_v32 }
  0x63   :  { %7318 = vset.pattern.permute.xlu1 %v14214_v18  ;;  %764 = vperm.xlu0 %7369, %v8305_v28  }
  0x64   :  { %1072 = vperm.xlu1 %7318, %v8253_v52   ;;  %v197_v40 = vmax.f32 %v196_v19, 0.0 }
  0x66   :  { %7920 = vrsqrt.f32 %v197_v40  ;;  %vm200_vm1 = vcmp.eq.f32.partialorder %v197_v40, inf  ;;  %v203_v49 = vand.u32 2147483648, %v197_v40  ;;  %vm202_vm2 = vcmp.eq.f32.partialorder %v197_v40, 0.0 }
  0x67   :  { %776 = vperm.xlu0 %7369, %v8316_v8  }
  0x68   :  { %7319 = vset.pattern.permute.xlu1 %v14210_v30 }
  0x69   :  { %840 = vperm.xlu1 %7319, %v8363_v51  }
  0x6b   :  { %780 = vperm.xlu0 %7369, %v8241_v48  }
  0x6d   :  { %7320 = vset.pattern.permute.xlu1 %v14214_v18 }
  0x6e   :  { %1076 = vperm.xlu1 %7320, %v8209_v37  }
  0x6f   :  { %788 = vperm.xlu0 %7369, %v8343_v36  }
  0x70   :  { %v7921_v42 = vpop.eup %7920 }
  0x71   :  { %v199_v23 = vmul.f32 %v7921_v42, %v197_v40 }
  0x72   :  { %7321 = vset.pattern.permute.xlu1 %v14224_v5 }
  0x73   :  { %575 = vperm.xlu1 %7321, %v8101_v2   ;;  %800 = vperm.xlu0 %7369, %v8368_v55   ;;  %v201_v50 = vsel %vm200_vm1, %v197_v40, %v199_v23  ;;  %vm3105_vm1 = vcmask 72704  }
  0x74   :  { %v204_v54 = vsel %vm202_vm2, %v203_v49, %v201_v50  ;;  %vm3034_vm2 = vcmask 654336  }
  0x75   :  { %v205_v57 = vadd.f32 1e-06, %v204_v54 }
  0x77   :  { %7322 = vset.pattern.permute.xlu1 %v14210_v30  ;;  %804 = vperm.xlu0 %7369, %v8474_v43   ;;  %7922 = vrcp.f32 %v205_v57 }
  0x78   :  { %844 = vperm.xlu1 %7322, %v8305_v28  }
  0x7b   :  { %7376 = vset.pattern.permute.xlu0 %v14206_v46 }
  0x7c   :  { %7323 = vset.pattern.permute.xlu1 %v14208_v39  ;;  %908 = vperm.xlu0 %7376, %v8106_v3  }
  0x7d   :  { %1156 = vperm.xlu1 %7323, %v8209_v37  }
  0x80   :  { %920 = vperm.xlu0 %7376, %v8363_v51  }
  0x81   :  { %7324 = vset.pattern.permute.xlu1 %v14224_v5  ;;  %v8485_v53 = vpop.permute.xlu1 %664  ;;  %v7923_v58 = vpop.eup %7922 }
  0x82   :  { %14658 = vst [vmem:[#allocation8_spill] sm:$0xff] %v8485_v53  ;;  %579 = vperm.xlu1 %7324, %v8112_v4   ;;  %v208_v56 = vmul.f32 %v7923_v58, %v8292_v22  ;;  %v209_v20 = vmul.f32 %v7923_v58, %v8296_v24  ;;  %v210_v61 = vmul.f32 %v7923_v58, %v8300_v26  ;;  %v8501_v63 = vpop.permute.xlu0 %688 }
  0x83   :  { %14661 = vst [vmem:[#allocation11_spill] sm:$0xff] %v8501_v63  ;;  %v211_v22 = vmul.f32 %v7923_v58, %v8309_v29  ;;  %v212_v24 = vmul.f32 %v7923_v58, %v8321_v9  ;;  %v213_v7 = vmul.f32 %v7923_v58, %v8331_v33  ;;  %v214_v29 = vmul.f32 %v7923_v58, %v8338_v15 }
  0x84   :  { %932 = vperm.xlu0 %7376, %v8112_v4   ;;  %6913 = vmatprep.mubr.msk.f32.mxu1 %vm87_vm0, %v208_v56  ;;  %v215_v13 = vmul.f32 %v7923_v58, %v8354_v45  ;;  %v216_v33 = vmul.f32 %v7923_v58, %v8372_v27  ;;  %v217_v16 = vmul.f32 %v7923_v58, %v8381_v60  ;;  %v14199_v56 = vmov 0  }
  0x85   :  { %v8489_v59 = vpop.permute.xlu1 %668  ;;  %6914 = vmatmul.mubr.msk.f32.vlgmr.msra.gmra.mrb[0].mxu1 %vm87_vm0, %v209_v20  ;;  %v218_v45 = vmul.f32 %v7923_v58, %v8389_v6  ;;  %v219_v38 = vmul.f32 %v7923_v58, %v8397_v34  ;;  %v220_v60 = vmul.f32 %v7923_v58, %v8407_v10  ;;  %v222_v34 = vmul.f32 %v7923_v58, %v8424_v44 }
  0x86   :  { %14659 = vst [vmem:[#allocation9_spill] sm:$0xff] %v8489_v59  ;;  %7326 = vset.pattern.permute.xlu1 %v14206_v46  ;;  %6916 = vmatprep.mubr.msk.f32.mxu1 %vm87_vm0, %v210_v61  ;;  %v8515_v12 = vpop.permute.xlu0 %692  ;;  %v223_v10 = vmul.f32 %v7923_v58, %v8431_v47 }
  0x87   :  { %924 = vperm.xlu1 %7326, %v8305_v28   ;;  %14663 = vst [vmem:[#allocation13_spill] sm:$0xff] %v8515_v12  ;;  %v14723_v12 = vmov 6  }
  0x88   :  { %944 = vperm.xlu0 %7376, %v8499_v31  }
  0x89   :  { %6917 = vmatmul.mubr.msk.f32.gmra.mrb[2].mxu1 %vm87_vm0, %v211_v22 }
  0x8a   :  { %v8508_v26 = vpop.permute.xlu1 %748  ;;  %6919 = vmatprep.mubr.msk.f32.mxu1 %vm87_vm0, %v212_v24  ;;  %v8531_v15 = vpop.permute.xlu0 %712 }
  0x8b   :  { %14662 = vst [vmem:[#allocation12_spill] sm:$0xff] %v8508_v26  ;;  %7327 = vset.pattern.permute.xlu1 %v14200_v62  ;;  %14666 = vst [vmem:[#allocation16_spill] sm:$0xff] %v8531_v15 }
  0x8c   :  { %1000 = vperm.xlu1 %7327, %v8363_v51   ;;  %956 = vperm.xlu0 %7376, %v8178_v25  }
  0x8d   :  { %6920 = vmatmul.mubr.msk.f32.gmra.mrb[4].mxu1 %vm87_vm0, %v213_v7 }
  0x8e   :  { %6922 = vmatprep.mubr.msk.f32.mxu1 %vm87_vm0, %v214_v29  ;;  %v8545_v41 = vpop.permute.xlu0 %716 }
  0x8f   :  { %v8520_v9 = vpop.permute.xlu1 %824  ;;  %14668 = vst [vmem:[#allocation18_spill] sm:$0xff] %v8545_v41 }
  0x90   :  { %14664 = vst [vmem:[#allocation14_spill] sm:$0xff] %v8520_v9  ;;  %7328 = vset.pattern.permute.xlu1 %v14204_v21  ;;  %960 = vperm.xlu0 %7376, %v8368_v55  }
  0x91   :  { %768 = vperm.xlu1 %7328, %v8101_v2   ;;  %6923 = vmatmul.mubr.msk.f32.gmra.mrb[6].mxu1 %vm87_vm0, %v215_v13 }
  0x92   :  { %6925 = vmatprep.mubr.msk.f32.mxu1 %vm87_vm0, %v216_v33 }
  0x93   :  { %v8529_v14 = vpop.permute.xlu1 %828  ;;  %v8559_v11 = vpop.permute.xlu0 %836 }
  0x94   :  { %14665 = vst [vmem:[#allocation15_spill] sm:$0xff] %v8529_v14  ;;  %7380 = vset.pattern.permute.xlu0 %v14200_v62  ;;  %14670 = vst [vmem:[#allocation20_spill] sm:$0xff] %v8559_v11 }
  0x95   :  { %7329 = vset.pattern.permute.xlu1 %v14214_v18  ;;  %992 = vperm.xlu0 %7380, %v8253_v52   ;;  %v221_v52 = vmul.f32 %v7923_v58, %v8414_v35 }
  0x96   :  { %1080 = vperm.xlu1 %7329, %v8363_v51   ;;  %6926 = vmatmul.mubr.msk.f32.gmra.mrb[8].mxu1 %vm87_vm0, %v217_v16 }
  0x97   :  { %6928 = vmatprep.mubr.msk.f32.mxu1 %vm87_vm0, %v218_v45  ;;  %v8572_v44 = vpop.permute.xlu0 %848 }
  0x98   :  { %v8540_v27 = vpop.permute.xlu1 %904  ;;  %14672 = vst [vmem:[#allocation22_spill] sm:$0xff] %v8572_v44 }
  0x99   :  { %14667 = vst [vmem:[#allocation17_spill] sm:$0xff] %v8540_v27  ;;  %996 = vperm.xlu0 %7380, %v8209_v37  }
  0x9a   :  { %7330 = vset.pattern.permute.xlu1 %v14204_v21  ;;  %6929 = vmatmul.mubr.msk.f32.gmra.mrb[10].mxu1 %vm87_vm0, %v219_v38 }
  0x9b   :  { %772 = vperm.xlu1 %7330, %v8112_v4   ;;  %6931 = vmatprep.mubr.msk.f32.mxu1 %vm87_vm0, %v220_v60  ;;  %v8579_v47 = vpop.permute.xlu0 %860 }
  0x9c   :  { %14674 = vst [vmem:[#allocation24_spill] sm:$0xff] %v8579_v47 }
  0x9d   :  { %v8554_v6 = vpop.permute.xlu1 %672  ;;  %1004 = vperm.xlu0 %7380, %v8305_v28  }
  0x9e   :  { %14669 = vst [vmem:[#allocation19_spill] sm:$0xff] %v8554_v6  ;;  %6932 = vmatmul.mubr.msk.f32.gmra.mrb[12].mxu1 %vm87_vm0, %v221_v52 }
  0x9f   :  { %7331 = vset.pattern.permute.xlu1 %v14214_v18  ;;  %6934 = vmatprep.mubr.msk.f32.mxu1 %vm87_vm0, %v222_v34  ;;  %v8589_v42 = vpop.permute.xlu0 %872 }
  0xa0   :  { %1084 = vperm.xlu1 %7331, %v8305_v28   ;;  %14677 = vst [vmem:[#allocation27_spill] sm:$0xff] %v8589_v42 }
  0xa1   :  { %1016 = vperm.xlu0 %7380, %v8316_v8  }
  0xa2   :  { %v8566_v35 = vpop.permute.xlu1 %984  ;;  %6935 = vmatmul.mubr.msk.f32.gmra.mrb[14].mxu1 %vm87_vm0, %v223_v10 }
  0xa3   :  { %14671 = vst [vmem:[#allocation21_spill] sm:$0xff] %v8566_v35 }
  0xa4   :  { %7332 = vset.pattern.permute.xlu1 %v14208_v39  ;;  %v8597_v23 = vpop.permute.xlu0 %551 }
  0xa5   :  { %1160 = vperm.xlu1 %7332, %v8363_v51   ;;  %1020 = vperm.xlu0 %7380, %v8241_v48   ;;  %14679 = vst [vmem:[#allocation29_spill] sm:$0xff] %v8597_v23 }
  0xa7   :  { %v8574_v32 = vpop.permute.xlu1 %676 }
  0xa8   :  { %14673 = vst [vmem:[#allocation23_spill] sm:$0xff] %v8574_v32  ;;  %v8605_v54 = vpop.permute.xlu0 %555 }
  0xa9   :  { %7333 = vset.pattern.permute.xlu1 %v14210_v30  ;;  %1028 = vperm.xlu0 %7380, %v8343_v36   ;;  %14681 = vst [vmem:[#allocation31_spill] sm:$0xff] %v8605_v54 }
  0xaa   :  { %852 = vperm.xlu1 %7333, %v8112_v4  }
  0xac   :  { %v8581_v19 = vpop.permute.xlu1 %988  ;;  %v8614_v57 = vpop.permute.xlu0 %559 }
  0xad   :  { %14675 = vst [vmem:[#allocation25_spill] sm:$0xff] %v8581_v19  ;;  %1040 = vperm.xlu0 %7380, %v8368_v55   ;;  %14683 = vst [vmem:[#allocation33_spill] sm:$0xff] %v8614_v57 }
  0xae   :  { %7334 = vset.pattern.permute.xlu1 %v14206_v46 }
  0xaf   :  { %928 = vperm.xlu1 %7334, %v8101_v2  }
  0xb0   :  { %v8622_v20 = vpop.permute.xlu0 %563 }
  0xb1   :  { %v8587_v40 = vpop.permute.xlu1 %1064  ;;  %7383 = vset.pattern.permute.xlu0 %v14214_v18  ;;  %14685 = vst [vmem:[#allocation35_spill] sm:$0xff] %v8622_v20 }
  0xb2   :  { %14676 = vst [vmem:[#allocation26_spill] sm:$0xff] %v8587_v40  ;;  %1068 = vperm.xlu0 %7383, %v8106_v3  }
  0xb3   :  { %7335 = vset.pattern.permute.xlu1 %v14224_v5 }
  0xb4   :  { %587 = vperm.xlu1 %7335, %v8241_v48   ;;  %v8632_v24 = vpop.permute.xlu0 %571 }
  0xb5   :  { %14688 = vst [vmem:[#allocation38_spill] sm:$0xff] %v8632_v24 }
  0xb6   :  { %v8595_v49 = vpop.permute.xlu1 %832  ;;  %1092 = vperm.xlu0 %7383, %v8112_v4  }
  0xb7   :  { %14678 = vst [vmem:[#allocation28_spill] sm:$0xff] %v8595_v49 }
  0xb8   :  { %7336 = vset.pattern.permute.xlu1 %v14202_v1  ;;  %v8638_v7 = vpop.permute.xlu0 %583 }
  0xb9   :  { %696 = vperm.xlu1 %7336, %v8316_v8   ;;  %14690 = vst [vmem:[#allocation40_spill] sm:$0xff] %v8638_v7  ;;  %v14720_v7 = vmov 5  }
  0xba   :  { %1116 = vperm.xlu0 %7383, %v8178_v25  }
  0xbb   :  { %v8602_v50 = vpop.permute.xlu1 %1144 }
  0xbc   :  { %14680 = vst [vmem:[#allocation30_spill] sm:$0xff] %v8602_v50 }
  0xbd   :  { %7337 = vset.pattern.permute.xlu1 %v14200_v62 }
  0xbe   :  { %1008 = vperm.xlu1 %7337, %v8101_v2   ;;  %1124 = vperm.xlu0 %7383, %v8474_v43  }
  0xc0   :  { %v8609_v3 = vpop.permute.xlu1 %567 }
  0xc1   :  { %14682 = vst [vmem:[#allocation32_spill] sm:$0xff] %v8609_v3 }
  0xc2   :  { %7338 = vset.pattern.permute.xlu1 %v14202_v1  ;;  %7387 = vset.pattern.permute.xlu0 %v14199_v56 }
  0xc3   :  { %700 = vperm.xlu1 %7338, %v8241_v48   ;;  %456 = vperm.xlu0 %7387, %v8093_v0  }
  0xc5   :  { %v8616_v58 = vpop.permute.xlu1 %912 }
  0xc6   :  { %14684 = vst [vmem:[#allocation34_spill] sm:$0xff] %v8616_v58 }
  0xc7   :  { %7339 = vset.pattern.permute.xlu1 %v14200_v62  ;;  %471 = vperm.xlu0 %7387, %v8209_v37  }
  0xc8   :  { %1012 = vperm.xlu1 %7339, %v8112_v4  }
  0xca   :  { %v8624_v61 = vpop.permute.xlu1 %1148 }
  0xcb   :  { %14686 = vst [vmem:[#allocation36_spill] sm:$0xff] %v8624_v61  ;;  %481 = vperm.xlu0 %7387, %v8305_v28   ;;  %v8645_v28 = vpop.permute.xlu0 %595 }
  0xcc   :  { %7340 = vset.pattern.permute.xlu1 %v14214_v18  ;;  %14692 = vst [vmem:[#allocation42_spill] sm:$0xff] %v8645_v28 }
  0xcd   :  { %1088 = vperm.xlu1 %7340, %v8101_v2  }
  0xcf   :  { %v8630_v22 = vpop.permute.xlu1 %680  ;;  %v8652_v13 = vpop.permute.xlu0 %607 }
  0xd0   :  { %14687 = vst [vmem:[#allocation37_spill] sm:$0xff] %v8630_v22  ;;  %14694 = vst [vmem:[#allocation44_spill] sm:$0xff] %v8652_v13  ;;  %v14713_v13 = vmov 4  }
  0xd1   :  { %7341 = vset.pattern.permute.xlu1 %v14210_v30 }
  0xd2   :  { %856 = vperm.xlu1 %7341, %v8316_v8  }
  0xd4   :  { %v8636_v0 = vpop.permute.xlu1 %916 }
  0xd5   :  { %14689 = vst [vmem:[#allocation39_spill] sm:$0xff] %v8636_v0 }
  0xd6   :  { %7342 = vset.pattern.permute.xlu1 %v14208_v39 }
  0xd7   :  { %1168 = vperm.xlu1 %7342, %v8101_v2   ;;  %v8658_v2 = vpop.permute.xlu0 %1152 }
  0xd8   :  { %14696 = vst [vmem:[#allocation46_spill] sm:$0xff] %v8658_v2 }
  0xd9   :  { %v8642_v37 = vpop.permute.xlu1 %684 }
  0xda   :  { %14691 = vst [vmem:[#allocation41_spill] sm:$0xff] %v8642_v37 }
  0xdb   :  { %7343 = vset.pattern.permute.xlu1 %v14224_v5  ;;  %v8666_v38 = vpop.permute.xlu0 %1164 }
  0xdc   :  { %591 = vperm.xlu1 %7343, %v8499_v31   ;;  %14699 = vst [vmem:[#allocation49_spill] sm:$0xff] %v8666_v38 }
  0xde   :  { %v8648_v29 = vpop.permute.xlu1 %760 }
  0xdf   :  { %14693 = vst [vmem:[#allocation43_spill] sm:$0xff] %v8648_v29  ;;  %v8672_v52 = vpop.permute.xlu0 %1176 }
  0xe0   :  { %7344 = vset.pattern.permute.xlu1 %v14206_v46  ;;  %14701 = vst [vmem:[#allocation51_spill] sm:$0xff] %v8672_v52 }
  0xe1   :  { %936 = vperm.xlu1 %7344, %v8316_v8  }
  0xe3   :  { %v8654_v33 = vpop.permute.xlu1 %1072  ;;  %v8679_v34 = vpop.permute.xlu0 %1188 }
  0xe4   :  { %14695 = vst [vmem:[#allocation45_spill] sm:$0xff] %v8654_v33  ;;  %14703 = vst [vmem:[#allocation53_spill] sm:$0xff] %v8679_v34 }
  0xe5   :  { %7345 = vset.pattern.permute.xlu1 %v14208_v39 }
  0xe6   :  { %1172 = vperm.xlu1 %7345, %v8112_v4  }
  0xe7   :  { %v8686_v56 = vpop.permute.xlu0 %744 }
  0xe8   :  { %v8660_v16 = vpop.permute.xlu1 %840  ;;  %14705 = vst [vmem:[#allocation55_spill] sm:$0xff] %v8686_v56 }
  0xe9   :  { %14697 = vst [vmem:[#allocation47_spill] sm:$0xff] %v8660_v16 }
  0xea   :  { %7346 = vset.pattern.permute.xlu1 %v14202_v1 }
  0xeb   :  { %704 = vperm.xlu1 %7346, %v8499_v31  }
  0xed   :  { %v8664_v45 = vpop.permute.xlu1 %1076 }
  0xee   :  { %14698 = vst [vmem:[#allocation48_spill] sm:$0xff] %v8664_v45 }
  0xef   :  { %7347 = vset.pattern.permute.xlu1 %v14206_v46 }
  0xf0   :  { %940 = vperm.xlu1 %7347, %v8241_v48  }
  0xf2   :  { %v8670_v60 = vpop.permute.xlu1 %575 }
  0xf3   :  { %14700 = vst [vmem:[#allocation50_spill] sm:$0xff] %v8670_v60  ;;  %v14729_v60 = vmov 7  }
  0xf4   :  { %7348 = vset.pattern.permute.xlu1 %v14202_v1  ;;  %v8692_v1 = vpop.permute.xlu0 %752 }
  0xf5   :  { %708 = vperm.xlu1 %7348, %v8343_v36   ;;  %14707 = vst [vmem:[#allocation57_spill] sm:$0xff] %v8692_v1 }
  0xf7   :  { %v8676_v4 = vpop.permute.xlu1 %844 }
  0xf8   :  { %14702 = vst [vmem:[#allocation52_spill] sm:$0xff] %v8676_v4  ;;  %v8700_v39 = vpop.permute.xlu0 %756 }
  0xf9   :  { %7349 = vset.pattern.permute.xlu1 %v14204_v21  ;;  %14710 = vst [vmem:[#allocation60_spill] sm:$0xff] %v8700_v39 }
  0xfa   :  { %784 = vperm.xlu1 %7349, %v8499_v31  }
  0xfc   :  { %v8682_v10 = vpop.permute.xlu1 %1156 }
  0xfd   :  { %14704 = vst [vmem:[#allocation54_spill] sm:$0xff] %v8682_v10 }
  0xfe   :  { %7350 = vset.pattern.permute.xlu1 %v14214_v18 }
  0xff   :  { %1096 = vperm.xlu1 %7350, %v8316_v8  }
 0x101   :  { %v8688_v62 = vpop.permute.xlu1 %579 }
 0x102   :  { %14706 = vst [vmem:[#allocation56_spill] sm:$0xff] %v8688_v62 }
 0x103   :  { %7351 = vset.pattern.permute.xlu1 %v14210_v30  ;;  %v8706_v30 = vpop.permute.xlu0 %764 }
 0x104   :  { %864 = vperm.xlu1 %7351, %v8499_v31   ;;  %14712 = vst [vmem:[#allocation62_spill] sm:$0xff] %v8706_v30 }
 0x106   :  { %v8694_v21 = vpop.permute.xlu1 %924 }
 0x107   :  { %14708 = vst [vmem:[#allocation58_spill] sm:$0xff] %v8694_v21  ;;  %v8713_v28 = vpop.permute.xlu0 %776  ;;  %v14726_v21 = vmov 3  }
 0x108   :  { %7352 = vset.pattern.permute.xlu1 %v14214_v18  ;;  %v14715_v18 = vmov 8   ;;  %14716 = vst [vmem:[#allocation64_spill] sm:$0xff] %v8713_v28 }
 0x109   :  { %1100 = vperm.xlu1 %7352, %v8241_v48  }
 0x10b   :  { %v8698_v46 = vpop.permute.xlu1 %1000  ;;  %v8720_v42 = vpop.permute.xlu0 %780 }
 0x10c   :  { %14709 = vst [vmem:[#allocation59_spill] sm:$0xff] %v8698_v46  ;;  %14718 = vst [vmem:[#allocation66_spill] sm:$0xff] %v8720_v42  ;;  %v14741_v42 = vmov 1  }
 0x10d   :  { %7353 = vset.pattern.permute.xlu1 %v14224_v5 }
 0x10e   :  { %599 = vperm.xlu1 %7353, %v8156_v17  }
 0x10f   :  { %v8726_v52 = vpop.permute.xlu0 %788 }
 0x110   :  { %v8704_v8 = vpop.permute.xlu1 %768  ;;  %14721 = vst [vmem:[#allocation68_spill] sm:$0xff] %v8726_v52 }
 0x111   :  { %14711 = vst [vmem:[#allocation61_spill] sm:$0xff] %v8704_v8 }
 0x112   :  { %7354 = vset.pattern.permute.xlu1 %v14713_v13 }
 0x113   :  { %868 = vperm.xlu1 %7354, %v8343_v36  }
 0x115   :  { %v8710_v41 = vpop.permute.xlu1 %1080 }
 0x116   :  { %14714 = vst [vmem:[#allocation63_spill] sm:$0xff] %v8710_v41 }
 0x117   :  { %7355 = vset.pattern.permute.xlu1 %v14715_v18 }
 0x118   :  { %1180 = vperm.xlu1 %7355, %v8241_v48  }
 0x11a   :  { %v8716_v34 = vpop.permute.xlu1 %772 }
 0x11b   :  { %14717 = vst [vmem:[#allocation65_spill] sm:$0xff] %v8716_v34 }
 0x11c   :  { %7356 = vset.pattern.permute.xlu1 %v14224_v5  ;;  %v8734_v5 = vpop.permute.xlu0 %800 }
 0x11d   :  { %603 = vperm.xlu1 %7356, %v8178_v25   ;;  %14725 = vst [vmem:[#allocation71_spill] sm:$0xff] %v8734_v5 }
 0x11f   :  { %v8722_v15 = vpop.permute.xlu1 %1084 }
 0x120   :  { %14719 = vst [vmem:[#allocation67_spill] sm:$0xff] %v8722_v15  ;;  %v8740_v47 = vpop.permute.xlu0 %804 }
 0x121   :  { %7357 = vset.pattern.permute.xlu1 %v14720_v7  ;;  %14728 = vst [vmem:[#allocation73_spill] sm:$0xff] %v8740_v47 }
 0x122   :  { %948 = vperm.xlu1 %7357, %v8343_v36  }
 0x124   :  { %v8728_v44 = vpop.permute.xlu1 %1160 }
 0x125   :  { %14722 = vst [vmem:[#allocation69_spill] sm:$0xff] %v8728_v44  ;;  %v8747_v44 = vpop.permute.xlu0 %908 }
 0x126   :  { %7358 = vset.pattern.permute.xlu1 %v14723_v12  ;;  %14731 = vst [vmem:[#allocation75_spill] sm:$0xff] %v8747_v44 }
 0x127   :  { %1024 = vperm.xlu1 %7358, %v8499_v31  }
 0x129   :  { %v8732_v48 = vpop.permute.xlu1 %852 }
 0x12a   :  { %14724 = vst [vmem:[#allocation70_spill] sm:$0xff] %v8732_v48 }
 0x12b   :  { %7360 = vset.pattern.permute.xlu1 %v14726_v21 }
 0x12c   :  { %792 = vperm.xlu1 %7360, %v8156_v17  }
 0x12e   :  { %v8738_v62 = vpop.permute.xlu1 %928 }
 0x12f   :  { %14727 = vst [vmem:[#allocation72_spill] sm:$0xff] %v8738_v62  ;;  %v8754_v62 = vpop.permute.xlu0 %920 }
 0x130   :  { %7361 = vset.pattern.permute.xlu1 %v14729_v60  ;;  %14733 = vst [vmem:[#allocation77_spill] sm:$0xff] %v8754_v62 }
 0x131   :  { %1104 = vperm.xlu1 %7361, %v8499_v31  }
 0x133   :  { %v8744_v52 = vpop.permute.xlu1 %587 }
 0x134   :  { %14730 = vst [vmem:[#allocation74_spill] sm:$0xff] %v8744_v52  ;;  %v8760_v52 = vpop.permute.xlu0 %932 }
 0x135   :  { %7362 = vset.pattern.permute.xlu1 %v14726_v21  ;;  %14735 = vst [vmem:[#allocation79_spill] sm:$0xff] %v8760_v52  ;;  %v14743_v52 = vmov 2  }
 0x136   :  { %796 = vperm.xlu1 %7362, %v8178_v25  }
 0x138   :  { %v8750_v5 = vpop.permute.xlu1 %696  ;;  %v8768_v16 = vpop.permute.xlu0 %944 }
 0x139   :  { %14732 = vst [vmem:[#allocation76_spill] sm:$0xff] %v8750_v5  ;;  %14738 = vst [vmem:[#allocation82_spill] sm:$0xff] %v8768_v16  ;;  %v435_v16 = vlaneseq }
 0x13a   :  { %7364 = vset.pattern.permute.xlu1 %v14729_v60 }
 0x13b   :  { %1108 = vperm.xlu1 %7364, %v8343_v36  }
 0x13c   :  { %v8774_v62 = vpop.permute.xlu0 %956 }
 0x13d   :  { %v8756_v47 = vpop.permute.xlu1 %1008  ;;  %14740 = vst [vmem:[#allocation84_spill] sm:$0xff] %v8774_v62  ;;  %v8788_v62 = vshrl.u32 %v435_v16, 7 }
 0x13e   :  { %14734 = vst [vmem:[#allocation78_spill] sm:$0xff] %v8756_v47 }
 0x13f   :  { %7365 = vset.pattern.permute.xlu1 %v14715_v18  ;;  %14746 = vst [vmem:[#allocation88_spill] sm:$0xff] %v8788_v62  ;;  %vm646_vm3 = vcmp.lt.s32.totalorder %v8788_v62, 7  ;;  %vm437_vm4 = vcmp.lt.s32.totalorder %v8788_v62, 1 }
 0x140   :  { %1184 = vperm.xlu1 %7365, %v8499_v31   ;;  %v8781_v31 = vpop.permute.xlu0 %960 }
 0x141   :  { %14744 = vst [vmem:[#allocation86_spill] sm:$0xff] %v8781_v31 }
 0x142   :  { %v8762_v21 = vpop.permute.xlu1 %700 }
 0x143   :  { %14736 = vst [vmem:[#allocation80_spill] sm:$0xff] %v8762_v21 }
 0x144   :  { %7367 = vset.pattern.permute.xlu1 %v14713_v13 }
 0x145   :  { %876 = vperm.xlu1 %7367, %v8178_v25  }
 0x147   :  { %v8766_v2 = vpop.permute.xlu1 %1012 }
 0x148   :  { %14737 = vst [vmem:[#allocation81_spill] sm:$0xff] %v8766_v2 }
 0x149   :  { %7368 = vset.pattern.permute.xlu1 %v14720_v7 }
 0x14a   :  { %952 = vperm.xlu1 %7368, %v8156_v17  }
 0x14c   :  { %v8772_v36 = vpop.permute.xlu1 %1088 }
 0x14d   :  { %14739 = vst [vmem:[#allocation83_spill] sm:$0xff] %v8772_v36 }
 0x14e   :  { %7370 = vset.pattern.permute.xlu1 %v14741_v42  ;;  %v8790_v42 = vpop.permute.xlu0 %992 }
 0x14f   :  { %611 = vperm.xlu1 %7370, %v8474_v43   ;;  %14747 = vst [vmem:[#allocation89_spill] sm:$0xff] %v8790_v42 }
 0x151   :  { %v8778_v21 = vpop.permute.xlu1 %856 }
 0x152   :  { %14742 = vst [vmem:[#allocation85_spill] sm:$0xff] %v8778_v21  ;;  %v8808_v47 = vpop.permute.xlu0 %996 }
 0x153   :  { %7371 = vset.pattern.permute.xlu1 %v14743_v52  ;;  %14751 = vst [vmem:[#allocation93_spill] sm:$0xff] %v8808_v47 }
 0x154   :  { %720 = vperm.xlu1 %7371, %v8368_v55  }
 0x156   :  { %v8784_v2 = vpop.permute.xlu1 %1168 }
 0x157   :  { %14745 = vst [vmem:[#allocation87_spill] sm:$0xff] %v8784_v2 }
 0x158   :  { %7372 = vset.pattern.permute.xlu1 %v14723_v12  ;;  %v8794_v21 = vpop.f32.mrb[0].mxu1 }
 0x159   :  { %1032 = vperm.xlu1 %7372, %v8156_v17   ;;  %14749 = vst [vmem:[#allocation91_spill] sm:$0xff] %v8794_v21  ;;  %v8796_v28 = vpop.f32.mrb[1].mxu1  ;;  %v631_v31 = vrot.slane %v8794_v21, 1  ;;  %v420_v2 = vrot.slane %v8794_v21, 7 }
 0x15a   :  { %14750 = vst [vmem:[#allocation92_spill] sm:$0xff] %v8796_v28  ;;  %v615_v16 = vmul.f32 %v8605_v54, %v8796_v28  ;;  %v14259_v37 = vrot.slane %v8796_v28, 1 }
 0x15b   :  { %v8792_v36 = vpop.permute.xlu1 %591 }
 0x15c   :  { %14748 = vst [vmem:[#allocation90_spill] sm:$0xff] %v8792_v36  ;;  %v14263_v36 = vrot.slane %v8796_v28, 7  ;;  %v8810_v0 = vpop.f32.mrb[2].mxu1  ;;  %1241 = vrot.lane.b32.xlu0 %v615_v16, %s8014_s27 }
 0x15d   :  { %7373 = vset.pattern.permute.xlu1 %v14743_v52  ;;  %14752 = vst [vmem:[#allocation94_spill] sm:$0xff] %v8810_v0  ;;  %v8817_v52 = vsel %vm646_vm3, %v14259_v37, %v631_v31  ;;  %v8827_v47 = vpop.f32.mrb[3].mxu1  ;;  %v422_v38 = vrot.slane %v8810_v0, 7 }
 0x15e   :  { %724 = vperm.xlu1 %7373, %v8474_v43   ;;  %14753 = vst [vmem:[#allocation95_spill] sm:$0xff] %v8817_v52  ;;  %v8825_v5 = vsel %vm437_vm4, %v14263_v36, %v420_v2  ;;  %14755 = vst [vmem:[#allocation97_spill] sm:$0xff] %v8827_v47  ;;  %v728_v24 = vmul.f32 %v8489_v59, %v8817_v52  ;;  %v632_v16 = vrot.slane %v8827_v47, 1  ;;  %v421_v37 = vrot.slane %v8827_v47, 7 }
 0x160   :  { %v8819_v54 = vpop.permute.xlu1 %936  ;;  %v8837_v58 = vpop.f32.mrb[4].mxu1  ;;  %1305 = vrot.lane.b32.xlu0 %v728_v24, %s8015_s28  ;;  %v8842_v36 = vsel %vm646_vm3, %v631_v31, %v632_v16  ;;  %v8846_v59 = vsel %vm437_vm4, %v420_v2, %v421_v37  ;;  %v8850_v48 = vsel %vm437_vm4, %v421_v37, %v422_v38 }
 0x161   :  { %14754 = vst [vmem:[#allocation96_spill] sm:$0xff] %v8819_v54  ;;  %v633_v54 = vrot.slane %v8810_v0, 1  ;;  %14756 = vst [vmem:[#allocation98_spill] sm:$0xff] %v8837_v58  ;;  %v8860_v24 = vpop.permute.xlu0 %1004  ;;  %v424_v2 = vrot.slane %v8837_v58, 7  ;;  %v635_v37 = vrot.slane %v8837_v58, 1 }
 0x162   :  { %7374 = vset.pattern.permute.xlu1 %v14723_v12  ;;  %14757 = vst [vmem:[#allocation99_spill] sm:$0xff] %v8850_v48  ;;  %14760 = vst [vmem:[#allocation102_spill] sm:$0xff] %v8860_v24 }
 0x163   :  { %1036 = vperm.xlu1 %7374, %v8178_v25   ;;  %v8852_v25 = vpop.f32.mrb[5].mxu1  ;;  %v8858_v50 = vsel %vm646_vm3, %v632_v16, %v633_v54 }
 0x164   :  { %14758 = vst [vmem:[#allocation100_spill] sm:$0xff] %v8852_v25  ;;  %v634_v31 = vrot.slane %v8852_v25, 1  ;;  %v423_v15 = vrot.slane %v8852_v25, 7  ;;  %v8867_v49 = vpop.f32.mrb[6].mxu1 }
 0x165   :  { %v8854_v3 = vpop.permute.xlu1 %1172  ;;  %14761 = vst [vmem:[#allocation103_spill] sm:$0xff] %v8867_v49  ;;  %v8881_v34 = vpop.f32.mrb[7].mxu1  ;;  %v426_v8 = vrot.slane %v8867_v49, 7 }
 0x166   :  { %14759 = vst [vmem:[#allocation101_spill] sm:$0xff] %v8854_v3  ;;  %v7930_v3 = vld [vmem:[%s14188_s1 + $0x30] sm:$0xff]  ;;  %v8875_v16 = vsel %vm646_vm3, %v633_v54, %v634_v31  ;;  %v8879_v24 = vsel %vm437_vm4, %v422_v38, %v423_v15  ;;  %14763 = vst [vmem:[#allocation105_spill] sm:$0xff] %v8881_v34  ;;  %v8885_v41 = vsel %vm437_vm4, %v423_v15, %v424_v2  ;;  %v636_v54 = vrot.slane %v8881_v34, 1  ;;  %v8902_v15 = vpop.permute.xlu0 %1016 }
 0x167   :  { %7375 = vset.pattern.permute.xlu1 %v14729_v60  ;;  %486 = vperm.xlu0 %7387, %v7930_v3   ;;  %14762 = vst [vmem:[#allocation104_spill] sm:$0xff] %v8879_v24  ;;  %14764 = vst [vmem:[#allocation106_spill] sm:$0xff] %v8885_v41  ;;  %v8889_v19 = vsel %vm646_vm3, %v634_v31, %v635_v37  ;;  %v425_v38 = vrot.slane %v8881_v34, 7 }
 0x168   :  { %1112 = vperm.xlu1 %7375, %v8156_v17   ;;  %v887_v17 = vmul.f32 %v8520_v9, %v8796_v28  ;;  %14767 = vst [vmem:[#allocation109_spill] sm:$0xff] %v8902_v15  ;;  %v8906_v31 = vsel %vm646_vm3, %v635_v37, %v636_v54  ;;  %v637_v9 = vrot.slane %v8867_v49, 1  ;;  %v616_v15 = vmul.f32 %v8794_v21, %v8614_v57 }
 0x169   :  { %v8898_v56 = vpop.f32.mrb[8].mxu1  ;;  %v8914_v34 = vsel %vm437_vm4, %v424_v2, %v425_v38  ;;  %v967_v57 = vmul.f32 %v8540_v27, %v8817_v52 }
 0x16a   :  { %v8893_v3 = vpop.permute.xlu1 %704  ;;  %14766 = vst [vmem:[#allocation108_spill] sm:$0xff] %v8898_v56  ;;  %14769 = vst [vmem:[#allocation111_spill] sm:$0xff] %v8914_v34  ;;  %v8924_v37 = vsel %vm646_vm3, %v636_v54, %v637_v9  ;;  %v428_v54 = vrot.slane %v8898_v56, 7  ;;  %v639_v52 = vrot.slane %v8898_v56, 1 }
 0x16b   :  { %14765 = vst [vmem:[#allocation107_spill] sm:$0xff] %v8893_v3  ;;  %1431 = vrot.lane.b32.xlu0 %v887_v17, %s8016_s12  ;;  %v8909_v3 = vpop.f32.mrb[9].mxu1  ;;  %v8918_v17 = vsel %vm437_vm4, %v425_v38, %v426_v8  ;;  %14771 = vst [vmem:[#allocation113_spill] sm:$0xff] %v8924_v37 }
 0x16c   :  { %7377 = vset.pattern.permute.xlu1 %v14713_v13  ;;  %14768 = vst [vmem:[#allocation110_spill] sm:$0xff] %v8909_v3  ;;  %14770 = vst [vmem:[#allocation112_spill] sm:$0xff] %v8918_v17  ;;  %v638_v46 = vrot.slane %v8909_v3, 1  ;;  %v427_v2 = vrot.slane %v8909_v3, 7 }
 0x16d   :  { %880 = vperm.xlu1 %7377, %v8368_v55   ;;  %v8929_v53 = vpop.f32.mrb[10].mxu1 }
 0x16e   :  { %14773 = vst [vmem:[#allocation115_spill] sm:$0xff] %v8929_v53  ;;  %v8933_v34 = vpop.f32.mrb[11].mxu1  ;;  %v8938_v38 = vsel %vm646_vm3, %v637_v9, %v638_v46  ;;  %v8953_v3 = vsel %vm437_vm4, %v426_v8, %v427_v2  ;;  %v8957_v9 = vsel %vm437_vm4, %v427_v2, %v428_v54  ;;  %v729_v8 = vmul.f32 %v8554_v6, %v8842_v36 }
 0x16f   :  { %v8926_v49 = vpop.permute.xlu1 %940  ;;  %1243 = vrot.lane.b32.xlu0 %v616_v15, %s8014_s27  ;;  %14774 = vst [vmem:[#allocation116_spill] sm:$0xff] %v8933_v34  ;;  %14775 = vst [vmem:[#allocation117_spill] sm:$0xff] %v8938_v38  ;;  %v8949_v15 = vpop.permute.xlu0 %1020  ;;  %v8973_v2 = vsel %vm646_vm3, %v638_v46, %v639_v52  ;;  %v641_v46 = vrot.slane %v8929_v53, 1 }
 0x170   :  { %14772 = vst [vmem:[#allocation114_spill] sm:$0xff] %v8926_v49  ;;  %v8946_v49 = vld [vmem:[%s14188_s1 + $0x60] sm:$0xff]  ;;  %14777 = vst [vmem:[#allocation119_spill] sm:$0xff] %v8949_v15  ;;  %v640_v15 = vrot.slane %v8933_v34, 1 }
 0x171   :  { %7378 = vset.pattern.permute.xlu1 %v14715_v18  ;;  %14776 = vst [vmem:[#allocation118_spill] sm:$0xff] %v8946_v49  ;;  %14778 = vst [vmem:[#allocation120_spill] sm:$0xff] %v8953_v3  ;;  %v8959_v38 = vpop.f32.mrb[12].mxu1 }
 0x172   :  { %1192 = vperm.xlu1 %7378, %v8946_v49   ;;  %14779 = vst [vmem:[#allocation121_spill] sm:$0xff] %v8957_v9  ;;  %14780 = vst [vmem:[#allocation122_spill] sm:$0xff] %v8959_v38  ;;  %v8965_v49 = vpop.f32.mrb[13].mxu1  ;;  %v429_v9 = vrot.slane %v8933_v34, 7  ;;  %v643_v37 = vrot.slane %v8959_v38, 1 }
 0x173   :  { %1495 = vrot.lane.b32.xlu0 %v967_v57, %s8017_s14  ;;  %14782 = vst [vmem:[#allocation124_spill] sm:$0xff] %v8965_v49  ;;  %14783 = vst [vmem:[#allocation125_spill] sm:$0xff] %v8973_v2  ;;  %v8979_v57 = vsel %vm646_vm3, %v639_v52, %v640_v15  ;;  %v8984_v56 = vpop.permute.xlu0 %1028 }
 0x174   :  { %v8962_v27 = vpop.permute.xlu1 %708  ;;  %14784 = vst [vmem:[#allocation126_spill] sm:$0xff] %v8979_v57  ;;  %14786 = vst [vmem:[#allocation128_spill] sm:$0xff] %v8984_v56  ;;  %v1047_v57 = vmul.f32 %v8566_v35, %v8825_v5  ;;  %v14791_v56 = vrot.slane %v8796_v28, 1  ;;  %v430_v35 = vrot.slane %v8929_v53, 7 }
 0x175   :  { %14781 = vst [vmem:[#allocation123_spill] sm:$0xff] %v8962_v27  ;;  %v8981_v27 = vpop.f32.mrb[14].mxu1 }
 0x176   :  { %7379 = vset.pattern.permute.xlu1 %v14713_v13  ;;  %14785 = vst [vmem:[#allocation127_spill] sm:$0xff] %v8981_v27  ;;  %v8988_v13 = vsel %vm437_vm4, %v428_v54, %v429_v9  ;;  %v8991_v6 = vpop.f32.mrb[15].mxu1  ;;  %v645_v2 = vrot.slane %v8981_v27, 1  ;;  %v434_v52 = vrot.slane %v8981_v27, 7  ;;  %v642_v54 = vrot.slane %v8965_v49, 1 }
 0x177   :  { %884 = vperm.xlu1 %7379, %v8474_v43   ;;  %1307 = vrot.lane.b32.xlu0 %v729_v8, %s8015_s28  ;;  %14787 = vst [vmem:[#allocation129_spill] sm:$0xff] %v8988_v13  ;;  %14788 = vst [vmem:[#allocation130_spill] sm:$0xff] %v8991_v6  ;;  %v9001_v8 = vsel %vm646_vm3, %v640_v15, %v641_v46  ;;  %v14792_v13 = vrot.slane %v8796_v28, 7  ;;  %v809_v15 = vmul.f32 %v8692_v1, %v8846_v59  ;;  %v9042_v53 = vpop.permute.xlu0 %1040 }
 0x178   :  { %14790 = vst [vmem:[#allocation132_spill] sm:$0xff] %v9001_v8  ;;  %v9024_v8 = vld [vmem:[%s14188_s1 + $0x68] sm:$0xff]  ;;  %v9034_v28 = vsel %vm437_vm4, %v429_v9, %v430_v35  ;;  %14795 = vst [vmem:[#allocation135_spill] sm:$0xff] %v9042_v53  ;;  %v644_v9 = vrot.slane %v8991_v6, 1 }
 0x179   :  { %v8993_v34 = vpop.permute.xlu1 %784  ;;  %v9015_v3 = vsel %vm437_vm4, %v434_v52, %v14792_v13  ;;  %14793 = vst [vmem:[#allocation133_spill] sm:$0xff] %v9024_v8  ;;  %v431_v13 = vrot.slane %v8965_v49, 7  ;;  %v1127_v49 = vmul.f32 %v8794_v21, %v8587_v40 }
 0x17a   :  { %14789 = vst [vmem:[#allocation131_spill] sm:$0xff] %v8993_v34  ;;  %v9009_v34 = vsel %vm646_vm3, %v645_v2, %v14791_v56  ;;  %v9029_v56 = vsel %vm646_vm3, %v641_v46, %v642_v54  ;;  %v432_v46 = vrot.slane %v8959_v38, 7 }
 0x17b   :  { %7381 = vset.pattern.permute.xlu1 %v14715_v18  ;;  %1559 = vrot.lane.b32.xlu0 %v1047_v57, %s8018_s15  ;;  %v9040_v1 = vsel %vm437_vm4, %v430_v35, %v431_v13  ;;  %v9053_v35 = vsel %vm646_vm3, %v642_v54, %v643_v37  ;;  %v9080_v40 = vpop.permute.xlu0 %1068 }
 0x17c   :  { %1196 = vperm.xlu1 %7381, %v9024_v8   ;;  %v433_v8 = vrot.slane %v8991_v6, 7  ;;  %14797 = vst [vmem:[#allocation137_spill] sm:$0xff] %v9080_v40 }
 0x17e   :  { %v9036_v57 = vpop.permute.xlu1 %1096  ;;  %v9057_v53 = vsel %vm437_vm4, %v433_v8, %v434_v52  ;;  %v9073_v54 = vsel %vm437_vm4, %v432_v46, %v433_v8  ;;  %v9078_v52 = vsel %vm646_vm3, %v644_v9, %v645_v2  ;;  %v1128_v8 = vmul.f32 %v9080_v40, %v8827_v47 }
 0x17f   :  { %14794 = vst [vmem:[#allocation134_spill] sm:$0xff] %v9036_v57  ;;  %1371 = vrot.lane.b32.xlu0 %v809_v15, %s8019_s18  ;;  %v9067_v15 = vsel %vm437_vm4, %v431_v13, %v432_v46  ;;  %v890_v2 = vmul.f32 %v8810_v0, %v8559_v11 }
 0x180   :  { %7382 = vset.pattern.permute.xlu1 %v14720_v7  ;;  %v9063_v7 = vsel %vm646_vm3, %v643_v37, %v644_v9  ;;  %v810_v37 = vmul.f32 %v8700_v39, %v8850_v48  ;;  %v14826_v39 = vld [vmem:[#allocation28_spill] sm:$0xff] }
 0x181   :  { %964 = vperm.xlu1 %7382, %v8474_v43  }
 0x183   :  { %v9069_v6 = vpop.permute.xlu1 %864  ;;  %1623 = vrot.lane.b32.xlu0 %v1127_v49, %s8020_s19 }
 0x184   :  { %14796 = vst [vmem:[#allocation136_spill] sm:$0xff] %v9069_v6 }
 0x185   :  { %7384 = vset.pattern.permute.xlu1 %v14723_v12  ;;  %v7933_v12 = vld [vmem:[%s14188_s1 + $0x48] sm:$0xff] }
 0x186   :  { %1044 = vperm.xlu1 %7384, %v8474_v43  }
 0x187   :  { %1373 = vrot.lane.b32.xlu0 %v810_v37, %s8019_s18  ;;  %v14802_v37 = vmov 0  }
 0x188   :  { %v9089_v13 = vpop.permute.xlu1 %1100 }
 0x189   :  { %14798 = vst [vmem:[#allocation138_spill] sm:$0xff] %v9089_v13 }
 0x18a   :  { %7385 = vset.pattern.permute.xlu1 %v14729_v60  ;;  %v1208_v60 = vmul.f32 %v8624_v61, %v8858_v50  ;;  %v1130_v61 = vmul.f32 %v8664_v45, %v8852_v25  ;;  %v14817_v45 = vld [vmem:[#allocation111_spill] sm:$0xff] }
 0x18b   :  { %1120 = vperm.xlu1 %7385, %v8368_v55   ;;  %1625 = vrot.lane.b32.xlu0 %v1128_v8, %s8020_s19  ;;  %v731_v8 = vmul.f32 %v8630_v22, %v8875_v16 }
 0x18d   :  { %v9094_v49 = vpop.permute.xlu1 %599 }
 0x18e   :  { %14799 = vst [vmem:[#allocation139_spill] sm:$0xff] %v9094_v49 }
 0x18f   :  { %7386 = vset.pattern.permute.xlu1 %v14715_v18  ;;  %501 = vperm.xlu0 %7387, %v7933_v12  }
 0x190   :  { %1200 = vperm.xlu1 %7386, %v8368_v55   ;;  %v7934_v55 = vld [vmem:[%s14188_s1 + $0x8] sm:$0xff] }
 0x192   :  { %v9103_v9 = vpop.permute.xlu1 %868 }
 0x193   :  { %14800 = vst [vmem:[#allocation140_spill] sm:$0xff] %v9103_v9  ;;  %1437 = vrot.lane.b32.xlu0 %v890_v2, %s8016_s12  ;;  %v7935_v2 = vld [vmem:[%s14188_s1 + $0x10] sm:$0xff] }
 0x194   :  { %1204 = vperm.xlu1 %7386, %v8474_v43   ;;  %v1049_v43 = vmul.f32 %v8790_v42, %v8850_v48 }
 0x197   :  { %v9109_v46 = vpop.permute.xlu1 %1180  ;;  %1689 = vrot.lane.b32.xlu0 %v1208_v60, %s8021_s22 }
 0x198   :  { %14801 = vst [vmem:[#allocation141_spill] sm:$0xff] %v9109_v46  ;;  %7388 = vset.pattern.permute.xlu1 %v14802_v37  ;;  %v811_v37 = vmul.f32 %v8648_v29, %v8879_v24 }
 0x199   :  { %461 = vperm.xlu1 %7388, %v7934_v55   ;;  %v7936_v55 = vld [vmem:[%s14188_s1 + $0x38] sm:$0xff] }
 0x19b   :  { %1311 = vrot.lane.b32.xlu0 %v731_v8, %s8015_s28  ;;  %v1129_v8 = vmul.f32 %v8810_v0, %v8654_v33  ;;  %v14820_v33 = vld [vmem:[#allocation25_spill] sm:$0xff] }
 0x19c   :  { %v9121_v12 = vpop.permute.xlu1 %603 }
 0x19d   :  { %14803 = vst [vmem:[#allocation142_spill] sm:$0xff] %v9121_v12  ;;  %466 = vperm.xlu1 %7388, %v7935_v2   ;;  %v14882_v12 = vld [vmem:[#allocation13_spill] sm:$0xff] }
 0x19f   :  { %1563 = vrot.lane.b32.xlu0 %v1049_v43, %s8018_s15  ;;  %v812_v43 = vmul.f32 %v8706_v30, %v8885_v41  ;;  %v733_v30 = vmul.f32 %v8501_v63, %v8906_v31 }
 0x1a1   :  { %476 = vperm.xlu1 %7388, %v8363_v51   ;;  %v9128_v60 = vpop.permute.xlu1 %948  ;;  %v808_v51 = vmul.f32 %v8508_v26, %v8825_v5  ;;  %v968_v26 = vmul.f32 %v8747_v44, %v8842_v36 }
 0x1a2   :  { %14804 = vst [vmem:[#allocation143_spill] sm:$0xff] %v9128_v60 }
 0x1a3   :  { %1375 = vrot.lane.b32.xlu0 %v811_v37, %s8019_s18 }
 0x1a5   :  { %491 = vperm.xlu1 %7388, %v7936_v55   ;;  %v888_v55 = vmul.f32 %v8794_v21, %v8529_v14  ;;  %v892_v21 = vmul.f32 %v8837_v58, %v8676_v4 }
 0x1a6   :  { %v9138_v2 = vpop.permute.xlu1 %1024 }
 0x1a7   :  { %14805 = vst [vmem:[#allocation144_spill] sm:$0xff] %v9138_v2  ;;  %1627 = vrot.lane.b32.xlu0 %v1129_v8, %s8020_s19  ;;  %v617_v8 = vmul.f32 %v8622_v20, %v8827_v47  ;;  %v1872_v20 = vld [vmem:[%s14190_s3 + $0x10] sm:$0xff] }
 0x1a9   :  { %1369 = vrot.lane.b32.xlu1 %v808_v51, %s8019_s18 }
 0x1ab   :  { %v9146_v37 = vpop.permute.xlu1 %792  ;;  %1377 = vrot.lane.b32.xlu0 %v812_v43, %s8019_s18  ;;  %v7937_v43 = vld [vmem:[%s14188_s1 + $0x58] sm:$0xff] }
 0x1ac   :  { %14806 = vst [vmem:[#allocation145_spill] sm:$0xff] %v9146_v37 }
 0x1ad   :  { %1433 = vrot.lane.b32.xlu1 %v888_v55, %s8016_s12 }
 0x1af   :  { %1629 = vrot.lane.b32.xlu0 %v1130_v61, %s8020_s19  ;;  %v730_v61 = vmul.f32 %v8574_v32, %v8858_v50 }
 0x1b0   :  { %v9157_v51 = vpop.permute.xlu1 %1104 }
 0x1b1   :  { %14807 = vst [vmem:[#allocation146_spill] sm:$0xff] %v9157_v51  ;;  %1245 = vrot.lane.b32.xlu1 %v617_v8, %s8014_s27  ;;  %v1210_v8 = vmul.f32 %v8682_v10, %v8889_v19 }
 0x1b3   :  { %511 = vperm.xlu0 %7387, %v7937_v43   ;;  %v9178_v43 = vpop.permute.xlu0 %1092 }
 0x1b4   :  { %14810 = vst [vmem:[#allocation149_spill] sm:$0xff] %v9178_v43 }
 0x1b5   :  { %1497 = vrot.lane.b32.xlu1 %v968_v26, %s8017_s14  ;;  %v9166_v55 = vpop.permute.xlu1 %796  ;;  %v614_v26 = vmul.f32 %v8981_v27, %v8597_v23  ;;  %v14814_v23 = vld [vmem:[#allocation59_spill] sm:$0xff] }
 0x1b6   :  { %14808 = vst [vmem:[#allocation147_spill] sm:$0xff] %v9166_v55  ;;  %v1051_v42 = vmul.f32 %v14814_v23, %v8885_v41 }
 0x1b7   :  { %1441 = vrot.lane.b32.xlu0 %v892_v21, %s8016_s12  ;;  %v9191_v10 = vpop.permute.xlu0 %1116 }
 0x1b8   :  { %14813 = vst [vmem:[#allocation151_spill] sm:$0xff] %v9191_v10  ;;  %v14846_v10 = vld [vmem:[#allocation39_spill] sm:$0xff] }
 0x1b9   :  { %1309 = vrot.lane.b32.xlu1 %v730_v61, %s8015_s28  ;;  %v14812_v61 = vld [vmem:[#allocation8_spill] sm:$0xff] }
 0x1ba   :  { %v9176_v22 = vpop.permute.xlu1 %1108  ;;  %v727_v29 = vmul.f32 %v14812_v61, %v9009_v34  ;;  %v14818_v61 = vld [vmem:[#allocation61_spill] sm:$0xff] }
 0x1bb   :  { %14809 = vst [vmem:[#allocation148_spill] sm:$0xff] %v9176_v22  ;;  %1693 = vrot.lane.b32.xlu0 %v1210_v8, %s8021_s22  ;;  %v14815_v8 = vld [vmem:[#allocation55_spill] sm:$0xff]  ;;  %v813_v4 = vmul.f32 %v14818_v61, %v14817_v45  ;;  %v1871_v61 = vld [vmem:[%s14190_s3 + $0x8] sm:$0xff]  ;;  %v14864_v22 = vld [vmem:[#allocation46_spill] sm:$0xff] }
 0x1bc   :  { %v1209_v55 = vmul.f32 %v14864_v22, %v8875_v16 }
 0x1bd   :  { %1239 = vrot.lane.b32.xlu1 %v614_v26, %s8014_s27  ;;  %v807_v26 = vmul.f32 %v14815_v8, %v9015_v3  ;;  %v14822_v8 = vld [vmem:[#allocation63_spill] sm:$0xff] }
 0x1bf   :  { %v9186_v21 = vpop.permute.xlu1 %1184  ;;  %1315 = vrot.lane.b32.xlu0 %v733_v30, %s8015_s28  ;;  %v9204_v30 = vpop.permute.xlu0 %1124 }
 0x1c0   :  { %14811 = vst [vmem:[#allocation150_spill] sm:$0xff] %v9186_v21  ;;  %14819 = vst [vmem:[#allocation153_spill] sm:$0xff] %v9204_v30 }
 0x1c1   :  { %1303 = vrot.lane.b32.xlu1 %v727_v29, %s8015_s28  ;;  %v1048_v29 = vmul.f32 %v14820_v33, %v8846_v59  ;;  %v889_v33 = vmul.f32 %v14826_v39, %v8827_v47  ;;  %v1874_v39 = vld [vmem:[%s14190_s3 + $0x20] sm:$0xff] }
 0x1c3   :  { %1567 = vrot.lane.b32.xlu0 %v1051_v42, %s8018_s15  ;;  %v1131_v42 = vmul.f32 %v8837_v58, %v14822_v8  ;;  %v9221_v32 = vpop.permute.xlu0 %456  ;;  %v14824_v8 = vld [vmem:[#allocation65_spill] sm:$0xff] }
 0x1c4   :  { %v9199_v63 = vpop.permute.xlu1 %876  ;;  %14823 = vst [vmem:[#allocation155_spill] sm:$0xff] %v9221_v32  ;;  %v814_v44 = vmul.f32 %v14824_v8, %v8918_v17  ;;  %v14828_v8 = vld [vmem:[#allocation67_spill] sm:$0xff] }
 0x1c5   :  { %14816 = vst [vmem:[#allocation152_spill] sm:$0xff] %v9199_v63  ;;  %1367 = vrot.lane.b32.xlu1 %v807_v26, %s8019_s18  ;;  %v1870_v26 = vld [vmem:[%s14190_s3] sm:$0xff] }
 0x1c7   :  { %1379 = vrot.lane.b32.xlu0 %v813_v4, %s8019_s18  ;;  %v7938_v4 = vld [vmem:[%s14188_s1 + $0x40] sm:$0xff]  ;;  %v9242_v11 = vpop.permute.xlu0 %471 }
 0x1c8   :  { %14829 = vst [vmem:[#allocation157_spill] sm:$0xff] %v9242_v11 }
 0x1c9   :  { %1561 = vrot.lane.b32.xlu1 %v1048_v29, %s8018_s15  ;;  %v9210_v23 = vpop.permute.xlu1 %952  ;;  %v7165_v29 = vpack.c.bf16 %v1871_v61, %v1870_v26  ;;  %v1873_v61 = vld [vmem:[%s14190_s3 + $0x18] sm:$0xff] }
 0x1ca   :  { %14821 = vst [vmem:[#allocation154_spill] sm:$0xff] %v9210_v23  ;;  %v7169_v26 = vpack.c.bf16 %v1873_v61, %v1872_v20  ;;  %v1875_v20 = vld [vmem:[%s14190_s3 + $0x28] sm:$0xff] }
 0x1cb   :  { %1631 = vrot.lane.b32.xlu0 %v1131_v42, %s8020_s19  ;;  %7166 = vmatprep.subr.bf16.mxu1 %v7165_v29  ;;  %v14832_v61 = vld [vmem:[#allocation32_spill] sm:$0xff]  ;;  %v9267_v62 = vpop.permute.xlu0 %481 }
 0x1cc   :  { %7168 = vmatpush3.bf16.msra.mxu1 %v7165_v29  ;;  %14835 = vst [vmem:[#allocation159_spill] sm:$0xff] %v9267_v62 }
 0x1cd   :  { %496 = vperm.xlu1 %7388, %v7938_v4   ;;  %v14827_v4 = vld [vmem:[#allocation105_spill] sm:$0xff]  ;;  %7170 = vmatprep.subr.bf16.mxu1 %v7169_v26 }
 0x1ce   :  { %v9228_v42 = vpop.permute.xlu1 %611  ;;  %v1132_v40 = vmul.f32 %v14828_v8, %v14827_v4  ;;  %v618_v8 = vmul.f32 %v8810_v0, %v14832_v61 }
 0x1cf   :  { %14825 = vst [vmem:[#allocation156_spill] sm:$0xff] %v9228_v42  ;;  %1381 = vrot.lane.b32.xlu0 %v814_v44, %s8019_s18  ;;  %v14831_v44 = vld [vmem:[#allocation30_spill] sm:$0xff]  ;;  %v9278_v14 = vpop.permute.xlu0 %1241 }
 0x1d0   :  { %v1207_v29 = vmul.f32 %v14831_v44, %v8842_v36  ;;  %7172 = vmatpush3.bf16.msra.mxu1 %v7169_v26  ;;  %v14833_v36 = vld [vmem:[#allocation133_spill] sm:$0xff]  ;;  %v1877_v26 = vld [vmem:[%s14190_s3 + $0x38] sm:$0xff] }
 0x1d1   :  { %1435 = vrot.lane.b32.xlu1 %v889_v33, %s8016_s12  ;;  %v7173_v33 = vpack.c.bf16 %v1875_v20, %v1874_v39  ;;  %v14837_v20 = vld [vmem:[#allocation103_spill] sm:$0xff]  ;;  %v14859_v42 = vld [vmem:[#allocation66_spill] sm:$0xff] }
 0x1d3   :  { %v9244_v47 = vpop.permute.xlu1 %720  ;;  %1633 = vrot.lane.b32.xlu0 %v1132_v40, %s8020_s19  ;;  %7174 = vmatprep.subr.bf16.mxu1 %v7173_v33  ;;  %v1876_v40 = vld [vmem:[%s14190_s3 + $0x30] sm:$0xff] }
 0x1d4   :  { %14830 = vst [vmem:[#allocation158_spill] sm:$0xff] %v9244_v47  ;;  %7176 = vmatpush3.bf16.msra.mxu1 %v7173_v33  ;;  %v7177_v39 = vpack.c.bf16 %v1877_v26, %v1876_v40  ;;  %v1878_v33 = vld [vmem:[%s14190_s3 + $0x40] sm:$0xff]  ;;  %v14840_v40 = vld [vmem:[#allocation113_spill] sm:$0xff] }
 0x1d5   :  { %1687 = vrot.lane.b32.xlu1 %v1207_v29, %s8021_s22  ;;  %v14836_v29 = vld [vmem:[#allocation70_spill] sm:$0xff]  ;;  %v14841_v26 = vld [vmem:[#allocation49_spill] sm:$0xff]  ;;  %v734_v30 = vmul.f32 %v14882_v12, %v14840_v40 }
 0x1d6   :  { %v894_v0 = vmul.f32 %v14837_v20, %v14836_v29  ;;  %7178 = vmatprep.subr.bf16.mxu1 %v7177_v39  ;;  %v1212_v29 = vmul.f32 %v14841_v26, %v14840_v40  ;;  %v14847_v26 = vld [vmem:[#allocation78_spill] sm:$0xff] }
 0x1d7   :  { %521 = vperm.xlu0 %7387, %v14833_v36   ;;  %v14838_v36 = vld [vmem:[#allocation34_spill] sm:$0xff] }
 0x1d8   :  { %v9259_v44 = vpop.permute.xlu1 %1032  ;;  %v969_v61 = vmul.f32 %v14838_v36, %v8858_v50  ;;  %7180 = vmatpush3.bf16.msra.mxu1 %v7177_v39  ;;  %v14842_v50 = vld [vmem:[#allocation38_spill] sm:$0xff]  ;;  %v14844_v39 = vld [vmem:[#allocation76_spill] sm:$0xff] }
 0x1d9   :  { %14834 = vst [vmem:[#allocation133_spill] sm:$0xff] %v9259_v44  ;;  %1247 = vrot.lane.b32.xlu1 %v618_v8, %s8014_s27  ;;  %6953 = vmatprep.subr.mxu1 %v1878_v33  ;;  %v619_v36 = vmul.f32 %v14842_v50, %v8852_v25 }
 0x1db   :  { %1445 = vrot.lane.b32.xlu0 %v894_v0, %s8016_s12  ;;  %v14843_v0 = vld [vmem:[#allocation117_spill] sm:$0xff] }
 0x1dc   :  { %6954 = vmatpush3.msra.mxu1 %v1878_v33  ;;  %v735_v41 = vmul.f32 %v14844_v39, %v14843_v0  ;;  %v14850_v39 = vld [vmem:[#allocation41_spill] sm:$0xff] }
 0x1dd   :  { %1499 = vrot.lane.b32.xlu1 %v969_v61, %s8017_s14  ;;  %v9281_v8 = vpop.permute.xlu1 %724  ;;  %v9293_v61 = vpop.permute.xlu0 %1305  ;;  %v732_v50 = vmul.f32 %v14850_v39, %v8889_v19 }
 0x1de   :  { %14839 = vst [vmem:[#allocation160_spill] sm:$0xff] %v9281_v8  ;;  %v970_v8 = vmul.f32 %v14846_v10, %v8875_v16  ;;  %v14852_v10 = vld [vmem:[#allocation64_spill] sm:$0xff] }
 0x1df   :  { %1697 = vrot.lane.b32.xlu0 %v1212_v29, %s8021_s22  ;;  %v1053_v29 = vmul.f32 %v14847_v26, %v8918_v17  ;;  %v14855_v17 = vld [vmem:[#allocation83_spill] sm:$0xff]  ;;  %v14868_v16 = vld [vmem:[#allocation108_spill] sm:$0xff] }
 0x1e0   :  { %v1133_v39 = vmul.f32 %v14837_v20, %v14855_v17  ;;  %v1135_v12 = vmul.f32 %v14868_v16, %v9036_v57  ;;  %v14894_v57 = vld [vmem:[#allocation51_spill] sm:$0xff] }
 0x1e1   :  { %1249 = vrot.lane.b32.xlu1 %v619_v36, %s8014_s27 }
 0x1e2   :  { %v9291_v27 = vpop.permute.xlu1 %1036 }
 0x1e3   :  { %14845 = vst [vmem:[#allocation113_spill] sm:$0xff] %v9291_v27  ;;  %1319 = vrot.lane.b32.xlu0 %v735_v41, %s8015_s28  ;;  %v14851_v27 = vld [vmem:[#allocation120_spill] sm:$0xff] }
 0x1e4   :  { %v815_v62 = vmul.f32 %v14852_v10, %v14851_v27 }
 0x1e5   :  { %1501 = vrot.lane.b32.xlu1 %v970_v8, %s8017_s14  ;;  %v14853_v8 = vld [vmem:[#allocation93_spill] sm:$0xff] }
 0x1e6   :  { %v9301_v33 = vpop.permute.xlu0 %486  ;;  %v1050_v48 = vmul.f32 %v14853_v8, %v8879_v24 }
 0x1e7   :  { %14848 = vst [vmem:[#allocation117_spill] sm:$0xff] %v9301_v33  ;;  %v9303_v36 = vpop.permute.xlu1 %1112  ;;  %1571 = vrot.lane.b32.xlu0 %v1053_v29, %s8018_s15  ;;  %v14858_v33 = vld [vmem:[#allocation121_spill] sm:$0xff] }
 0x1e8   :  { %14849 = vst [vmem:[#allocation161_spill] sm:$0xff] %v9303_v36  ;;  %v816_v8 = vmul.f32 %v14859_v42, %v14858_v33 }
 0x1e9   :  { %1313 = vrot.lane.b32.xlu1 %v732_v50, %s8015_s28  ;;  %v14856_v50 = vld [vmem:[#allocation10_spill] sm:$0xff] }
 0x1ea   :  { %v9311_v41 = vpop.permute.xlu0 %1431 }
 0x1eb   :  { %1383 = vrot.lane.b32.xlu0 %v815_v62, %s8019_s18  ;;  %v14860_v62 = vld [vmem:[#allocation47_spill] sm:$0xff] }
 0x1ec   :  { %v9316_v26 = vpop.permute.xlu1 %880  ;;  %v891_v23 = vmul.f32 %v14860_v62, %v8852_v25  ;;  %v14867_v62 = vld [vmem:[#allocation24_spill] sm:$0xff] }
 0x1ed   :  { %14854 = vst [vmem:[#allocation162_spill] sm:$0xff] %v9316_v26  ;;  %1565 = vrot.lane.b32.xlu1 %v1050_v48, %s8018_s15  ;;  %v14861_v48 = vld [vmem:[#allocation110_spill] sm:$0xff]  ;;  %v896_v22 = vmul.f32 %v14868_v16, %v14867_v62  ;;  %v14874_v62 = vld [vmem:[#allocation56_spill] sm:$0xff] }
 0x1ee   :  { %v9321_v29 = vpop.permute.xlu0 %1243  ;;  %v1134_v17 = vmul.f32 %v9178_v43, %v14861_v48  ;;  %v7939_v43 = vld [vmem:[%s14188_s1 + $0x78] sm:$0xff]  ;;  %v621_v60 = vmul.f32 %v14874_v62, %v14827_v4 }
 0x1ef   :  { %1635 = vrot.lane.b32.xlu0 %v1133_v39, %s8020_s19 }
 0x1f1   :  { %506 = vperm.xlu1 %7388, %v14856_v50   ;;  %v9325_v10 = vpop.permute.xlu1 %1192 }
 0x1f2   :  { %14857 = vst [vmem:[#allocation10_spill] sm:$0xff] %v9325_v10  ;;  %v9329_v24 = vpop.permute.xlu0 %1495 }
 0x1f3   :  { %1385 = vrot.lane.b32.xlu0 %v816_v8, %s8019_s18  ;;  %v14866_v8 = vld [vmem:[#allocation50_spill] sm:$0xff] }
 0x1f5   :  { %1439 = vrot.lane.b32.xlu1 %v891_v23, %s8016_s12  ;;  %v620_v23 = vmul.f32 %v8837_v58, %v14866_v8  ;;  %v14872_v58 = vld [vmem:[#allocation125_spill] sm:$0xff] }
 0x1f6   :  { %v9337_v39 = vpop.permute.xlu1 %884  ;;  %v9339_v50 = vpop.permute.xlu0 %1307 }
 0x1f7   :  { %14862 = vst [vmem:[#allocation163_spill] sm:$0xff] %v9337_v39  ;;  %14863 = vst [vmem:[#allocation164_spill] sm:$0xff] %v9339_v50  ;;  %1637 = vrot.lane.b32.xlu0 %v1134_v17, %s8020_s19 }
 0x1f9   :  { %1691 = vrot.lane.b32.xlu1 %v1209_v55, %s8021_s22  ;;  %v14870_v55 = vld [vmem:[#allocation77_spill] sm:$0xff] }
 0x1fa   :  { %v9345_v42 = vpop.permute.xlu0 %1559  ;;  %v971_v39 = vmul.f32 %v14870_v55, %v8889_v19  ;;  %v14877_v55 = vld [vmem:[#allocation107_spill] sm:$0xff] }
 0x1fb   :  { %v9347_v25 = vpop.permute.xlu1 %1196  ;;  %531 = vperm.xlu0 %7387, %v7939_v43   ;;  %v14873_v43 = vld [vmem:[#allocation101_spill] sm:$0xff] }
 0x1fc   :  { %14865 = vst [vmem:[#allocation165_spill] sm:$0xff] %v9347_v25  ;;  %v1214_v8 = vmul.f32 %v14873_v43, %v14872_v58  ;;  %v14880_v43 = vld [vmem:[#allocation109_spill] sm:$0xff] }
 0x1fd   :  { %1251 = vrot.lane.b32.xlu1 %v620_v23, %s8014_s27  ;;  %v1055_v62 = vmul.f32 %v14880_v43, %v14858_v33  ;;  %v14887_v43 = vld [vmem:[#allocation102_spill] sm:$0xff] }
 0x1fe   :  { %v9357_v17 = vpop.permute.xlu0 %1371  ;;  %v1052_v33 = vmul.f32 %v14887_v43, %v14817_v45 }
 0x1ff   :  { %14869 = vst [vmem:[#allocation166_spill] sm:$0xff] %v9357_v17  ;;  %1449 = vrot.lane.b32.xlu0 %v896_v22, %s8016_s12  ;;  %v14876_v22 = vld [vmem:[#allocation126_spill] sm:$0xff] }
 0x200   :  { %v9362_v25 = vpop.permute.xlu1 %964  ;;  %7919 = vset.pattern.permute.xlu0 %v14715_v18  ;;  %v737_v17 = vmul.f32 %v14877_v55, %v14876_v22  ;;  %v14879_v18 = vld [vmem:[#allocation58_spill] sm:$0xff]  ;;  %v14883_v55 = vld [vmem:[#allocation129_spill] sm:$0xff]  ;;  %v1215_v45 = vmul.f32 %v14894_v57, %v14876_v22 }
 0x201   :  { %14871 = vst [vmem:[#allocation167_spill] sm:$0xff] %v9362_v25  ;;  %1503 = vrot.lane.b32.xlu1 %v971_v39, %s8017_s14  ;;  %v972_v50 = vmul.f32 %v14879_v18, %v8906_v31  ;;  %v14884_v18 = vld [vmem:[#allocation131_spill] sm:$0xff] }
 0x202   :  { %v9368_v23 = vpop.permute.xlu0 %1623 }
 0x203   :  { %1701 = vrot.lane.b32.xlu0 %v1214_v8, %s8021_s22 }
 0x205   :  { %1253 = vrot.lane.b32.xlu1 %v621_v60, %s8014_s27  ;;  %v9374_v19 = vpop.permute.xlu1 %1044 }
 0x206   :  { %14875 = vst [vmem:[#allocation125_spill] sm:$0xff] %v9374_v19  ;;  %v9378_v39 = vpop.permute.xlu0 %1373 }
 0x207   :  { %14878 = vst [vmem:[#allocation126_spill] sm:$0xff] %v9378_v39  ;;  %1323 = vrot.lane.b32.xlu0 %v737_v17, %s8015_s28  ;;  %v817_v39 = vmul.f32 %v14884_v18, %v14883_v55  ;;  %v14890_v18 = vld [vmem:[#allocation118_spill] sm:$0xff] }
 0x209   :  { %1505 = vrot.lane.b32.xlu1 %v972_v50, %s8017_s14 }
 0x20a   :  { %v9386_v8 = vpop.permute.xlu1 %1120  ;;  %v9388_v60 = vpop.permute.xlu0 %1625 }
 0x20b   :  { %14881 = vst [vmem:[#allocation168_spill] sm:$0xff] %v9386_v8  ;;  %1575 = vrot.lane.b32.xlu0 %v1055_v62, %s8018_s15 }
 0x20d   :  { %1317 = vrot.lane.b32.xlu1 %v734_v30, %s8015_s28 }
 0x20e   :  { %v9396_v17 = vpop.permute.xlu0 %501 }
 0x20f   :  { %14885 = vst [vmem:[#allocation129_spill] sm:$0xff] %v9396_v17  ;;  %v9398_v50 = vpop.permute.xlu1 %1200  ;;  %1387 = vrot.lane.b32.xlu0 %v817_v39, %s8019_s18  ;;  %v14891_v17 = vld [vmem:[#allocation116_spill] sm:$0xff]  ;;  %v14892_v39 = vld [vmem:[#allocation22_spill] sm:$0xff] }
 0x210   :  { %14886 = vst [vmem:[#allocation169_spill] sm:$0xff] %v9398_v50  ;;  %v897_v50 = vmul.f32 %v9069_v6, %v14891_v17  ;;  %v893_v43 = vmul.f32 %v14892_v39, %v14827_v4 }
 0x211   :  { %1569 = vrot.lane.b32.xlu1 %v1052_v33, %s8018_s15 }
 0x212   :  { %v9406_v62 = vpop.permute.xlu0 %1437 }
 0x213   :  { %14888 = vst [vmem:[#allocation170_spill] sm:$0xff] %v9406_v62  ;;  %v9408_v30 = vpop.permute.xlu1 %1204  ;;  %1639 = vrot.lane.b32.xlu0 %v1135_v12, %s8020_s19 }
 0x214   :  { %14889 = vst [vmem:[#allocation171_spill] sm:$0xff] %v9408_v30 }
 0x215   :  { %516 = vperm.xlu1 %7388, %v14890_v18   ;;  %v14896_v18 = vld [vmem:[#allocation69_spill] sm:$0xff] }
 0x216   :  { %v9414_v8 = vpop.permute.xlu0 %1689  ;;  %v1211_v62 = vmul.f32 %v14896_v18, %v8906_v31  ;;  %v14901_v31 = vld [vmem:[#allocation132_spill] sm:$0xff] }
 0x217   :  { %1451 = vrot.lane.b32.xlu0 %v897_v50, %s8016_s12  ;;  %v14898_v50 = vld [vmem:[#allocation115_spill] sm:$0xff] }
 0x218   :  { %v9419_v33 = vpop.permute.xlu1 %461  ;;  %v898_v4 = vmul.f32 %v14898_v50, %v9103_v9 }
 0x219   :  { %14893 = vst [vmem:[#allocation118_spill] sm:$0xff] %v9419_v33  ;;  %1443 = vrot.lane.b32.xlu1 %v893_v43, %s8016_s12  ;;  %v14899_v43 = vld [vmem:[#allocation40_spill] sm:$0xff] }
 0x21a   :  { %v9424_v12 = vpop.permute.xlu0 %1311  ;;  %v622_v30 = vmul.f32 %v14837_v20, %v14899_v43 }
 0x21b   :  { %14895 = vst [vmem:[#allocation172_spill] sm:$0xff] %v9424_v12  ;;  %1703 = vrot.lane.b32.xlu0 %v1215_v45, %s8021_s22  ;;  %v1216_v45 = vmul.f32 %v9109_v46, %v14901_v31 }
 0x21c   :  { %v9429_v6 = vpop.permute.xlu1 %466 }
 0x21d   :  { %14897 = vst [vmem:[#allocation173_spill] sm:$0xff] %v9429_v6  ;;  %1695 = vrot.lane.b32.xlu1 %v1211_v62, %s8021_s22  ;;  %v14903_v62 = vld [vmem:[#allocation72_spill] sm:$0xff] }
 0x21e   :  { %v9434_v39 = vpop.permute.xlu0 %1563  ;;  %v973_v12 = vmul.f32 %v14903_v62, %v14840_v40  ;;  %v1057_v40 = vmul.f32 %v9138_v2, %v9034_v28 }
 0x21f   :  { %1453 = vrot.lane.b32.xlu0 %v898_v4, %s8016_s12  ;;  %v14905_v4 = vld [vmem:[#allocation16_spill] sm:$0xff] }
 0x220   :  { %v9439_v57 = vpop.permute.xlu1 %476  ;;  %v739_v20 = vmul.f32 %v14905_v4, %v9029_v56 }
 0x221   :  { %14900 = vst [vmem:[#allocation174_spill] sm:$0xff] %v9439_v57  ;;  %1255 = vrot.lane.b32.xlu1 %v622_v30, %s8014_s27  ;;  %v14907_v30 = vld [vmem:[#allocation74_spill] sm:$0xff] }
 0x222   :  { %v9444_v18 = vpop.permute.xlu0 %1375  ;;  %v623_v57 = vmul.f32 %v14907_v30, %v14861_v48 }
 0x223   :  { %14902 = vst [vmem:[#allocation132_spill] sm:$0xff] %v9444_v18  ;;  %1705 = vrot.lane.b32.xlu0 %v1216_v45, %s8021_s22 }
 0x224   :  { %v9449_v9 = vpop.permute.xlu1 %491 }
 0x225   :  { %14904 = vst [vmem:[#allocation175_spill] sm:$0xff] %v9449_v9  ;;  %1507 = vrot.lane.b32.xlu1 %v973_v12, %s8017_s14  ;;  %v14909_v12 = vld [vmem:[#allocation79_spill] sm:$0xff] }
 0x226   :  { %v9454_v43 = vpop.permute.xlu0 %1627  ;;  %v974_v62 = vmul.f32 %v14909_v12, %v14843_v0 }
 0x227   :  { %14906 = vst [vmem:[#allocation176_spill] sm:$0xff] %v9454_v43  ;;  %1327 = vrot.lane.b32.xlu0 %v739_v20, %s8015_s28  ;;  %v819_v20 = vmul.f32 %v9146_v37, %v9040_v1 }
 0x228   :  { %v9459_v46 = vpop.permute.xlu1 %1369 }
 0x229   :  { %1257 = vrot.lane.b32.xlu1 %v623_v57, %s8014_s27  ;;  %v14910_v57 = vld [vmem:[#allocation80_spill] sm:$0xff] }
 0x22a   :  { %v9464_v45 = vpop.permute.xlu0 %1377  ;;  %v736_v9 = vmul.f32 %v14910_v57, %v14872_v58  ;;  %v14913_v57 = vld [vmem:[#allocation124_spill] sm:$0xff] }
 0x22b   :  { %14908 = vst [vmem:[#allocation177_spill] sm:$0xff] %v9464_v45  ;;  %1579 = vrot.lane.b32.xlu0 %v1057_v40, %s8018_s15  ;;  %v1137_v40 = vmul.f32 %v14898_v50, %v9157_v51  ;;  %v14914_v45 = vld [vmem:[#allocation27_spill] sm:$0xff]  ;;  %v7940_v51 = vld [vmem:[%s14188_s1 + $0x70] sm:$0xff] }
 0x22c   :  { %v9469_v4 = vpop.permute.xlu1 %1433 }
 0x22d   :  { %1509 = vrot.lane.b32.xlu1 %v974_v62, %s8017_s14  ;;  %v14912_v62 = vld [vmem:[#allocation81_spill] sm:$0xff] }
 0x22e   :  { %v9474_v30 = vpop.permute.xlu0 %1629  ;;  %v1054_v18 = vmul.f32 %v14912_v62, %v14851_v27 }
 0x22f   :  { %1391 = vrot.lane.b32.xlu0 %v819_v20, %s8019_s18  ;;  %v899_v20 = vmul.f32 %v14914_v45, %v14913_v57 }
 0x230   :  { %v9479_v2 = vpop.permute.xlu1 %1245 }
 0x231   :  { %1321 = vrot.lane.b32.xlu1 %v736_v9, %s8015_s28 }
 0x232   :  { %v9484_v12 = vpop.permute.xlu0 %511 }
 0x233   :  { %14911 = vst [vmem:[#allocation178_spill] sm:$0xff] %v9484_v12  ;;  %1643 = vrot.lane.b32.xlu0 %v1137_v40, %s8020_s19  ;;  %v1217_v40 = vmul.f32 %v9186_v21, %v9029_v56 }
 0x234   :  { %v1498_v37 = vpop.permute.xlu1 %1497 }
 0x235   :  { %1573 = vrot.lane.b32.xlu1 %v1054_v18, %s8018_s15  ;;  %v14917_v18 = vld [vmem:[#allocation85_spill] sm:$0xff] }
 0x236   :  { %v9492_v43 = vpop.permute.xlu0 %1441  ;;  %v895_v12 = vmul.f32 %v14917_v18, %v14861_v48  ;;  %v14920_v48 = vld [vmem:[#allocation53_spill] sm:$0xff] }
 0x237   :  { %14915 = vst [vmem:[#allocation179_spill] sm:$0xff] %v9492_v43  ;;  %1455 = vrot.lane.b32.xlu0 %v899_v20, %s8016_s12  ;;  %v900_v20 = vmul.f32 %v8959_v38, %v9199_v63  ;;  %v1218_v18 = vmul.f32 %v14920_v48, %v9053_v35  ;;  %v534_v63 = vmul.f32 %v9221_v32, %v9057_v53 }
 0x238   :  { %v9495_v9 = vpop.permute.xlu1 %1309 }
 0x239   :  { %526 = vperm.xlu1 %7388, %v7940_v51   ;;  %v14919_v51 = vld [vmem:[#allocation87_spill] sm:$0xff] }
 0x23a   :  { %v9502_v62 = vpop.permute.xlu0 %1693  ;;  %v1213_v43 = vmul.f32 %v14919_v51, %v14843_v0  ;;  %v535_v0 = vmul.f32 %v9419_v33, %v9015_v3 }
 0x23b   :  { %14916 = vst [vmem:[#allocation180_spill] sm:$0xff] %v9502_v62  ;;  %1707 = vrot.lane.b32.xlu0 %v1217_v40, %s8021_s22  ;;  %v14921_v62 = vld [vmem:[#allocation90_spill] sm:$0xff] }
 0x23c   :  { %v1240_v45 = vpop.permute.xlu1 %1239 }
 0x23d   :  { %1447 = vrot.lane.b32.xlu1 %v895_v12, %s8016_s12  ;;  %v624_v12 = vmul.f32 %v14868_v16, %v14921_v62  ;;  %v14922_v16 = vld [vmem:[#allocation96_spill] sm:$0xff] }
 0x23e   :  { %v9510_v27 = vpop.permute.xlu0 %1315  ;;  %v975_v51 = vmul.f32 %v14922_v16, %v14872_v58  ;;  %v14923_v58 = vld [vmem:[#allocation42_spill] sm:$0xff] }
 0x23f   :  { %14918 = vst [vmem:[#allocation181_spill] sm:$0xff] %v9510_v27  ;;  %1457 = vrot.lane.b32.xlu0 %v900_v20, %s8016_s12  ;;  %v741_v20 = vmul.f32 %v9244_v47, %v9063_v7 }
 0x240   :  { %v1304_v21 = vpop.permute.xlu1 %1303 }
 0x241   :  { %1699 = vrot.lane.b32.xlu1 %v1213_v43, %s8021_s22  ;;  %v1736_v43 = vsel %vm1735_vm5, %v534_v63, %v1240_v45  ;;  %v1059_v63 = vmul.f32 %v9259_v44, %v9067_v15 }
 0x242   :  { %v9518_v40 = vpop.permute.xlu0 %1567 }
 0x243   :  { %1709 = vrot.lane.b32.xlu0 %v1218_v18, %s8021_s22  ;;  %v1752_v18 = vsel %vm87_vm0, %v1736_v43, %v1304_v21  ;;  %v625_v43 = vmul.f32 %v14923_v58, %v14891_v17 }
 0x244   :  { %v1368_v27 = vpop.permute.xlu1 %1367 }
 0x245   :  { %1259 = vrot.lane.b32.xlu1 %v624_v12, %s8014_s27  ;;  %v1769_v33 = vsel %vm1768_vm6, %v1752_v18, %v1368_v27  ;;  %v1737_v12 = vsel %vm1735_vm5, %v535_v0, %v9278_v14  ;;  %v14925_v0 = vld [vmem:[#allocation71_spill] sm:$0xff] }
 0x246   :  { %v9531_v48 = vpop.permute.xlu0 %1379  ;;  %v1786_v21 = vsel %vm1785_vm7, %v1769_v33, %v9311_v41  ;;  %v1753_v27 = vsel %vm87_vm0, %v1737_v12, %v9293_v61  ;;  %v821_v61 = vmul.f32 %v14925_v0, %v9073_v54  ;;  %v14926_v12 = vld [vmem:[#allocation114_spill] sm:$0xff]  ;;  %v14941_v0 = vld [vmem:[#allocation143_spill] sm:$0xff] }
 0x247   :  { %1331 = vrot.lane.b32.xlu0 %v741_v20, %s8015_s28  ;;  %v1803_v33 = vsel %vm1802_vm8, %v1786_v21, %v9329_v24  ;;  %v14927_v21 = vld [vmem:[#allocation123_spill] sm:$0xff]  ;;  %v978_v44 = vmul.f32 %v14941_v0, %v9029_v56 }
 0x248   :  { %v1562_v32 = vpop.permute.xlu1 %1561  ;;  %v1820_v24 = vsel %vm1819_vm9, %v1803_v33, %v9345_v42 }
 0x249   :  { %1511 = vrot.lane.b32.xlu1 %v975_v51, %s8017_s14  ;;  %v1770_v51 = vsel %vm1768_vm6, %v1753_v27, %v9459_v46  ;;  %v738_v27 = vmul.f32 %v14927_v21, %v14901_v31 }
 0x24a   :  { %v9543_v45 = vpop.permute.xlu0 %1631  ;;  %v1787_v41 = vsel %vm1785_vm7, %v1770_v51, %v9469_v4 }
 0x24b   :  { %1583 = vrot.lane.b32.xlu0 %v1059_v63, %s8018_s15  ;;  %v1804_v20 = vsel %vm1802_vm8, %v1787_v41, %v1498_v37  ;;  %v976_v63 = vmul.f32 %v14926_v12, %v14876_v22  ;;  %v1139_v37 = vmul.f32 %v8959_v38, %v9303_v36 }
 0x24c   :  { %v9552_v14 = vpop.permute.xlu1 %496  ;;  %v1821_v46 = vsel %vm1819_vm9, %v1804_v20, %v1562_v32  ;;  %v1837_v32 = vsel %vm1836_vm10, %v1820_v24, %v9368_v23  ;;  %v14930_v20 = vld [vmem:[#allocation119_spill] sm:$0xff]  ;;  %v14931_v24 = vld [vmem:[#allocation68_spill] sm:$0xff] }
 0x24d   :  { %14924 = vst [vmem:[#allocation182_spill] sm:$0xff] %v9552_v14  ;;  %1261 = vrot.lane.b32.xlu1 %v625_v43, %s8014_s27  ;;  %v1838_v4 = vsel %vm1836_vm10, %v1821_v46, %v9388_v60  ;;  %v14928_v60 = vld [vmem:[#allocation130_spill] sm:$0xff]  ;;  %v1056_v23 = vmul.f32 %v14930_v20, %v14883_v55 }
 0x24e   :  { %v9564_v18 = vpop.permute.xlu0 %1381  ;;  %v1855_v41 = vsel %vm1853_vm11, %v1838_v4, %v9414_v8  ;;  %v901_v33 = vmul.f32 %v9316_v26, %v14928_v60  ;;  %v1219_v8 = vmul.f32 %v9325_v10, %v9063_v7  ;;  %v14933_v10 = vld [vmem:[#allocation82_spill] sm:$0xff]  ;;  %v14955_v26 = vld [vmem:[#allocation99_spill] sm:$0xff] }
 0x24f   :  { %1395 = vrot.lane.b32.xlu0 %v821_v61, %s8019_s18 }
 0x250   :  { %v9570_v43 = vpop.permute.xlu1 %1435 }
 0x251   :  { %1513 = vrot.lane.b32.xlu1 %v976_v63, %s8017_s14 }
 0x252   :  { %v9579_v22 = vpop.permute.xlu0 %1633 }
 0x253   :  { %1647 = vrot.lane.b32.xlu0 %v1139_v37, %s8020_s19  ;;  %v818_v37 = vmul.f32 %v14931_v24, %v9034_v28 }
 0x254   :  { %v1688_v51 = vpop.permute.xlu1 %1687 }
 0x255   :  { %v1854_v42 = vsel %vm1853_vm11, %v1837_v32, %v1688_v51  ;;  %1325 = vrot.lane.b32.xlu1 %v738_v27, %s8015_s28  ;;  %v14932_v27 = vld [vmem:[#allocation86_spill] sm:$0xff] }
 0x256   :  { %6955 = vmatprep.mubr.msk.f32.mxu1 %vm1886_vm12, %v1854_v42  ;;  %v9593_v61 = vpop.permute.xlu0 %521  ;;  %v981_v32 = vmul.f32 %v14932_v27, %v9078_v52  ;;  %v1136_v42 = vmul.f32 %v9089_v13, %v14891_v17  ;;  %v1062_v17 = vmul.f32 %v9374_v19, %v9015_v3 }
 0x257   :  { %14929 = vst [vmem:[#allocation183_spill] sm:$0xff] %v9593_v61  ;;  %6956 = vmatmul.mubr.msk.f32.vlgmr.msra.gmra.mrb[16].mxu1 %vm1886_vm12, %v1855_v41  ;;  %1459 = vrot.lane.b32.xlu0 %v901_v33, %s8016_s12  ;;  %v982_v33 = vmul.f32 %v9362_v25, %v9009_v34  ;;  %v977_v25 = vmul.f32 %v14933_v10, %v14901_v31 }
 0x258   :  { %v9599_v63 = vpop.permute.xlu1 %1247 }
 0x259   :  { %1577 = vrot.lane.b32.xlu1 %v1056_v23, %s8018_s15 }
 0x25a   :  { %v9604_v46 = vpop.permute.xlu0 %1445 }
 0x25b   :  { %1711 = vrot.lane.b32.xlu0 %v1219_v8, %s8021_s22  ;;  %v626_v8 = vmul.f32 %v14898_v50, %v9094_v49  ;;  %v14935_v50 = vld [vmem:[#allocation153_spill] sm:$0xff] }
 0x25c   :  { %v1500_v4 = vpop.permute.xlu1 %1499 }
 0x25d   :  { %1389 = vrot.lane.b32.xlu1 %v818_v37, %s8019_s18 }
 0x25e   :  { %v9612_v51 = vpop.permute.xlu0 %1697 }
 0x25f   :  { %1523 = vrot.lane.b32.xlu0 %v981_v32, %s8017_s14  ;;  %v536_v32 = vmul.f32 %v9429_v6, %v8825_v5 }
 0x260   :  { %v9617_v41 = vpop.permute.xlu1 %1249 }
 0x261   :  { %1641 = vrot.lane.b32.xlu1 %v1136_v42, %s8020_s19  ;;  %v1738_v5 = vsel %vm1735_vm5, %v536_v32, %v9321_v29  ;;  %v14938_v32 = vld [vmem:[#allocation95_spill] sm:$0xff] }
 0x262   :  { %v9622_v23 = vpop.permute.xlu0 %1319 }
 0x263   :  { %1525 = vrot.lane.b32.xlu0 %v982_v33, %s8017_s14  ;;  %v537_v33 = vmul.f32 %v9242_v11, %v8846_v59 }
 0x264   :  { %v1502_v37 = vpop.permute.xlu1 %1501 }
 0x265   :  { %1263 = vrot.lane.b32.xlu1 %v626_v8, %s8014_s27  ;;  %v14934_v8 = vld [vmem:[#allocation92_spill] sm:$0xff]  ;;  %v1739_v6 = vsel %vm1735_vm5, %v537_v33, %v9479_v2  ;;  %v14940_v2 = vld [vmem:[#allocation126_spill] sm:$0xff] }
 0x266   :  { %v9632_v42 = vpop.permute.xlu0 %1571  ;;  %v1142_v3 = vmul.f32 %v14935_v50, %v14934_v8  ;;  %v1755_v47 = vsel %vm87_vm0, %v1739_v6, %v9495_v9  ;;  %v14939_v8 = vld [vmem:[#allocation171_spill] sm:$0xff]  ;;  %v14942_v6 = vld [vmem:[#allocation166_spill] sm:$0xff] }
 0x267   :  { %1589 = vrot.lane.b32.xlu0 %v1062_v17, %s8018_s15  ;;  %v14936_v17 = vld [vmem:[#allocation142_spill] sm:$0xff]  ;;  %v1222_v11 = vmul.f32 %v14939_v8, %v14938_v32  ;;  %v1772_v33 = vsel %vm1768_vm6, %v1755_v47, %v14940_v2 }
 0x268   :  { %v9637_v27 = vpop.permute.xlu1 %1313  ;;  %v627_v31 = vmul.f32 %v14936_v17, %v14913_v57  ;;  %v14944_v47 = vld [vmem:[#allocation170_spill] sm:$0xff] }
 0x269   :  { %1515 = vrot.lane.b32.xlu1 %v977_v25, %s8017_s14  ;;  %v14937_v25 = vld [vmem:[#allocation164_spill] sm:$0xff] }
 0x26a   :  { %v9648_v19 = vpop.permute.xlu0 %1383  ;;  %v1754_v29 = vsel %vm87_vm0, %v1738_v5, %v14937_v25  ;;  %v1789_v25 = vsel %vm1785_vm7, %v1772_v33, %v14944_v47 }
 0x26b   :  { %1653 = vrot.lane.b32.xlu0 %v1142_v3, %s8020_s19  ;;  %v1771_v9 = vsel %vm1768_vm6, %v1754_v29, %v14942_v6  ;;  %v1806_v32 = vsel %vm1802_vm8, %v1789_v25, %v1502_v37  ;;  %v14945_v29 = vld [vmem:[#allocation18_spill] sm:$0xff]  ;;  %v14946_v37 = vld [vmem:[#allocation128_spill] sm:$0xff] }
 0x26c   :  { %v1566_v59 = vpop.permute.xlu1 %1565  ;;  %v1788_v5 = vsel %vm1785_vm7, %v1771_v9, %v9570_v43  ;;  %v740_v2 = vmul.f32 %v14945_v29, %v9053_v35  ;;  %v1058_v33 = vmul.f32 %v14946_v37, %v9040_v1  ;;  %v14947_v9 = vld [vmem:[#allocation176_spill] sm:$0xff] }
 0x26d   :  { %1265 = vrot.lane.b32.xlu1 %v627_v31, %s8014_s27  ;;  %v1805_v31 = vsel %vm1802_vm8, %v1788_v5, %v1500_v4  ;;  %v14960_v37 = vld [vmem:[#allocation172_spill] sm:$0xff] }
 0x26e   :  { %v9662_v50 = vpop.permute.xlu0 %1635  ;;  %v1822_v43 = vsel %vm1819_vm9, %v1805_v31, %v9434_v39  ;;  %v14948_v39 = vld [vmem:[#allocation180_spill] sm:$0xff] }
 0x26f   :  { %1717 = vrot.lane.b32.xlu0 %v1222_v11, %s8021_s22  ;;  %v1823_v11 = vsel %vm1819_vm9, %v1806_v32, %v1566_v59  ;;  %v1839_v5 = vsel %vm1836_vm10, %v1822_v43, %v14947_v9 }
 0x270   :  { %v9669_v3 = vpop.permute.xlu1 %506 }
 0x271   :  { %14943 = vst [vmem:[#allocation164_spill] sm:$0xff] %v9669_v3  ;;  %1517 = vrot.lane.b32.xlu1 %v978_v44, %s8017_s14  ;;  %v1840_v44 = vsel %vm1836_vm10, %v1823_v11, %v9474_v30  ;;  %v14950_v30 = vld [vmem:[#allocation147_spill] sm:$0xff]  ;;  %v14951_v11 = vld [vmem:[#allocation148_spill] sm:$0xff] }
 0x272   :  { %v9678_v56 = vpop.permute.xlu0 %1385  ;;  %v1857_v31 = vsel %vm1853_vm11, %v1840_v44, %v14948_v39  ;;  %v820_v32 = vmul.f32 %v14950_v30, %v9067_v15  ;;  %v1138_v43 = vmul.f32 %v14951_v11, %v14913_v57  ;;  %v14952_v44 = vld [vmem:[#allocation44_spill] sm:$0xff]  ;;  %v14953_v39 = vld [vmem:[#allocation154_spill] sm:$0xff] }
 0x273   :  { %v14954_v57 = vld [vmem:[#allocation156_spill] sm:$0xff] }
 0x274   :  { %v1440_v6 = vpop.permute.xlu1 %1439  ;;  %v629_v8 = vmul.f32 %v14954_v57, %v14928_v60 }
 0x275   :  { %1329 = vrot.lane.b32.xlu1 %v740_v2, %s8015_s28 }
 0x276   :  { %v9688_v4 = vpop.permute.xlu0 %1637 }
 0x278   :  { %v1692_v47 = vpop.permute.xlu1 %1691 }
 0x279   :  { %v1856_v59 = vsel %vm1853_vm11, %v1839_v5, %v1692_v47  ;;  %1581 = vrot.lane.b32.xlu1 %v1058_v33, %s8018_s15  ;;  %v628_v5 = vmul.f32 %v8959_v38, %v14952_v44  ;;  %v14957_v38 = vld [vmem:[#allocation104_spill] sm:$0xff]  ;;  %v14958_v44 = vld [vmem:[#allocation159_spill] sm:$0xff] }
 0x27a   :  { %6958 = vmatprep.mubr.msk.f32.mxu1 %vm1886_vm12, %v1856_v59  ;;  %v9699_v25 = vpop.permute.xlu0 %531  ;;  %v539_v29 = vmul.f32 %v14958_v44, %v14957_v38  ;;  %v14961_v44 = vld [vmem:[#allocation177_spill] sm:$0xff] }
 0x27b   :  { %14949 = vst [vmem:[#allocation95_spill] sm:$0xff] %v9699_v25  ;;  %6959 = vmatmul.mubr.msk.f32.gmra.mrb[18].mxu1 %vm1886_vm12, %v1857_v31  ;;  %v979_v31 = vmul.f32 %v14953_v39, %v9053_v35  ;;  %v14959_v39 = vld [vmem:[#allocation84_spill] sm:$0xff] }
 0x27c   :  { %v9704_v2 = vpop.permute.xlu1 %1251  ;;  %v980_v57 = vmul.f32 %v14959_v39, %v9063_v7 }
 0x27d   :  { %1393 = vrot.lane.b32.xlu1 %v820_v32, %s8019_s18 }
 0x27e   :  { %v9709_v9 = vpop.permute.xlu0 %1449 }
 0x280   :  { %v1504_v33 = vpop.permute.xlu1 %1503 }
 0x281   :  { %1645 = vrot.lane.b32.xlu1 %v1138_v43, %s8020_s19  ;;  %v14956_v43 = vld [vmem:[#allocation174_spill] sm:$0xff] }
 0x282   :  { %v9717_v59 = vpop.permute.xlu0 %1701  ;;  %v538_v36 = vmul.f32 %v14956_v43, %v14955_v26 }
 0x284   :  { %v9714_v47 = vpop.permute.xlu1 %1253  ;;  %v1740_v35 = vsel %vm1735_vm5, %v538_v36, %v9599_v63  ;;  %v14962_v36 = vld [vmem:[#allocation160_spill] sm:$0xff] }
 0x285   :  { %1267 = vrot.lane.b32.xlu1 %v628_v5, %s8014_s27  ;;  %v1756_v38 = vsel %vm87_vm0, %v1740_v35, %v14960_v37  ;;  %v742_v63 = vmul.f32 %v14962_v36, %v9078_v52 }
 0x286   :  { %v9730_v5 = vpop.permute.xlu0 %1323 }
 0x288   :  { %v1506_v32 = vpop.permute.xlu1 %1505 }
 0x289   :  { %1519 = vrot.lane.b32.xlu1 %v979_v31, %s8017_s14  ;;  %v1741_v31 = vsel %vm1735_vm5, %v539_v29, %v9617_v41  ;;  %v14963_v41 = vld [vmem:[#allocation132_spill] sm:$0xff] }
 0x28a   :  { %v1757_v26 = vsel %vm87_vm0, %v1741_v31, %v9637_v27  ;;  %v9746_v0 = vpop.permute.xlu0 %1575  ;;  %v1773_v7 = vsel %vm1768_vm6, %v1756_v38, %v14963_v41  ;;  %v14966_v31 = vld [vmem:[#allocation113_spill] sm:$0xff] }
 0x28b   :  { %v1790_v27 = vsel %vm1785_vm7, %v1773_v7, %v1440_v6 }
 0x28c   :  { %v9726_v30 = vpop.permute.xlu1 %1317  ;;  %v1807_v37 = vsel %vm1802_vm8, %v1790_v27, %v1504_v33  ;;  %v14967_v33 = vld [vmem:[#allocation73_spill] sm:$0xff] }
 0x28d   :  { %1269 = vrot.lane.b32.xlu1 %v629_v8, %s8014_s27  ;;  %v1774_v8 = vsel %vm1768_vm6, %v1757_v26, %v14961_v44  ;;  %v1060_v26 = vmul.f32 %v14966_v31, %v9073_v54  ;;  %v1824_v38 = vsel %vm1819_vm9, %v1807_v37, %v9518_v40  ;;  %v14970_v37 = vld [vmem:[#allocation127_spill] sm:$0xff] }
 0x28e   :  { %v9765_v41 = vpop.permute.xlu0 %1387 }
 0x290   :  { %v1570_v43 = vpop.permute.xlu1 %1569 }
 0x291   :  { %1521 = vrot.lane.b32.xlu1 %v980_v57, %s8017_s14  ;;  %v14965_v57 = vld [vmem:[#allocation179_spill] sm:$0xff] }
 0x292   :  { %v1791_v35 = vsel %vm1785_vm7, %v1774_v8, %v14965_v57  ;;  %v822_v8 = vmul.f32 %v14967_v33, %v9057_v53  ;;  %v9779_v7 = vpop.permute.xlu0 %1639 }
 0x293   :  { %v1808_v44 = vsel %vm1802_vm8, %v1791_v35, %v1506_v32  ;;  %v1841_v32 = vsel %vm1836_vm10, %v1824_v38, %v9543_v45  ;;  %v14969_v45 = vld [vmem:[#allocation163_spill] sm:$0xff] }
 0x294   :  { %v9752_v29 = vpop.permute.xlu1 %516  ;;  %v1825_v36 = vsel %vm1819_vm9, %v1808_v44, %v1570_v43  ;;  %v902_v57 = vmul.f32 %v14970_v37, %v14969_v45 }
 0x295   :  { %14964 = vst [vmem:[#allocation126_spill] sm:$0xff] %v9752_v29  ;;  %1333 = vrot.lane.b32.xlu1 %v742_v63, %s8015_s28  ;;  %v1842_v6 = vsel %vm1836_vm10, %v1825_v36, %v9579_v22  ;;  %v14968_v22 = vld [vmem:[#allocation151_spill] sm:$0xff] }
 0x296   :  { %v1859_v40 = vsel %vm1853_vm11, %v1842_v6, %v9612_v51  ;;  %v1140_v36 = vmul.f32 %v14968_v22, %v14928_v60  ;;  %v9787_v44 = vpop.permute.xlu0 %1451  ;;  %v14971_v51 = vld [vmem:[#allocation165_spill] sm:$0xff] }
 0x297   :  { %v14975_v60 = vld [vmem:[#allocation117_spill] sm:$0xff] }
 0x298   :  { %v1444_v39 = vpop.permute.xlu1 %1443 }
 0x299   :  { %1585 = vrot.lane.b32.xlu1 %v1060_v26, %s8018_s15  ;;  %v1220_v26 = vmul.f32 %v14971_v51, %v9078_v52  ;;  %v14973_v52 = vld [vmem:[#allocation168_spill] sm:$0xff] }
 0x29a   :  { %v1704_v6 = vpop.permute.xlu0 %1703 }
 0x29c   :  { %v1696_v63 = vpop.permute.xlu1 %1695 }
 0x29d   :  { %v1858_v43 = vsel %vm1853_vm11, %v1841_v32, %v1696_v63  ;;  %1397 = vrot.lane.b32.xlu1 %v822_v8, %s8019_s18  ;;  %v14972_v8 = vld [vmem:[#allocation135_spill] sm:$0xff] }
 0x29e   :  { %6961 = vmatprep.mubr.msk.f32.mxu1 %vm1886_vm12, %v1858_v43  ;;  %v1061_v32 = vmul.f32 %v14972_v8, %v9057_v53  ;;  %v2096_v43 = vld [vmem:[%s14192_s5] sm:$0xff] }
 0x29f   :  { %6962 = vmatmul.mubr.msk.f32.gmra.mrb[20].mxu1 %vm1886_vm12, %v1859_v40  ;;  %v2097_v40 = vld [vmem:[%s14192_s5 + $0x8] sm:$0xff]  ;;  %v14976_v53 = vld [vmem:[#allocation111_spill] sm:$0xff] }
 0x2a0   :  { %v1256_v27 = vpop.permute.xlu1 %1255  ;;  %v14977_v8 = vld [vmem:[#allocation175_spill] sm:$0xff] }
 0x2a1   :  { %1649 = vrot.lane.b32.xlu1 %v1140_v36, %s8020_s19  ;;  %v1141_v36 = vmul.f32 %v14970_v37, %v14973_v52  ;;  %v541_v31 = vmul.f32 %v14977_v8, %v14976_v53  ;;  %v14979_v53 = vld [vmem:[#allocation181_spill] sm:$0xff] }
 0x2a3   :  { %v1743_v37 = vsel %vm1735_vm5, %v541_v31, %v9714_v47 }
 0x2a4   :  { %v1508_v35 = vpop.permute.xlu1 %1507 }
 0x2a5   :  { %1461 = vrot.lane.b32.xlu1 %v902_v57, %s8016_s12  ;;  %v7181_v57 = vpack.c.bf16 %v2097_v40, %v2096_v43  ;;  %v14978_v43 = vld [vmem:[#allocation169_spill] sm:$0xff] }
 0x2a6   :  { %v1221_v40 = vmul.f32 %v14978_v43, %v9009_v34 }
 0x2a7   :  { %7182 = vmatprep.subr.bf16.mxu0 %v7181_v57 }
 0x2a8   :  { %v9792_v38 = vpop.permute.xlu1 %1257  ;;  %7184 = vmatpush3.bf16.msra.mxu0 %v7181_v57 }
 0x2a9   :  { %1713 = vrot.lane.b32.xlu1 %v1220_v26, %s8021_s22  ;;  %v14974_v26 = vld [vmem:[#allocation106_spill] sm:$0xff] }
 0x2aa   :  { %v540_v51 = vmul.f32 %v14975_v60, %v14974_v26  ;;  %v1759_v26 = vsel %vm87_vm0, %v1743_v37, %v9726_v30 }
 0x2ac   :  { %v1510_v63 = vpop.permute.xlu1 %1509  ;;  %v1742_v22 = vsel %vm1735_vm5, %v540_v51, %v9704_v2 }
 0x2ad   :  { %1587 = vrot.lane.b32.xlu1 %v1061_v32, %s8018_s15  ;;  %v9810_v32 = vpop.permute.xlu0 %1453  ;;  %v1758_v8 = vsel %vm87_vm0, %v1742_v22, %v14979_v53 }
 0x2ae   :  { %v1775_v51 = vsel %vm1768_vm6, %v1758_v8, %v9531_v48  ;;  %v14981_v48 = vld [vmem:[#allocation112_spill] sm:$0xff] }
 0x2af   :  { %v1792_v34 = vsel %vm1785_vm7, %v1775_v51, %v1444_v39  ;;  %v542_v8 = vmul.f32 %v9552_v14, %v14981_v48  ;;  %v15093_v14 = vld [vmem:[#allocation18_spill] sm:$0xff] }
 0x2b0   :  { %v1322_v33 = vpop.permute.xlu1 %1321  ;;  %v1809_v31 = vsel %vm1802_vm8, %v1792_v34, %v1508_v35 }
 0x2b1   :  { %1651 = vrot.lane.b32.xlu1 %v1141_v36, %s8020_s19  ;;  %v1776_v36 = vsel %vm1768_vm6, %v1759_v26, %v9564_v18  ;;  %v1706_v2 = vpop.permute.xlu0 %1705  ;;  %v1826_v18 = vsel %vm1819_vm9, %v1809_v31, %v9632_v42 }
 0x2b2   :  { %v1793_v30 = vsel %vm1785_vm7, %v1776_v36, %v9604_v46  ;;  %v1843_v35 = vsel %vm1836_vm10, %v1826_v18, %v9662_v50  ;;  %v14983_v18 = vld [vmem:[#allocation129_spill] sm:$0xff] }
 0x2b3   :  { %v1810_v22 = vsel %vm1802_vm8, %v1793_v30, %v1510_v63  ;;  %v1744_v63 = vsel %vm1735_vm5, %v542_v8, %v1256_v27 }
 0x2b4   :  { %v1574_v60 = vpop.permute.xlu1 %1573  ;;  %v1760_v53 = vsel %vm87_vm0, %v1744_v63, %v9622_v23  ;;  %v14984_v63 = vld [vmem:[#allocation121_spill] sm:$0xff] }
 0x2b5   :  { %1715 = vrot.lane.b32.xlu1 %v1221_v40, %s8021_s22  ;;  %v1827_v37 = vsel %vm1819_vm9, %v1810_v22, %v1574_v60  ;;  %v9836_v40 = vpop.permute.xlu0 %1327  ;;  %v1777_v50 = vsel %vm1768_vm6, %v1760_v53, %v9648_v19 }
 0x2b6   :  { %v1844_v39 = vsel %vm1836_vm10, %v1827_v37, %v9688_v4 }
 0x2b7   :  { %v1861_v26 = vsel %vm1853_vm11, %v1844_v39, %v9717_v59 }
 0x2b8   :  { %v9828_v47 = vpop.permute.xlu1 %526 }
 0x2b9   :  { %14980 = vst [vmem:[#allocation166_spill] sm:$0xff] %v9828_v47  ;;  %v1580_v42 = vpop.permute.xlu0 %1579 }
 0x2bc   :  { %v1448_v57 = vpop.permute.xlu1 %1447 }
 0x2bd   :  { %v1794_v36 = vsel %vm1785_vm7, %v1777_v50, %v1448_v57  ;;  %v9857_v51 = vpop.permute.xlu0 %1391  ;;  %v14982_v57 = vld [vmem:[#allocation120_spill] sm:$0xff] }
 0x2be   :  { %v543_v48 = vmul.f32 %v14983_v18, %v14982_v57 }
 0x2c0   :  { %v1700_v46 = vpop.permute.xlu1 %1699  ;;  %v1745_v39 = vsel %vm1735_vm5, %v543_v48, %v9792_v38 }
 0x2c1   :  { %v1860_v60 = vsel %vm1853_vm11, %v1843_v35, %v1700_v46  ;;  %v1644_v22 = vpop.permute.xlu0 %1643 }
 0x2c2   :  { %6964 = vmatprep.mubr.msk.f32.mxu1 %vm1886_vm12, %v1860_v60  ;;  %v544_v60 = vmul.f32 %v9669_v3, %v14984_v63 }
 0x2c3   :  { %6965 = vmatmul.mubr.msk.f32.gmra.mrb[22].mxu1 %vm1886_vm12, %v1861_v26 }
 0x2c4   :  { %v1260_v4 = vpop.permute.xlu1 %1259 }
 0x2c5   :  { %v1456_v8 = vpop.permute.xlu0 %1455  ;;  %v1746_v53 = vsel %vm1735_vm5, %v544_v60, %v1260_v4 }
 0x2c8   :  { %v1512_v27 = vpop.permute.xlu1 %1511 }
 0x2c9   :  { %v1811_v34 = vsel %vm1802_vm8, %v1794_v36, %v1512_v27  ;;  %v1708_v46 = vpop.permute.xlu0 %1707 }
 0x2ca   :  { %v1828_v59 = vsel %vm1819_vm9, %v1811_v34, %v9746_v0  ;;  %v1761_v0 = vsel %vm87_vm0, %v1745_v39, %v1322_v33 }
 0x2cb   :  { %v1845_v31 = vsel %vm1836_vm10, %v1828_v59, %v9779_v7  ;;  %v1778_v7 = vsel %vm1768_vm6, %v1761_v0, %v9678_v56  ;;  %v1762_v56 = vsel %vm87_vm0, %v1746_v53, %v9730_v5 }
 0x2cc   :  { %v1262_v30 = vpop.permute.xlu1 %1261  ;;  %v1862_v23 = vsel %vm1853_vm11, %v1845_v31, %v1704_v6  ;;  %v1795_v26 = vsel %vm1785_vm7, %v1778_v7, %v9709_v9  ;;  %v1779_v9 = vsel %vm1768_vm6, %v1762_v56, %v9765_v41  ;;  %v14985_v7 = vld [vmem:[#allocation178_spill] sm:$0xff] }
 0x2cd   :  { %6967 = vmatprep.mubr.msk.f32.mxu1 %vm1886_vm12, %v1862_v23  ;;  %v9880_v33 = vpop.permute.xlu0 %1457  ;;  %v1796_v31 = vsel %vm1785_vm7, %v1779_v9, %v9787_v44  ;;  %v545_v63 = vmul.f32 %v14985_v7, %v14883_v55 }
 0x2d0   :  { %v1514_v19 = vpop.permute.xlu1 %1513 }
 0x2d1   :  { %v1812_v50 = vsel %vm1802_vm8, %v1795_v26, %v1514_v19  ;;  %v1710_v4 = vpop.permute.xlu0 %1709  ;;  %v1747_v26 = vsel %vm1735_vm5, %v545_v63, %v1262_v30 }
 0x2d4   :  { %v1326_v37 = vpop.permute.xlu1 %1325 }
 0x2d5   :  { %v1332_v39 = vpop.permute.xlu0 %1331 }
 0x2d8   :  { %v1578_v35 = vpop.permute.xlu1 %1577 }
 0x2d9   :  { %v1829_v38 = vsel %vm1819_vm9, %v1812_v50, %v1578_v35  ;;  %v1584_v35 = vpop.permute.xlu0 %1583 }
 0x2dc   :  { %v1390_v6 = vpop.permute.xlu1 %1389 }
 0x2dd   :  { %v1396_v60 = vpop.permute.xlu0 %1395 }
 0x2e0   :  { %v1642_v36 = vpop.permute.xlu1 %1641 }
 0x2e1   :  { %v1846_v27 = vsel %vm1836_vm10, %v1829_v38, %v1642_v36  ;;  %v1648_v38 = vpop.permute.xlu0 %1647 }
 0x2e2   :  { %v1863_v34 = vsel %vm1853_vm11, %v1846_v27, %v1706_v2 }
 0x2e3   :  { %6968 = vmatmul.mubr.msk.f32.gmra.mrb[24].mxu1 %vm1886_vm12, %v1863_v34 }
 0x2e4   :  { %v1264_v59 = vpop.permute.xlu1 %1263 }
 0x2e5   :  { %v1460_v34 = vpop.permute.xlu0 %1459 }
 0x2e8   :  { %v1516_v23 = vpop.permute.xlu1 %1515 }
 0x2e9   :  { %v1813_v19 = vsel %vm1802_vm8, %v1796_v31, %v1516_v23 }
 0x2ea   :  { %v1830_v57 = vsel %vm1819_vm9, %v1813_v19, %v1580_v42  ;;  %v1763_v42 = vsel %vm87_vm0, %v1747_v26, %v1326_v37  ;;  %v1712_v19 = vpop.permute.xlu0 %1711 }
 0x2eb   :  { %v1847_v48 = vsel %vm1836_vm10, %v1830_v57, %v1644_v22  ;;  %v1780_v22 = vsel %vm1768_vm6, %v1763_v42, %v1390_v6 }
 0x2ec   :  { %v1266_v5 = vpop.permute.xlu1 %1265  ;;  %v1864_v2 = vsel %vm1853_vm11, %v1847_v48, %v1708_v46  ;;  %v546_v46 = vmul.f32 %v9752_v29, %v9034_v28  ;;  %v1797_v50 = vsel %vm1785_vm7, %v1780_v22, %v9810_v32 }
 0x2ed   :  { %6970 = vmatprep.mubr.msk.f32.mxu1 %vm1886_vm12, %v1864_v2 }
 0x2ee   :  { %v1748_v36 = vsel %vm1735_vm5, %v546_v46, %v1264_v59  ;;  %v548_v46 = vmul.f32 %v9828_v47, %v9067_v15 }
 0x2ef   :  { %v1764_v37 = vsel %vm87_vm0, %v1748_v36, %v9836_v40 }
 0x2f0   :  { %v1518_v0 = vpop.permute.xlu1 %1517  ;;  %v1781_v32 = vsel %vm1768_vm6, %v1764_v37, %v9857_v51  ;;  %v1524_v51 = vpop.permute.xlu0 %1523 }
 0x2f1   :  { %v1814_v55 = vsel %vm1802_vm8, %v1797_v50, %v1518_v0  ;;  %v1798_v59 = vsel %vm1785_vm7, %v1781_v32, %v1456_v8  ;;  %v547_v8 = vmul.f32 %v9593_v61, %v9040_v1 }
 0x2f4   :  { %v1330_v41 = vpop.permute.xlu1 %1329  ;;  %v1526_v22 = vpop.permute.xlu0 %1525 }
 0x2f8   :  { %v1582_v44 = vpop.permute.xlu1 %1581 }
 0x2f9   :  { %v1831_v27 = vsel %vm1819_vm9, %v1814_v55, %v1582_v44  ;;  %v1749_v44 = vsel %vm1735_vm5, %v547_v8, %v1266_v5 }
 0x2fc   :  { %v1394_v53 = vpop.permute.xlu1 %1393 }
 0x300   :  { %v1646_v56 = vpop.permute.xlu1 %1645 }
 0x301   :  { %v1848_v30 = vsel %vm1836_vm10, %v1831_v27, %v1646_v56  ;;  %v1590_v56 = vpop.permute.xlu0 %1589 }
 0x302   :  { %v1865_v6 = vsel %vm1853_vm11, %v1848_v30, %v1710_v4 }
 0x303   :  { %6971 = vmatmul.mubr.msk.f32.gmra.mrb[26].mxu1 %vm1886_vm12, %v1865_v6 }
 0x304   :  { %v1268_v28 = vpop.permute.xlu1 %1267 }
 0x305   :  { %v1750_v1 = vsel %vm1735_vm5, %v548_v46, %v1268_v28 }
 0x308   :  { %v1520_v9 = vpop.permute.xlu1 %1519 }
 0x309   :  { %v1815_v31 = vsel %vm1802_vm8, %v1798_v59, %v1520_v9 }
 0x30a   :  { %v1832_v23 = vsel %vm1819_vm9, %v1815_v31, %v1584_v35  ;;  %v1765_v35 = vsel %vm87_vm0, %v1749_v44, %v1330_v41 }
 0x30b   :  { %v1849_v57 = vsel %vm1836_vm10, %v1832_v23, %v1648_v38  ;;  %v1782_v42 = vsel %vm1768_vm6, %v1765_v35, %v1394_v53  ;;  %v549_v38 = vmul.f32 %v9699_v25, %v9073_v54  ;;  %v9941_v54 = vld [vmem:[%s14191_s4] ss:$0 sm:$0xff]  ;;  %v15064_v25 = vld [vmem:[#allocation66_spill] sm:$0xff] }
 0x30c   :  { %v1270_v40 = vpop.permute.xlu1 %1269  ;;  %v1866_v4 = vsel %vm1853_vm11, %v1849_v57, %v1712_v19  ;;  %v1799_v36 = vsel %vm1785_vm7, %v1782_v42, %v9880_v33  ;;  %v1766_v33 = vsel %vm87_vm0, %v1750_v1, %v1332_v39  ;;  %v1654_v57 = vpop.permute.xlu0 %1653 }
 0x30d   :  { %6973 = vmatprep.mubr.msk.f32.mxu1 %vm1886_vm12, %v1866_v4  ;;  %v1751_v55 = vsel %vm1735_vm5, %v549_v38, %v1270_v40  ;;  %v1783_v9 = vsel %vm1768_vm6, %v1766_v33, %v1396_v60 }
 0x30e   :  { %v1800_v4 = vsel %vm1785_vm7, %v1783_v9, %v1460_v34 }
 0x310   :  { %v1522_v48 = vpop.permute.xlu1 %1521 }
 0x311   :  { %v1816_v5 = vsel %vm1802_vm8, %v1799_v36, %v1522_v48 }
 0x314   :  { %v1334_v2 = vpop.permute.xlu1 %1333 }
 0x315   :  { %v1767_v53 = vsel %vm87_vm0, %v1751_v55, %v1334_v2 }
 0x318   :  { %v1586_v0 = vpop.permute.xlu1 %1585 }
 0x319   :  { %v1833_v41 = vsel %vm1819_vm9, %v1816_v5, %v1586_v0  ;;  %v1817_v0 = vsel %vm1802_vm8, %v1800_v4, %v1524_v51 }
 0x31c   :  { %v1398_v63 = vpop.permute.xlu1 %1397 }
 0x31d   :  { %v1784_v30 = vsel %vm1768_vm6, %v1767_v53, %v1398_v63 }
 0x320   :  { %v1650_v26 = vpop.permute.xlu1 %1649 }
 0x321   :  { %v1850_v27 = vsel %vm1836_vm10, %v1833_v41, %v1650_v26  ;;  %v1718_v26 = vpop.permute.xlu0 %1717 }
 0x324   :  { %v1462_v50 = vpop.permute.xlu1 %1461 }
 0x325   :  { %v1801_v6 = vsel %vm1785_vm7, %v1784_v30, %v1462_v50 }
 0x326   :  { %v1818_v19 = vsel %vm1802_vm8, %v1801_v6, %v1526_v22 }
 0x327   :  { %v1835_v48 = vsel %vm1819_vm9, %v1818_v19, %v1590_v56 }
 0x328   :  { %v1714_v15 = vpop.permute.xlu1 %1713  ;;  %v1852_v63 = vsel %vm1836_vm10, %v1835_v48, %v1654_v57 }
 0x329   :  { %v1867_v37 = vsel %vm1853_vm11, %v1850_v27, %v1714_v15  ;;  %v1869_v34 = vsel %vm1853_vm11, %v1852_v63, %v1718_v26 }
 0x32a   :  { %v6957_v28 = vpop.f32.mrb[16].mxu1  ;;  %6974 = vmatmul.mubr.msk.f32.gmra.mrb[28].mxu1 %vm1886_vm12, %v1867_v37 }
 0x32b   :  { %v2007_v32 = vadd.f32 %v6957_v28, %v9941_v54  ;;  %v2001_v59 = vpop.f32.mrb[17].mxu1 }
 0x32c   :  { %v2002_v31 = vadd.f32 %v9941_v54, %v2001_v59  ;;  %v1588_v23 = vpop.permute.xlu1 %1587 }
 0x32d   :  { %v2081_v40 = vmax.f32 %v2007_v32, 0.0  ;;  %v1834_v60 = vsel %vm1819_vm9, %v1817_v0, %v1588_v23 }
 0x32e   :  { %v2080_v39 = vmax.f32 %v2002_v31, 0.0 }
 0x330   :  { %6983 = vmatprep.mubr.msk.f32.mxu0 %vm87_vm0, %v2080_v39  ;;  %v1652_v2 = vpop.permute.xlu1 %1651 }
 0x331   :  { %6984 = vmatmul.mubr.msk.f32.vlgmr.msra.gmra.mrb[0].mxu0 %vm87_vm0, %v2081_v40  ;;  %v1851_v8 = vsel %vm1836_vm10, %v1834_v60, %v1652_v2 }
 0x334   :  { %v1716_v44 = vpop.permute.xlu1 %1715 }
 0x335   :  { %v1868_v35 = vsel %vm1853_vm11, %v1851_v8, %v1716_v44  ;;  %v9989_v44 = vld [vmem:[%s14193_s6] ss:$0 sm:$0xff] }
 0x336   :  { %6976 = vmatprep.mubr.msk.f32.mxu1 %vm1886_vm12, %v1868_v35 }
 0x337   :  { %6977 = vmatmul.mubr.msk.f32.gmra.mrb[30].mxu1 %vm1886_vm12, %v1869_v34 }
 0x34e   :  { %v6960_v42 = vpop.f32.mrb[18].mxu1 }
 0x34f   :  { %v2017_v22 = vadd.f32 %v6960_v42, %v9941_v54  ;;  %v2011_v51 = vpop.f32.mrb[19].mxu1 }
 0x350   :  { %v2012_v46 = vadd.f32 %v9941_v54, %v2011_v51 }
 0x351   :  { %v2083_v38 = vmax.f32 %v2017_v22, 0.0 }
 0x352   :  { %v2082_v50 = vmax.f32 %v2012_v46, 0.0  ;;  %v14987_v46 = vld [vmem:[#allocation15_spill] sm:$0xff] }
 0x354   :  { %6986 = vmatprep.mubr.msk.f32.mxu0 %vm87_vm0, %v2082_v50 }
 0x355   :  { %6987 = vmatmul.mubr.msk.f32.gmra.mrb[2].mxu0 %vm87_vm0, %v2083_v38 }
 0x372   :  { %v6963_v36 = vpop.f32.mrb[20].mxu1 }
 0x373   :  { %v2027_v1 = vadd.f32 %v6963_v36, %v9941_v54  ;;  %v2021_v5 = vpop.f32.mrb[21].mxu1  ;;  %v14988_v36 = vld [vmem:[#allocation14_spill] sm:$0xff] }
 0x374   :  { %v2022_v55 = vadd.f32 %v9941_v54, %v2021_v5 }
 0x375   :  { %v2085_v53 = vmax.f32 %v2027_v1, 0.0 }
 0x376   :  { %v2084_v41 = vmax.f32 %v2022_v55, 0.0 }
 0x378   :  { %6989 = vmatprep.mubr.msk.f32.mxu0 %vm87_vm0, %v2084_v41 }
 0x379   :  { %6990 = vmatmul.mubr.msk.f32.gmra.mrb[4].mxu0 %vm87_vm0, %v2085_v53 }
 0x396   :  { %v6966_v27 = vpop.f32.mrb[22].mxu1 }
 0x397   :  { %v2037_v15 = vadd.f32 %v6966_v27, %v9941_v54  ;;  %v2031_v56 = vpop.f32.mrb[23].mxu1 }
 0x398   :  { %v2032_v33 = vadd.f32 %v9941_v54, %v2031_v56 }
 0x399   :  { %v2087_v37 = vmax.f32 %v2037_v15, 0.0 }
 0x39a   :  { %v2086_v30 = vmax.f32 %v2032_v33, 0.0 }
 0x39c   :  { %6992 = vmatprep.mubr.msk.f32.mxu0 %vm87_vm0, %v2086_v30 }
 0x39d   :  { %6993 = vmatmul.mubr.msk.f32.gmra.mrb[6].mxu0 %vm87_vm0, %v2087_v37 }
 0x3b6   :  { %v6969_v6 = vpop.f32.mrb[24].mxu1 }
 0x3b7   :  { %v2047_v28 = vadd.f32 %v6969_v6, %v9941_v54  ;;  %v2041_v32 = vpop.f32.mrb[25].mxu1 }
 0x3b8   :  { %v2042_v59 = vadd.f32 %v9941_v54, %v2041_v32 }
 0x3b9   :  { %v2089_v31 = vmax.f32 %v2047_v28, 0.0 }
 0x3ba   :  { %v2088_v9 = vmax.f32 %v2042_v59, 0.0 }
 0x3bc   :  { %6995 = vmatprep.mubr.msk.f32.mxu0 %vm87_vm0, %v2088_v9 }
 0x3bd   :  { %6996 = vmatmul.mubr.msk.f32.gmra.mrb[8].mxu0 %vm87_vm0, %v2089_v31  ;;  %v15128_v31 = vmov 0 }
 0x3be   :  { %v15129_v31 = vsel %vm10631_vm15, 4294967295, %v15128_v31 }
 0x3bf   :  { %15130 = vst [vmem:[#allocation201_spill] sm:$0xff] %v15129_v31 }
 0x3d6   :  { %v6972_v23 = vpop.f32.mrb[26].mxu1 }
 0x3d7   :  { %v2057_v19 = vadd.f32 %v6972_v23, %v9941_v54  ;;  %v2051_v39 = vpop.f32.mrb[27].mxu1 }
 0x3d8   :  { %v2052_v57 = vadd.f32 %v9941_v54, %v2051_v39 }
 0x3d9   :  { %v2091_v4 = vmax.f32 %v2057_v19, 0.0 }
 0x3da   :  { %v2090_v40 = vmax.f32 %v2052_v57, 0.0  ;;  %v14992_v57 = vld [vmem:[#allocation26_spill] sm:$0xff] }
 0x3dc   :  { %6998 = vmatprep.mubr.msk.f32.mxu0 %vm87_vm0, %v2090_v40 }
 0x3dd   :  { %6999 = vmatmul.mubr.msk.f32.gmra.mrb[10].mxu0 %vm87_vm0, %v2091_v4  ;;  %v14993_v4 = vld [vmem:[#allocation33_spill] sm:$0xff] }
 0x3fd   :  { %v6975_v48 = vpop.f32.mrb[28].mxu1 }
 0x3fe   :  { %v2067_v2 = vadd.f32 %v6975_v48, %v9941_v54  ;;  %v2061_v0 = vpop.f32.mrb[29].mxu1 }
 0x3ff   :  { %v2062_v60 = vadd.f32 %v9941_v54, %v2061_v0 }
 0x400   :  { %v2093_v8 = vmax.f32 %v2067_v2, 0.0  ;;  %v14994_v2 = vld [vmem:[#allocation20_spill] sm:$0xff] }
 0x401   :  { %v2092_v63 = vmax.f32 %v2062_v60, 0.0 }
 0x403   :  { %7001 = vmatprep.mubr.msk.f32.mxu0 %vm87_vm0, %v2092_v63 }
 0x404   :  { %v6985_v26 = vpop.f32.mrb[0].mxu0  ;;  %7002 = vmatmul.mubr.msk.f32.gmra.mrb[12].mxu0 %vm87_vm0, %v2093_v8  ;;  %v14995_v8 = vld [vmem:[#allocation137_spill] sm:$0xff] }
 0x405   :  { %v2225_v35 = vadd.f32 %v6985_v26, %v9989_v44  ;;  %v2219_v34 = vpop.f32.mrb[1].mxu0 }
 0x406   :  { %v2220_v42 = vadd.f32 %v9989_v44, %v2219_v34 }
 0x407   :  { %v2299_v22 = vmax.f32 %v2225_v35, 0.0  ;;  %v14996_v35 = vld [vmem:[#allocation35_spill] sm:$0xff] }
 0x408   :  { %v9995_v51 = vmax.f32 %v2220_v42, 0.0 }
 0x409   :  { %v2443_v50 = vmul.f32 %v2299_v22, %v14987_v46  ;;  %v2315_v56 = vrot.slane %v2299_v22, 7  ;;  %v2379_v33 = vrot.slane %v2299_v22, 1  ;;  %v2490_v40 = vmul.f32 %v2299_v22, %v14992_v57  ;;  %v15057_v57 = vld [vmem:[#allocation81_spill] sm:$0xff]  ;;  %v15063_v46 = vld [vmem:[#allocation64_spill] sm:$0xff] }
 0x40a   :  { %14986 = vst [vmem:[#allocation170_spill] sm:$0xff] %v9995_v51  ;;  %v6978_v38 = vpop.f32.mrb[30].mxu1  ;;  %v2442_v1 = vmul.f32 %v9995_v51, %v14988_v36  ;;  %v14465_v30 = vrot.slane %v9995_v51, 7  ;;  %v14466_v37 = vrot.slane %v9995_v51, 1  ;;  %v2364_v48 = vmul.f32 %v2299_v22, %v14993_v4  ;;  %v15060_v4 = vld [vmem:[#allocation80_spill] sm:$0xff] }
 0x40b   :  { %v2077_v5 = vadd.f32 %v6978_v38, %v9941_v54  ;;  %v2071_v55 = vpop.f32.mrb[31].mxu1 }
 0x40c   :  { %v2072_v41 = vadd.f32 %v9941_v54, %v2071_v55  ;;  %v7389_v53 = vpack.i.bf16 %v2443_v50, %v2442_v1  ;;  %v10015_v23 = vsel %vm437_vm4, %v14465_v30, %v2315_v56  ;;  %v10021_v19 = vsel %vm646_vm3, %v14466_v37, %v2379_v33  ;;  %v14997_v50 = vld [vmem:[#allocation28_spill] sm:$0xff]  ;;  %v14998_v1 = vld [vmem:[#allocation21_spill] sm:$0xff] }
 0x40d   :  { %v2095_v15 = vmax.f32 %v2077_v5, 0.0  ;;  %14990 = vst [vmem:[#allocation176_spill] sm:$0xff] %v10015_v23  ;;  %14991 = vst [vmem:[#allocation180_spill] sm:$0xff] %v10021_v19  ;;  %v2474_v5 = vmul.f32 %v10015_v23, %v14998_v1  ;;  %v14999_v55 = vld [vmem:[#allocation17_spill] sm:$0xff] }
 0x40e   :  { %v2094_v27 = vmax.f32 %v2072_v41, 0.0  ;;  %7390 = vrot.lane.b32.xlu0 %v7389_v53, %s8021_s22  ;;  %v2458_v41 = vmul.f32 %v10021_v19, %v14999_v55  ;;  %v15032_v55 = vld [vmem:[#allocation56_spill] sm:$0xff] }
 0x410   :  { %7004 = vmatprep.mubr.msk.f32.mxu0 %vm87_vm0, %v2094_v27 }
 0x411   :  { %7005 = vmatmul.mubr.msk.f32.gmra.mrb[14].mxu0 %vm87_vm0, %v2095_v15 }
 0x428   :  { %v6988_v6 = vpop.f32.mrb[2].mxu0 }
 0x429   :  { %v2235_v28 = vadd.f32 %v6988_v6, %v9989_v44  ;;  %v2229_v32 = vpop.f32.mrb[3].mxu0  ;;  %v15001_v6 = vld [vmem:[#allocation30_spill] sm:$0xff] }
 0x42a   :  { %v2230_v54 = vadd.f32 %v9989_v44, %v2229_v32 }
 0x42b   :  { %v10009_v59 = vmax.f32 %v2235_v28, 0.0 }
 0x42c   :  { %v2300_v9 = vmax.f32 %v2230_v54, 0.0  ;;  %v15002_v54 = vld [vmem:[#allocation25_spill] sm:$0xff] }
 0x42d   :  { %v2317_v39 = vrot.slane %v10009_v59, 7  ;;  %v2445_v0 = vmul.f32 %v10009_v59, %v14994_v2  ;;  %v2381_v42 = vrot.slane %v10009_v59, 1  ;;  %v15015_v2 = vld [vmem:[#allocation47_spill] sm:$0xff] }
 0x42e   :  { %v2316_v60 = vrot.slane %v2300_v9, 7  ;;  %v2380_v63 = vrot.slane %v2300_v9, 1  ;;  %v2491_v26 = vmul.f32 %v2300_v9, %v14995_v8  ;;  %v2365_v34 = vmul.f32 %v2300_v9, %v14996_v35 }
 0x42f   :  { %v2444_v38 = vmul.f32 %v2300_v9, %v14997_v50 }
 0x430   :  { %v7394_v22 = vpack.i.bf16 %v2491_v26, %v2490_v40  ;;  %v7399_v53 = vpack.i.bf16 %v2365_v34, %v2364_v48  ;;  %v2407_v27 = vsel %vm646_vm3, %v2379_v33, %v2380_v63  ;;  %v10040_v15 = vsel %vm437_vm4, %v2315_v56, %v2316_v60  ;;  %v15004_v33 = vld [vmem:[#allocation57_spill] sm:$0xff]  ;;  %v15005_v56 = vld [vmem:[#allocation60_spill] sm:$0xff]  ;;  %v15006_v26 = vld [vmem:[#allocation75_spill] sm:$0xff] }
 0x431   :  { %15000 = vst [vmem:[#allocation99_spill] sm:$0xff] %v10040_v15  ;;  %v2506_v28 = vmul.f32 %v2407_v27, %v15001_v6  ;;  %v7404_v32 = vpack.i.bf16 %v2445_v0, %v2444_v38  ;;  %v2475_v9 = vmul.f32 %v10040_v15, %v15002_v54  ;;  %v10047_v30 = vsel %vm437_vm4, %v2316_v60, %v2317_v39  ;;  %v15008_v38 = vld [vmem:[#allocation19_spill] sm:$0xff] }
 0x432   :  { %15003 = vst [vmem:[#allocation104_spill] sm:$0xff] %v10047_v30  ;;  %7395 = vrot.lane.b32.xlu1 %v7394_v22, %s8022_s29  ;;  %7400 = vrot.lane.b32.xlu0 %v7399_v53, %s8015_s28  ;;  %v2428_v40 = vmul.f32 %v10040_v15, %v15004_v33  ;;  %v2429_v48 = vmul.f32 %v10047_v30, %v15005_v56  ;;  %v15009_v53 = vld [vmem:[#allocation23_spill] sm:$0xff] }
 0x433   :  { %v2459_v0 = vmul.f32 %v2407_v27, %v15006_v26  ;;  %6614 = vmatprep.mubr.msk.f32.mxu0 %vm87_vm0, %v2506_v28  ;;  %v7414_v34 = vpack.i.bf16 %v2475_v9, %v2474_v5  ;;  %v10059_v60 = vsel %vm646_vm3, %v2380_v63, %v2381_v42  ;;  %v2412_v37 = vmul.f32 %v2407_v27, %v15008_v38  ;;  %v15013_v38 = vld [vmem:[#allocation48_spill] sm:$0xff] }
 0x434   :  { %15007 = vst [vmem:[#allocation172_spill] sm:$0xff] %v10059_v60  ;;  %v7424_v22 = vpack.i.bf16 %v2429_v48, %v2428_v40  ;;  %v2413_v50 = vmul.f32 %v10059_v60, %v15009_v53  ;;  %v15017_v53 = vld [vmem:[#allocation34_spill] sm:$0xff] }
 0x435   :  { %v7409_v6 = vpack.i.bf16 %v2459_v0, %v2458_v41 }
 0x436   :  { %7405 = vrot.lane.b32.xlu1 %v7404_v32, %s8021_s22  ;;  %7415 = vrot.lane.b32.xlu0 %v7414_v34, %s8023_s30  ;;  %v7419_v33 = vpack.i.bf16 %v2413_v50, %v2412_v37  ;;  %v15010_v32 = vld [vmem:[#allocation45_spill] sm:$0xff]  ;;  %v15011_v50 = vld [vmem:[#allocation32_spill] sm:$0xff] }
 0x437   :  { %v2492_v40 = vmul.f32 %v10009_v59, %v15010_v32  ;;  %v2366_v0 = vmul.f32 %v10009_v59, %v15011_v50  ;;  %v15012_v34 = vld [vmem:[#allocation52_spill] sm:$0xff]  ;;  %v2460_v32 = vmul.f32 %v10059_v60, %v15017_v53  ;;  %v15034_v50 = vld [vmem:[#allocation59_spill] sm:$0xff]  ;;  %v15102_v60 = vld [vmem:[#allocation9_spill] sm:$0xff] }
 0x43a   :  { %7425 = vrot.lane.b32.xlu0 %v7424_v22, %s8018_s15  ;;  %7410 = vrot.lane.b32.xlu1 %v7409_v6, %s8024_s13 }
 0x43e   :  { %7420 = vrot.lane.b32.xlu1 %v7419_v33, %s8016_s12 }
 0x44c   :  { %v6991_v63 = vpop.f32.mrb[4].mxu0 }
 0x44d   :  { %v2245_v5 = vadd.f32 %v6991_v63, %v9989_v44  ;;  %v2239_v41 = vpop.f32.mrb[5].mxu0  ;;  %v15014_v63 = vld [vmem:[#allocation38_spill] sm:$0xff] }
 0x44e   :  { %v2240_v27 = vadd.f32 %v9989_v44, %v2239_v41 }
 0x44f   :  { %v2303_v28 = vmax.f32 %v2245_v5, 0.0  ;;  %v15016_v5 = vld [vmem:[#allocation89_spill] sm:$0xff] }
 0x450   :  { %v2302_v9 = vmax.f32 %v2240_v27, 0.0  ;;  %v2476_v27 = vmul.f32 %v10047_v30, %v15016_v5  ;;  %v15106_v30 = vld [vmem:[#allocation29_spill] sm:$0xff] }
 0x451   :  { %v2319_v48 = vrot.slane %v2303_v28, 7  ;;  %v2383_v37 = vrot.slane %v2303_v28, 1  ;;  %v2447_v6 = vmul.f32 %v2303_v28, %v15012_v34 }
 0x452   :  { %v2318_v22 = vrot.slane %v2302_v9, 7  ;;  %v2382_v33 = vrot.slane %v2302_v9, 1  ;;  %v2493_v56 = vmul.f32 %v2302_v9, %v15013_v38  ;;  %v2367_v54 = vmul.f32 %v2302_v9, %v15014_v63  ;;  %v15020_v63 = vld [vmem:[#allocation93_spill] sm:$0xff] }
 0x453   :  { %v2446_v41 = vmul.f32 %v2302_v9, %v15015_v2  ;;  %v15021_v2 = vld [vmem:[#allocation39_spill] sm:$0xff] }
 0x454   :  { %v7429_v1 = vpack.i.bf16 %v2493_v56, %v2492_v40  ;;  %v7434_v26 = vpack.i.bf16 %v2367_v54, %v2366_v0  ;;  %v10085_v59 = vsel %vm437_vm4, %v2317_v39, %v2318_v22  ;;  %v10089_v34 = vsel %vm646_vm3, %v2381_v42, %v2382_v33  ;;  %v15023_v39 = vld [vmem:[#allocation43_spill] sm:$0xff]  ;;  %v15024_v42 = vld [vmem:[#allocation62_spill] sm:$0xff] }
 0x455   :  { %15018 = vst [vmem:[#allocation177_spill] sm:$0xff] %v10085_v59  ;;  %15019 = vst [vmem:[#allocation132_spill] sm:$0xff] %v10089_v34  ;;  %v7439_v38 = vpack.i.bf16 %v2447_v6, %v2446_v41  ;;  %v2477_v9 = vmul.f32 %v10085_v59, %v15020_v63  ;;  %v2461_v5 = vmul.f32 %v10089_v34, %v15021_v2  ;;  %v15026_v41 = vld [vmem:[#allocation37_spill] sm:$0xff] }
 0x456   :  { %v10097_v53 = vsel %vm437_vm4, %v2318_v22, %v2319_v48  ;;  %7430 = vrot.lane.b32.xlu0 %v7429_v1, %s8022_s29  ;;  %7435 = vrot.lane.b32.xlu1 %v7434_v26, %s8015_s28  ;;  %v2430_v54 = vmul.f32 %v10085_v59, %v15023_v39  ;;  %v10107_v40 = vsel %vm646_vm3, %v2382_v33, %v2383_v37  ;;  %v15027_v63 = vld [vmem:[#allocation41_spill] sm:$0xff] }
 0x457   :  { %15022 = vst [vmem:[#allocation179_spill] sm:$0xff] %v10097_v53  ;;  %v2431_v56 = vmul.f32 %v10097_v53, %v15024_v42  ;;  %15025 = vst [vmem:[#allocation106_spill] sm:$0xff] %v10107_v40  ;;  %v7449_v0 = vpack.i.bf16 %v2477_v9, %v2476_v27  ;;  %v7444_v6 = vpack.i.bf16 %v2461_v5, %v2460_v32 }
 0x458   :  { %v2414_v22 = vmul.f32 %v10089_v34, %v15026_v41  ;;  %v2415_v1 = vmul.f32 %v10107_v40, %v15027_v63  ;;  %v15030_v41 = vld [vmem:[#allocation70_spill] sm:$0xff]  ;;  %v15031_v63 = vld [vmem:[#allocation67_spill] sm:$0xff] }
 0x459   :  { %v7459_v2 = vpack.i.bf16 %v2431_v56, %v2430_v54  ;;  %v15028_v54 = vld [vmem:[#allocation63_spill] sm:$0xff] }
 0x45a   :  { %v7454_v26 = vpack.i.bf16 %v2415_v1, %v2414_v22  ;;  %7440 = vrot.lane.b32.xlu0 %v7439_v38, %s8021_s22  ;;  %7450 = vrot.lane.b32.xlu1 %v7449_v0, %s8023_s30  ;;  %v2494_v56 = vmul.f32 %v2303_v28, %v15028_v54  ;;  %v15029_v1 = vld [vmem:[#allocation50_spill] sm:$0xff]  ;;  %v15101_v34 = vld [vmem:[#allocation31_spill] sm:$0xff] }
 0x45b   :  { %v2368_v0 = vmul.f32 %v2303_v28, %v15029_v1  ;;  %v15056_v1 = vld [vmem:[#allocation79_spill] sm:$0xff]  ;;  %v2363_v59 = vmul.f32 %v9995_v51, %v15101_v34 }
 0x45e   :  { %7445 = vrot.lane.b32.xlu0 %v7444_v6, %s8024_s13  ;;  %7460 = vrot.lane.b32.xlu1 %v7459_v2, %s8018_s15 }
 0x462   :  { %7455 = vrot.lane.b32.xlu0 %v7454_v26, %s8016_s12 }
 0x470   :  { %v6994_v33 = vpop.f32.mrb[6].mxu0 }
 0x471   :  { %v2255_v32 = vadd.f32 %v6994_v33, %v9989_v44  ;;  %v2249_v5 = vpop.f32.mrb[7].mxu0  ;;  %v15033_v33 = vld [vmem:[#allocation22_spill] sm:$0xff] }
 0x472   :  { %v2250_v27 = vadd.f32 %v9989_v44, %v2249_v5  ;;  %v15035_v5 = vld [vmem:[#allocation77_spill] sm:$0xff] }
 0x473   :  { %v2305_v9 = vmax.f32 %v2255_v32, 0.0  ;;  %v2478_v32 = vmul.f32 %v10097_v53, %v15034_v50 }
 0x474   :  { %v2304_v39 = vmax.f32 %v2250_v27, 0.0  ;;  %v2462_v27 = vmul.f32 %v10107_v40, %v15035_v5 }
 0x475   :  { %v2321_v22 = vrot.slane %v2305_v9, 7  ;;  %v2385_v38 = vrot.slane %v2305_v9, 1  ;;  %v2449_v6 = vmul.f32 %v2305_v9, %v15030_v41 }
 0x476   :  { %v2320_v42 = vrot.slane %v2304_v39, 7  ;;  %v2384_v2 = vrot.slane %v2304_v39, 1  ;;  %v2495_v26 = vmul.f32 %v2304_v39, %v15031_v63  ;;  %v2369_v8 = vmul.f32 %v2304_v39, %v15032_v55  ;;  %v15038_v55 = vld [vmem:[#allocation102_spill] sm:$0xff] }
 0x477   :  { %v2448_v35 = vmul.f32 %v2304_v39, %v15033_v33  ;;  %v15039_v33 = vld [vmem:[#allocation58_spill] sm:$0xff] }
 0x478   :  { %v7464_v54 = vpack.i.bf16 %v2495_v26, %v2494_v56  ;;  %v7469_v36 = vpack.i.bf16 %v2369_v8, %v2368_v0  ;;  %v10132_v28 = vsel %vm437_vm4, %v2319_v48, %v2320_v42  ;;  %v10136_v41 = vsel %vm646_vm3, %v2383_v37, %v2384_v2  ;;  %v15041_v8 = vld [vmem:[#allocation61_spill] sm:$0xff]  ;;  %v15044_v26 = vld [vmem:[#allocation11_spill] sm:$0xff] }
 0x479   :  { %15036 = vst [vmem:[#allocation111_spill] sm:$0xff] %v10132_v28  ;;  %15037 = vst [vmem:[#allocation181_spill] sm:$0xff] %v10136_v41  ;;  %v7474_v63 = vpack.i.bf16 %v2449_v6, %v2448_v35  ;;  %v2479_v39 = vmul.f32 %v10132_v28, %v15038_v55  ;;  %v2463_v50 = vmul.f32 %v10136_v41, %v15039_v33  ;;  %v15042_v37 = vld [vmem:[#allocation65_spill] sm:$0xff] }
 0x47a   :  { %v10144_v5 = vsel %vm437_vm4, %v2320_v42, %v2321_v22  ;;  %7465 = vrot.lane.b32.xlu1 %v7464_v54, %s8022_s29  ;;  %7470 = vrot.lane.b32.xlu0 %v7469_v36, %s8015_s28  ;;  %v2432_v48 = vmul.f32 %v10132_v28, %v15041_v8  ;;  %v10154_v56 = vsel %vm646_vm3, %v2384_v2, %v2385_v38  ;;  %v15045_v55 = vld [vmem:[#allocation13_spill] sm:$0xff] }
 0x47b   :  { %15040 = vst [vmem:[#allocation112_spill] sm:$0xff] %v10144_v5  ;;  %v2433_v35 = vmul.f32 %v10144_v5, %v15042_v37  ;;  %15043 = vst [vmem:[#allocation120_spill] sm:$0xff] %v10154_v56  ;;  %v7484_v0 = vpack.i.bf16 %v2479_v39, %v2478_v32  ;;  %v7479_v6 = vpack.i.bf16 %v2463_v50, %v2462_v27  ;;  %v15051_v37 = vld [vmem:[#allocation72_spill] sm:$0xff] }
 0x47c   :  { %v2416_v42 = vmul.f32 %v10136_v41, %v15044_v26  ;;  %v2417_v54 = vmul.f32 %v10154_v56, %v15045_v55  ;;  %v15096_v41 = vld [vmem:[#allocation145_spill] sm:$0xff] }
 0x47d   :  { %v7494_v33 = vpack.i.bf16 %v2433_v35, %v2432_v48  ;;  %v15046_v35 = vld [vmem:[#allocation83_spill] sm:$0xff] }
 0x47e   :  { %v7489_v36 = vpack.i.bf16 %v2417_v54, %v2416_v42  ;;  %7475 = vrot.lane.b32.xlu1 %v7474_v63, %s8021_s22  ;;  %7485 = vrot.lane.b32.xlu0 %v7484_v0, %s8023_s30  ;;  %v10170_v42 = vmul.f32 %v2305_v9, %v15046_v35  ;;  %v15048_v54 = vld [vmem:[#allocation24_spill] sm:$0xff]  ;;  %v2464_v63 = vmul.f32 %v10154_v56, %v15051_v37  ;;  %v15052_v35 = vld [vmem:[#allocation78_spill] sm:$0xff] }
 0x47f   :  { %v2480_v55 = vmul.f32 %v10144_v5, %v15052_v35 }
 0x482   :  { %7480 = vrot.lane.b32.xlu1 %v7479_v6, %s8024_s13  ;;  %7495 = vrot.lane.b32.xlu0 %v7494_v33, %s8018_s15  ;;  %v15047_v6 = vld [vmem:[#allocation40_spill] sm:$0xff] }
 0x483   :  { %v10175_v33 = vmul.f32 %v2305_v9, %v15047_v6  ;;  %v15053_v9 = vld [vmem:[#allocation85_spill] sm:$0xff] }
 0x486   :  { %7490 = vrot.lane.b32.xlu1 %v7489_v36, %s8016_s12 }
 0x490   :  { %v6997_v2 = vpop.f32.mrb[8].mxu0 }
 0x491   :  { %v2265_v50 = vadd.f32 %v6997_v2, %v9989_v44  ;;  %v2259_v32 = vpop.f32.mrb[9].mxu0 }
 0x492   :  { %v2260_v27 = vadd.f32 %v9989_v44, %v2259_v32  ;;  %v15049_v32 = vld [vmem:[#allocation149_spill] sm:$0xff] }
 0x493   :  { %v10167_v39 = vmax.f32 %v2265_v50, 0.0 }
 0x494   :  { %v2306_v48 = vmax.f32 %v2260_v27, 0.0  ;;  %v15050_v27 = vld [vmem:[#allocation74_spill] sm:$0xff] }
 0x495   :  { %v2387_v0 = vrot.slane %v10167_v39, 1  ;;  %v10179_v36 = vmul.f32 %v10167_v39, %v15048_v54  ;;  %v15061_v37 = vrot.slane %v10167_v39, 7 }
 0x496   :  { %v2322_v2 = vrot.slane %v2306_v48, 7  ;;  %v2386_v8 = vrot.slane %v2306_v48, 1  ;;  %v10182_v50 = vmul.f32 %v2306_v48, %v15049_v32  ;;  %v10185_v26 = vmul.f32 %v2306_v48, %v15050_v27 }
 0x497   :  { %v10192_v6 = vmul.f32 %v2306_v48, %v15053_v9  ;;  %v15059_v9 = vld [vmem:[#allocation76_spill] sm:$0xff] }
 0x498   :  { %v10196_v54 = vsel %vm646_vm3, %v2385_v38, %v2386_v8  ;;  %v10200_v32 = vsel %vm437_vm4, %v2321_v22, %v2322_v2  ;;  %v10212_v38 = vsel %vm646_vm3, %v2386_v8, %v2387_v0 }
 0x499   :  { %15054 = vst [vmem:[#allocation121_spill] sm:$0xff] %v10196_v54  ;;  %15055 = vst [vmem:[#allocation184_spill] sm:$0xff] %v10200_v32  ;;  %v2465_v35 = vmul.f32 %v10196_v54, %v15056_v1  ;;  %v2481_v48 = vmul.f32 %v10200_v32, %v15057_v57  ;;  %v10216_v22 = vmul.f32 %v10196_v54, %v15059_v9 }
 0x49a   :  { %15058 = vst [vmem:[#allocation185_spill] sm:$0xff] %v10212_v38  ;;  %v10220_v27 = vmul.f32 %v10212_v38, %v15060_v4  ;;  %v10226_v1 = vsel %vm437_vm4, %v2322_v2, %v15061_v37  ;;  %v10230_v57 = vmul.f32 %v10200_v32, %v15063_v46 }
 0x49b   :  { %15062 = vst [vmem:[#allocation186_spill] sm:$0xff] %v10226_v1  ;;  %v7499_v43 = vpack.i.bf16 %v2465_v35, %v2464_v63  ;;  %v7504_v9 = vpack.i.bf16 %v2481_v48, %v2480_v55  ;;  %v10236_v47 = vmul.f32 %v10226_v1, %v15064_v25  ;;  %v3085_v55 = vld [vmem:[%s14194_s7] sm:$0xff]  ;;  %v3086_v35 = vld [vmem:[%s14194_s7 + $0x8] sm:$0xff]  ;;  %v15065_v25 = vld [vmem:[#allocation134_spill] sm:$0xff] }
 0x49c   :  { %v7192_v48 = vpack.c.bf16 %v3086_v35, %v3085_v55  ;;  %v10263_v61 = vmul.f32 %v10167_v39, %v15065_v25  ;;  %v3090_v55 = vld [vmem:[%s14194_s7 + $0x28] sm:$0xff]  ;;  %v10290_v35 = vmul.f32 %v10212_v38, %v14922_v16  ;;  %v15083_v38 = vld [vmem:[#allocation27_spill] sm:$0xff] }
 0x49d   :  { %7500 = vrot.lane.b32.xlu0 %v7499_v43, %s8024_s13  ;;  %7505 = vrot.lane.b32.xlu1 %v7504_v9, %s8023_s30  ;;  %v3087_v43 = vld [vmem:[%s14194_s7 + $0x10] sm:$0xff]  ;;  %v14475_v9 = vmov 0.0|0.0  }
 0x49e   :  { %7191 = vmatprep.subr.bf16.mxu0 %v14475_v9  ;;  %v15066_v9 = vld [vmem:[#allocation140_spill] sm:$0xff] }
 0x49f   :  { %7193 = vmatpush1.bf16.msra.mxu0 %v7192_v48 }
 0x4b0   :  { %v7000_v2 = vpop.f32.mrb[10].mxu0 }
 0x4b1   :  { %v2275_v46 = vadd.f32 %v7000_v2, %v9989_v44  ;;  %v2269_v8 = vpop.f32.mrb[11].mxu0  ;;  %v3088_v2 = vld [vmem:[%s14194_s7 + $0x18] sm:$0xff] }
 0x4b2   :  { %v2270_v63 = vadd.f32 %v9989_v44, %v2269_v8  ;;  %v7195_v29 = vpack.c.bf16 %v3088_v2, %v3087_v43  ;;  %v3089_v8 = vld [vmem:[%s14194_s7 + $0x20] sm:$0xff]  ;;  %v15067_v43 = vmov 0.0|0.0  }
 0x4b3   :  { %v10259_v37 = vmax.f32 %v2275_v46, 0.0  ;;  %7194 = vmatprep.subr.bf16.mxu0 %v15067_v43  ;;  %v15068_v46 = vld [vmem:[#allocation109_spill] sm:$0xff]  ;;  %v7198_v32 = vpack.c.bf16 %v3090_v55, %v3089_v8  ;;  %v15075_v8 = vld [vmem:[#allocation107_spill] sm:$0xff] }
 0x4b4   :  { %v2308_v4 = vmax.f32 %v2270_v63, 0.0  ;;  %v10275_v63 = vmul.f32 %v10167_v39, %v14921_v62  ;;  %v10294_v62 = vmul.f32 %v10226_v1, %v15068_v46  ;;  %7196 = vmatpush1.bf16.msra.mxu0 %v7195_v29  ;;  %v3091_v29 = vld [vmem:[%s14194_s7 + $0x30] sm:$0xff]  ;;  %v3092_v46 = vld [vmem:[%s14194_s7 + $0x38] sm:$0xff] }
 0x4b5   :  { %v10279_v48 = vmul.f32 %v10259_v37, %v15066_v9  ;;  %v15069_v9 = vld [vmem:[#allocation136_spill] sm:$0xff]  ;;  %7197 = vmatprep.subr.bf16.mxu0 %v15067_v43 }
 0x4b6   :  { %v2324_v2 = vrot.slane %v2308_v4, 7  ;;  %v2388_v25 = vrot.slane %v2308_v4, 1  ;;  %v10283_v7 = vmul.f32 %v2308_v4, %v9089_v13  ;;  %v10286_v3 = vmul.f32 %v2308_v4, %v14923_v58 }
 0x4b7   :  { %v10297_v54 = vmul.f32 %v2308_v4, %v15069_v9  ;;  %v15071_v13 = vrot.slane %v10167_v39, 7  ;;  %v15073_v39 = vrot.slane %v10259_v37, 1 }
 0x4b8   :  { %v10301_v18 = vsel %vm646_vm3, %v2387_v0, %v2388_v25  ;;  %7199 = vmatpush1.bf16.msra.mxu0 %v7198_v32  ;;  %v3095_v32 = vld [vmem:[%s14194_s7 + $0x50] sm:$0xff] }
 0x4b9   :  { %15070 = vst [vmem:[#allocation187_spill] sm:$0xff] %v10301_v18  ;;  %v10307_v58 = vsel %vm437_vm4, %v15071_v13, %v2324_v2  ;;  %v10315_v4 = vmul.f32 %v10301_v18, %v14926_v12  ;;  %v10325_v13 = vsel %vm646_vm3, %v2388_v25, %v15073_v39  ;;  %v10329_v55 = vmul.f32 %v10301_v18, %v15075_v8  ;;  %v15078_v8 = vld [vmem:[#allocation131_spill] sm:$0xff] }
 0x4ba   :  { %15072 = vst [vmem:[#allocation188_spill] sm:$0xff] %v10307_v58  ;;  %v10319_v0 = vmul.f32 %v10307_v58, %v14930_v20  ;;  %15074 = vst [vmem:[#allocation189_spill] sm:$0xff] %v10325_v13  ;;  %v10340_v16 = vmul.f32 %v10325_v13, %v14927_v21  ;;  %v15076_v25 = vrot.slane %v10259_v37, 7  ;;  %v10350_v9 = vmul.f32 %v10307_v58, %v15078_v8  ;;  %v3093_v20 = vld [vmem:[%s14194_s7 + $0x40] sm:$0xff]  ;;  %v3094_v21 = vld [vmem:[%s14194_s7 + $0x48] sm:$0xff] }
 0x4bb   :  { %7200 = vmatprep.subr.bf16.mxu0 %v15067_v43  ;;  %v7204_v12 = vpack.c.bf16 %v3094_v21, %v3093_v20  ;;  %v15079_v58 = vld [vmem:[#allocation146_spill] sm:$0xff] }
 0x4bc   :  { %v10346_v39 = vsel %vm437_vm4, %v2324_v2, %v15076_v25  ;;  %v7201_v25 = vpack.c.bf16 %v3092_v46, %v3091_v29  ;;  %v3096_v46 = vld [vmem:[%s14194_s7 + $0x58] sm:$0xff]  ;;  %v10388_v1 = vmul.f32 %v10259_v37, %v15079_v58 }
 0x4bd   :  { %15077 = vst [vmem:[#allocation190_spill] sm:$0xff] %v10346_v39  ;;  %v10360_v18 = vmul.f32 %v10346_v39, %v14931_v24  ;;  %v7207_v29 = vpack.c.bf16 %v3096_v46, %v3095_v32  ;;  %v10394_v46 = vmul.f32 %v10259_v37, %v9094_v49  ;;  %v15082_v32 = vld [vmem:[#allocation144_spill] sm:$0xff] }
 0x4be   :  { %7202 = vmatpush1.bf16.msra.mxu0 %v7201_v25  ;;  %v10412_v49 = vmul.f32 %v10346_v39, %v15082_v32  ;;  %v15090_v39 = vld [vmem:[#allocation128_spill] sm:$0xff] }
 0x4bf   :  { %7203 = vmatprep.subr.bf16.mxu0 %v15067_v43 }
 0x4c2   :  { %7205 = vmatpush1.bf16.msra.mxu0 %v7204_v12  ;;  %v10408_v12 = vmul.f32 %v10325_v13, %v14933_v10  ;;  %v15092_v13 = vld [vmem:[#allocation16_spill] sm:$0xff] }
 0x4c3   :  { %7206 = vmatprep.subr.bf16.mxu0 %v15067_v43 }
 0x4c6   :  { %7208 = vmatpush1.bf16.msra.mxu0 %v7207_v29  ;;  %v15080_v29 = vld [vmem:[#allocation152_spill] sm:$0xff] }
 0x4c7   :  { %7209 = vmatprep.subr.bf16.mxu0 %v15067_v43 }
 0x4d7   :  { %v7003_v8 = vpop.f32.mrb[12].mxu0 }
 0x4d8   :  { %v2285_v21 = vadd.f32 %v7003_v8, %v9989_v44  ;;  %v2279_v20 = vpop.f32.mrb[13].mxu0 }
 0x4d9   :  { %v2280_v25 = vadd.f32 %v9989_v44, %v2279_v20 }
 0x4da   :  { %v10384_v2 = vmax.f32 %v2285_v21, 0.0 }
 0x4db   :  { %v2310_v24 = vmax.f32 %v2280_v25, 0.0 }
 0x4dc   :  { %v10398_v8 = vmul.f32 %v10384_v2, %v15080_v29  ;;  %v15085_v29 = vrot.slane %v10259_v37, 1 }
 0x4dd   :  { %v2326_v20 = vrot.slane %v2310_v24, 7  ;;  %v2390_v21 = vrot.slane %v2310_v24, 1  ;;  %v10401_v25 = vmul.f32 %v2310_v24, %v14951_v11  ;;  %v10404_v58 = vmul.f32 %v2310_v24, %v14936_v17 }
 0x4de   :  { %15081 = vst [vmem:[#allocation191_spill] sm:$0xff] %v10398_v8  ;;  %v10415_v56 = vmul.f32 %v2310_v24, %v15083_v38  ;;  %v15087_v17 = vrot.slane %v10259_v37, 7  ;;  %v15089_v24 = vld [vmem:[#allocation143_spill] sm:$0xff]  ;;  %v15091_v37 = vrot.slane %v10384_v2, 1  ;;  %v15108_v8 = vld [vmem:[#allocation156_spill] sm:$0xff] }
 0x4df   :  { %v10421_v11 = vsel %vm646_vm3, %v15085_v29, %v2390_v21 }
 0x4e0   :  { %15084 = vst [vmem:[#allocation192_spill] sm:$0xff] %v10415_v56  ;;  %15086 = vst [vmem:[#allocation193_spill] sm:$0xff] %v10421_v11  ;;  %v10427_v5 = vsel %vm437_vm4, %v15087_v17, %v2326_v20  ;;  %v10435_v38 = vmul.f32 %v10421_v11, %v15089_v24  ;;  %v10445_v17 = vsel %vm646_vm3, %v2390_v21, %v15091_v37  ;;  %v15094_v24 = vrot.slane %v10384_v2, 7 }
 0x4e1   :  { %15088 = vst [vmem:[#allocation194_spill] sm:$0xff] %v10427_v5  ;;  %v10439_v29 = vmul.f32 %v10427_v5, %v15090_v39  ;;  %v10449_v10 = vmul.f32 %v10421_v11, %v15092_v13  ;;  %v10453_v32 = vmul.f32 %v10445_v17, %v15093_v14  ;;  %v10463_v28 = vmul.f32 %v10427_v5, %v15096_v41  ;;  %v15098_v14 = vld [vmem:[#allocation147_spill] sm:$0xff]  ;;  %v15105_v13 = vld [vmem:[#allocation44_spill] sm:$0xff] }
 0x4e2   :  { %v10459_v39 = vsel %vm437_vm4, %v2326_v20, %v15094_v24  ;;  %v3097_v20 = vld [vmem:[%s14194_s7 + $0x60] sm:$0xff]  ;;  %v3098_v24 = vld [vmem:[%s14194_s7 + $0x68] sm:$0xff]  ;;  %v10508_v34 = vmul.f32 %v10384_v2, %v15105_v13 }
 0x4e3   :  { %15095 = vst [vmem:[#allocation195_spill] sm:$0xff] %v10459_v39  ;;  %15097 = vst [vmem:[#allocation196_spill] sm:$0xff] %v10463_v28  ;;  %v10473_v11 = vmul.f32 %v10459_v39, %v15098_v14  ;;  %v7210_v41 = vpack.c.bf16 %v3098_v24, %v3097_v20  ;;  %v2411_v20 = vmul.f32 %v10021_v19, %v15102_v60  ;;  %v15103_v24 = vld [vmem:[#allocation12_spill] sm:$0xff] }
 0x4e4   :  { %v7006_v37 = vpop.f32.mrb[14].mxu0  ;;  %v2427_v21 = vmul.f32 %v10015_v23, %v15103_v24 }
 0x4e5   :  { %15099 = vst [vmem:[#allocation197_spill] sm:$0xff] %v10473_v11  ;;  %v2295_v5 = vadd.f32 %v7006_v37, %v9989_v44  ;;  %v2289_v14 = vpop.f32.mrb[15].mxu0  ;;  %7211 = vmatpush1.bf16.msra.mxu0 %v7210_v41  ;;  %v3099_v37 = vld [vmem:[%s14194_s7 + $0x70] sm:$0xff] }
 0x4e6   :  { %v2290_v53 = vadd.f32 %v9989_v44, %v2289_v14  ;;  %7212 = vmatprep.subr.bf16.mxu0 %v15067_v43  ;;  %v3100_v14 = vld [vmem:[%s14194_s7 + $0x78] sm:$0xff]  ;;  %v15104_v41 = vld [vmem:[#allocation161_spill] sm:$0xff] }
 0x4e7   :  { %v10488_v40 = vmax.f32 %v2295_v5, 0.0  ;;  %v10504_v5 = vmul.f32 %v10384_v2, %v15104_v41  ;;  %v7213_v60 = vpack.c.bf16 %v3100_v14, %v3099_v37  ;;  %v15107_v41 = vld [vmem:[#allocation151_spill] sm:$0xff]  ;;  %v15109_v14 = vrot.slane %v9995_v51, 1 }
 0x4e8   :  { %v2312_v44 = vmax.f32 %v2290_v53, 0.0 }
 0x4e9   :  { %15100 = vst [vmem:[#allocation198_spill] sm:$0xff] %v10488_v40  ;;  %v2329_v24 = vrot.slane %v10488_v40, 7  ;;  %v2393_v19 = vrot.slane %v10488_v40, 1  ;;  %v2362_v15 = vmul.f32 %v10488_v40, %v15106_v30  ;;  %v10516_v23 = vmul.f32 %v10488_v40, %v14969_v45  ;;  %7214 = vmatpush1.bf16.msra.mxu0 %v7213_v60  ;;  %v15111_v40 = vld [vmem:[#allocation162_spill] sm:$0xff]  ;;  %v15113_v60 = vld [vmem:[#allocation55_spill] sm:$0xff] }
 0x4ea   :  { %v2328_v53 = vrot.slane %v2312_v44, 7  ;;  %v2392_v52 = vrot.slane %v2312_v44, 1  ;;  %v10519_v56 = vmul.f32 %v2312_v44, %v15107_v41  ;;  %v10522_v13 = vmul.f32 %v2312_v44, %v15108_v8  ;;  %7215 = vmatprep.subr.bf16.mxu0 %v15067_v43  ;;  %v15112_v8 = vld [vmem:[#allocation8_spill] sm:$0xff] }
 0x4eb   :  { %v7509_v37 = vpack.i.bf16 %v2363_v59, %v2362_v15  ;;  %v10528_v28 = vsel %vm646_vm3, %v2393_v19, %v15109_v14  ;;  %v15110_v30 = vrot.slane %v9995_v51, 7  ;;  %v10537_v41 = vmul.f32 %v2312_v44, %v15111_v40  ;;  %v15117_v14 = vld [vmem:[#allocation113_spill] sm:$0xff] }
 0x4ec   :  { %v2410_v15 = vmul.f32 %v10528_v28, %v15112_v8  ;;  %v15114_v43 = vrot.slane %v10384_v2, 7  ;;  %v10582_v44 = vsel %vm437_vm4, %v2328_v53, %v2329_v24 }
 0x4ed   :  { %v10534_v45 = vsel %vm437_vm4, %v2329_v24, %v15110_v30  ;;  %7510 = vrot.lane.b32.xlu1 %v7509_v37, %s8015_s28  ;;  %v15120_v37 = vld [vmem:[#allocation154_spill] sm:$0xff] }
 0x4ee   :  { %v2426_v59 = vmul.f32 %v10534_v45, %v15113_v60  ;;  %v7514_v30 = vpack.i.bf16 %v2411_v20, %v2410_v15  ;;  %v10555_v40 = vsel %vm437_vm4, %v15114_v43, %v2328_v53  ;;  %v15116_v60 = vld [vmem:[#allocation133_spill] sm:$0xff]  ;;  %v15118_v20 = vrot.slane %v10384_v2, 1  ;;  %v15121_v43 = vld [vmem:[#allocation84_spill] sm:$0xff]  ;;  %v15124_v53 = vld [vmem:[#allocation158_spill] sm:$0xff] }
 0x4ef   :  { %15115 = vst [vmem:[#allocation199_spill] sm:$0xff] %v10555_v40  ;;  %v10559_v8 = vmul.f32 %v10459_v39, %v15116_v60  ;;  %v10563_v51 = vmul.f32 %v10555_v40, %v15117_v14  ;;  %v10573_v15 = vmul.f32 %v10445_v17, %v15120_v37  ;;  %v15122_v14 = vld [vmem:[#allocation71_spill] sm:$0xff]  ;;  %v15123_v60 = vld [vmem:[#allocation73_spill] sm:$0xff]  ;;  %v15127_v37 = vpack.i.bf16 %v10185_v26, %v10175_v33 }
 0x4f0   :  { %v7524_v11 = vpack.i.bf16 %v2427_v21, %v2426_v59  ;;  %v10569_v21 = vsel %vm646_vm3, %v15118_v20, %v2392_v52  ;;  %7515 = vrot.lane.b32.xlu0 %v7514_v30, %s8016_s12  ;;  %v10586_v2 = vmul.f32 %v10555_v40, %v15122_v14  ;;  %v10590_v20 = vsel %vm646_vm3, %v2392_v52, %v2393_v19  ;;  %v3103_v52 = vld [vmem:[%s14196_s9] sm:$0xff]  ;;  %v10652_v33 = vld [vmem:[%s14188_s1 + $0x8] sm:$0xff] }
 0x4f1   :  { %15119 = vst [vmem:[#allocation200_spill] sm:$0xff] %v10569_v21  ;;  %v10578_v59 = vmul.f32 %v10569_v21, %v15121_v43  ;;  %v10599_v24 = vmul.f32 %v10582_v44, %v15123_v60  ;;  %v10603_v14 = vmul.f32 %v10569_v21, %v15124_v53  ;;  %v3104_v43 = vld [vmem:[%s14196_s9 + $0x8] sm:$0x1]  ;;  %v3101_v30 = vld [vmem:[%s14194_s7 + $0x80] sm:$0xff]  ;;  %v15126_v53 = vpack.i.bf16 %v10182_v50, %v10170_v42 }
 0x4f2   :  { %7525 = vrot.lane.b32.xlu1 %v7524_v11, %s8018_s15  ;;  %v15125_v11 = vld [vmem:[#allocation160_spill] sm:$0xff]  ;;  %v7185_v39 = vpack.c.bf16 %v3104_v43, %v3103_v52  ;;  %v15132_v26 = vpack.i.bf16 %v10220_v27, %v10216_v22  ;;  %15133 = vst [vmem:[#allocation203_spill] sm:$0xff] %v10652_v33  ;;  %v10664_v27 = vld [vmem:[%s14188_s1 + $0x10] sm:$0xff]  ;;  %v15140_v43 = vpack.i.bf16 %v10319_v0, %v10294_v62 }
 0x4f3   :  { %v10610_v19 = vmul.f32 %v10590_v20, %v15125_v11  ;;  %v3102_v60 = vld [vmem:[%s14194_s7 + $0x88] sm:$0xff]  ;;  %v7649_v11 = vpack.i.bf16 %v10599_v24, %v10586_v2  ;;  %v10640_v42 = vld [vmem:[%s14188_s1] sm:$0xff]  ;;  %15135 = vst [vmem:[#allocation204_spill] sm:$0xff] %v10664_v27  ;;  %v14543_v22 = vsub.f32 1.0, %v10664_v27  ;;  %v10719_v62 = vld [vmem:[%s14188_s1 + $0x30] sm:$0xff]  ;;  %v15146_v52 = vpack.i.bf16 %v10340_v16, %v10329_v55 }
 0x4f4   :  { %7520 = vrot.lane.b32.xlu0 %v15126_v53, %s8022_s29  ;;  %v7216_v21 = vpack.c.bf16 %v3102_v60, %v3101_v30  ;;  %15131 = vst [vmem:[#allocation202_spill] sm:$0xff] %v10640_v42  ;;  %v14545_v50 = vsub.f32 1.0, %v10640_v42  ;;  %7187 = vmatprep.subr.msk.bf16.mxu1 %vm10631_vm15, %v7185_v39  ;;  %v14544_v60 = vsub.f32 1.0, %v10652_v33  ;;  %v15142_v30 = vpack.i.bf16 %v10283_v7, %v10263_v61  ;;  %v10732_v61 = vld [vmem:[%s14188_s1 + $0x38] sm:$0xff]  ;;  %v10756_v16 = vld [vmem:[%s14188_s1 + $0x40] sm:$0xff] }
 0x4f5   :  { %v7644_v40 = vpack.i.bf16 %v10610_v19, %v10603_v14  ;;  %7190 = vmatpush3.bf16.msk.msra.mxu1 %vm10631_vm15, %v7185_v39  ;;  %15143 = vst [vmem:[#allocation208_spill] sm:$0xff] %v10719_v62  ;;  %v14539_v0 = vsub.f32 1.0, %v10719_v62  ;;  %v15144_v53 = vpack.i.bf16 %v10286_v3, %v10275_v63  ;;  %15145 = vst [vmem:[#allocation209_spill] sm:$0xff] %v10732_v61  ;;  %v14538_v7 = vsub.f32 1.0, %v10732_v61  ;;  %v15175_v2 = vld [vmem:[#allocation168_spill] sm:$0xff]  ;;  %v15176_v24 = vld [vmem:[#allocation198_spill] sm:$0xff] }
 0x4f6   :  { %7530 = vrot.lane.b32.xlu1 %v15127_v37, %s8015_s28  ;;  %v15134_v37 = vpack.i.bf16 %v10236_v47, %v10230_v57  ;;  %7217 = vmatpush1.bf16.msra.mxu0 %v7216_v21  ;;  %v15136_v47 = vpack.i.bf16 %v10179_v36, %v10192_v6  ;;  %v10680_v57 = vld [vmem:[%s14188_s1 + $0x18] sm:$0xff]  ;;  %v15138_v21 = vpack.i.bf16 %v10315_v4, %v10290_v35  ;;  %v10693_v6 = vld [vmem:[%s14188_s1 + $0x20] sm:$0xff]  ;;  %v10706_v35 = vld [vmem:[%s14188_s1 + $0x28] sm:$0xff]  ;;  %v14537_v55 = vsub.f32 1.0, %v10756_v16 }
 0x4f7   :  { %7011 = vmatprep.mubr.msk.f32.mxu1 %vm3105_vm1, %v14545_v50  ;;  %15137 = vst [vmem:[#allocation205_spill] sm:$0xff] %v10680_v57  ;;  %v14542_v39 = vsub.f32 1.0, %v10680_v57  ;;  %15139 = vst [vmem:[#allocation206_spill] sm:$0xff] %v10693_v6  ;;  %v14541_v36 = vsub.f32 1.0, %v10693_v6  ;;  %v14540_v4 = vsub.f32 1.0, %v10706_v35  ;;  %v15147_v3 = vpack.i.bf16 %v10360_v18, %v10350_v9  ;;  %v10773_v9 = vld [vmem:[%s14188_s1 + $0x48] sm:$0xff] }
 0x4f8   :  { %7535 = vrot.lane.b32.xlu0 %v15132_v26, %s8016_s12  ;;  %7012 = vmatmul.mubr.msk.f32.vlgmr.msra.gmra.mrb[32].mxu1 %vm3105_vm1, %v14544_v60  ;;  %15141 = vst [vmem:[#allocation207_spill] sm:$0xff] %v10706_v35  ;;  %v15148_v63 = vpack.i.bf16 %v10279_v48, %v10297_v54  ;;  %15149 = vst [vmem:[#allocation210_spill] sm:$0xff] %v10756_v16  ;;  %v15150_v18 = vpack.i.bf16 %v10435_v38, %v10408_v12  ;;  %v14536_v48 = vsub.f32 1.0, %v10773_v9  ;;  %v10790_v12 = vld [vmem:[%s14188_s1 + $0x50] sm:$0xff]  ;;  %v15159_v26 = vld [vmem:[#allocation196_spill] sm:$0xff] }
 0x4f9   :  { %7014 = vmatprep.mubr.msk.f32.mxu1 %vm3105_vm1, %v14543_v22  ;;  %v15151_v54 = vpack.i.bf16 %v10439_v29, %v10412_v49  ;;  %15152 = vst [vmem:[#allocation211_spill] sm:$0xff] %v10773_v9  ;;  %v15153_v38 = vpack.i.bf16 %v10401_v25, %v10388_v1  ;;  %v15154_v49 = vpack.i.bf16 %v10404_v58, %v10394_v46  ;;  %15155 = vst [vmem:[#allocation212_spill] sm:$0xff] %v10790_v12  ;;  %v10799_v1 = vld [vmem:[%s14188_s1 + $0x58] sm:$0xff]  ;;  %v15158_v46 = vld [vmem:[#allocation197_spill] sm:$0xff] }
 0x4fa   :  { %7540 = vrot.lane.b32.xlu1 %v15134_v37, %s8018_s15  ;;  %v14535_v29 = vsub.f32 1.0, %v10790_v12  ;;  %15156 = vst [vmem:[#allocation213_spill] sm:$0xff] %v10799_v1  ;;  %v14534_v25 = vsub.f32 1.0, %v10799_v1  ;;  %v15157_v58 = vpack.i.bf16 %v10453_v32, %v10449_v10  ;;  %v15160_v37 = vpack.i.bf16 %v15158_v46, %v15159_v26  ;;  %v10824_v10 = vld [vmem:[%s14188_s1 + $0x60] sm:$0xff]  ;;  %v15178_v46 = vld [vmem:[#allocation125_spill] sm:$0xff]  ;;  %v15185_v22 = vld [vmem:[#allocation174_spill] sm:$0xff] }
 0x4fb   :  { %15165 = vst [vmem:[#allocation197_spill] sm:$0xff] %v10824_v10  ;;  %v14533_v32 = vsub.f32 1.0, %v10824_v10  ;;  %v2489_v26 = vmul.f32 %v10534_v45, %v15178_v46  ;;  %v15186_v60 = vld [vmem:[#allocation104_spill] sm:$0xff]  ;;  %v15190_v62 = vld [vmem:[#allocation118_spill] sm:$0xff] }
 0x4fc   :  { %7545 = vrot.lane.b32.xlu0 %v15136_v47, %s8021_s22  ;;  %7015 = vmatmul.mubr.msk.f32.gmra.mrb[34].mxu1 %vm3105_vm1, %v14542_v39  ;;  %v15161_v47 = vld [vmem:[#allocation191_spill] sm:$0xff]  ;;  %v2350_v50 = vmul.f32 %v15186_v60, %v15185_v22 }
 0x4fd   :  { %7017 = vmatprep.mubr.msk.f32.mxu1 %vm3105_vm1, %v14541_v36  ;;  %v15189_v60 = vld [vmem:[#allocation155_spill] sm:$0xff] }
 0x4fe   :  { %7550 = vrot.lane.b32.xlu1 %v15138_v21, %s8024_s13  ;;  %v15162_v21 = vld [vmem:[#allocation192_spill] sm:$0xff]  ;;  %v2346_v61 = vmul.f32 %v10582_v44, %v15189_v60 }
 0x500   :  { %7555 = vrot.lane.b32.xlu0 %v15140_v43, %s8023_s30  ;;  %7018 = vmatmul.mubr.msk.f32.gmra.mrb[36].mxu1 %vm3105_vm1, %v14540_v4  ;;  %v15163_v43 = vpack.i.bf16 %v15161_v47, %v15162_v21  ;;  %v15180_v47 = vld [vmem:[#allocation170_spill] sm:$0xff]  ;;  %v15184_v4 = vld [vmem:[#allocation99_spill] sm:$0xff] }
 0x501   :  { %7020 = vmatprep.mubr.msk.f32.mxu1 %vm3105_vm1, %v14539_v0  ;;  %v15183_v0 = vld [vmem:[#allocation157_spill] sm:$0xff] }
 0x502   :  { %7560 = vrot.lane.b32.xlu1 %v15142_v30, %s8022_s29  ;;  %v15164_v30 = vpack.i.bf16 %v10519_v56, %v10504_v5  ;;  %v15167_v56 = vpack.i.bf16 %v10516_v23, %v10537_v41  ;;  %v10841_v5 = vld [vmem:[%s14188_s1 + $0x68] sm:$0xff]  ;;  %v10856_v23 = vld [vmem:[%s14188_s1 + $0x70] sm:$0xff]  ;;  %v15171_v41 = vpack.i.bf16 %v10578_v59, %v10573_v15  ;;  %v2349_v36 = vmul.f32 %v15184_v4, %v15183_v0 }
 0x503   :  { %15168 = vst [vmem:[#allocation196_spill] sm:$0xff] %v10841_v5  ;;  %15170 = vst [vmem:[#allocation191_spill] sm:$0xff] %v10856_v23  ;;  %v15173_v59 = vld [vmem:[#allocation86_spill] sm:$0xff]  ;;  %v15289_v0 = vld [vmem:[#allocation20_spill] sm:$0xff] }
 0x504   :  { %7565 = vrot.lane.b32.xlu0 %v15144_v53, %s8015_s28  ;;  %7021 = vmatmul.mubr.msk.f32.gmra.mrb[38].mxu1 %vm3105_vm1, %v14538_v7  ;;  %v15166_v53 = vpack.i.bf16 %v10522_v13, %v10508_v34  ;;  %v15169_v34 = vpack.i.bf16 %v10563_v51, %v10559_v8  ;;  %v14531_v13 = vsub.f32 1.0, %v10856_v23  ;;  %v10869_v51 = vld [vmem:[%s14188_s1 + $0x78] sm:$0xff]  ;;  %v15187_v23 = vld [vmem:[#allocation36_spill] sm:$0xff] }
 0x505   :  { %7023 = vmatprep.mubr.msk.f32.mxu1 %vm3105_vm1, %v14537_v55  ;;  %15172 = vst [vmem:[#allocation192_spill] sm:$0xff] %v10869_v51  ;;  %v14530_v8 = vsub.f32 1.0, %v10869_v51 }
 0x506   :  { %7570 = vrot.lane.b32.xlu1 %v15146_v52, %s8016_s12  ;;  %v14532_v52 = vsub.f32 1.0, %v10841_v5  ;;  %v15188_v5 = vld [vmem:[#allocation172_spill] sm:$0xff] }
 0x507   :  { %v2507_v10 = vmul.f32 %v15188_v5, %v15187_v23  ;;  %v2347_v5 = vmul.f32 %v10534_v45, %v15190_v62 }
 0x508   :  { %7575 = vrot.lane.b32.xlu0 %v15147_v3, %s8018_s15  ;;  %7024 = vmatmul.mubr.msk.f32.gmra.mrb[40].mxu1 %vm3105_vm1, %v14536_v48  ;;  %v10844_v3 = vpop.permute.xlu1 %7395 }
 0x509   :  { %7026 = vmatprep.mubr.msk.f32.mxu1 %vm3105_vm1, %v14535_v29  ;;  %v7397_v9 = vunpack.i.l.bf16 %v10844_v3 }
 0x50a   :  { %7580 = vrot.lane.b32.xlu1 %v15148_v63, %s8021_s22  ;;  %v10872_v63 = vpop.permute.xlu0 %7390 }
 0x50c   :  { %7585 = vrot.lane.b32.xlu0 %v15150_v18, %s8024_s13  ;;  %7027 = vmatmul.mubr.msk.f32.gmra.mrb[42].mxu1 %vm3105_vm1, %v14534_v25  ;;  %v10878_v15 = vpop.permute.xlu1 %7405  ;;  %v2472_v18 = vmul.f32 %v10590_v20, %v15173_v59  ;;  %v15182_v25 = vld [vmem:[#allocation176_spill] sm:$0xff] }
 0x50d   :  { %7029 = vmatprep.mubr.msk.f32.mxu1 %vm3105_vm1, %v14533_v32  ;;  %v15181_v32 = vld [vmem:[#allocation173_spill] sm:$0xff] }
 0x50e   :  { %7590 = vrot.lane.b32.xlu1 %v15151_v54, %s8023_s30  ;;  %v15174_v54 = vld [vmem:[#allocation135_spill] sm:$0xff]  ;;  %v2348_v29 = vmul.f32 %v15182_v25, %v15181_v32  ;;  %v7393_v25 = vunpack.i.h.bf16 %v10872_v63 }
 0x510   :  { %7595 = vrot.lane.b32.xlu0 %v15153_v38, %s8022_s29  ;;  %7030 = vmatmul.mubr.msk.f32.gmra.mrb[44].mxu1 %vm3105_vm1, %v14532_v52  ;;  %v2488_v38 = vmul.f32 %v10582_v44, %v15174_v54  ;;  %v10895_v14 = vpop.permute.xlu1 %7410  ;;  %v15296_v54 = vld [vmem:[#allocation34_spill] sm:$0xff] }
 0x511   :  { %7032 = vmatprep.mubr.msk.f32.mxu1 %vm3105_vm1, %v14531_v13  ;;  %v7413_v42 = vunpack.i.h.bf16 %v10895_v14 }
 0x512   :  { %7600 = vrot.lane.b32.xlu1 %v15154_v49, %s8015_s28  ;;  %v7401_v49 = vpop.permute.xlu0 %7400 }
 0x513   :  { %v7403_v48 = vunpack.i.h.bf16 %v7401_v49  ;;  %v7402_v55 = vunpack.i.l.bf16 %v7401_v49  ;;  %v7392_v49 = vunpack.i.l.bf16 %v10872_v63 }
 0x514   :  { %7605 = vrot.lane.b32.xlu0 %v15157_v58, %s8016_s12  ;;  %7033 = vmatmul.mubr.msk.f32.gmra.mrb[46].mxu1 %vm3105_vm1, %v14530_v8 }
 0x515   :  { %v2972_v4 = vsel %vm87_vm0, %v2348_v29, %v7402_v55  ;;  %v2973_v16 = vsel %vm87_vm0, %v2349_v36, %v7403_v48 }
 0x516   :  { %7610 = vrot.lane.b32.xlu1 %v15160_v37, %s8018_s15  ;;  %v10901_v58 = vpop.permute.xlu0 %7415  ;;  %v15179_v37 = vld [vmem:[#allocation153_spill] sm:$0xff] }
 0x517   :  { %v2505_v21 = vmul.f32 %v15180_v47, %v15179_v37  ;;  %v7418_v35 = vunpack.i.h.bf16 %v10901_v58 }
 0x518   :  { %7615 = vrot.lane.b32.xlu0 %v15163_v43, %s8021_s22  ;;  %v10908_v43 = vpop.permute.xlu1 %7420 }
 0x519   :  { %v7422_v39 = vunpack.i.l.bf16 %v10908_v43  ;;  %v7423_v44 = vunpack.i.h.bf16 %v10908_v43 }
 0x51a   :  { %7620 = vrot.lane.b32.xlu1 %v15164_v30, %s8022_s29  ;;  %v10911_v30 = vpop.permute.xlu0 %7425 }
 0x51b   :  { %v2988_v6 = vsel %vm1785_vm7, %v2972_v4, %v7422_v39  ;;  %v7427_v48 = vunpack.i.l.bf16 %v10911_v30  ;;  %v7412_v39 = vunpack.i.l.bf16 %v10895_v14 }
 0x51c   :  { %7625 = vrot.lane.b32.xlu0 %v15166_v53, %s8015_s28  ;;  %v10913_v53 = vpop.permute.xlu1 %7435 }
 0x51e   :  { %7630 = vrot.lane.b32.xlu1 %v15167_v56, %s8021_s22  ;;  %v10915_v56 = vpop.permute.xlu0 %7430 }
 0x520   :  { %7640 = vrot.lane.b32.xlu0 %v15169_v34, %s8023_s30  ;;  %v10917_v34 = vpop.permute.xlu1 %7450 }
 0x522   :  { %7635 = vrot.lane.b32.xlu1 %v15171_v41, %s8024_s13  ;;  %v10919_v41 = vpop.permute.xlu0 %7440 }
 0x524   :  { %7650 = vrot.lane.b32.xlu0 %v7649_v11, %s8018_s15  ;;  %v2504_v11 = vmul.f32 %v15176_v24, %v15175_v2 }
 0x526   :  { %7645 = vrot.lane.b32.xlu1 %v7644_v40, %s8016_s12  ;;  %v15177_v40 = vld [vmem:[#allocation167_spill] sm:$0xff] }
 0x527   :  { %v2473_v19 = vmul.f32 %v10528_v28, %v15177_v40  ;;  %v15303_v40 = vld [vmem:[#allocation38_spill] sm:$0xff] }
 0x528   :  { %2822 = vrot.lane.b32.xlu0 %v2472_v18, %s8024_s13  ;;  %v10921_v18 = vpop.permute.xlu1 %7460 }
 0x52a   :  { %2886 = vrot.lane.b32.xlu1 %v2488_v38, %s8023_s30  ;;  %v10923_v38 = vpop.permute.xlu0 %7445 }
 0x52b   :  { %v7447_v14 = vunpack.i.l.bf16 %v10923_v38 }
 0x52c   :  { %2950 = vrot.lane.b32.xlu0 %v2504_v11, %s8022_s29  ;;  %v10925_v24 = vpop.permute.xlu1 %7465 }
 0x52e   :  { %2824 = vrot.lane.b32.xlu1 %v2473_v19, %s8024_s13  ;;  %v10927_v11 = vpop.permute.xlu0 %7455 }
 0x530   :  { %2888 = vrot.lane.b32.xlu0 %v2489_v26, %s8023_s30  ;;  %v10929_v19 = vpop.permute.xlu1 %7475 }
 0x532   :  { %2952 = vrot.lane.b32.xlu1 %v2505_v21, %s8022_s29  ;;  %v10931_v26 = vpop.permute.xlu0 %7470 }
 0x534   :  { %v10933_v47 = vpop.permute.xlu1 %7480 }
 0x536   :  { %v10935_v21 = vpop.permute.xlu0 %7485 }
 0x538   :  { %v10937_v8 = vpop.permute.xlu1 %7490 }
 0x53a   :  { %v10939_v13 = vpop.permute.xlu0 %7495 }
 0x53c   :  { %v10941_v52 = vpop.permute.xlu1 %7505 }
 0x53e   :  { %v10945_v7 = vpop.permute.xlu0 %7500 }
 0x55f   :  { %v7511_v51 = vpop.permute.xlu1 %7510 }
 0x560   :  { %v7513_v1 = vunpack.i.h.bf16 %v7511_v51  ;;  %v7512_v12 = vunpack.i.l.bf16 %v7511_v51 }
 0x562   :  { %v7516_v51 = vpop.permute.xlu0 %7515  ;;  %v2971_v33 = vsel %vm87_vm0, %v2347_v5, %v7513_v1  ;;  %v2970_v55 = vsel %vm87_vm0, %v2346_v61, %v7512_v12  ;;  %v3004_v61 = vsel %vm1819_vm9, %v2988_v6, %v7427_v48  ;;  %v7457_v6 = vunpack.i.l.bf16 %v10927_v11 }
 0x563   :  { %v7518_v57 = vunpack.i.h.bf16 %v7516_v51  ;;  %v7517_v63 = vunpack.i.l.bf16 %v7516_v51  ;;  %v7438_v48 = vunpack.i.h.bf16 %v10913_v53 }
 0x564   :  { %v7526_v27 = vpop.permute.xlu1 %7525 }
 0x565   :  { %v7528_v29 = vunpack.i.h.bf16 %v7526_v27  ;;  %v7527_v36 = vunpack.i.l.bf16 %v7526_v27  ;;  %v2986_v45 = vsel %vm1785_vm7, %v2970_v55, %v7517_v63  ;;  %v2987_v31 = vsel %vm1785_vm7, %v2971_v33, %v7518_v57 }
 0x566   :  { %v10975_v5 = vpop.permute.xlu0 %7520  ;;  %v7417_v27 = vunpack.i.l.bf16 %v10901_v58  ;;  %v7437_v57 = vunpack.i.l.bf16 %v10913_v53  ;;  %v7407_v63 = vunpack.i.l.bf16 %v10878_v15  ;;  %v2989_v58 = vsel %vm1785_vm7, %v2973_v16, %v7423_v44 }
 0x567   :  { %v3002_v4 = vsel %vm1819_vm9, %v2986_v45, %v7527_v36  ;;  %v3003_v1 = vsel %vm1819_vm9, %v2987_v31, %v7528_v29  ;;  %v7428_v55 = vunpack.i.h.bf16 %v10911_v30  ;;  %v15191_v29 = vld [vmem:[#allocation159_spill] sm:$0xff]  ;;  %v7448_v53 = vunpack.i.h.bf16 %v10923_v38  ;;  %v15194_v38 = vld [vmem:[#allocation132_spill] sm:$0xff] }
 0x568   :  { %v3018_v12 = vsel %vm1853_vm11, %v3002_v4, %v7392_v49  ;;  %v10980_v43 = vpop.permute.xlu1 %7530  ;;  %v3019_v33 = vsel %vm1853_vm11, %v3003_v1, %v7393_v25  ;;  %v15192_v25 = vld [vmem:[#allocation177_spill] sm:$0xff]  ;;  %v7458_v4 = vunpack.i.h.bf16 %v10927_v11  ;;  %v3020_v30 = vsel %vm1853_vm11, %v3004_v61, %v7407_v63 }
 0x569   :  { %v3035_v51 = vsel %vm3034_vm2, %v3018_v12, %v7412_v39  ;;  %v3036_v31 = vsel %vm3034_vm2, %v3019_v33, %v7413_v42  ;;  %v2351_v36 = vmul.f32 %v15192_v25, %v15191_v29  ;;  %v7398_v42 = vunpack.i.h.bf16 %v10844_v3  ;;  %v15286_v29 = vld [vmem:[#allocation23_spill] sm:$0xff] }
 0x56a   :  { %v3052_v49 = vsel %vm14565_vm13, %v3035_v51, %v7417_v27  ;;  %v10995_v45 = vpop.permute.xlu0 %7535  ;;  %v3053_v44 = vsel %vm14565_vm13, %v3036_v31, %v7418_v35  ;;  %v3005_v1 = vsel %vm1819_vm9, %v2989_v58, %v7428_v55  ;;  %v2974_v27 = vsel %vm87_vm0, %v2350_v50, %v7437_v57  ;;  %v15193_v57 = vld [vmem:[#allocation46_spill] sm:$0xff] }
 0x56b   :  { %v3069_v39 = vsel %vm14564_vm14, %v3052_v49, %v7397_v9  ;;  %v3037_v9 = vsel %vm3034_vm2, %v3020_v30, %v7447_v14  ;;  %v7408_v3 = vunpack.i.h.bf16 %v10878_v15  ;;  %v7452_v11 = vunpack.i.l.bf16 %v10917_v34 }
 0x56c   :  { %v11000_v16 = vpop.permute.xlu1 %7540  ;;  %3416 = vmatmul.mubr.f32.vlgmr.msra.gmra.mrb[16].mxu0 %v3069_v39  ;;  %v2990_v12 = vsel %vm1785_vm7, %v2974_v27, %v7457_v6  ;;  %v2975_v35 = vsel %vm87_vm0, %v2351_v36, %v7438_v48  ;;  %v7462_v61 = vunpack.i.l.bf16 %v10921_v18  ;;  %v3070_v50 = vsel %vm14564_vm14, %v3053_v44, %v7398_v42  ;;  %v15195_v48 = vld [vmem:[#allocation54_spill] sm:$0xff] }
 0x56d   :  { %6615 = vmatprep.mubr.msk.f32.mxu0 %vm87_vm0, %v2507_v10  ;;  %v2508_v51 = vmul.f32 %v15194_v38, %v15193_v57  ;;  %v7432_v10 = vunpack.i.l.bf16 %v10915_v56  ;;  %v2991_v14 = vsel %vm1785_vm7, %v2975_v35, %v7458_v4  ;;  %v3054_v31 = vsel %vm14565_vm13, %v3037_v9, %v7452_v11  ;;  %v15196_v39 = vld [vmem:[#allocation106_spill] sm:$0xff]  ;;  %v15198_v35 = vld [vmem:[#allocation179_spill] sm:$0xff] }
 0x56e   :  { %v11014_v33 = vpop.permute.xlu0 %7545  ;;  %v3021_v63 = vsel %vm1853_vm11, %v3005_v1, %v7408_v3  ;;  %v7463_v58 = vunpack.i.h.bf16 %v10921_v18  ;;  %v3006_v6 = vsel %vm1819_vm9, %v2990_v12, %v7462_v61  ;;  %v7482_v49 = vunpack.i.l.bf16 %v10933_v47  ;;  %v15197_v12 = vld [vmem:[#allocation117_spill] sm:$0xff]  ;;  %v15200_v38 = vld [vmem:[#allocation111_spill] sm:$0xff] }
 0x56f   :  { %v3038_v55 = vsel %vm3034_vm2, %v3021_v63, %v7448_v53  ;;  %v7442_v25 = vunpack.i.l.bf16 %v10919_v41  ;;  %v7453_v36 = vunpack.i.h.bf16 %v10917_v34  ;;  %v2509_v42 = vmul.f32 %v15196_v39, %v15195_v48  ;;  %v15203_v39 = vld [vmem:[#allocation182_spill] sm:$0xff] }
 0x570   :  { %v11021_v15 = vpop.permute.xlu1 %7550  ;;  %3421 = vmatmul.mubr.f32.gmra.mrb[18].mxu0 %v3070_v50  ;;  %v3007_v4 = vsel %vm1819_vm9, %v2991_v14, %v7463_v58  ;;  %v7472_v44 = vunpack.i.l.bf16 %v10931_v26  ;;  %v7483_v18 = vunpack.i.h.bf16 %v10933_v47  ;;  %v3071_v1 = vsel %vm14564_vm14, %v3054_v31, %v7432_v10  ;;  %v15199_v50 = vld [vmem:[#allocation175_spill] sm:$0xff] }
 0x571   :  { %6616 = vmatprep.mubr.msk.f32.mxu0 %vm87_vm0, %v2508_v51  ;;  %v7443_v27 = vunpack.i.h.bf16 %v10919_v41  ;;  %v7492_v53 = vunpack.i.l.bf16 %v10937_v8  ;;  %v3055_v34 = vsel %vm14565_vm13, %v3038_v55, %v7453_v36  ;;  %v3022_v3 = vsel %vm1853_vm11, %v3006_v6, %v7442_v25  ;;  %v15202_v6 = vld [vmem:[#allocation181_spill] sm:$0xff] }
 0x572   :  { %v11037_v30 = vpop.permute.xlu0 %7555  ;;  %v7433_v11 = vunpack.i.h.bf16 %v10915_v56  ;;  %v2352_v47 = vmul.f32 %v15198_v35, %v15197_v12  ;;  %v7473_v61 = vunpack.i.h.bf16 %v10931_v26  ;;  %v3039_v41 = vsel %vm3034_vm2, %v3022_v3, %v7482_v49  ;;  %v15201_v26 = vld [vmem:[#allocation69_spill] sm:$0xff] }
 0x573   :  { %v2353_v51 = vmul.f32 %v15200_v38, %v15199_v50  ;;  %v7487_v10 = vunpack.i.l.bf16 %v10935_v21  ;;  %v7493_v14 = vunpack.i.h.bf16 %v10937_v8  ;;  %v3023_v31 = vsel %vm1853_vm11, %v3007_v4, %v7443_v27  ;;  %v15207_v35 = vld [vmem:[#allocation129_spill] sm:$0xff] }
 0x574   :  { %v11042_v9 = vpop.permute.xlu1 %7560  ;;  %3426 = vmatmul.mubr.f32.gmra.mrb[20].mxu0 %v3071_v1  ;;  %v2976_v56 = vsel %vm87_vm0, %v2352_v47, %v7472_v44  ;;  %v3072_v58 = vsel %vm14564_vm14, %v3055_v34, %v7433_v11  ;;  %v2510_v55 = vmul.f32 %v15202_v6, %v15201_v26  ;;  %v3040_v49 = vsel %vm3034_vm2, %v3023_v31, %v7483_v18  ;;  %v15205_v18 = vld [vmem:[#allocation49_spill] sm:$0xff]  ;;  %v15208_v47 = vld [vmem:[#allocation184_spill] sm:$0xff] }
 0x575   :  { %6617 = vmatprep.mubr.msk.f32.mxu0 %vm87_vm0, %v2509_v42  ;;  %v7488_v25 = vunpack.i.h.bf16 %v10935_v21  ;;  %v2992_v36 = vsel %vm1785_vm7, %v2976_v56, %v7492_v53  ;;  %v15204_v42 = vld [vmem:[#allocation112_spill] sm:$0xff]  ;;  %v3056_v4 = vsel %vm14565_vm13, %v3039_v41, %v7487_v10  ;;  %v2977_v44 = vsel %vm87_vm0, %v2353_v51, %v7473_v61 }
 0x576   :  { %v11058_v63 = vpop.permute.xlu0 %7565  ;;  %v2354_v8 = vmul.f32 %v15204_v42, %v15203_v39  ;;  %v7467_v27 = vunpack.i.l.bf16 %v10925_v24  ;;  %v7497_v34 = vunpack.i.l.bf16 %v10939_v13  ;;  %v15206_v21 = vld [vmem:[#allocation120_spill] sm:$0xff]  ;;  %v7498_v53 = vunpack.i.h.bf16 %v10939_v13 }
 0x577   :  { %v2511_v3 = vmul.f32 %v15206_v21, %v15205_v18  ;;  %v2993_v11 = vsel %vm1785_vm7, %v2977_v44, %v7493_v14  ;;  %v2355_v38 = vmul.f32 %v15208_v47, %v15207_v35  ;;  %v3057_v41 = vsel %vm14565_vm13, %v3040_v49, %v7488_v25  ;;  %v15210_v49 = vld [vmem:[#allocation121_spill] sm:$0xff] }
 0x578   :  { %v11068_v1 = vpop.permute.xlu1 %7570  ;;  %3431 = vmatmul.mubr.f32.gmra.mrb[22].mxu0 %v3072_v58  ;;  %v3008_v61 = vsel %vm1819_vm9, %v2992_v36, %v7497_v34  ;;  %v7502_v51 = vunpack.i.l.bf16 %v10945_v7  ;;  %v7532_v10 = vunpack.i.l.bf16 %v10980_v43  ;;  %v3073_v56 = vsel %vm14564_vm14, %v3056_v4, %v7467_v27 }
 0x579   :  { %6618 = vmatprep.mubr.msk.f32.mxu0 %vm87_vm0, %v2510_v55  ;;  %v7468_v58 = vunpack.i.h.bf16 %v10925_v24  ;;  %v7477_v13 = vunpack.i.l.bf16 %v10929_v19  ;;  %v7537_v14 = vunpack.i.l.bf16 %v10995_v45  ;;  %v15209_v55 = vld [vmem:[#allocation87_spill] sm:$0xff]  ;;  %v7478_v36 = vunpack.i.h.bf16 %v10929_v19 }
 0x57a   :  { %v11085_v31 = vpop.permute.xlu0 %7575  ;;  %v2512_v25 = vmul.f32 %v15210_v49, %v15209_v55  ;;  %v3009_v42 = vsel %vm1819_vm9, %v2993_v11, %v7498_v53  ;;  %v7503_v44 = vunpack.i.h.bf16 %v10945_v7  ;;  %v7533_v4 = vunpack.i.h.bf16 %v10980_v43 }
 0x57b   :  { %v7507_v24 = vunpack.i.l.bf16 %v10941_v52  ;;  %v7538_v27 = vunpack.i.h.bf16 %v10995_v45  ;;  %v3074_v34 = vsel %vm14564_vm14, %v3057_v41, %v7468_v58  ;;  %v3024_v21 = vsel %vm1853_vm11, %v3008_v61, %v7477_v13  ;;  %v15211_v45 = vld [vmem:[#allocation101_spill] sm:$0xff] }
 0x57c   :  { %v11091_v6 = vpop.permute.xlu1 %7580  ;;  %3436 = vmatmul.mubr.f32.gmra.mrb[24].mxu0 %v3073_v56  ;;  %v7522_v47 = vunpack.i.l.bf16 %v10975_v5  ;;  %v2978_v19 = vsel %vm87_vm0, %v2354_v8, %v7532_v10  ;;  %v7542_v53 = vunpack.i.l.bf16 %v11000_v16  ;;  %v3041_v7 = vsel %vm3034_vm2, %v3024_v21, %v7502_v51  ;;  %v15212_v41 = vld [vmem:[#allocation185_spill] sm:$0xff] }
 0x57d   :  { %6619 = vmatprep.mubr.msk.f32.mxu0 %vm87_vm0, %v2511_v3  ;;  %v2994_v43 = vsel %vm1785_vm7, %v2978_v19, %v7537_v14  ;;  %v7547_v3 = vunpack.i.l.bf16 %v11014_v33  ;;  %v2513_v61 = vmul.f32 %v15212_v41, %v15211_v45  ;;  %v3025_v58 = vsel %vm1853_vm11, %v3009_v42, %v7478_v36  ;;  %v15216_v19 = vld [vmem:[#allocation188_spill] sm:$0xff]  ;;  %v15218_v41 = vld [vmem:[#allocation187_spill] sm:$0xff] }
 0x57e   :  { %v11107_v11 = vpop.permute.xlu0 %7585  ;;  %v7508_v8 = vunpack.i.h.bf16 %v10941_v52  ;;  %v2979_v10 = vsel %vm87_vm0, %v2355_v38, %v7533_v4  ;;  %v7543_v13 = vunpack.i.h.bf16 %v11000_v16  ;;  %v3042_v51 = vsel %vm3034_vm2, %v3025_v58, %v7503_v44  ;;  %v15213_v44 = vld [vmem:[#allocation164_spill] sm:$0xff]  ;;  %v15214_v4 = vld [vmem:[#allocation186_spill] sm:$0xff] }
 0x57f   :  { %v7523_v14 = vunpack.i.h.bf16 %v10975_v5  ;;  %v2995_v49 = vsel %vm1785_vm7, %v2979_v10, %v7538_v27  ;;  %v3058_v21 = vsel %vm14565_vm13, %v3041_v7, %v7507_v24  ;;  %v3010_v36 = vsel %vm1819_vm9, %v2994_v43, %v7542_v53 }
 0x580   :  { %v11112_v56 = vpop.permute.xlu1 %7590  ;;  %3441 = vmatmul.mubr.f32.gmra.mrb[26].mxu0 %v3074_v34  ;;  %v7548_v34 = vunpack.i.h.bf16 %v11014_v33  ;;  %v7552_v52 = vunpack.i.l.bf16 %v11021_v15  ;;  %v7567_v38 = vunpack.i.l.bf16 %v11058_v63  ;;  %v3075_v16 = vsel %vm14564_vm14, %v3058_v21, %v7522_v47  ;;  %v15215_v33 = vld [vmem:[#allocation178_spill] sm:$0xff] }
 0x581   :  { %6620 = vmatprep.mubr.msk.f32.mxu0 %vm87_vm0, %v2512_v25  ;;  %v3026_v25 = vsel %vm1853_vm11, %v3010_v36, %v7547_v3  ;;  %v7557_v5 = vunpack.i.l.bf16 %v11037_v30  ;;  %v2356_v27 = vmul.f32 %v15214_v4, %v15213_v44  ;;  %v2357_v24 = vmul.f32 %v15216_v19, %v15215_v33  ;;  %v15217_v3 = vld [vmem:[#allocation51_spill] sm:$0xff] }
 0x582   :  { %v11129_v42 = vpop.permute.xlu0 %7595  ;;  %v3011_v53 = vsel %vm1819_vm9, %v2995_v49, %v7543_v13  ;;  %v7568_v43 = vunpack.i.h.bf16 %v11058_v63  ;;  %v3059_v47 = vsel %vm14565_vm13, %v3042_v51, %v7508_v8  ;;  %v2514_v58 = vmul.f32 %v15218_v41, %v15217_v3  ;;  %v15221_v41 = vld [vmem:[#allocation126_spill] sm:$0xff] }
 0x583   :  { %v3027_v10 = vsel %vm1853_vm11, %v3011_v53, %v7548_v34  ;;  %v7553_v21 = vunpack.i.h.bf16 %v11021_v15  ;;  %v7572_v36 = vunpack.i.l.bf16 %v11068_v1  ;;  %v3076_v4 = vsel %vm14564_vm14, %v3059_v47, %v7523_v14 }
 0x584   :  { %v11138_v7 = vpop.permute.xlu1 %7600  ;;  %3446 = vmatmul.mubr.f32.gmra.mrb[28].mxu0 %v3075_v16  ;;  %v7562_v16 = vunpack.i.l.bf16 %v11042_v9  ;;  %v2980_v13 = vsel %vm87_vm0, %v2356_v27, %v7567_v38  ;;  %v7577_v63 = vunpack.i.l.bf16 %v11085_v31  ;;  %v3043_v8 = vsel %vm3034_vm2, %v3026_v25, %v7552_v52  ;;  %v15219_v52 = vld [vmem:[#allocation141_spill] sm:$0xff] }
 0x585   :  { %6621 = vmatprep.mubr.msk.f32.mxu0 %vm87_vm0, %v2513_v61  ;;  %v7558_v51 = vunpack.i.h.bf16 %v11037_v30  ;;  %v7573_v49 = vunpack.i.h.bf16 %v11068_v1  ;;  %v3060_v15 = vsel %vm14565_vm13, %v3043_v8, %v7557_v5  ;;  %v2981_v14 = vsel %vm87_vm0, %v2357_v24, %v7568_v43  ;;  %v15220_v25 = vld [vmem:[#allocation189_spill] sm:$0xff] }
 0x586   :  { %v7606_v61 = vpop.permute.xlu0 %7605  ;;  %v7578_v19 = vunpack.i.h.bf16 %v11085_v31  ;;  %v2996_v38 = vsel %vm1785_vm7, %v2980_v13, %v7572_v36  ;;  %v7582_v27 = vunpack.i.l.bf16 %v11091_v6  ;;  %v2515_v30 = vmul.f32 %v15220_v25, %v15219_v52 }
 0x587   :  { %v3044_v1 = vsel %vm3034_vm2, %v3027_v10, %v7553_v21  ;;  %v7563_v53 = vunpack.i.h.bf16 %v11042_v9  ;;  %v3012_v47 = vsel %vm1819_vm9, %v2996_v38, %v7577_v63  ;;  %v7587_v5 = vunpack.i.l.bf16 %v11107_v11  ;;  %v15223_v63 = vld [vmem:[#allocation150_spill] sm:$0xff] }
 0x588   :  { %v11156_v34 = vpop.permute.xlu1 %7610  ;;  %3451 = vmatmul.mubr.f32.gmra.mrb[30].mxu0 %v3076_v4  ;;  %v3077_v31 = vsel %vm14564_vm14, %v3060_v15, %v7562_v16  ;;  %v2997_v43 = vsel %vm1785_vm7, %v2981_v14, %v7573_v49  ;;  %v3061_v13 = vsel %vm14565_vm13, %v3044_v1, %v7558_v51  ;;  %v7583_v9 = vunpack.i.h.bf16 %v11091_v6  ;;  %v15224_v16 = vld [vmem:[#allocation193_spill] sm:$0xff] }
 0x589   :  { %6622 = vmatprep.mubr.msk.f32.mxu0 %vm87_vm0, %v2514_v58  ;;  %v15222_v58 = vld [vmem:[#allocation190_spill] sm:$0xff]  ;;  %v3013_v10 = vsel %vm1819_vm9, %v2997_v43, %v7578_v19  ;;  %v7602_v21 = vunpack.i.l.bf16 %v11138_v7  ;;  %v2516_v8 = vmul.f32 %v15224_v16, %v15223_v63  ;;  %v3028_v49 = vsel %vm1853_vm11, %v3012_v47, %v7582_v27 }
 0x58a   :  { %v7616_v24 = vpop.permute.xlu0 %7615  ;;  %v2358_v36 = vmul.f32 %v15222_v58, %v15221_v41  ;;  %v7588_v15 = vunpack.i.h.bf16 %v11107_v11  ;;  %v7592_v14 = vunpack.i.l.bf16 %v11112_v56  ;;  %v7607_v38 = vunpack.i.l.bf16 %v7606_v61  ;;  %v15227_v11 = vld [vmem:[#allocation53_spill] sm:$0xff] }
 0x58b   :  { %v7597_v51 = vunpack.i.l.bf16 %v11129_v42  ;;  %v7603_v19 = vunpack.i.h.bf16 %v11138_v7  ;;  %v3078_v6 = vsel %vm14564_vm14, %v3061_v13, %v7563_v53  ;;  %v3045_v1 = vsel %vm3034_vm2, %v3028_v49, %v7587_v5 }
 0x58c   :  { %v11174_v4 = vpop.permute.xlu1 %7620  ;;  %3456 = vmatmul.mubr.f32.gmra.mrb[32].mxu0 %v3077_v31  ;;  %v15226_v31 = vld [vmem:[#allocation194_spill] sm:$0xff]  ;;  %v7608_v58 = vunpack.i.h.bf16 %v7606_v61  ;;  %v2517_v27 = vmul.f32 %v10445_v17, %v15227_v11  ;;  %v3029_v47 = vsel %vm1853_vm11, %v3013_v10, %v7583_v9  ;;  %v7593_v33 = vunpack.i.h.bf16 %v11112_v56 }
 0x58d   :  { %6623 = vmatprep.mubr.msk.f32.mxu0 %vm87_vm0, %v2515_v30  ;;  %v15225_v30 = vld [vmem:[#allocation183_spill] sm:$0xff]  ;;  %v2982_v7 = vsel %vm87_vm0, %v2358_v36, %v7602_v21  ;;  %v7612_v53 = vunpack.i.l.bf16 %v11156_v34  ;;  %v7617_v13 = vunpack.i.l.bf16 %v7616_v24  ;;  %v3062_v61 = vsel %vm14565_vm13, %v3045_v1, %v7592_v14 }
 0x58e   :  { %v7626_v25 = vpop.permute.xlu0 %7625  ;;  %v2359_v43 = vmul.f32 %v15226_v31, %v15225_v30  ;;  %v2998_v5 = vsel %vm1785_vm7, %v2982_v7, %v7607_v38  ;;  %v3046_v49 = vsel %vm3034_vm2, %v3029_v47, %v7588_v15  ;;  %v7613_v10 = vunpack.i.h.bf16 %v11156_v34  ;;  %v15228_v15 = vld [vmem:[#allocation10_spill] sm:$0xff] }
 0x58f   :  { %v3079_v36 = vsel %vm14564_vm14, %v3062_v61, %v7597_v51  ;;  %v7618_v21 = vunpack.i.h.bf16 %v7616_v24  ;;  %v3014_v38 = vsel %vm1819_vm9, %v2998_v5, %v7612_v53  ;;  %v7627_v34 = vunpack.i.l.bf16 %v7626_v25  ;;  %v15231_v61 = vld [vmem:[#allocation195_spill] sm:$0xff] }
 0x590   :  { %v11192_v16 = vpop.permute.xlu1 %7630  ;;  %3461 = vmatmul.mubr.f32.gmra.mrb[34].mxu0 %v3078_v6  ;;  %v7598_v6 = vunpack.i.h.bf16 %v11129_v42  ;;  %v2983_v17 = vsel %vm87_vm0, %v2359_v43, %v7603_v19  ;;  %v15229_v42 = vld [vmem:[#allocation200_spill] sm:$0xff]  ;;  %v3030_v19 = vsel %vm1853_vm11, %v3014_v38, %v7617_v13  ;;  %v3063_v51 = vsel %vm14565_vm13, %v3046_v49, %v7593_v33 }
 0x591   :  { %6624 = vmatprep.mubr.msk.f32.mxu0 %vm87_vm0, %v2516_v8  ;;  %v2999_v9 = vsel %vm1785_vm7, %v2983_v17, %v7608_v58  ;;  %v2518_v1 = vmul.f32 %v15229_v42, %v15228_v15  ;;  %v7628_v24 = vunpack.i.h.bf16 %v7626_v25  ;;  %v7622_v49 = vunpack.i.l.bf16 %v11174_v4  ;;  %v15234_v42 = vld [vmem:[#allocation165_spill] sm:$0xff] }
 0x592   :  { %v7641_v56 = vpop.permute.xlu0 %7640  ;;  %v3015_v58 = vsel %vm1819_vm9, %v2999_v9, %v7613_v10  ;;  %v3080_v7 = vsel %vm14564_vm14, %v3063_v51, %v7598_v6 }
 0x593   :  { %v7642_v43 = vunpack.i.l.bf16 %v7641_v56  ;;  %v3031_v5 = vsel %vm1853_vm11, %v3015_v58, %v7618_v21  ;;  %v7643_v21 = vunpack.i.h.bf16 %v7641_v56  ;;  %v7632_v58 = vunpack.i.l.bf16 %v11192_v16 }
 0x594   :  { %v7636_v8 = vpop.permute.xlu1 %7635  ;;  %3466 = vmatmul.mubr.f32.gmra.mrb[36].mxu0 %v3079_v36  ;;  %v15232_v36 = vld [vmem:[#allocation95_spill] sm:$0xff] }
 0x595   :  { %v7638_v31 = vunpack.i.h.bf16 %v7636_v8  ;;  %v7637_v14 = vunpack.i.l.bf16 %v7636_v8  ;;  %6625 = vmatprep.mubr.msk.f32.mxu0 %vm87_vm0, %v2517_v27  ;;  %v15230_v27 = vld [vmem:[#allocation166_spill] sm:$0xff]  ;;  %v15233_v8 = vld [vmem:[#allocation199_spill] sm:$0xff] }
 0x596   :  { %v7651_v47 = vpop.permute.xlu0 %7650  ;;  %v2360_v17 = vmul.f32 %v15231_v61, %v15230_v27  ;;  %v2361_v13 = vmul.f32 %v15233_v8, %v15232_v36 }
 0x597   :  { %v3047_v53 = vsel %vm3034_vm2, %v3030_v19, %v7637_v14  ;;  %v3048_v6 = vsel %vm3034_vm2, %v3031_v5, %v7638_v31  ;;  %v7652_v14 = vunpack.i.l.bf16 %v7651_v47  ;;  %v2519_v19 = vmul.f32 %v10590_v20, %v15234_v42  ;;  %v15298_v42 = vld [vmem:[#allocation19_spill] sm:$0xff] }
 0x598   :  { %v7646_v38 = vpop.permute.xlu1 %7645  ;;  %3471 = vmatmul.mubr.f32.gmra.mrb[38].mxu0 %v3080_v7  ;;  %v3064_v33 = vsel %vm14565_vm13, %v3047_v53, %v7642_v43  ;;  %v2984_v9 = vsel %vm87_vm0, %v2360_v17, %v7627_v34  ;;  %v2985_v51 = vsel %vm87_vm0, %v2361_v13, %v7628_v24  ;;  %v3065_v56 = vsel %vm14565_vm13, %v3048_v6, %v7643_v21  ;;  %v15236_v21 = vld [vmem:[#allocation171_spill] sm:$0xff] }
 0x599   :  { %v7648_v25 = vunpack.i.h.bf16 %v7646_v38  ;;  %v7647_v10 = vunpack.i.l.bf16 %v7646_v38  ;;  %6626 = vmatprep.mubr.msk.f32.mxu0 %vm87_vm0, %v2518_v1  ;;  %v3081_v53 = vsel %vm14564_vm14, %v3064_v33, %v7622_v49  ;;  %v7623_v34 = vunpack.i.h.bf16 %v11174_v4  ;;  %v15235_v38 = vld [vmem:[#allocation169_spill] sm:$0xff] }
 0x59a   :  { %v2823_v7 = vpop.permute.xlu0 %2822  ;;  %v7653_v20 = vunpack.i.h.bf16 %v7651_v47  ;;  %v2520_v33 = vmul.f32 %v10528_v28, %v15235_v38  ;;  %v7633_v49 = vunpack.i.h.bf16 %v11192_v16  ;;  %v15292_v38 = vld [vmem:[#allocation45_spill] sm:$0xff] }
 0x59b   :  { %v3000_v43 = vsel %vm1785_vm7, %v2984_v9, %v7647_v10  ;;  %v3001_v1 = vsel %vm1785_vm7, %v2985_v51, %v7648_v25  ;;  %v3082_v13 = vsel %vm14564_vm14, %v3065_v56, %v7623_v34 }
 0x59c   :  { %v3016_v31 = vsel %vm1819_vm9, %v3000_v43, %v7652_v14  ;;  %v2887_v5 = vpop.permute.xlu1 %2886  ;;  %3476 = vmatmul.mubr.f32.gmra.mrb[40].mxu0 %v3081_v53  ;;  %v3017_v8 = vsel %vm1819_vm9, %v3001_v1, %v7653_v20  ;;  %v15237_v14 = vld [vmem:[#allocation180_spill] sm:$0xff] }
 0x59d   :  { %v3032_v24 = vsel %vm1853_vm11, %v3016_v31, %v7632_v58  ;;  %6627 = vmatprep.mubr.msk.f32.mxu0 %vm87_vm0, %v2519_v19  ;;  %v3033_v47 = vsel %vm1853_vm11, %v3017_v8, %v7633_v49  ;;  %v2521_v19 = vmul.f32 %v15237_v14, %v15236_v21  ;;  %v15293_v21 = vld [vmem:[#allocation60_spill] sm:$0xff] }
 0x59e   :  { %v3049_v61 = vsel %vm3034_vm2, %v3032_v24, %v2823_v7  ;;  %v2951_v17 = vpop.permute.xlu0 %2950 }
 0x59f   :  { %v3066_v25 = vsel %vm14565_vm13, %v3049_v61, %v2887_v5 }
 0x5a0   :  { %v2825_v4 = vpop.permute.xlu1 %2824  ;;  %3481 = vmatmul.mubr.f32.gmra.mrb[42].mxu0 %v3082_v13  ;;  %v3083_v9 = vsel %vm14564_vm14, %v3066_v25, %v2951_v17  ;;  %v11267_v25 = vld [vmem:[%s14195_s8] ss:$0 sm:$0xff] }
 0x5a1   :  { %6628 = vmatprep.mubr.msk.f32.mxu0 %vm87_vm0, %v2520_v33  ;;  %v3050_v10 = vsel %vm3034_vm2, %v3033_v47, %v2825_v4 }
 0x5a2   :  { %v2889_v6 = vpop.permute.xlu0 %2888 }
 0x5a3   :  { %v3067_v28 = vsel %vm14565_vm13, %v3050_v10, %v2889_v6 }
 0x5a4   :  { %v2953_v51 = vpop.permute.xlu1 %2952  ;;  %3486 = vmatmul.mubr.f32.gmra.mrb[44].mxu0 %v3083_v9 }
 0x5a5   :  { %6629 = vmatprep.mubr.msk.f32.mxu0 %vm87_vm0, %v2521_v19  ;;  %v3084_v16 = vsel %vm14564_vm14, %v3067_v28, %v2953_v51 }
 0x5a8   :  { %3491 = vmatmul.mubr.f32.gmra.mrb[46].mxu0 %v3084_v16 }
 0x5cb   :  { %v7013_v58 = vpop.f32.mrb[32].mxu1 }
 0x5cc   :  { %v3224_v43 = vpop.f32.mrb[33].mxu1 }
 0x5cf   :  { %v7016_v7 = vpop.f32.mrb[34].mxu1 }
 0x5d0   :  { %v3234_v53 = vpop.f32.mrb[35].mxu1 }
 0x5d3   :  { %v7019_v1 = vpop.f32.mrb[36].mxu1 }
 0x5d4   :  { %v3244_v31 = vpop.f32.mrb[37].mxu1 }
 0x5d7   :  { %v7022_v5 = vpop.f32.mrb[38].mxu1 }
 0x5d8   :  { %v3254_v56 = vpop.f32.mrb[39].mxu1 }
 0x5db   :  { %v7025_v34 = vpop.f32.mrb[40].mxu1 }
 0x5dc   :  { %v3264_v20 = vpop.f32.mrb[41].mxu1 }
 0x5df   :  { %v7028_v24 = vpop.f32.mrb[42].mxu1 }
 0x5e0   :  { %v3274_v61 = vpop.f32.mrb[43].mxu1 }
 0x5e3   :  { %v11256_v17 = vpop.f32.mrb[44].mxu1 }
 0x5e4   :  { %v11258_v8 = vpop.f32.mrb[45].mxu1 }
 0x5e7   :  { %v11260_v13 = vpop.f32.mrb[46].mxu1 }
 0x5e8   :  { %v11262_v33 = vpop.f32.mrb[47].mxu1 }
 0x63f   :  { %v3417_v49 = vpop.f32.mrb[16].mxu0 }
 0x640   :  { %v3418_v4 = vadd.f32 %v3417_v49, %v3224_v43  ;;  %v3419_v47 = vpop.f32.mrb[17].mxu0 }
 0x642   :  { %v3503_v10 = vadd.f32 %v11267_v25, %v3418_v4 }
 0x643   :  { %v3422_v6 = vpop.f32.mrb[18].mxu0 }
 0x644   :  { %v3423_v9 = vadd.f32 %v7013_v58, %v3422_v6  ;;  %v3424_v14 = vpop.f32.mrb[19].mxu0  ;;  %3535 = vrot.lane.b32.xlu0 %v3503_v10, %s8014_s27 }
 0x646   :  { %v3504_v19 = vadd.f32 %v11267_v25, %v3423_v9 }
 0x647   :  { %v3427_v28 = vpop.f32.mrb[20].mxu0 }
 0x648   :  { %v3428_v51 = vadd.f32 %v3427_v28, %v3234_v53  ;;  %v3429_v16 = vpop.f32.mrb[21].mxu0  ;;  %3537 = vrot.lane.b32.xlu1 %v3504_v19, %s8014_s27 }
 0x64a   :  { %v3505_v27 = vadd.f32 %v11267_v25, %v3428_v51 }
 0x64b   :  { %v3432_v36 = vpop.f32.mrb[22].mxu0 }
 0x64c   :  { %v3433_v30 = vadd.f32 %v7016_v7, %v3432_v36  ;;  %v3434_v43 = vpop.f32.mrb[23].mxu0  ;;  %3539 = vrot.lane.b32.xlu0 %v3505_v27, %s8014_s27 }
 0x64e   :  { %v3506_v49 = vadd.f32 %v11267_v25, %v3433_v30 }
 0x64f   :  { %v3437_v58 = vpop.f32.mrb[24].mxu0 }
 0x650   :  { %v3438_v4 = vadd.f32 %v3437_v58, %v3244_v31  ;;  %v3439_v47 = vpop.f32.mrb[25].mxu0  ;;  %3541 = vrot.lane.b32.xlu1 %v3506_v49, %s8014_s27 }
 0x652   :  { %v3507_v10 = vadd.f32 %v11267_v25, %v3438_v4 }
 0x653   :  { %v3442_v53 = vpop.f32.mrb[26].mxu0 }
 0x654   :  { %v3443_v6 = vadd.f32 %v7019_v1, %v3442_v53  ;;  %v3444_v9 = vpop.f32.mrb[27].mxu0  ;;  %3543 = vrot.lane.b32.xlu0 %v3507_v10, %s8014_s27 }
 0x656   :  { %v3508_v14 = vadd.f32 %v11267_v25, %v3443_v6 }
 0x657   :  { %v3447_v36 = vpop.f32.mrb[28].mxu0 }
 0x658   :  { %v3448_v7 = vadd.f32 %v3447_v36, %v3254_v56  ;;  %v3449_v19 = vpop.f32.mrb[29].mxu0  ;;  %3545 = vrot.lane.b32.xlu1 %v3508_v14, %s8014_s27 }
 0x65a   :  { %v3509_v30 = vadd.f32 %v11267_v25, %v3448_v7 }
 0x65b   :  { %v3452_v27 = vpop.f32.mrb[30].mxu0 }
 0x65c   :  { %v3453_v31 = vadd.f32 %v7022_v5, %v3452_v27  ;;  %v3454_v28 = vpop.f32.mrb[31].mxu0  ;;  %3547 = vrot.lane.b32.xlu0 %v3509_v30, %s8014_s27 }
 0x65e   :  { %v3510_v51 = vadd.f32 %v11267_v25, %v3453_v31 }
 0x65f   :  { %v3457_v1 = vpop.f32.mrb[32].mxu0 }
 0x660   :  { %v3458_v16 = vadd.f32 %v3457_v1, %v3264_v20  ;;  %v3459_v43 = vpop.f32.mrb[33].mxu0  ;;  %3549 = vrot.lane.b32.xlu1 %v3510_v51, %s8014_s27 }
 0x662   :  { %v3511_v49 = vadd.f32 %v11267_v25, %v3458_v16 }
 0x663   :  { %v3462_v56 = vpop.f32.mrb[34].mxu0 }
 0x664   :  { %v3463_v58 = vadd.f32 %v7025_v34, %v3462_v56  ;;  %v3464_v4 = vpop.f32.mrb[35].mxu0  ;;  %3551 = vrot.lane.b32.xlu0 %v3511_v49, %s8014_s27  ;;  %v6631_v56 = vld [vmem:[%s14189_s2 + $0x10] sm:$0xff] }
 0x666   :  { %v3512_v47 = vadd.f32 %v11267_v25, %v3463_v58 }
 0x667   :  { %v3467_v5 = vpop.f32.mrb[36].mxu0 }
 0x668   :  { %v3468_v10 = vadd.f32 %v3467_v5, %v3274_v61  ;;  %v3469_v53 = vpop.f32.mrb[37].mxu0  ;;  %3553 = vrot.lane.b32.xlu1 %v3512_v47, %s8014_s27 }
 0x66a   :  { %v3513_v6 = vadd.f32 %v11267_v25, %v3468_v10  ;;  %v15239_v10 = vld [vmem:[#allocation91_spill] sm:$0xff] }
 0x66b   :  { %v3472_v20 = vpop.f32.mrb[38].mxu0 }
 0x66c   :  { %v3473_v9 = vadd.f32 %v7028_v24, %v3472_v20  ;;  %v3474_v14 = vpop.f32.mrb[39].mxu0  ;;  %3555 = vrot.lane.b32.xlu0 %v3513_v6, %s8014_s27 }
 0x66e   :  { %v3514_v36 = vadd.f32 %v11267_v25, %v3473_v9 }
 0x66f   :  { %v3477_v34 = vpop.f32.mrb[40].mxu0 }
 0x670   :  { %v3478_v7 = vadd.f32 %v3477_v34, %v11258_v8  ;;  %v3479_v19 = vpop.f32.mrb[41].mxu0  ;;  %3557 = vrot.lane.b32.xlu1 %v3514_v36, %s8014_s27  ;;  %v15240_v34 = vld [vmem:[#allocation97_spill] sm:$0xff] }
 0x672   :  { %v3515_v61 = vadd.f32 %v11267_v25, %v3478_v7 }
 0x673   :  { %v3482_v30 = vpop.f32.mrb[42].mxu0 }
 0x674   :  { %v3483_v27 = vadd.f32 %v11256_v17, %v3482_v30  ;;  %v3484_v31 = vpop.f32.mrb[43].mxu0  ;;  %3559 = vrot.lane.b32.xlu0 %v3515_v61, %s8014_s27 }
 0x675   :  { %v15241_v31 = vld [vmem:[#allocation94_spill] sm:$0xff] }
 0x676   :  { %v3516_v24 = vadd.f32 %v11267_v25, %v3483_v27 }
 0x677   :  { %v3487_v28 = vpop.f32.mrb[44].mxu0 }
 0x678   :  { %v3488_v51 = vadd.f32 %v3487_v28, %v11262_v33  ;;  %v3489_v1 = vpop.f32.mrb[45].mxu0  ;;  %3561 = vrot.lane.b32.xlu1 %v3516_v24, %s8014_s27  ;;  %v6632_v33 = vld [vmem:[%s14189_s2 + $0x18] sm:$0xff] }
 0x679   :  { %v7218_v58 = vpack.c.bf16 %v6632_v33, %v6631_v56 }
 0x67a   :  { %v3517_v8 = vadd.f32 %v11267_v25, %v3488_v51 }
 0x67b   :  { %v3492_v16 = vpop.f32.mrb[46].mxu0  ;;  %7219 = vmatprep.subr.bf16.mxu1 %v7218_v58 }
 0x67c   :  { %v3493_v43 = vadd.f32 %v11260_v13, %v3492_v16  ;;  %v3494_v49 = vpop.f32.mrb[47].mxu0  ;;  %3563 = vrot.lane.b32.xlu0 %v3517_v8, %s8014_s27  ;;  %7221 = vmatpush3.bf16.msra.mxu1 %v7218_v58  ;;  %v15238_v13 = vld [vmem:[#allocation92_spill] sm:$0xff]  ;;  %v15243_v58 = vld [vmem:[#allocation98_spill] sm:$0xff] }
 0x67d   :  { %v15242_v16 = vld [vmem:[#allocation100_spill] sm:$0xff] }
 0x67e   :  { %v3518_v17 = vadd.f32 %v11267_v25, %v3493_v43 }
 0x680   :  { %3565 = vrot.lane.b32.xlu1 %v3518_v17, %s8014_s27 }
 0x6b6   :  { %v3536_v4 = vpop.permute.xlu0 %3535 }
 0x6b7   :  { %v3583_v47 = vsub.f32 %v15238_v13, %v3536_v4 }
 0x6b9   :  { %v11314_v25 = vsel %vm1735_vm5, %v15238_v13, %v3583_v47 }
 0x6ba   :  { %v3538_v5 = vpop.permute.xlu1 %3537  ;;  %v3615_v20 = vsel %vm87_vm0, %v11314_v25, 0.0 }
 0x6bb   :  { %v3584_v53 = vsub.f32 %v15239_v10, %v3538_v5 }
 0x6bd   :  { %v11319_v6 = vsel %vm1735_vm5, %v15239_v10, %v3584_v53  ;;  %v15244_v53 = vld [vmem:[#allocation105_spill] sm:$0xff] }
 0x6be   :  { %v3616_v9 = vsel %vm87_vm0, %v11319_v6, 0.0  ;;  %v3540_v14 = vpop.permute.xlu0 %3539 }
 0x6bf   :  { %v3617_v36 = vadd.f32 %v3616_v9, %v3615_v20  ;;  %v3585_v7 = vsub.f32 %v15240_v34, %v3540_v14 }
 0x6c1   :  { %v11328_v19 = vsel %vm1735_vm5, %v15240_v34, %v3585_v7  ;;  %v15245_v7 = vld [vmem:[#allocation103_spill] sm:$0xff] }
 0x6c2   :  { %v3618_v61 = vsel %vm87_vm0, %v11328_v19, 0.0  ;;  %v3542_v30 = vpop.permute.xlu1 %3541 }
 0x6c3   :  { %v3619_v27 = vadd.f32 %v3618_v61, %v3617_v36  ;;  %v3586_v24 = vsub.f32 %v15241_v31, %v3542_v30 }
 0x6c5   :  { %v11335_v28 = vsel %vm1735_vm5, %v15241_v31, %v3586_v24 }
 0x6c6   :  { %v3620_v51 = vsel %vm87_vm0, %v11335_v28, 0.0  ;;  %v3544_v1 = vpop.permute.xlu0 %3543 }
 0x6c7   :  { %v3621_v8 = vadd.f32 %v3620_v51, %v3619_v27  ;;  %v3587_v43 = vsub.f32 %v15242_v16, %v3544_v1  ;;  %v15246_v51 = vld [vmem:[#allocation110_spill] sm:$0xff] }
 0x6c9   :  { %v11342_v49 = vsel %vm1735_vm5, %v15242_v16, %v3587_v43 }
 0x6ca   :  { %v3622_v17 = vsel %vm87_vm0, %v11342_v49, 0.0  ;;  %v3546_v56 = vpop.permute.xlu1 %3545 }
 0x6cb   :  { %v3623_v33 = vadd.f32 %v3622_v17, %v3621_v8  ;;  %v3588_v4 = vsub.f32 %v15243_v58, %v3546_v56  ;;  %v15247_v56 = vld [vmem:[#allocation108_spill] sm:$0xff] }
 0x6cd   :  { %v11349_v13 = vsel %vm1735_vm5, %v15243_v58, %v3588_v4 }
 0x6ce   :  { %v3624_v47 = vsel %vm87_vm0, %v11349_v13, 0.0  ;;  %v3548_v5 = vpop.permute.xlu0 %3547 }
 0x6cf   :  { %v3625_v10 = vadd.f32 %v3624_v47, %v3623_v33  ;;  %v3589_v20 = vsub.f32 %v15244_v53, %v3548_v5 }
 0x6d1   :  { %v3605_v9 = vsel %vm1735_vm5, %v15244_v53, %v3589_v20 }
 0x6d2   :  { %v3626_v14 = vsel %vm87_vm0, %v3605_v9, 0.0  ;;  %v3550_v36 = vpop.permute.xlu1 %3549 }
 0x6d3   :  { %v3627_v34 = vadd.f32 %v3626_v14, %v3625_v10  ;;  %v3590_v61 = vsub.f32 %v15245_v7, %v3550_v36  ;;  %v15248_v10 = vld [vmem:[#allocation116_spill] sm:$0xff] }
 0x6d5   :  { %v3606_v30 = vsel %vm1735_vm5, %v15245_v7, %v3590_v61  ;;  %v15249_v7 = vld [vmem:[#allocation115_spill] sm:$0xff] }
 0x6d6   :  { %v3628_v27 = vsel %vm87_vm0, %v3606_v30, 0.0  ;;  %v3552_v31 = vpop.permute.xlu0 %3551 }
 0x6d7   :  { %v3629_v24 = vadd.f32 %v3628_v27, %v3627_v34  ;;  %v3591_v1 = vsub.f32 %v15246_v51, %v3552_v31 }
 0x6d9   :  { %v3607_v8 = vsel %vm1735_vm5, %v15246_v51, %v3591_v1  ;;  %v15250_v1 = vld [vmem:[#allocation124_spill] sm:$0xff] }
 0x6da   :  { %v3630_v16 = vsel %vm87_vm0, %v3607_v8, 0.0  ;;  %v3554_v43 = vpop.permute.xlu1 %3553 }
 0x6db   :  { %v3631_v17 = vadd.f32 %v3630_v16, %v3629_v24  ;;  %v3592_v33 = vsub.f32 %v15247_v56, %v3554_v43 }
 0x6dd   :  { %v3608_v58 = vsel %vm1735_vm5, %v15247_v56, %v3592_v33 }
 0x6de   :  { %v3632_v4 = vsel %vm87_vm0, %v3608_v58, 0.0  ;;  %v3556_v47 = vpop.permute.xlu0 %3555 }
 0x6df   :  { %v3633_v5 = vadd.f32 %v3632_v4, %v3631_v17  ;;  %v3593_v53 = vsub.f32 %v15248_v10, %v3556_v47  ;;  %v15251_v4 = vld [vmem:[#allocation122_spill] sm:$0xff] }
 0x6e1   :  { %v3609_v20 = vsel %vm1735_vm5, %v15248_v10, %v3593_v53 }
 0x6e2   :  { %v3634_v14 = vsel %vm87_vm0, %v3609_v20, 0.0  ;;  %v3558_v36 = vpop.permute.xlu1 %3557 }
 0x6e3   :  { %v3635_v34 = vadd.f32 %v3634_v14, %v3633_v5  ;;  %v3594_v61 = vsub.f32 %v15249_v7, %v3558_v36  ;;  %v15252_v36 = vld [vmem:[#allocation130_spill] sm:$0xff] }
 0x6e5   :  { %v3610_v27 = vsel %vm1735_vm5, %v15249_v7, %v3594_v61 }
 0x6e6   :  { %v3636_v31 = vsel %vm87_vm0, %v3610_v27, 0.0  ;;  %v3560_v24 = vpop.permute.xlu0 %3559 }
 0x6e7   :  { %v3637_v51 = vadd.f32 %v3636_v31, %v3635_v34  ;;  %v3595_v16 = vsub.f32 %v15250_v1, %v3560_v24 }
 0x6e9   :  { %v3611_v43 = vsel %vm1735_vm5, %v15250_v1, %v3595_v16  ;;  %v15253_v1 = vld [vmem:[#allocation127_spill] sm:$0xff] }
 0x6ea   :  { %v3638_v17 = vsel %vm87_vm0, %v3611_v43, 0.0  ;;  %v3562_v56 = vpop.permute.xlu1 %3561 }
 0x6eb   :  { %v3639_v33 = vadd.f32 %v3638_v17, %v3637_v51  ;;  %v3596_v47 = vsub.f32 %v15251_v4, %v3562_v56 }
 0x6ed   :  { %v3612_v5 = vsel %vm1735_vm5, %v15251_v4, %v3596_v47 }
 0x6ee   :  { %v3640_v10 = vsel %vm87_vm0, %v3612_v5, 0.0  ;;  %v3564_v53 = vpop.permute.xlu0 %3563 }
 0x6ef   :  { %v3641_v14 = vadd.f32 %v3640_v10, %v3639_v33  ;;  %v3597_v34 = vsub.f32 %v15252_v36, %v3564_v53 }
 0x6f1   :  { %v3613_v7 = vsel %vm1735_vm5, %v15252_v36, %v3597_v34 }
 0x6f2   :  { %v3642_v61 = vsel %vm87_vm0, %v3613_v7, 0.0  ;;  %v3566_v31 = vpop.permute.xlu1 %3565 }
 0x6f3   :  { %v3643_v24 = vadd.f32 %v3642_v61, %v3641_v14  ;;  %v3598_v51 = vsub.f32 %v15253_v1, %v3566_v31 }
 0x6f5   :  { %v3614_v16 = vsel %vm1735_vm5, %v15253_v1, %v3598_v51 }
 0x6f6   :  { %v3644_v17 = vsel %vm87_vm0, %v3614_v16, 0.0 }
 0x6f7   :  { %v3645_v56 = vadd.f32 %v3644_v17, %v3643_v24 }
 0x6f9   :  { %v3646_v4 = vrot.slane %v3645_v56, 4 }
 0x6fb   :  { %v3647_v47 = vadd.f32 %v3646_v4, %v3645_v56 }
 0x6fd   :  { %v3648_v33 = vrot.slane %v3647_v47, 2 }
 0x6ff   :  { %v3649_v10 = vadd.f32 %v3648_v33, %v3647_v47 }
 0x701   :  { %v3650_v53 = vrot.slane %v3649_v10, 1 }
 0x703   :  { %v3651_v41 = vadd.f32 %v3650_v53, %v3649_v10 }
 0x705   :  { %v3652_v35 = vmul.f32 0.0078125, %v3651_v41 }
 0x707   :  { %v11393_v36 = vsub.f32 %v3614_v16, %v3652_v35  ;;  %v11396_v34 = vsub.f32 %v11314_v25, %v3652_v35  ;;  %v11399_v14 = vsub.f32 %v11319_v6, %v3652_v35  ;;  %v11402_v61 = vsub.f32 %v11328_v19, %v3652_v35 }
 0x708   :  { %v11405_v31 = vsub.f32 %v11335_v28, %v3652_v35  ;;  %v11408_v24 = vsub.f32 %v11342_v49, %v3652_v35  ;;  %v11411_v1 = vsub.f32 %v11349_v13, %v3652_v35  ;;  %v11413_v41 = vsub.f32 %v3605_v9, %v3652_v35 }
 0x709   :  { %v11415_v51 = vsub.f32 %v3606_v30, %v3652_v35  ;;  %v11417_v25 = vsub.f32 %v3607_v8, %v3652_v35  ;;  %v11419_v6 = vsub.f32 %v3608_v58, %v3652_v35  ;;  %v11421_v16 = vsub.f32 %v3609_v20, %v3652_v35 }
 0x70a   :  { %v11423_v19 = vsub.f32 %v3610_v27, %v3652_v35  ;;  %v11425_v28 = vsub.f32 %v3611_v43, %v3652_v35  ;;  %v11427_v17 = vsub.f32 %v3612_v5, %v3652_v35  ;;  %v11429_v49 = vsub.f32 %v3613_v7, %v3652_v35 }
 0x70b   :  { %v3669_v13 = vmul.f32 %v11396_v34, %v11396_v34  ;;  %v3670_v9 = vmul.f32 %v11399_v14, %v11399_v14  ;;  %v3671_v30 = vmul.f32 %v11402_v61, %v11402_v61  ;;  %v3672_v8 = vmul.f32 %v11405_v31, %v11405_v31 }
 0x70c   :  { %v3673_v35 = vmul.f32 %v11408_v24, %v11408_v24  ;;  %v3674_v7 = vmul.f32 %v11411_v1, %v11411_v1  ;;  %v3675_v47 = vmul.f32 %v11413_v41, %v11413_v41  ;;  %v3676_v53 = vmul.f32 %v11415_v51, %v11415_v51 }
 0x70d   :  { %v3685_v58 = vsel %vm87_vm0, %v3669_v13, 0.0  ;;  %v3686_v20 = vsel %vm87_vm0, %v3670_v9, 0.0  ;;  %v3688_v43 = vsel %vm87_vm0, %v3671_v30, 0.0  ;;  %v3690_v56 = vsel %vm87_vm0, %v3672_v8, 0.0 }
 0x70e   :  { %v3687_v27 = vadd.f32 %v3686_v20, %v3685_v58  ;;  %v3692_v33 = vsel %vm87_vm0, %v3673_v35, 0.0  ;;  %v3694_v13 = vsel %vm87_vm0, %v3674_v7, 0.0  ;;  %v3677_v30 = vmul.f32 %v11417_v25, %v11417_v25 }
 0x70f   :  { %v3696_v58 = vsel %vm87_vm0, %v3675_v47, 0.0  ;;  %v3678_v8 = vmul.f32 %v11419_v6, %v11419_v6  ;;  %v3679_v35 = vmul.f32 %v11421_v16, %v11421_v16  ;;  %v3680_v7 = vmul.f32 %v11423_v19, %v11423_v19 }
 0x710   :  { %v3689_v5 = vadd.f32 %v3688_v43, %v3687_v27  ;;  %v3698_v27 = vsel %vm87_vm0, %v3676_v53, 0.0  ;;  %v3681_v47 = vmul.f32 %v11425_v28, %v11425_v28  ;;  %v3682_v53 = vmul.f32 %v11427_v17, %v11427_v17 }
 0x712   :  { %v3691_v4 = vadd.f32 %v3690_v56, %v3689_v5  ;;  %v3700_v5 = vsel %vm87_vm0, %v3677_v30, 0.0  ;;  %v3683_v30 = vmul.f32 %v11429_v49, %v11429_v49 }
 0x714   :  { %v3693_v10 = vadd.f32 %v3692_v33, %v3691_v4  ;;  %v3702_v4 = vsel %vm87_vm0, %v3678_v8, 0.0  ;;  %v3684_v8 = vmul.f32 %v11393_v36, %v11393_v36 }
 0x716   :  { %v3695_v9 = vadd.f32 %v3694_v13, %v3693_v10  ;;  %v3704_v10 = vsel %vm87_vm0, %v3679_v35, 0.0  ;;  %v3712_v35 = vsel %vm87_vm0, %v3683_v30, 0.0 }
 0x718   :  { %v3697_v20 = vadd.f32 %v3696_v58, %v3695_v9  ;;  %v3706_v9 = vsel %vm87_vm0, %v3680_v7, 0.0 }
 0x71a   :  { %v3699_v43 = vadd.f32 %v3698_v27, %v3697_v20  ;;  %v3708_v20 = vsel %vm87_vm0, %v3681_v47, 0.0 }
 0x71c   :  { %v3701_v56 = vadd.f32 %v3700_v5, %v3699_v43  ;;  %v3710_v43 = vsel %vm87_vm0, %v3682_v53, 0.0 }
 0x71e   :  { %v3703_v33 = vadd.f32 %v3702_v4, %v3701_v56  ;;  %v3714_v4 = vsel %vm87_vm0, %v3684_v8, 0.0 }
 0x720   :  { %v3705_v13 = vadd.f32 %v3704_v10, %v3703_v33 }
 0x722   :  { %v3707_v58 = vadd.f32 %v3706_v9, %v3705_v13 }
 0x724   :  { %v3709_v27 = vadd.f32 %v3708_v20, %v3707_v58 }
 0x726   :  { %v3711_v5 = vadd.f32 %v3710_v43, %v3709_v27 }
 0x728   :  { %v3713_v56 = vadd.f32 %v3712_v35, %v3711_v5 }
 0x72a   :  { %v3715_v33 = vadd.f32 %v3714_v4, %v3713_v56  ;;  %v15257_v56 = vld [vmem:[#allocation15_spill] sm:$0xff] }
 0x72c   :  { %v3716_v7 = vrot.slane %v3715_v33, 4 }
 0x72e   :  { %v3717_v10 = vadd.f32 %v3716_v7, %v3715_v33 }
 0x730   :  { %v3718_v13 = vrot.slane %v3717_v10, 2 }
 0x732   :  { %v3719_v9 = vadd.f32 %v3718_v13, %v3717_v10 }
 0x734   :  { %v3720_v44 = vrot.slane %v3719_v9, 1 }
 0x736   :  { %v3721_v50 = vadd.f32 %v3720_v44, %v3719_v9 }
 0x738   :  { %v3722_v47 = vmul.f32 0.007874016, %v3721_v50 }
 0x73a   :  { %v3723_v58 = vmax.f32 %v3722_v47, 0.0 }
 0x73c   :  { %7924 = vrsqrt.f32 %v3723_v58  ;;  %vm3726_vm14 = vcmp.eq.f32.partialorder %v3723_v58, inf  ;;  %v3729_v53 = vand.u32 2147483648, %v3723_v58  ;;  %vm3728_vm13 = vcmp.eq.f32.partialorder %v3723_v58, 0.0 }
 0x746   :  { %v7925_v20 = vpop.eup %7924 }
 0x747   :  { %v3725_v39 = vmul.f32 %v7925_v20, %v3723_v58  ;;  %v15263_v20 = vld [vmem:[#allocation26_spill] sm:$0xff] }
 0x749   :  { %v3727_v27 = vsel %vm3726_vm14, %v3723_v58, %v3725_v39 }
 0x74a   :  { %v3730_v30 = vsel %vm3728_vm13, %v3729_v53, %v3727_v27  ;;  %v15264_v27 = vld [vmem:[#allocation14_spill] sm:$0xff] }
 0x74b   :  { %v3731_v43 = vadd.f32 1e-06, %v3730_v30 }
 0x74d   :  { %7926 = vrcp.f32 %v3731_v43 }
 0x757   :  { %v11479_v8 = vpop.eup %7926 }
 0x758   :  { %15254 = vst [vmem:[#allocation198_spill] sm:$0xff] %v11479_v8  ;;  %v3734_v5 = vmul.f32 %v11479_v8, %v11396_v34  ;;  %v3735_v44 = vmul.f32 %v11479_v8, %v11399_v14  ;;  %v3736_v50 = vmul.f32 %v11479_v8, %v11402_v61  ;;  %v3737_v39 = vmul.f32 %v11479_v8, %v11405_v31 }
 0x759   :  { %v3738_v35 = vmul.f32 %v11479_v8, %v11408_v24  ;;  %v3739_v34 = vmul.f32 %v11479_v8, %v11411_v1  ;;  %v3740_v14 = vmul.f32 %v11479_v8, %v11413_v41  ;;  %v3741_v61 = vmul.f32 %v11479_v8, %v11415_v51 }
 0x75a   :  { %7039 = vmatprep.mubr.msk.f32.mxu1 %vm87_vm0, %v3734_v5  ;;  %v3742_v31 = vmul.f32 %v11479_v8, %v11417_v25  ;;  %v3743_v24 = vmul.f32 %v11479_v8, %v11419_v6  ;;  %v3744_v1 = vmul.f32 %v11479_v8, %v11421_v16  ;;  %v3745_v41 = vmul.f32 %v11479_v8, %v11423_v19 }
 0x75b   :  { %7040 = vmatmul.mubr.msk.f32.vlgmr.msra.gmra.mrb[48].mxu1 %vm87_vm0, %v3735_v44  ;;  %v3746_v51 = vmul.f32 %v11479_v8, %v11425_v28  ;;  %v3747_v25 = vmul.f32 %v11479_v8, %v11427_v17  ;;  %v3748_v6 = vmul.f32 %v11479_v8, %v11429_v49  ;;  %v3749_v16 = vmul.f32 %v11479_v8, %v11393_v36  ;;  %v15258_v17 = vld [vmem:[#allocation33_spill] sm:$0xff] }
 0x75c   :  { %7042 = vmatprep.mubr.msk.f32.mxu1 %vm87_vm0, %v3736_v50 }
 0x75f   :  { %7043 = vmatmul.mubr.msk.f32.gmra.mrb[50].mxu1 %vm87_vm0, %v3737_v39 }
 0x760   :  { %7045 = vmatprep.mubr.msk.f32.mxu1 %vm87_vm0, %v3738_v35 }
 0x763   :  { %7046 = vmatmul.mubr.msk.f32.gmra.mrb[52].mxu1 %vm87_vm0, %v3739_v34 }
 0x764   :  { %7048 = vmatprep.mubr.msk.f32.mxu1 %vm87_vm0, %v3740_v14 }
 0x767   :  { %7049 = vmatmul.mubr.msk.f32.gmra.mrb[54].mxu1 %vm87_vm0, %v3741_v61  ;;  %v15268_v61 = vld [vmem:[#allocation31_spill] sm:$0xff] }
 0x768   :  { %7051 = vmatprep.mubr.msk.f32.mxu1 %vm87_vm0, %v3742_v31 }
 0x76b   :  { %7052 = vmatmul.mubr.msk.f32.gmra.mrb[56].mxu1 %vm87_vm0, %v3743_v24  ;;  %v15269_v24 = vld [vmem:[#allocation32_spill] sm:$0xff] }
 0x76c   :  { %7054 = vmatprep.mubr.msk.f32.mxu1 %vm87_vm0, %v3744_v1 }
 0x76f   :  { %7055 = vmatmul.mubr.msk.f32.gmra.mrb[58].mxu1 %vm87_vm0, %v3745_v41 }
 0x770   :  { %7057 = vmatprep.mubr.msk.f32.mxu1 %vm87_vm0, %v3746_v51 }
 0x773   :  { %7058 = vmatmul.mubr.msk.f32.gmra.mrb[60].mxu1 %vm87_vm0, %v3747_v25 }
 0x774   :  { %7060 = vmatprep.mubr.msk.f32.mxu1 %vm87_vm0, %v3748_v6 }
 0x777   :  { %7061 = vmatmul.mubr.msk.f32.gmra.mrb[62].mxu1 %vm87_vm0, %v3749_v16 }
 0x82e   :  { %v11529_v19 = vpop.f32.mrb[48].mxu1 }
 0x82f   :  { %15255 = vst [vmem:[#allocation170_spill] sm:$0xff] %v11529_v19  ;;  %v11531_v28 = vpop.f32.mrb[49].mxu1  ;;  %v4082_v4 = vmul.f32 %v11529_v19, %v15257_v56  ;;  %v4003_v33 = vmul.f32 %v11529_v19, %v15258_v17  ;;  %v4018_v49 = vrot.slane %v11529_v19, 1  ;;  %v3954_v36 = vrot.slane %v11529_v19, 7  ;;  %v15281_v17 = vld [vmem:[#allocation17_spill] sm:$0xff] }
 0x830   :  { %15256 = vst [vmem:[#allocation176_spill] sm:$0xff] %v11531_v28  ;;  %v14566_v7 = vrot.slane %v11531_v28, 1  ;;  %v14567_v10 = vrot.slane %v11531_v28, 7  ;;  %v4129_v53 = vmul.f32 %v11529_v19, %v15263_v20  ;;  %v4081_v30 = vmul.f32 %v11531_v28, %v15264_v27 }
 0x831   :  { %4371 = vrot.lane.b32.xlu0 %v4082_v4, %s8016_s12  ;;  %4181 = vrot.lane.b32.xlu1 %v4003_v33, %s8014_s27  ;;  %v4002_v31 = vmul.f32 %v11531_v28, %v15268_v61  ;;  %v15273_v33 = vld [vmem:[#allocation9_spill] sm:$0xff]  ;;  %v15304_v2 = vrot.slane %v11531_v28, 1 }
 0x832   :  { %v11543_v13 = vpop.f32.mrb[50].mxu1  ;;  %v11549_v47 = vsel %vm646_vm3, %v14566_v7, %v4018_v49  ;;  %v11561_v43 = vsel %vm437_vm4, %v14567_v10, %v3954_v36 }
 0x833   :  { %15259 = vst [vmem:[#allocation99_spill] sm:$0xff] %v11543_v13  ;;  %15261 = vst [vmem:[#allocation104_spill] sm:$0xff] %v11549_v47  ;;  %v11551_v58 = vpop.f32.mrb[51].mxu1  ;;  %v4020_v44 = vrot.slane %v11543_v13, 1  ;;  %v3956_v34 = vrot.slane %v11543_v13, 7  ;;  %v4005_v1 = vmul.f32 %v11543_v13, %v15269_v24  ;;  %v4084_v62 = vmul.f32 %v11543_v13, %v15289_v0 }
 0x834   :  { %15262 = vst [vmem:[#allocation172_spill] sm:$0xff] %v11551_v58  ;;  %15265 = vst [vmem:[#allocation177_spill] sm:$0xff] %v11561_v43  ;;  %v4019_v5 = vrot.slane %v11551_v58, 1  ;;  %v3955_v50 = vrot.slane %v11551_v58, 7 }
 0x835   :  { %4561 = vrot.lane.b32.xlu1 %v4129_v53, %s8020_s19  ;;  %4369 = vrot.lane.b32.xlu0 %v4081_v30, %s8016_s12  ;;  %v15274_v53 = vld [vmem:[#allocation35_spill] sm:$0xff] }
 0x836   :  { %v11568_v39 = vpop.f32.mrb[52].mxu1  ;;  %v11572_v35 = vsel %vm646_vm3, %v4018_v49, %v4019_v5  ;;  %v11583_v41 = vsel %vm646_vm3, %v4019_v5, %v4020_v44  ;;  %v11587_v51 = vsel %vm437_vm4, %v3954_v36, %v3955_v50  ;;  %v11591_v25 = vsel %vm437_vm4, %v3955_v50, %v3956_v34 }
 0x837   :  { %15266 = vst [vmem:[#allocation132_spill] sm:$0xff] %v11568_v39  ;;  %v11575_v14 = vpop.f32.mrb[53].mxu1  ;;  %15270 = vst [vmem:[#allocation179_spill] sm:$0xff] %v11587_v51  ;;  %v4050_v49 = vmul.f32 %v11549_v47, %v15273_v33  ;;  %v4004_v36 = vmul.f32 %v11551_v58, %v15274_v53  ;;  %v4022_v5 = vrot.slane %v11568_v39, 1  ;;  %v15278_v33 = vld [vmem:[#allocation137_spill] sm:$0xff]  ;;  %v4099_v59 = vmul.f32 %v11583_v41, %v15296_v54 }
 0x838   :  { %15267 = vst [vmem:[#allocation106_spill] sm:$0xff] %v11575_v14  ;;  %v4021_v6 = vrot.slane %v11575_v14, 1  ;;  %v3957_v50 = vrot.slane %v11575_v14, 7 }
 0x839   :  { %4179 = vrot.lane.b32.xlu1 %v4002_v31, %s8014_s27  ;;  %4185 = vrot.lane.b32.xlu0 %v4005_v1, %s8014_s27  ;;  %v3958_v31 = vrot.slane %v11568_v39, 7 }
 0x83a   :  { %v11596_v16 = vpop.f32.mrb[54].mxu1  ;;  %v11606_v30 = vsel %vm646_vm3, %v4020_v44, %v4021_v6  ;;  %v11615_v1 = vsel %vm646_vm3, %v4021_v6, %v4022_v5  ;;  %v11622_v44 = vsel %vm437_vm4, %v3956_v34, %v3957_v50  ;;  %v4130_v6 = vmul.f32 %v11551_v58, %v15278_v33 }
 0x83b   :  { %15271 = vst [vmem:[#allocation111_spill] sm:$0xff] %v11596_v16  ;;  %v11598_v4 = vpop.f32.mrb[55].mxu1  ;;  %v11626_v19 = vsel %vm437_vm4, %v3957_v50, %v3958_v31  ;;  %v4024_v24 = vrot.slane %v11596_v16, 1  ;;  %v3960_v61 = vrot.slane %v11596_v16, 7  ;;  %v4097_v33 = vmul.f32 %v11549_v47, %v15281_v17 }
 0x83c   :  { %15272 = vst [vmem:[#allocation181_spill] sm:$0xff] %v11598_v4  ;;  %v4023_v7 = vrot.slane %v11598_v4, 1  ;;  %v3959_v53 = vrot.slane %v11598_v4, 7  ;;  %v4131_v47 = vmul.f32 %v11543_v13, %v15292_v38 }
 0x83d   :  { %4243 = vrot.lane.b32.xlu1 %v4050_v49, %s8015_s28  ;;  %4183 = vrot.lane.b32.xlu0 %v4004_v36, %s8014_s27  ;;  %v15277_v49 = vld [vmem:[#allocation12_spill] sm:$0xff] }
 0x83e   :  { %v11618_v10 = vpop.f32.mrb[56].mxu1  ;;  %v4066_v36 = vmul.f32 %v11561_v43, %v15277_v49  ;;  %v11638_v34 = vsel %vm646_vm3, %v4022_v5, %v4023_v7  ;;  %v11653_v5 = vsel %vm646_vm3, %v4023_v7, %v4024_v24  ;;  %v11657_v20 = vsel %vm437_vm4, %v3958_v31, %v3959_v53  ;;  %v15285_v7 = vld [vmem:[#allocation21_spill] sm:$0xff] }
 0x83f   :  { %15275 = vst [vmem:[#allocation112_spill] sm:$0xff] %v11618_v10  ;;  %v11628_v8 = vpop.f32.mrb[57].mxu1  ;;  %v11661_v27 = vsel %vm437_vm4, %v3959_v53, %v3960_v61  ;;  %v4113_v60 = vmul.f32 %v11561_v43, %v15285_v7  ;;  %v4052_v31 = vmul.f32 %v11583_v41, %v15286_v29  ;;  %v3962_v7 = vrot.slane %v11618_v10, 7 }
 0x840   :  { %15276 = vst [vmem:[#allocation120_spill] sm:$0xff] %v11628_v8  ;;  %v4025_v17 = vrot.slane %v11628_v8, 1 }
 0x841   :  { %4307 = vrot.lane.b32.xlu1 %v4066_v36, %s8019_s18  ;;  %4563 = vrot.lane.b32.xlu0 %v4130_v6, %s8020_s19  ;;  %v15282_v36 = vld [vmem:[#allocation75_spill] sm:$0xff] }
 0x842   :  { %v11641_v50 = vpop.f32.mrb[58].mxu1  ;;  %v4098_v6 = vmul.f32 %v11572_v35, %v15282_v36  ;;  %v11676_v53 = vsel %vm646_vm3, %v4024_v24, %v4025_v17 }
 0x843   :  { %15279 = vst [vmem:[#allocation184_spill] sm:$0xff] %v11641_v50  ;;  %v11645_v49 = vpop.f32.mrb[59].mxu1  ;;  %v3964_v38 = vrot.slane %v11641_v50, 7 }
 0x844   :  { %15280 = vst [vmem:[#allocation121_spill] sm:$0xff] %v11645_v49  ;;  %v4027_v0 = vrot.slane %v11645_v49, 1 }
 0x845   :  { %4433 = vrot.lane.b32.xlu1 %v4097_v33, %s8017_s14  ;;  %4435 = vrot.lane.b32.xlu0 %v4098_v6, %s8017_s14  ;;  %v4026_v33 = vrot.slane %v11618_v10, 1  ;;  %v3961_v6 = vrot.slane %v11628_v8, 7 }
 0x846   :  { %v11666_v56 = vpop.f32.mrb[60].mxu1 }
 0x847   :  { %15283 = vst [vmem:[#allocation185_spill] sm:$0xff] %v11666_v56  ;;  %v11668_v36 = vpop.f32.mrb[61].mxu1  ;;  %v11684_v12 = vsel %vm646_vm3, %v4025_v17, %v4026_v33  ;;  %v11691_v24 = vsel %vm437_vm4, %v3960_v61, %v3961_v6  ;;  %v11702_v17 = vsel %vm437_vm4, %v3961_v6, %v3962_v7  ;;  %v15291_v61 = vrot.slane %v11531_v28, 7 }
 0x848   :  { %15284 = vst [vmem:[#allocation186_spill] sm:$0xff] %v11668_v36  ;;  %v4068_v6 = vmul.f32 %v11591_v25, %v15293_v21  ;;  %v15295_v21 = vld [vmem:[#allocation28_spill] sm:$0xff] }
 0x849   :  { %4497 = vrot.lane.b32.xlu1 %v4113_v60, %s8018_s15  ;;  %4247 = vrot.lane.b32.xlu0 %v4052_v31, %s8015_s28  ;;  %v15290_v60 = vld [vmem:[#allocation25_spill] sm:$0xff] }
 0x84a   :  { %v11687_v22 = vpop.f32.mrb[62].mxu1  ;;  %v4114_v31 = vmul.f32 %v11587_v51, %v15290_v60  ;;  %v4028_v60 = vrot.slane %v11641_v50, 1 }
 0x84b   :  { %15287 = vst [vmem:[#allocation188_spill] sm:$0xff] %v11687_v22  ;;  %v11693_v29 = vpop.f32.mrb[63].mxu1  ;;  %v3968_v43 = vrot.slane %v11687_v22, 7 }
 0x84c   :  { %15288 = vst [vmem:[#allocation187_spill] sm:$0xff] %v11693_v29 }
 0x84d   :  { %4375 = vrot.lane.b32.xlu1 %v4084_v62, %s8016_s12  ;;  %4499 = vrot.lane.b32.xlu0 %v4114_v31, %s8018_s15  ;;  %v11710_v32 = vsel %vm437_vm4, %v3968_v43, %v15291_v61  ;;  %v11720_v62 = vsel %vm646_vm3, %v4026_v33, %v4027_v0  ;;  %v3963_v31 = vrot.slane %v11645_v49, 7  ;;  %v11725_v61 = vsel %vm646_vm3, %v4027_v0, %v4028_v60 }
 0x84e   :  { %v4083_v33 = vmul.f32 %v11551_v58, %v15295_v21  ;;  %v4051_v58 = vmul.f32 %v11572_v35, %v15298_v42  ;;  %v15299_v21 = vld [vmem:[#allocation50_spill] sm:$0xff]  ;;  %v15302_v42 = vld [vmem:[#allocation57_spill] sm:$0xff] }
 0x84f   :  { %v11731_v13 = vsel %vm437_vm4, %v3962_v7, %v3963_v31  ;;  %v11740_v0 = vsel %vm437_vm4, %v3963_v31, %v3964_v38  ;;  %v4030_v7 = vrot.slane %v11666_v56, 1  ;;  %v4007_v54 = vmul.f32 %v11568_v39, %v15299_v21 }
 0x850   :  { %15294 = vst [vmem:[#allocation189_spill] sm:$0xff] %v11731_v13  ;;  %15297 = vst [vmem:[#allocation190_spill] sm:$0xff] %v11740_v0  ;;  %v4067_v46 = vmul.f32 %v11587_v51, %v15302_v42  ;;  %v15306_v51 = vld [vmem:[#allocation48_spill] sm:$0xff] }
 0x851   :  { %4565 = vrot.lane.b32.xlu1 %v4131_v47, %s8020_s19  ;;  %4311 = vrot.lane.b32.xlu0 %v4068_v6, %s8019_s18  ;;  %v4029_v47 = vrot.slane %v11668_v36, 1  ;;  %v3965_v6 = vrot.slane %v11668_v36, 7 }
 0x853   :  { %v11753_v31 = vsel %vm646_vm3, %v4028_v60, %v4029_v47  ;;  %v11762_v15 = vsel %vm437_vm4, %v3964_v38, %v3965_v6  ;;  %v4032_v60 = vrot.slane %v11687_v22, 1 }
 0x854   :  { %15300 = vst [vmem:[#allocation193_spill] sm:$0xff] %v11762_v15 }
 0x855   :  { %4373 = vrot.lane.b32.xlu1 %v4083_v33, %s8016_s12  ;;  %4437 = vrot.lane.b32.xlu0 %v4099_v59, %s8017_s14  ;;  %v3966_v33 = vrot.slane %v11666_v56, 7  ;;  %v11758_v59 = vsel %vm646_vm3, %v4029_v47, %v4030_v7  ;;  %v4006_v47 = vmul.f32 %v11575_v14, %v15303_v40  ;;  %v11779_v38 = vsel %vm646_vm3, %v4032_v60, %v15304_v2 }
 0x856   :  { %v4132_v40 = vmul.f32 %v11575_v14, %v15306_v51 }
 0x857   :  { %v11768_v21 = vsel %vm437_vm4, %v3965_v6, %v3966_v33  ;;  %v15305_v6 = vld [vmem:[#allocation30_spill] sm:$0xff] }
 0x858   :  { %15301 = vst [vmem:[#allocation194_spill] sm:$0xff] %v11768_v21  ;;  %v4145_v42 = vmul.f32 %v11572_v35, %v15305_v6  ;;  %v15358_v6 = vld [vmem:[#allocation68_spill] sm:$0xff] }
 0x859   :  { %4245 = vrot.lane.b32.xlu1 %v4051_v58, %s8015_s28  ;;  %4189 = vrot.lane.b32.xlu0 %v4007_v54, %s8014_s27  ;;  %v4031_v54 = vrot.slane %v11693_v29, 1  ;;  %v3967_v58 = vrot.slane %v11693_v29, 7  ;;  %v4076_v9 = vmul.f32 %v11740_v0, %v15358_v6  ;;  %v15365_v6 = vld [vmem:[#allocation44_spill] sm:$0xff] }
 0x85b   :  { %v11791_v28 = vsel %vm646_vm3, %v4030_v7, %v4031_v54  ;;  %v11795_v2 = vsel %vm646_vm3, %v4031_v54, %v4032_v60  ;;  %v11805_v35 = vsel %vm437_vm4, %v3967_v58, %v3968_v43  ;;  %v4146_v7 = vmul.f32 %v11583_v41, %v15187_v23  ;;  %v15311_v43 = vld [vmem:[#allocation52_spill] sm:$0xff]  ;;  %v15312_v54 = vld [vmem:[#allocation93_spill] sm:$0xff]  ;;  %v15314_v23 = vld [vmem:[#allocation62_spill] sm:$0xff] }
 0x85c   :  { %v4086_v41 = vmul.f32 %v11568_v39, %v15311_v43 }
 0x85d   :  { %4309 = vrot.lane.b32.xlu1 %v4067_v46, %s8019_s18  ;;  %4187 = vrot.lane.b32.xlu0 %v4006_v47, %s8014_s27  ;;  %v11799_v46 = vsel %vm437_vm4, %v3966_v33, %v3967_v58  ;;  %v15308_v47 = vld [vmem:[#allocation39_spill] sm:$0xff]  ;;  %v15309_v33 = vld [vmem:[#allocation89_spill] sm:$0xff]  ;;  %v4116_v58 = vmul.f32 %v11622_v44, %v15312_v54 }
 0x85e   :  { %15307 = vst [vmem:[#allocation200_spill] sm:$0xff] %v11799_v46  ;;  %v4100_v51 = vmul.f32 %v11606_v30, %v15308_v47  ;;  %v4115_v60 = vmul.f32 %v11591_v25, %v15309_v33  ;;  %v15316_v47 = vld [vmem:[#allocation77_spill] sm:$0xff] }
 0x85f   :  { %v4101_v54 = vmul.f32 %v11615_v1, %v15316_v47 }
 0x861   :  { %4625 = vrot.lane.b32.xlu1 %v4145_v42, %s8021_s22  ;;  %4567 = vrot.lane.b32.xlu0 %v4132_v40, %s8020_s19  ;;  %v15310_v42 = vld [vmem:[#allocation41_spill] sm:$0xff] }
 0x862   :  { %v4054_v40 = vmul.f32 %v11615_v1, %v15310_v42  ;;  %v4070_v42 = vmul.f32 %v11626_v19, %v15314_v23 }
 0x865   :  { %4627 = vrot.lane.b32.xlu1 %v4146_v7, %s8021_s22  ;;  %4439 = vrot.lane.b32.xlu0 %v4100_v51, %s8017_s14  ;;  %v15313_v51 = vld [vmem:[#allocation63_spill] sm:$0xff] }
 0x866   :  { %v4133_v7 = vmul.f32 %v11568_v39, %v15313_v51  ;;  %v15318_v39 = vld [vmem:[#allocation40_spill] sm:$0xff] }
 0x867   :  { %v4009_v51 = vmul.f32 %v11596_v16, %v15318_v39 }
 0x869   :  { %4501 = vrot.lane.b32.xlu1 %v4115_v60, %s8018_s15  ;;  %4251 = vrot.lane.b32.xlu0 %v4054_v40, %s8015_s28  ;;  %v15315_v60 = vld [vmem:[#allocation47_spill] sm:$0xff] }
 0x86a   :  { %v4085_v40 = vmul.f32 %v11575_v14, %v15315_v60  ;;  %v15320_v14 = vld [vmem:[#allocation56_spill] sm:$0xff] }
 0x86b   :  { %v4008_v47 = vmul.f32 %v11598_v4, %v15320_v14 }
 0x86d   :  { %4379 = vrot.lane.b32.xlu1 %v4086_v41, %s8016_s12  ;;  %4503 = vrot.lane.b32.xlu0 %v4116_v58, %s8018_s15  ;;  %v15317_v41 = vld [vmem:[#allocation37_spill] sm:$0xff] }
 0x86e   :  { %v4053_v58 = vmul.f32 %v11606_v30, %v15317_v41 }
 0x871   :  { %4569 = vrot.lane.b32.xlu1 %v4133_v7, %s8020_s19  ;;  %4315 = vrot.lane.b32.xlu0 %v4070_v42, %s8019_s18  ;;  %v15319_v42 = vld [vmem:[#allocation43_spill] sm:$0xff] }
 0x872   :  { %v4069_v7 = vmul.f32 %v11622_v44, %v15319_v42 }
 0x875   :  { %4377 = vrot.lane.b32.xlu1 %v4085_v40, %s8016_s12  ;;  %4441 = vrot.lane.b32.xlu0 %v4101_v54, %s8017_s14  ;;  %v4147_v54 = vmul.f32 %v11606_v30, %v15193_v57  ;;  %v15321_v40 = vld [vmem:[#allocation67_spill] sm:$0xff] }
 0x876   :  { %v4134_v39 = vmul.f32 %v11598_v4, %v15321_v40 }
 0x879   :  { %4249 = vrot.lane.b32.xlu1 %v4053_v58, %s8015_s28  ;;  %4193 = vrot.lane.b32.xlu0 %v4009_v51, %s8014_s27  ;;  %v4148_v51 = vmul.f32 %v11615_v1, %v15195_v48  ;;  %v15322_v58 = vld [vmem:[#allocation58_spill] sm:$0xff] }
 0x87a   :  { %v4102_v14 = vmul.f32 %v11638_v34, %v15322_v58  ;;  %v15328_v58 = vld [vmem:[#allocation65_spill] sm:$0xff] }
 0x87d   :  { %4313 = vrot.lane.b32.xlu1 %v4069_v7, %s8019_s18  ;;  %4191 = vrot.lane.b32.xlu0 %v4008_v47, %s8014_s27  ;;  %v15323_v47 = vld [vmem:[#allocation59_spill] sm:$0xff]  ;;  %v15324_v7 = vld [vmem:[#allocation13_spill] sm:$0xff] }
 0x87e   :  { %v4117_v30 = vmul.f32 %v11626_v19, %v15323_v47  ;;  %v4056_v57 = vmul.f32 %v11653_v5, %v15324_v7  ;;  %v4072_v7 = vmul.f32 %v11661_v27, %v15328_v58  ;;  %v15330_v47 = vld [vmem:[#allocation72_spill] sm:$0xff] }
 0x881   :  { %4629 = vrot.lane.b32.xlu1 %v4147_v54, %s8021_s22  ;;  %4571 = vrot.lane.b32.xlu0 %v4134_v39, %s8020_s19  ;;  %v15325_v39 = vld [vmem:[#allocation70_spill] sm:$0xff] }
 0x882   :  { %v4088_v1 = vmul.f32 %v11596_v16, %v15325_v39  ;;  %v15326_v54 = vld [vmem:[#allocation102_spill] sm:$0xff] }
 0x883   :  { %v4118_v48 = vmul.f32 %v11657_v20, %v15326_v54  ;;  %v4103_v54 = vmul.f32 %v11653_v5, %v15330_v47 }
 0x885   :  { %4631 = vrot.lane.b32.xlu1 %v4148_v51, %s8021_s22  ;;  %4443 = vrot.lane.b32.xlu0 %v4102_v14, %s8017_s14  ;;  %v15327_v14 = vld [vmem:[#allocation83_spill] sm:$0xff] }
 0x886   :  { %v4135_v51 = vmul.f32 %v11596_v16, %v15327_v14  ;;  %v15332_v16 = vld [vmem:[#allocation90_spill] sm:$0xff] }
 0x887   :  { %v4011_v14 = vmul.f32 %v11618_v10, %v15332_v16 }
 0x889   :  { %4505 = vrot.lane.b32.xlu1 %v4117_v30, %s8018_s15  ;;  %4255 = vrot.lane.b32.xlu0 %v4056_v57, %s8015_s28  ;;  %v15329_v57 = vld [vmem:[#allocation22_spill] sm:$0xff] }
 0x88a   :  { %v4087_v30 = vmul.f32 %v11598_v4, %v15329_v57  ;;  %v15334_v4 = vld [vmem:[#allocation74_spill] sm:$0xff]  ;;  %v15345_v57 = vld [vmem:[#allocation96_spill] sm:$0xff] }
 0x88b   :  { %v4010_v47 = vmul.f32 %v11628_v8, %v15334_v4  ;;  %v4150_v4 = vmul.f32 %v11653_v5, %v15205_v18  ;;  %v4105_v40 = vmul.f32 %v11684_v12, %v15345_v57 }
 0x88d   :  { %4383 = vrot.lane.b32.xlu1 %v4088_v1, %s8016_s12  ;;  %4507 = vrot.lane.b32.xlu0 %v4118_v48, %s8018_s15  ;;  %v15331_v48 = vld [vmem:[#allocation11_spill] sm:$0xff] }
 0x88e   :  { %v4055_v1 = vmul.f32 %v11638_v34, %v15331_v48 }
 0x891   :  { %4573 = vrot.lane.b32.xlu1 %v4135_v51, %s8020_s19  ;;  %4319 = vrot.lane.b32.xlu0 %v4072_v7, %s8019_s18  ;;  %v15333_v7 = vld [vmem:[#allocation61_spill] sm:$0xff] }
 0x892   :  { %v4071_v51 = vmul.f32 %v11657_v20, %v15333_v7  ;;  %v15343_v7 = vld [vmem:[#allocation66_spill] sm:$0xff] }
 0x893   :  { %v4074_v39 = vmul.f32 %v11702_v17, %v15343_v7  ;;  %v15347_v7 = vld [vmem:[#allocation139_spill] sm:$0xff] }
 0x894   :  { %v4013_v41 = vmul.f32 %v11641_v50, %v15347_v7 }
 0x895   :  { %4381 = vrot.lane.b32.xlu1 %v4087_v30, %s8016_s12  ;;  %4445 = vrot.lane.b32.xlu0 %v4103_v54, %s8017_s14  ;;  %v4149_v54 = vmul.f32 %v11638_v34, %v15201_v26  ;;  %v15335_v30 = vld [vmem:[#allocation149_spill] sm:$0xff] }
 0x896   :  { %v4136_v16 = vmul.f32 %v11628_v8, %v15335_v30  ;;  %v15339_v30 = vld [vmem:[#allocation80_spill] sm:$0xff] }
 0x897   :  { %v4058_v48 = vmul.f32 %v11684_v12, %v15339_v30 }
 0x899   :  { %4253 = vrot.lane.b32.xlu1 %v4055_v1, %s8015_s28  ;;  %4197 = vrot.lane.b32.xlu0 %v4011_v14, %s8014_s27 }
 0x89d   :  { %4317 = vrot.lane.b32.xlu1 %v4071_v51, %s8019_s18  ;;  %4195 = vrot.lane.b32.xlu0 %v4010_v47, %s8014_s27  ;;  %v15336_v51 = vld [vmem:[#allocation79_spill] sm:$0xff] }
 0x89e   :  { %v4104_v47 = vmul.f32 %v11676_v53, %v15336_v51  ;;  %v15341_v51 = vld [vmem:[#allocation81_spill] sm:$0xff] }
 0x89f   :  { %v4120_v58 = vmul.f32 %v11691_v24, %v15341_v51 }
 0x8a1   :  { %4633 = vrot.lane.b32.xlu1 %v4149_v54, %s8021_s22  ;;  %4575 = vrot.lane.b32.xlu0 %v4136_v16, %s8020_s19  ;;  %v15338_v54 = vld [vmem:[#allocation78_spill] sm:$0xff] }
 0x8a2   :  { %v4119_v16 = vmul.f32 %v11661_v27, %v15338_v54 }
 0x8a3   :  { %v11903_v14 = vpop.permute.xlu0 %4371  ;;  %v11905_v1 = vpop.permute.xlu1 %4181 }
 0x8a5   :  { %4635 = vrot.lane.b32.xlu1 %v4150_v4, %s8021_s22  ;;  %4447 = vrot.lane.b32.xlu0 %v4104_v47, %s8017_s14  ;;  %v15340_v4 = vld [vmem:[#allocation24_spill] sm:$0xff] }
 0x8a6   :  { %v4090_v47 = vmul.f32 %v11618_v10, %v15340_v4 }
 0x8a7   :  { %v11913_v34 = vpop.permute.xlu1 %4561  ;;  %v11915_v26 = vpop.permute.xlu0 %4369 }
 0x8a8   :  { %15337 = vst [vmem:[#allocation195_spill] sm:$0xff] %v11913_v34 }
 0x8a9   :  { %4509 = vrot.lane.b32.xlu1 %v4119_v16, %s8018_s15  ;;  %4259 = vrot.lane.b32.xlu0 %v4058_v48, %s8015_s28  ;;  %v15342_v16 = vld [vmem:[#allocation134_spill] sm:$0xff] }
 0x8aa   :  { %v4137_v48 = vmul.f32 %v11618_v10, %v15342_v16 }
 0x8ab   :  { %v11923_v5 = vpop.permute.xlu1 %4179  ;;  %v11925_v18 = vpop.permute.xlu0 %4185 }
 0x8ad   :  { %4387 = vrot.lane.b32.xlu1 %v4090_v47, %s8016_s12  ;;  %4511 = vrot.lane.b32.xlu0 %v4120_v58, %s8018_s15  ;;  %v15344_v47 = vld [vmem:[#allocation85_spill] sm:$0xff] }
 0x8ae   :  { %v4089_v58 = vmul.f32 %v11628_v8, %v15344_v47  ;;  %v15349_v47 = vld [vmem:[#allocation42_spill] sm:$0xff] }
 0x8af   :  { %v11933_v54 = vpop.permute.xlu1 %4243  ;;  %v11935_v30 = vpop.permute.xlu0 %4183  ;;  %v4012_v23 = vmul.f32 %v11645_v49, %v15349_v47 }
 0x8b1   :  { %4577 = vrot.lane.b32.xlu1 %v4137_v48, %s8020_s19  ;;  %4323 = vrot.lane.b32.xlu0 %v4074_v39, %s8019_s18  ;;  %v15346_v48 = vld [vmem:[#allocation76_spill] sm:$0xff] }
 0x8b2   :  { %v4057_v39 = vmul.f32 %v11676_v53, %v15346_v48 }
 0x8b3   :  { %v11943_v4 = vpop.permute.xlu1 %4307  ;;  %v11945_v51 = vpop.permute.xlu0 %4563 }
 0x8b5   :  { %4385 = vrot.lane.b32.xlu1 %v4089_v58, %s8016_s12  ;;  %4449 = vrot.lane.b32.xlu0 %v4105_v40, %s8017_s14  ;;  %v15348_v58 = vld [vmem:[#allocation64_spill] sm:$0xff] }
 0x8b6   :  { %v4073_v40 = vmul.f32 %v11691_v24, %v15348_v58 }
 0x8b7   :  { %v11953_v10 = vpop.permute.xlu1 %4433  ;;  %v11955_v16 = vpop.permute.xlu0 %4435 }
 0x8b9   :  { %4257 = vrot.lane.b32.xlu1 %v4057_v39, %s8015_s28  ;;  %4201 = vrot.lane.b32.xlu0 %v4013_v41, %s8014_s27  ;;  %v4151_v41 = vmul.f32 %v11676_v53, %v15209_v55  ;;  %v15350_v39 = vld [vmem:[#allocation138_spill] sm:$0xff] }
 0x8ba   :  { %v4138_v42 = vmul.f32 %v11645_v49, %v15350_v39  ;;  %v15354_v39 = vld [vmem:[#allocation123_spill] sm:$0xff] }
 0x8bb   :  { %v11963_v8 = vpop.permute.xlu1 %4497  ;;  %v11965_v57 = vpop.permute.xlu0 %4247  ;;  %v4060_v43 = vmul.f32 %v11725_v61, %v15354_v39 }
 0x8bd   :  { %4321 = vrot.lane.b32.xlu1 %v4073_v40, %s8019_s18  ;;  %4199 = vrot.lane.b32.xlu0 %v4012_v23, %s8014_s27  ;;  %v4152_v23 = vmul.f32 %v11684_v12, %v15211_v45  ;;  %v15352_v40 = vld [vmem:[#allocation114_spill] sm:$0xff] }
 0x8be   :  { %v4106_v33 = vmul.f32 %v11720_v62, %v15352_v40  ;;  %v15356_v40 = vld [vmem:[#allocation119_spill] sm:$0xff] }
 0x8bf   :  { %v11973_v48 = vpop.permute.xlu1 %4375  ;;  %v11975_v7 = vpop.permute.xlu0 %4499  ;;  %v4122_v60 = vmul.f32 %v11731_v13, %v15356_v40 }
 0x8c1   :  { %4637 = vrot.lane.b32.xlu1 %v4151_v41, %s8021_s22  ;;  %4579 = vrot.lane.b32.xlu0 %v4138_v42, %s8020_s19  ;;  %v15353_v41 = vld [vmem:[#allocation109_spill] sm:$0xff] }
 0x8c2   :  { %v4121_v42 = vmul.f32 %v11702_v17, %v15353_v41 }
 0x8c3   :  { %v11983_v58 = vpop.permute.xlu1 %4565  ;;  %v11985_v47 = vpop.permute.xlu0 %4311 }
 0x8c4   :  { %15351 = vst [vmem:[#allocation199_spill] sm:$0xff] %v11983_v58  ;;  %v15362_v58 = vld [vmem:[#allocation82_spill] sm:$0xff] }
 0x8c5   :  { %4639 = vrot.lane.b32.xlu1 %v4152_v23, %s8021_s22  ;;  %4451 = vrot.lane.b32.xlu0 %v4106_v33, %s8017_s14  ;;  %v15355_v23 = vld [vmem:[#allocation140_spill] sm:$0xff]  ;;  %v4107_v34 = vmul.f32 %v11725_v61, %v15362_v58  ;;  %v15367_v58 = vld [vmem:[#allocation142_spill] sm:$0xff] }
 0x8c6   :  { %v4092_v33 = vmul.f32 %v11641_v50, %v15355_v23 }
 0x8c7   :  { %v11993_v53 = vpop.permute.xlu1 %4373  ;;  %v11995_v55 = vpop.permute.xlu0 %4437 }
 0x8c9   :  { %4513 = vrot.lane.b32.xlu1 %v4121_v42, %s8018_s15  ;;  %4263 = vrot.lane.b32.xlu0 %v4060_v43, %s8015_s28  ;;  %v15357_v42 = vld [vmem:[#allocation146_spill] sm:$0xff] }
 0x8ca   :  { %v4139_v43 = vmul.f32 %v11641_v50, %v15357_v42 }
 0x8cb   :  { %v12003_v12 = vpop.permute.xlu1 %4245  ;;  %v12005_v45 = vpop.permute.xlu0 %4189 }
 0x8cd   :  { %4391 = vrot.lane.b32.xlu1 %v4092_v33, %s8016_s12  ;;  %4515 = vrot.lane.b32.xlu0 %v4122_v60, %s8018_s15  ;;  %v15361_v33 = vld [vmem:[#allocation136_spill] sm:$0xff] }
 0x8ce   :  { %v4091_v60 = vmul.f32 %v11645_v49, %v15361_v33 }
 0x8cf   :  { %v12013_v41 = vpop.permute.xlu1 %4309  ;;  %v12015_v39 = vpop.permute.xlu0 %4187 }
 0x8d1   :  { %4581 = vrot.lane.b32.xlu1 %v4139_v43, %s8020_s19  ;;  %4327 = vrot.lane.b32.xlu0 %v4076_v9, %s8019_s18  ;;  %v15364_v43 = vld [vmem:[#allocation107_spill] sm:$0xff] }
 0x8d2   :  { %v4059_v9 = vmul.f32 %v11720_v62, %v15364_v43 }
 0x8d3   :  { %v12023_v23 = vpop.permute.xlu1 %4625  ;;  %v12025_v40 = vpop.permute.xlu0 %4567 }
 0x8d4   :  { %15359 = vst [vmem:[#allocation180_spill] sm:$0xff] %v12023_v23  ;;  %15360 = vst [vmem:[#allocation92_spill] sm:$0xff] %v12025_v40  ;;  %v4015_v40 = vmul.f32 %v11666_v56, %v15365_v6  ;;  %v4014_v23 = vmul.f32 %v11668_v36, %v15367_v58 }
 0x8d5   :  { %4389 = vrot.lane.b32.xlu1 %v4091_v60, %s8016_s12  ;;  %4453 = vrot.lane.b32.xlu0 %v4107_v34, %s8017_s14  ;;  %v15366_v60 = vld [vmem:[#allocation131_spill] sm:$0xff] }
 0x8d6   :  { %v4075_v34 = vmul.f32 %v11731_v13, %v15366_v60  ;;  %v6649_v60 = vld [vmem:[%s14190_s3 + $0x48] sm:$0xff] }
 0x8d7   :  { %v12033_v50 = vpop.permute.xlu1 %4627  ;;  %v12035_v42 = vpop.permute.xlu0 %4439 }
 0x8d8   :  { %15363 = vst [vmem:[#allocation91_spill] sm:$0xff] %v12033_v50 }
 0x8d9   :  { %4261 = vrot.lane.b32.xlu1 %v4059_v9, %s8015_s28  ;;  %4205 = vrot.lane.b32.xlu0 %v4015_v40, %s8014_s27  ;;  %v4153_v40 = vmul.f32 %v11720_v62, %v15217_v3  ;;  %v15370_v9 = vld [vmem:[#allocation148_spill] sm:$0xff]  ;;  %v4154_v62 = vmul.f32 %v11725_v61, %v15219_v52  ;;  %v15372_v3 = vld [vmem:[#allocation29_spill] sm:$0xff]  ;;  %v6651_v61 = vld [vmem:[%s14190_s3 + $0x58] sm:$0xff] }
 0x8da   :  { %v4140_v50 = vmul.f32 %v11668_v36, %v15370_v9  ;;  %v4001_v9 = vmul.f32 %v11687_v22, %v15372_v3  ;;  %v15378_v3 = vld [vmem:[#allocation18_spill] sm:$0xff] }
 0x8db   :  { %v12043_v49 = vpop.permute.xlu1 %4501  ;;  %v12045_v33 = vpop.permute.xlu0 %4251 }
 0x8dd   :  { %4325 = vrot.lane.b32.xlu1 %v4075_v34, %s8019_s18  ;;  %4203 = vrot.lane.b32.xlu0 %v4014_v23, %s8014_s27  ;;  %v6650_v34 = vld [vmem:[%s14190_s3 + $0x50] sm:$0xff] }
 0x8de   :  { %v7222_v23 = vpack.c.bf16 %v6650_v34, %v6649_v60  ;;  %v15374_v60 = vld [vmem:[#allocation144_spill] sm:$0xff] }
 0x8df   :  { %v12053_v43 = vpop.permute.xlu1 %4379  ;;  %v12055_v6 = vpop.permute.xlu0 %4503  ;;  %v4123_v34 = vmul.f32 %v11740_v0, %v15374_v60  ;;  %v15377_v60 = vld [vmem:[#allocation152_spill] sm:$0xff]  ;;  %v4062_v0 = vmul.f32 %v11758_v59, %v15378_v3 }
 0x8e0   :  { %15368 = vst [vmem:[#allocation97_spill] sm:$0xff] %v12053_v43  ;;  %15369 = vst [vmem:[#allocation94_spill] sm:$0xff] %v12055_v6  ;;  %7223 = vmatprep.subr.bf16.mxu1 %v7222_v23  ;;  %v15381_v3 = vld [vmem:[#allocation128_spill] sm:$0xff] }
 0x8e1   :  { %4641 = vrot.lane.b32.xlu1 %v4153_v40, %s8021_s22  ;;  %4583 = vrot.lane.b32.xlu0 %v4140_v50, %s8020_s19 }
 0x8e2   :  { %7225 = vmatpush3.bf16.msra.mxu1 %v7222_v23  ;;  %v6652_v23 = vld [vmem:[%s14190_s3 + $0x60] sm:$0xff] }
 0x8e3   :  { %v12069_v58 = vpop.permute.xlu1 %4569  ;;  %v12071_v13 = vpop.permute.xlu0 %4315 }
 0x8e4   :  { %15371 = vst [vmem:[#allocation100_spill] sm:$0xff] %v12069_v58  ;;  %v15375_v58 = vld [vmem:[#allocation143_spill] sm:$0xff] }
 0x8e5   :  { %4643 = vrot.lane.b32.xlu1 %v4154_v62, %s8021_s22  ;;  %4177 = vrot.lane.b32.xlu0 %v4001_v9, %s8014_s27  ;;  %v4108_v43 = vmul.f32 %v11753_v31, %v15375_v58  ;;  %v7226_v9 = vpack.c.bf16 %v6652_v23, %v6651_v61  ;;  %v4094_v58 = vmul.f32 %v11666_v56, %v15377_v60  ;;  %v15380_v60 = vld [vmem:[#allocation161_spill] sm:$0xff] }
 0x8e7   :  { %v12079_v40 = vpop.permute.xlu1 %4377  ;;  %v12081_v50 = vpop.permute.xlu0 %4441  ;;  %7227 = vmatprep.subr.bf16.mxu1 %v7226_v9 }
 0x8e8   :  { %15373 = vst [vmem:[#allocation98_spill] sm:$0xff] %v12081_v50  ;;  %7229 = vmatpush3.bf16.msra.mxu1 %v7226_v9  ;;  %v6653_v50 = vld [vmem:[%s14190_s3 + $0x68] sm:$0xff]  ;;  %v4141_v9 = vmul.f32 %v11666_v56, %v15380_v60  ;;  %v6655_v56 = vld [vmem:[%s14190_s3 + $0x78] sm:$0xff] }
 0x8e9   :  { %4517 = vrot.lane.b32.xlu1 %v4123_v34, %s8018_s15  ;;  %4455 = vrot.lane.b32.xlu0 %v4108_v43, %s8017_s14  ;;  %v6654_v43 = vld [vmem:[%s14190_s3 + $0x70] sm:$0xff] }
 0x8ea   :  { %v7230_v34 = vpack.c.bf16 %v6654_v43, %v6653_v50  ;;  %v15383_v50 = vld [vmem:[#allocation27_spill] sm:$0xff] }
 0x8eb   :  { %v12095_v62 = vpop.permute.xlu1 %4249  ;;  %v12097_v52 = vpop.permute.xlu0 %4193  ;;  %v4093_v43 = vmul.f32 %v11668_v36, %v15383_v50  ;;  %v15386_v36 = vld [vmem:[#allocation16_spill] sm:$0xff]  ;;  %v15387_v50 = vld [vmem:[#allocation154_spill] sm:$0xff] }
 0x8ec   :  { %15376 = vst [vmem:[#allocation105_spill] sm:$0xff] %v12097_v52  ;;  %v4124_v52 = vmul.f32 %v11762_v15, %v15381_v3  ;;  %7231 = vmatprep.subr.bf16.mxu1 %v7230_v34  ;;  %v4109_v3 = vmul.f32 %v11758_v59, %v15387_v50  ;;  %v4155_v50 = vmul.f32 %v11753_v31, %v15223_v63  ;;  %v15396_v63 = vld [vmem:[#allocation55_spill] sm:$0xff] }
 0x8ed   :  { %4395 = vrot.lane.b32.xlu1 %v4094_v58, %s8016_s12  ;;  %4267 = vrot.lane.b32.xlu0 %v4062_v0, %s8015_s28 }
 0x8ee   :  { %7233 = vmatpush3.bf16.msra.mxu1 %v7230_v34  ;;  %v6656_v34 = vld [vmem:[%s14190_s3 + $0x80] sm:$0xff] }
 0x8ef   :  { %v12111_v61 = vpop.permute.xlu1 %4313  ;;  %v12113_v23 = vpop.permute.xlu0 %4191 }
 0x8f0   :  { %15379 = vst [vmem:[#allocation103_spill] sm:$0xff] %v12113_v23  ;;  %v15384_v23 = vld [vmem:[#allocation147_spill] sm:$0xff] }
 0x8f1   :  { %4585 = vrot.lane.b32.xlu1 %v4141_v9, %s8020_s19  ;;  %4519 = vrot.lane.b32.xlu0 %v4124_v52, %s8018_s15  ;;  %v4078_v6 = vmul.f32 %v11768_v21, %v15384_v23  ;;  %v7234_v52 = vpack.c.bf16 %v6656_v34, %v6655_v56  ;;  %v4061_v23 = vmul.f32 %v11753_v31, %v15386_v36  ;;  %v15388_v56 = vld [vmem:[#allocation145_spill] sm:$0xff]  ;;  %v15391_v36 = vld [vmem:[#allocation151_spill] sm:$0xff] }
 0x8f2   :  { %v4077_v34 = vmul.f32 %v11762_v15, %v15388_v56  ;;  %v4142_v56 = vmul.f32 %v11693_v29, %v15391_v36  ;;  %v15393_v15 = vld [vmem:[#allocation8_spill] sm:$0xff]  ;;  %v4065_v36 = vmul.f32 %v11710_v32, %v15396_v63 }
 0x8f3   :  { %v12121_v58 = vpop.permute.xlu1 %4629  ;;  %v12123_v0 = vpop.permute.xlu0 %4571  ;;  %7235 = vmatprep.subr.bf16.mxu1 %v7234_v52 }
 0x8f4   :  { %15382 = vst [vmem:[#allocation110_spill] sm:$0xff] %v12123_v0  ;;  %7237 = vmatpush3.bf16.msra.mxu1 %v7234_v52  ;;  %v15389_v0 = vld [vmem:[#allocation156_spill] sm:$0xff] }
 0x8f5   :  { %4393 = vrot.lane.b32.xlu1 %v4093_v43, %s8016_s12  ;;  %4331 = vrot.lane.b32.xlu0 %v4078_v6, %s8019_s18 }
 0x8f7   :  { %v12137_v9 = vpop.permute.xlu1 %4631  ;;  %v12139_v60 = vpop.permute.xlu0 %4443 }
 0x8f8   :  { %15385 = vst [vmem:[#allocation108_spill] sm:$0xff] %v12137_v9  ;;  %v4016_v9 = vmul.f32 %v11693_v29, %v15389_v0  ;;  %v4156_v0 = vmul.f32 %v11758_v59, %v15227_v11 }
 0x8f9   :  { %4265 = vrot.lane.b32.xlu1 %v4061_v23, %s8015_s28  ;;  %4457 = vrot.lane.b32.xlu0 %v4109_v3, %s8017_s14  ;;  %v6657_v23 = vld [vmem:[%s14190_s3 + $0x88] sm:$0xff] }
 0x8fa   :  { %7079 = vmatprep.subr.mxu1 %v6657_v23 }
 0x8fb   :  { %v12147_v43 = vpop.permute.xlu1 %4505  ;;  %v12149_v6 = vpop.permute.xlu0 %4255  ;;  %7080 = vmatpush3.msra.mxu1 %v6657_v23 }
 0x8fd   :  { %4329 = vrot.lane.b32.xlu1 %v4077_v34, %s8019_s18  ;;  %4207 = vrot.lane.b32.xlu0 %v4016_v9, %s8014_s27 }
 0x8ff   :  { %v12160_v52 = vpop.permute.xlu1 %4383  ;;  %v12162_v3 = vpop.permute.xlu0 %4507 }
 0x900   :  { %15390 = vst [vmem:[#allocation116_spill] sm:$0xff] %v12160_v52  ;;  %v4049_v52 = vmul.f32 %v11779_v38, %v15393_v15  ;;  %v15398_v15 = vld [vmem:[#allocation163_spill] sm:$0xff] }
 0x901   :  { %4645 = vrot.lane.b32.xlu1 %v4155_v50, %s8021_s22  ;;  %4587 = vrot.lane.b32.xlu0 %v4142_v56, %s8020_s19  ;;  %v15395_v50 = vld [vmem:[#allocation133_spill] sm:$0xff] }
 0x902   :  { %v4125_v56 = vmul.f32 %v11768_v21, %v15395_v50  ;;  %v15401_v21 = vld [vmem:[#allocation168_spill] sm:$0xff] }
 0x903   :  { %v12170_v9 = vpop.permute.xlu1 %4573  ;;  %v12172_v34 = vpop.permute.xlu0 %4319 }
 0x904   :  { %15392 = vst [vmem:[#allocation115_spill] sm:$0xff] %v12170_v9  ;;  %v4096_v9 = vmul.f32 %v11687_v22, %v15398_v15 }
 0x905   :  { %4647 = vrot.lane.b32.xlu1 %v4156_v0, %s8021_s22  ;;  %4241 = vrot.lane.b32.xlu0 %v4049_v52, %s8015_s28  ;;  %v15397_v0 = vld [vmem:[#allocation162_spill] sm:$0xff] }
 0x906   :  { %v4095_v52 = vmul.f32 %v11693_v29, %v15397_v0  ;;  %v15405_v0 = vld [vmem:[#allocation84_spill] sm:$0xff] }
 0x907   :  { %v12180_v31 = vpop.permute.xlu1 %4381  ;;  %v12182_v23 = vpop.permute.xlu0 %4445 }
 0x908   :  { %15394 = vst [vmem:[#allocation124_spill] sm:$0xff] %v12182_v23  ;;  %v4143_v23 = vmul.f32 %v11687_v22, %v15401_v21 }
 0x909   :  { %4521 = vrot.lane.b32.xlu1 %v4125_v56, %s8018_s15  ;;  %4305 = vrot.lane.b32.xlu0 %v4065_v36, %s8019_s18  ;;  %v15400_v36 = vld [vmem:[#allocation176_spill] sm:$0xff] }
 0x90a   :  { %v4144_v56 = vmul.f32 %v15400_v36, %v15179_v37  ;;  %v15409_v37 = vld [vmem:[#allocation160_spill] sm:$0xff] }
 0x90b   :  { %v12190_v59 = vpop.permute.xlu1 %4253  ;;  %v12192_v11 = vpop.permute.xlu0 %4197  ;;  %v4064_v21 = vmul.f32 %v11795_v2, %v15409_v37 }
 0x90d   :  { %4397 = vrot.lane.b32.xlu1 %v4095_v52, %s8016_s12  ;;  %4399 = vrot.lane.b32.xlu0 %v4096_v9, %s8016_s12  ;;  %v15404_v52 = vld [vmem:[#allocation167_spill] sm:$0xff] }
 0x90e   :  { %v4112_v9 = vmul.f32 %v11779_v38, %v15404_v52 }
 0x90f   :  { %v12200_v50 = vpop.permute.xlu1 %4317  ;;  %v12202_v63 = vpop.permute.xlu0 %4195 }
 0x910   :  { %15399 = vst [vmem:[#allocation122_spill] sm:$0xff] %v12202_v63  ;;  %v4110_v63 = vmul.f32 %v11791_v28, %v15405_v0 }
 0x911   :  { %4591 = vrot.lane.b32.xlu1 %v4144_v56, %s8020_s19  ;;  %4589 = vrot.lane.b32.xlu0 %v4143_v23, %s8020_s19  ;;  %v15408_v56 = vld [vmem:[#allocation125_spill] sm:$0xff] }
 0x912   :  { %v4128_v23 = vmul.f32 %v11710_v32, %v15408_v56 }
 0x913   :  { %v12210_v29 = vpop.permute.xlu1 %4633  ;;  %v12212_v15 = vpop.permute.xlu0 %4575 }
 0x914   :  { %15402 = vst [vmem:[#allocation130_spill] sm:$0xff] %v12210_v29  ;;  %15403 = vst [vmem:[#allocation127_spill] sm:$0xff] %v12212_v15  ;;  %v15413_v15 = vld [vmem:[#allocation113_spill] sm:$0xff] }
 0x915   :  { %4463 = vrot.lane.b32.xlu1 %v4112_v9, %s8017_s14  ;;  %4459 = vrot.lane.b32.xlu0 %v4110_v63, %s8017_s14  ;;  %v15412_v9 = vld [vmem:[#allocation158_spill] sm:$0xff] }
 0x916   :  { %v4063_v63 = vmul.f32 %v11791_v28, %v15412_v9 }
 0x917   :  { %v12220_v36 = vpop.permute.xlu1 %4635  ;;  %v12222_v22 = vpop.permute.xlu0 %4447 }
 0x918   :  { %15406 = vst [vmem:[#allocation214_spill] sm:$0xff] %v12220_v36  ;;  %15407 = vst [vmem:[#allocation215_spill] sm:$0xff] %v12222_v22  ;;  %v4126_v22 = vmul.f32 %v11799_v46, %v15413_v15  ;;  %v15417_v36 = vld [vmem:[#allocation73_spill] sm:$0xff] }
 0x919   :  { %4527 = vrot.lane.b32.xlu1 %v4128_v23, %s8018_s15  ;;  %4271 = vrot.lane.b32.xlu0 %v4064_v21, %s8015_s28  ;;  %v15416_v23 = vld [vmem:[#allocation71_spill] sm:$0xff] }
 0x91a   :  { %v4079_v21 = vmul.f32 %v11799_v46, %v15416_v23  ;;  %v15420_v23 = vld [vmem:[#allocation10_spill] sm:$0xff] }
 0x91b   :  { %v12230_v52 = vpop.permute.xlu1 %4509  ;;  %v12232_v0 = vpop.permute.xlu0 %4259  ;;  %v4157_v46 = vmul.f32 %v11791_v28, %v15420_v23  ;;  %v15426_v28 = vmov 0.0|0.0   ;;  %v15430_v23 = vld [vmem:[#allocation169_spill] sm:$0xff] }
 0x91c   :  { %15410 = vst [vmem:[#allocation216_spill] sm:$0xff] %v12230_v52  ;;  %15411 = vst [vmem:[#allocation217_spill] sm:$0xff] %v12232_v0  ;;  %v4080_v0 = vmul.f32 %v11805_v35, %v15417_v36  ;;  %v15421_v36 = vld [vmem:[#allocation165_spill] sm:$0xff]  ;;  %v15424_v52 = vld [vmem:[#allocation86_spill] sm:$0xff] }
 0x91d   :  { %4269 = vrot.lane.b32.xlu1 %v4063_v63, %s8015_s28  ;;  %4523 = vrot.lane.b32.xlu0 %v4126_v22, %s8018_s15  ;;  %v6676_v63 = vld [vmem:[%s14192_s5 + $0x10] sm:$0xff]  ;;  %v6677_v22 = vld [vmem:[%s14192_s5 + $0x18] sm:$0xff] }
 0x91f   :  { %v12240_v56 = vpop.permute.xlu1 %4387  ;;  %v12242_v37 = vpop.permute.xlu0 %4511 }
 0x920   :  { %15414 = vst [vmem:[#allocation218_spill] sm:$0xff] %v12240_v56  ;;  %15415 = vst [vmem:[#allocation219_spill] sm:$0xff] %v12242_v37  ;;  %v7238_v56 = vpack.c.bf16 %v6677_v22, %v6676_v63  ;;  %v15428_v22 = vld [vmem:[#allocation171_spill] sm:$0xff] }
 0x921   :  { %4333 = vrot.lane.b32.xlu1 %v4079_v21, %s8019_s18  ;;  %4335 = vrot.lane.b32.xlu0 %v4080_v0, %s8019_s18  ;;  %v4158_v21 = vmul.f32 %v11795_v2, %v15421_v36 }
 0x922   :  { %7239 = vmatprep.subr.bf16.mxu0 %v7238_v56 }
 0x923   :  { %v12256_v9 = vpop.permute.xlu1 %4577  ;;  %v12258_v15 = vpop.permute.xlu0 %4323  ;;  %7241 = vmatpush3.bf16.msra.mxu0 %v7238_v56 }
 0x924   :  { %15418 = vst [vmem:[#allocation220_spill] sm:$0xff] %v12256_v9  ;;  %15419 = vst [vmem:[#allocation221_spill] sm:$0xff] %v12258_v15  ;;  %v4111_v9 = vmul.f32 %v11795_v2, %v15424_v52  ;;  %v15425_v15 = vld [vmem:[#allocation135_spill] sm:$0xff]  ;;  %7248 = vmatprep.subr.bf16.mxu0 %v15426_v28  ;;  %v4159_v2 = vmul.f32 %v11779_v38, %v15430_v23 }
 0x925   :  { %4649 = vrot.lane.b32.xlu1 %v4157_v46, %s8021_s22  ;;  %4651 = vrot.lane.b32.xlu0 %v4158_v21, %s8021_s22  ;;  %v4127_v29 = vmul.f32 %v11805_v35, %v15425_v15  ;;  %v15429_v21 = vld [vmem:[#allocation104_spill] sm:$0xff] }
 0x926   :  { %v4160_v36 = vmul.f32 %v15429_v21, %v15428_v22 }
 0x927   :  { %v12266_v0 = vpop.permute.xlu1 %4385  ;;  %v12268_v37 = vpop.permute.xlu0 %4449 }
 0x928   :  { %15422 = vst [vmem:[#allocation222_spill] sm:$0xff] %v12266_v0  ;;  %15423 = vst [vmem:[#allocation223_spill] sm:$0xff] %v12268_v37 }
 0x929   :  { %4461 = vrot.lane.b32.xlu1 %v4111_v9, %s8017_s14  ;;  %4525 = vrot.lane.b32.xlu0 %v4127_v29, %s8018_s15 }
 0x92b   :  { %v12277_v46 = vpop.permute.xlu1 %4257  ;;  %v12279_v63 = vpop.permute.xlu0 %4201 }
 0x92c   :  { %15427 = vst [vmem:[#allocation224_spill] sm:$0xff] %v12279_v63 }
 0x92d   :  { %4655 = vrot.lane.b32.xlu1 %v4160_v36, %s8021_s22  ;;  %4653 = vrot.lane.b32.xlu0 %v4159_v2, %s8021_s22 }
 0x92f   :  { %v12287_v56 = vpop.permute.xlu1 %4321  ;;  %v12289_v15 = vpop.permute.xlu0 %4199 }
 0x930   :  { %15431 = vst [vmem:[#allocation104_spill] sm:$0xff] %v12289_v15 }
 0x933   :  { %v12291_v9 = vpop.permute.xlu1 %4637  ;;  %v12293_v29 = vpop.permute.xlu0 %4579 }
 0x934   :  { %15432 = vst [vmem:[#allocation225_spill] sm:$0xff] %v12291_v9  ;;  %15433 = vst [vmem:[#allocation226_spill] sm:$0xff] %v12293_v29 }
 0x937   :  { %v12295_v52 = vpop.permute.xlu1 %4639  ;;  %v12297_v28 = vpop.permute.xlu0 %4451 }
 0x938   :  { %15434 = vst [vmem:[#allocation227_spill] sm:$0xff] %v12295_v52  ;;  %15435 = vst [vmem:[#allocation228_spill] sm:$0xff] %v12297_v28 }
 0x93b   :  { %v12299_v21 = vpop.permute.xlu1 %4513  ;;  %v12301_v22 = vpop.permute.xlu0 %4263 }
 0x93c   :  { %15436 = vst [vmem:[#allocation229_spill] sm:$0xff] %v12299_v21  ;;  %15437 = vst [vmem:[#allocation230_spill] sm:$0xff] %v12301_v22 }
 0x93f   :  { %v12303_v38 = vpop.permute.xlu1 %4391  ;;  %v12305_v36 = vpop.permute.xlu0 %4515 }
 0x940   :  { %15438 = vst [vmem:[#allocation231_spill] sm:$0xff] %v12303_v38  ;;  %15439 = vst [vmem:[#allocation232_spill] sm:$0xff] %v12305_v36 }
 0x943   :  { %v12307_v2 = vpop.permute.xlu1 %4581  ;;  %v12309_v23 = vpop.permute.xlu0 %4327 }
 0x944   :  { %15440 = vst [vmem:[#allocation233_spill] sm:$0xff] %v12307_v2  ;;  %15441 = vst [vmem:[#allocation234_spill] sm:$0xff] %v12309_v23 }
 0x947   :  { %v12311_v15 = vpop.permute.xlu1 %4389  ;;  %v12313_v9 = vpop.permute.xlu0 %4453 }
 0x948   :  { %15442 = vst [vmem:[#allocation235_spill] sm:$0xff] %v12311_v15  ;;  %15443 = vst [vmem:[#allocation236_spill] sm:$0xff] %v12313_v9 }
 0x94b   :  { %v12315_v29 = vpop.permute.xlu1 %4261  ;;  %v12317_v52 = vpop.permute.xlu0 %4205 }
 0x94c   :  { %15444 = vst [vmem:[#allocation237_spill] sm:$0xff] %v12315_v29  ;;  %15445 = vst [vmem:[#allocation238_spill] sm:$0xff] %v12317_v52 }
 0x94f   :  { %v12319_v28 = vpop.permute.xlu1 %4325  ;;  %v12321_v21 = vpop.permute.xlu0 %4203 }
 0x950   :  { %15446 = vst [vmem:[#allocation239_spill] sm:$0xff] %v12319_v28  ;;  %15447 = vst [vmem:[#allocation240_spill] sm:$0xff] %v12321_v21 }
 0x953   :  { %v12323_v22 = vpop.permute.xlu1 %4641  ;;  %v12325_v38 = vpop.permute.xlu0 %4583 }
 0x954   :  { %15448 = vst [vmem:[#allocation241_spill] sm:$0xff] %v12323_v22  ;;  %15449 = vst [vmem:[#allocation242_spill] sm:$0xff] %v12325_v38 }
 0x957   :  { %v12327_v36 = vpop.permute.xlu1 %4643  ;;  %v4178_v2 = vpop.permute.xlu0 %4177 }
 0x958   :  { %15450 = vst [vmem:[#allocation243_spill] sm:$0xff] %v12327_v36 }
 0x95b   :  { %v12329_v23 = vpop.permute.xlu1 %4517  ;;  %v12331_v15 = vpop.permute.xlu0 %4455 }
 0x95c   :  { %15451 = vst [vmem:[#allocation244_spill] sm:$0xff] %v12329_v23  ;;  %15452 = vst [vmem:[#allocation245_spill] sm:$0xff] %v12331_v15  ;;  %v15463_v15 = vld [vmem:[#allocation173_spill] sm:$0xff] }
 0x95f   :  { %v12333_v9 = vpop.permute.xlu1 %4395  ;;  %v12335_v37 = vpop.permute.xlu0 %4267 }
 0x960   :  { %15453 = vst [vmem:[#allocation246_spill] sm:$0xff] %v12333_v9  ;;  %15454 = vst [vmem:[#allocation247_spill] sm:$0xff] %v12335_v37  ;;  %v15464_v9 = vld [vmem:[#allocation177_spill] sm:$0xff]  ;;  %v15465_v37 = vld [vmem:[#allocation118_spill] sm:$0xff] }
 0x961   :  { %v3987_v29 = vmul.f32 %v15464_v9, %v15463_v15 }
 0x963   :  { %v12337_v52 = vpop.permute.xlu1 %4585  ;;  %v12339_v63 = vpop.permute.xlu0 %4519 }
 0x964   :  { %15455 = vst [vmem:[#allocation248_spill] sm:$0xff] %v12337_v52  ;;  %15456 = vst [vmem:[#allocation249_spill] sm:$0xff] %v12339_v63  ;;  %v3986_v52 = vmul.f32 %v11710_v32, %v15465_v37  ;;  %v15468_v32 = vld [vmem:[#allocation174_spill] sm:$0xff] }
 0x965   :  { %v3989_v37 = vmul.f32 %v11591_v25, %v15468_v32  ;;  %v15473_v32 = vld [vmem:[#allocation175_spill] sm:$0xff] }
 0x967   :  { %v12341_v21 = vpop.permute.xlu1 %4393  ;;  %v12343_v22 = vpop.permute.xlu0 %4331 }
 0x968   :  { %15457 = vst [vmem:[#allocation250_spill] sm:$0xff] %v12341_v21  ;;  %15458 = vst [vmem:[#allocation251_spill] sm:$0xff] %v12343_v22  ;;  %v4675_v22 = vsel %vm1735_vm5, %v3987_v29, %v11905_v1 }
 0x969   :  { %v4691_v9 = vsel %vm87_vm0, %v4675_v22, %v12003_v12  ;;  %v15471_v22 = vld [vmem:[#allocation155_spill] sm:$0xff] }
 0x96a   :  { %v4707_v1 = vsel %vm1768_vm6, %v4691_v9, %v12013_v41  ;;  %v3985_v25 = vmul.f32 %v11805_v35, %v15471_v22 }
 0x96b   :  { %v12345_v38 = vpop.permute.xlu1 %4265  ;;  %v12347_v36 = vpop.permute.xlu0 %4457  ;;  %v4723_v35 = vsel %vm1785_vm7, %v4707_v1, %v11993_v53 }
 0x96c   :  { %15459 = vst [vmem:[#allocation252_spill] sm:$0xff] %v12345_v38  ;;  %15460 = vst [vmem:[#allocation253_spill] sm:$0xff] %v12347_v36  ;;  %v4674_v36 = vsel %vm1735_vm5, %v3986_v52, %v11923_v5  ;;  %v15469_v52 = vld [vmem:[#allocation117_spill] sm:$0xff] }
 0x96d   :  { %v4690_v21 = vsel %vm87_vm0, %v4674_v36, %v11933_v54  ;;  %v15470_v36 = vld [vmem:[#allocation159_spill] sm:$0xff] }
 0x96e   :  { %v4706_v15 = vsel %vm1768_vm6, %v4690_v21, %v11943_v4  ;;  %v3990_v12 = vmul.f32 %v11622_v44, %v15470_v36  ;;  %v4677_v4 = vsel %vm1735_vm5, %v3989_v37, %v11925_v18  ;;  %v15472_v21 = vld [vmem:[#allocation182_spill] sm:$0xff]  ;;  %v4673_v37 = vsel %vm1735_vm5, %v3985_v25, %v4178_v2  ;;  %v15475_v2 = vld [vmem:[#allocation129_spill] sm:$0xff]  ;;  %v15686_v36 = vld [vmem:[#allocation27_spill] sm:$0xff] }
 0x96f   :  { %v12349_v28 = vpop.permute.xlu1 %4329  ;;  %v12351_v23 = vpop.permute.xlu0 %4207  ;;  %v3993_v9 = vmul.f32 %v11661_v27, %v15472_v21  ;;  %v4693_v27 = vsel %vm87_vm0, %v4677_v4, %v12095_v62  ;;  %v15478_v4 = vld [vmem:[#allocation94_spill] sm:$0xff] }
 0x970   :  { %15461 = vst [vmem:[#allocation254_spill] sm:$0xff] %v12349_v28  ;;  %15462 = vst [vmem:[#allocation255_spill] sm:$0xff] %v12351_v23  ;;  %v15466_v23 = vld [vmem:[#allocation157_spill] sm:$0xff]  ;;  %v15467_v28 = vld [vmem:[#allocation179_spill] sm:$0xff]  ;;  %v4709_v53 = vsel %vm1768_vm6, %v4693_v27, %v12111_v61  ;;  %v4678_v62 = vsel %vm1735_vm5, %v3990_v12, %v12015_v39 }
 0x971   :  { %v3988_v38 = vmul.f32 %v15467_v28, %v15466_v23  ;;  %v3991_v28 = vmul.f32 %v11626_v19, %v15469_v52  ;;  %v4722_v19 = vsel %vm1785_vm7, %v4706_v15, %v11903_v14 }
 0x972   :  { %v4738_v18 = vsel %vm1802_vm8, %v4722_v19, %v11955_v16  ;;  %v3994_v16 = vmul.f32 %v11691_v24, %v15475_v2  ;;  %v15479_v19 = vld [vmem:[#allocation199_spill] sm:$0xff]  ;;  %v15645_v2 = vld [vmem:[#allocation64_spill] sm:$0xff] }
 0x973   :  { %v12357_v0 = vpop.permute.xlu1 %4645  ;;  %v12359_v63 = vpop.permute.xlu0 %4587  ;;  %v4676_v54 = vsel %vm1735_vm5, %v3988_v38, %v11935_v30  ;;  %v3992_v30 = vmul.f32 %v11657_v20, %v15473_v32  ;;  %v4679_v61 = vsel %vm1735_vm5, %v3991_v28, %v12005_v45  ;;  %v15669_v32 = vld [vmem:[#allocation143_spill] sm:$0xff] }
 0x974   :  { %v4692_v41 = vsel %vm87_vm0, %v4676_v54, %v11965_v57  ;;  %v15474_v57 = vld [vmem:[#allocation164_spill] sm:$0xff]  ;;  %v4694_v54 = vsel %vm87_vm0, %v4678_v62, %v12045_v33 }
 0x975   :  { %v4708_v44 = vsel %vm1768_vm6, %v4692_v41, %v11985_v47  ;;  %v3995_v20 = vmul.f32 %v11702_v17, %v15474_v57  ;;  %v4754_v47 = vsel %vm1819_vm9, %v4738_v18, %v11975_v7  ;;  %v15483_v18 = vld [vmem:[#allocation97_spill] sm:$0xff] }
 0x976   :  { %v4724_v17 = vsel %vm1785_vm7, %v4708_v44, %v11973_v48  ;;  %v4710_v48 = vsel %vm1768_vm6, %v4694_v54, %v12071_v13  ;;  %v4770_v33 = vsel %vm1836_vm10, %v4754_v47, %v11945_v51  ;;  %v15480_v44 = vld [vmem:[#allocation180_spill] sm:$0xff]  ;;  %v15487_v54 = vld [vmem:[#allocation126_spill] sm:$0xff] }
 0x977   :  { %v12377_v29 = vpop.permute.xlu1 %4647  ;;  %v4242_v5 = vpop.permute.xlu0 %4241  ;;  %v4726_v27 = vsel %vm1785_vm7, %v4710_v48, %v15483_v18  ;;  %v15489_v48 = vld [vmem:[#allocation122_spill] sm:$0xff] }
 0x978   :  { %v4689_v38 = vsel %vm87_vm0, %v4673_v37, %v4242_v5  ;;  %v4739_v5 = vsel %vm1802_vm8, %v4723_v35, %v11995_v55  ;;  %v4725_v55 = vsel %vm1785_vm7, %v4709_v53, %v12079_v40  ;;  %v15476_v40 = vld [vmem:[#allocation195_spill] sm:$0xff]  ;;  %v15481_v35 = vld [vmem:[#allocation105_spill] sm:$0xff] }
 0x979   :  { %v4755_v24 = vsel %vm1819_vm9, %v4739_v5, %v12043_v49  ;;  %v15482_v37 = vld [vmem:[#allocation103_spill] sm:$0xff] }
 0x97b   :  { %v12409_v15 = vpop.permute.xlu1 %4521  ;;  %v4306_v14 = vpop.permute.xlu0 %4305 }
 0x97c   :  { %v4705_v1 = vsel %vm1768_vm6, %v4689_v38, %v4306_v14  ;;  %v15484_v38 = vld [vmem:[#allocation98_spill] sm:$0xff] }
 0x97d   :  { %v4721_v7 = vsel %vm1785_vm7, %v4705_v1, %v11915_v26  ;;  %v4695_v26 = vsel %vm87_vm0, %v4679_v61, %v12190_v59  ;;  %v15477_v59 = vld [vmem:[#allocation91_spill] sm:$0xff]  ;;  %v4741_v14 = vsel %vm1802_vm8, %v4725_v55, %v15484_v38  ;;  %v15490_v55 = vld [vmem:[#allocation100_spill] sm:$0xff] }
 0x97e   :  { %v4737_v39 = vsel %vm1802_vm8, %v4721_v7, %v11953_v10  ;;  %v4740_v10 = vsel %vm1802_vm8, %v4724_v17, %v12035_v42  ;;  %v4711_v13 = vsel %vm1768_vm6, %v4695_v26, %v12200_v50  ;;  %v4786_v25 = vsel %vm1853_vm11, %v4770_v33, %v15477_v59  ;;  %v15485_v17 = vld [vmem:[#allocation92_spill] sm:$0xff]  ;;  %v15495_v59 = vld [vmem:[#allocation237_spill] sm:$0xff] }
 0x97f   :  { %v12440_v12 = vpop.permute.xlu1 %4397  ;;  %v12442_v45 = vpop.permute.xlu0 %4399  ;;  %v4753_v49 = vsel %vm1819_vm9, %v4737_v39, %v11963_v8  ;;  %v4756_v41 = vsel %vm1819_vm9, %v4740_v10, %v15478_v4  ;;  %v4771_v8 = vsel %vm1836_vm10, %v4755_v24, %v15479_v19  ;;  %v4681_v42 = vsel %vm1735_vm5, %v3993_v9, %v15481_v35  ;;  %v15488_v39 = vld [vmem:[#allocation190_spill] sm:$0xff] }
 0x980   :  { %v4769_v28 = vsel %vm1836_vm10, %v4753_v49, %v15476_v40  ;;  %v4680_v50 = vsel %vm1735_vm5, %v3992_v30, %v15482_v37  ;;  %v4787_v47 = vsel %vm1853_vm11, %v4771_v8, %v12121_v58  ;;  %v4757_v53 = vsel %vm1819_vm9, %v4741_v14, %v12147_v43  ;;  %v15491_v49 = vld [vmem:[#allocation124_spill] sm:$0xff]  ;;  %v15492_v10 = vld [vmem:[#allocation130_spill] sm:$0xff]  ;;  %v15498_v8 = vld [vmem:[#allocation217_spill] sm:$0xff] }
 0x981   :  { %v4785_v51 = vsel %vm1853_vm11, %v4769_v28, %v15480_v44  ;;  %v4727_v9 = vsel %vm1785_vm7, %v4711_v13, %v12180_v31  ;;  %v4697_v30 = vsel %vm87_vm0, %v4681_v42, %v12277_v46  ;;  %v4772_v5 = vsel %vm1836_vm10, %v4756_v41, %v15485_v17  ;;  %v15486_v46 = vld [vmem:[#allocation108_spill] sm:$0xff]  ;;  %v15494_v40 = vld [vmem:[#allocation222_spill] sm:$0xff] }
 0x982   :  { %7081 = vmatprep.mubr.msk.f32.mxu1 %vm1886_vm12, %v4785_v51  ;;  %v4742_v58 = vsel %vm1802_vm8, %v4726_v27, %v12139_v60  ;;  %v4696_v43 = vsel %vm87_vm0, %v4680_v50, %v12149_v6  ;;  %v4713_v31 = vsel %vm1768_vm6, %v4697_v30, %v12287_v56  ;;  %v4788_v7 = vsel %vm1853_vm11, %v4772_v5, %v15486_v46  ;;  %v15493_v13 = vld [vmem:[#allocation216_spill] sm:$0xff]  ;;  %v15499_v51 = vld [vmem:[#allocation239_spill] sm:$0xff]  ;;  %v15500_v42 = vld [vmem:[#allocation214_spill] sm:$0xff] }
 0x983   :  { %v12479_v1 = vpop.permute.xlu1 %4591  ;;  %v12481_v62 = vpop.permute.xlu0 %4589  ;;  %7082 = vmatmul.mubr.msk.f32.vlgmr.msra.gmra.mrb[64].mxu1 %vm1886_vm12, %v4786_v25  ;;  %v4758_v61 = vsel %vm1819_vm9, %v4742_v58, %v12162_v3  ;;  %v4712_v24 = vsel %vm1768_vm6, %v4696_v43, %v12172_v34  ;;  %v3997_v60 = vmul.f32 %v15488_v39, %v15487_v54  ;;  %v4683_v6 = vsel %vm1735_vm5, %v3995_v20, %v12192_v11  ;;  %v15496_v25 = vld [vmem:[#allocation110_spill] sm:$0xff]  ;;  %v15497_v41 = vld [vmem:[#allocation116_spill] sm:$0xff]  ;;  %v15501_v50 = vld [vmem:[#allocation215_spill] sm:$0xff] }
 0x984   :  { %7084 = vmatprep.mubr.msk.f32.mxu1 %vm1886_vm12, %v4787_v47  ;;  %v4682_v56 = vsel %vm1735_vm5, %v3994_v16, %v15489_v48  ;;  %v4773_v26 = vsel %vm1836_vm10, %v4757_v53, %v15490_v55  ;;  %v4743_v33 = vsel %vm1802_vm8, %v4727_v9, %v15491_v49  ;;  %v4729_v28 = vsel %vm1785_vm7, %v4713_v31, %v15494_v40  ;;  %v15502_v27 = vld [vmem:[#allocation221_spill] sm:$0xff]  ;;  %v15503_v14 = vld [vmem:[#allocation178_spill] sm:$0xff]  ;;  %v15505_v9 = vld [vmem:[#allocation219_spill] sm:$0xff] }
 0x985   :  { %v4789_v3 = vsel %vm1853_vm11, %v4773_v26, %v15492_v10  ;;  %v4759_v34 = vsel %vm1819_vm9, %v4743_v33, %v15493_v13  ;;  %v4699_v11 = vsel %vm87_vm0, %v4683_v6, %v15495_v59  ;;  %v4774_v4 = vsel %vm1836_vm10, %v4758_v61, %v15496_v25  ;;  %v15504_v47 = vld [vmem:[#allocation189_spill] sm:$0xff]  ;;  %v15506_v17 = vld [vmem:[#allocation224_spill] sm:$0xff]  ;;  %v15507_v58 = vld [vmem:[#allocation115_spill] sm:$0xff] }
 0x986   :  { %v4728_v19 = vsel %vm1785_vm7, %v4712_v24, %v15497_v41  ;;  %v4698_v44 = vsel %vm87_vm0, %v4682_v56, %v15498_v8  ;;  %v4715_v35 = vsel %vm1768_vm6, %v4699_v11, %v15499_v51  ;;  %v4790_v37 = vsel %vm1853_vm11, %v4774_v4, %v15500_v42  ;;  %v15508_v31 = vld [vmem:[#allocation223_spill] sm:$0xff]  ;;  %v15510_v24 = vld [vmem:[#allocation225_spill] sm:$0xff]  ;;  %v15513_v49 = vld [vmem:[#allocation218_spill] sm:$0xff] }
 0x987   :  { %v12517_v20 = vpop.permute.xlu1 %4463  ;;  %v12519_v16 = vpop.permute.xlu0 %4459  ;;  %7085 = vmatmul.mubr.msk.f32.gmra.mrb[66].mxu1 %vm1886_vm12, %v4788_v7  ;;  %v4744_v18 = vsel %vm1802_vm8, %v4728_v19, %v15501_v50  ;;  %v4714_v38 = vsel %vm1768_vm6, %v4698_v44, %v15502_v27  ;;  %v3996_v53 = vmul.f32 %v15504_v47, %v15503_v14  ;;  %v4685_v5 = vsel %vm1735_vm5, %v3997_v60, %v15506_v17  ;;  %v15509_v7 = vld [vmem:[#allocation104_spill] sm:$0xff]  ;;  %v15511_v6 = vld [vmem:[#allocation229_spill] sm:$0xff]  ;;  %v15512_v56 = vld [vmem:[#allocation235_spill] sm:$0xff] }
 0x988   :  { %7087 = vmatprep.mubr.msk.f32.mxu1 %vm1886_vm12, %v4789_v3  ;;  %v4760_v30 = vsel %vm1819_vm9, %v4744_v18, %v15505_v9  ;;  %v4775_v43 = vsel %vm1836_vm10, %v4759_v34, %v15507_v58  ;;  %v4745_v46 = vsel %vm1802_vm8, %v4729_v28, %v15508_v31  ;;  %v4731_v55 = vsel %vm1785_vm7, %v4715_v35, %v15512_v56  ;;  %v15514_v10 = vld [vmem:[#allocation230_spill] sm:$0xff]  ;;  %v15515_v13 = vld [vmem:[#allocation183_spill] sm:$0xff]  ;;  %v15516_v34 = vld [vmem:[#allocation193_spill] sm:$0xff] }
 0x989   :  { %v4684_v61 = vsel %vm1735_vm5, %v3996_v53, %v15509_v7  ;;  %v4791_v39 = vsel %vm1853_vm11, %v4775_v43, %v15510_v24  ;;  %v4761_v48 = vsel %vm1819_vm9, %v4745_v46, %v15511_v6  ;;  %v4730_v33 = vsel %vm1785_vm7, %v4714_v38, %v15513_v49  ;;  %v15517_v28 = vld [vmem:[#allocation252_spill] sm:$0xff]  ;;  %v15518_v11 = vld [vmem:[#allocation127_spill] sm:$0xff]  ;;  %v15520_v19 = vld [vmem:[#allocation234_spill] sm:$0xff] }
 0x98a   :  { %v4700_v3 = vsel %vm87_vm0, %v4684_v61, %v15514_v10  ;;  %v3998_v40 = vmul.f32 %v15516_v34, %v15515_v13  ;;  %v4701_v59 = vsel %vm87_vm0, %v4685_v5, %v15517_v28  ;;  %v4776_v25 = vsel %vm1836_vm10, %v4760_v30, %v15518_v11  ;;  %v15519_v4 = vld [vmem:[#allocation228_spill] sm:$0xff]  ;;  %v15521_v44 = vld [vmem:[#allocation254_spill] sm:$0xff]  ;;  %v15522_v35 = vld [vmem:[#allocation227_spill] sm:$0xff] }
 0x98b   :  { %v12555_v26 = vpop.permute.xlu1 %4527  ;;  %v4272_v60 = vpop.permute.xlu0 %4271  ;;  %7088 = vmatmul.mubr.msk.f32.gmra.mrb[68].mxu1 %vm1886_vm12, %v4790_v37  ;;  %v4746_v41 = vsel %vm1802_vm8, %v4730_v33, %v15519_v4  ;;  %v4716_v8 = vsel %vm1768_vm6, %v4700_v3, %v15520_v19  ;;  %v4717_v51 = vsel %vm1768_vm6, %v4701_v59, %v15521_v44  ;;  %v4792_v42 = vsel %vm1853_vm11, %v4776_v25, %v15522_v35  ;;  %v15523_v37 = vld [vmem:[#allocation232_spill] sm:$0xff]  ;;  %v15527_v30 = vld [vmem:[#allocation241_spill] sm:$0xff]  ;;  %v15529_v46 = vld [vmem:[#allocation231_spill] sm:$0xff] }
 0x98c   :  { %7090 = vmatprep.mubr.msk.f32.mxu1 %vm1886_vm12, %v4791_v39  ;;  %v4762_v50 = vsel %vm1819_vm9, %v4746_v41, %v15523_v37  ;;  %v15524_v18 = vld [vmem:[#allocation220_spill] sm:$0xff]  ;;  %v4732_v7 = vsel %vm1785_vm7, %v4716_v8, %v15529_v46  ;;  %v15530_v61 = vld [vmem:[#allocation247_spill] sm:$0xff]  ;;  %v15531_v39 = vld [vmem:[#allocation250_spill] sm:$0xff] }
 0x98d   :  { %v4777_v27 = vsel %vm1836_vm10, %v4761_v48, %v15524_v18  ;;  %v15525_v38 = vld [vmem:[#allocation236_spill] sm:$0xff]  ;;  %v4733_v6 = vsel %vm1785_vm7, %v4717_v51, %v15531_v39  ;;  %v15532_v48 = vld [vmem:[#allocation95_spill] sm:$0xff]  ;;  %v15534_v49 = vld [vmem:[#allocation226_spill] sm:$0xff] }
 0x98e   :  { %v4747_v47 = vsel %vm1802_vm8, %v4731_v55, %v15525_v38  ;;  %v15526_v53 = vld [vmem:[#allocation240_spill] sm:$0xff]  ;;  %v4793_v17 = vsel %vm1853_vm11, %v4777_v27, %v15527_v30  ;;  %v4778_v33 = vsel %vm1836_vm10, %v4762_v50, %v15534_v49  ;;  %v15535_v10 = vld [vmem:[#allocation245_spill] sm:$0xff]  ;;  %v15536_v34 = vld [vmem:[#allocation251_spill] sm:$0xff] }
 0x98f   :  { %v4686_v9 = vsel %vm1735_vm5, %v3998_v40, %v15526_v53  ;;  %v15528_v5 = vld [vmem:[#allocation244_spill] sm:$0xff]  ;;  %v4270_v43 = vpop.permute.xlu1 %4269  ;;  %v4524_v31 = vpop.permute.xlu0 %4523  ;;  %7091 = vmatmul.mubr.msk.f32.gmra.mrb[70].mxu1 %vm1886_vm12, %v4792_v42  ;;  %v4748_v3 = vsel %vm1802_vm8, %v4732_v7, %v15535_v10  ;;  %v15537_v28 = vld [vmem:[#allocation243_spill] sm:$0xff]  ;;  %v15538_v11 = vld [vmem:[#allocation249_spill] sm:$0xff] }
 0x990   :  { %v4763_v58 = vsel %vm1819_vm9, %v4747_v47, %v15528_v5  ;;  %v4702_v24 = vsel %vm87_vm0, %v4686_v9, %v15530_v61  ;;  %v15533_v56 = vld [vmem:[#allocation200_spill] sm:$0xff]  ;;  %7093 = vmatprep.mubr.msk.f32.mxu1 %vm1886_vm12, %v4793_v17  ;;  %v4794_v59 = vsel %vm1853_vm11, %v4778_v33, %v15537_v28  ;;  %v4764_v25 = vsel %vm1819_vm9, %v4748_v3, %v15538_v11  ;;  %v15539_v4 = vld [vmem:[#allocation255_spill] sm:$0xff]  ;;  %v15540_v19 = vld [vmem:[#allocation233_spill] sm:$0xff] }
 0x991   :  { %v4000_v55 = vmul.f32 %v15533_v56, %v15532_v48  ;;  %v4718_v40 = vsel %vm1768_vm6, %v4702_v24, %v15536_v34  ;;  %v4779_v8 = vsel %vm1836_vm10, %v4763_v58, %v15540_v19  ;;  %v15541_v51 = vld [vmem:[#allocation253_spill] sm:$0xff]  ;;  %v15542_v18 = vld [vmem:[#allocation166_spill] sm:$0xff]  ;;  %v15547_v24 = vld [vmem:[#allocation248_spill] sm:$0xff] }
 0x992   :  { %v4795_v44 = vsel %vm1853_vm11, %v4779_v8, %v12357_v0  ;;  %v4749_v35 = vsel %vm1802_vm8, %v4733_v6, %v15541_v51  ;;  %v15543_v27 = vld [vmem:[#allocation194_spill] sm:$0xff]  ;;  %v15632_v48 = vld [vmem:[#allocation12_spill] sm:$0xff]  ;;  %v15643_v14 = vld [vmem:[#allocation109_spill] sm:$0xff] }
 0x993   :  { %v4688_v41 = vsel %vm1735_vm5, %v4000_v55, %v15539_v4  ;;  %v4334_v37 = vpop.permute.xlu1 %4333  ;;  %v4336_v50 = vpop.permute.xlu0 %4335  ;;  %7094 = vmatmul.mubr.msk.f32.gmra.mrb[72].mxu1 %vm1886_vm12, %v4794_v59  ;;  %v3999_v38 = vmul.f32 %v15543_v27, %v15542_v18  ;;  %v4765_v47 = vsel %vm1819_vm9, %v4749_v35, %v12409_v15  ;;  %v15544_v53 = vld [vmem:[#allocation246_spill] sm:$0xff]  ;;  %v15634_v18 = vld [vmem:[#allocation24_spill] sm:$0xff] }
 0x994   :  { %v4704_v42 = vsel %vm87_vm0, %v4688_v41, %v4272_v60  ;;  %v4734_v9 = vsel %vm1785_vm7, %v4718_v40, %v15544_v53  ;;  %7096 = vmatprep.mubr.msk.f32.mxu1 %vm1886_vm12, %v4795_v44  ;;  %v15545_v30 = vld [vmem:[#allocation242_spill] sm:$0xff]  ;;  %v4781_v39 = vsel %vm1836_vm10, %v4765_v47, %v15547_v24 }
 0x995   :  { %v4720_v0 = vsel %vm1768_vm6, %v4704_v42, %v4336_v50  ;;  %v4780_v60 = vsel %vm1836_vm10, %v4764_v25, %v15545_v30  ;;  %v4750_v17 = vsel %vm1802_vm8, %v4734_v9, %v12519_v16  ;;  %v15546_v5 = vld [vmem:[#allocation238_spill] sm:$0xff] }
 0x996   :  { %v4687_v58 = vsel %vm1735_vm5, %v3999_v38, %v15546_v5  ;;  %v4796_v46 = vsel %vm1853_vm11, %v4780_v60, %v12377_v29  ;;  %v4766_v15 = vsel %vm1819_vm9, %v4750_v17, %v4524_v31  ;;  %v4736_v7 = vsel %vm1785_vm7, %v4720_v0, %v12442_v45  ;;  %v15548_v11 = vld [vmem:[#allocation202_spill] sm:$0xff] }
 0x997   :  { %v4703_v61 = vsel %vm87_vm0, %v4687_v58, %v4270_v43  ;;  %v4650_v6 = vpop.permute.xlu1 %4649  ;;  %v4652_v56 = vpop.permute.xlu0 %4651  ;;  %7097 = vmatmul.mubr.msk.f32.gmra.mrb[74].mxu1 %vm1886_vm12, %v4796_v46  ;;  %v4752_v29 = vsel %vm1802_vm8, %v4736_v7, %v12517_v20  ;;  %v4782_v31 = vsel %vm1836_vm10, %v4766_v15, %v12359_v63 }
 0x998   :  { %v4719_v16 = vsel %vm1768_vm6, %v4703_v61, %v4334_v37  ;;  %v4797_v55 = vsel %vm1853_vm11, %v4781_v39, %v4650_v6  ;;  %v4798_v45 = vsel %vm1853_vm11, %v4782_v31, %v4652_v56  ;;  %v4768_v3 = vsel %vm1819_vm9, %v4752_v29, %v12555_v26 }
 0x999   :  { %7099 = vmatprep.mubr.msk.f32.mxu1 %vm1886_vm12, %v4797_v55  ;;  %v4735_v43 = vsel %vm1785_vm7, %v4719_v16, %v12440_v12  ;;  %v4784_v40 = vsel %vm1836_vm10, %v4768_v3, %v12479_v1  ;;  %v15549_v26 = vsub.f32 1.0, %v15548_v11  ;;  %v12690_v11 = vld [vmem:[%s14193_s6 + $0x1] ss:$0 sm:$0xff] }
 0x99b   :  { %v4462_v49 = vpop.permute.xlu1 %4461  ;;  %v4526_v33 = vpop.permute.xlu0 %4525  ;;  %7100 = vmatmul.mubr.msk.f32.gmra.mrb[76].mxu1 %vm1886_vm12, %v4798_v45 }
 0x99c   :  { %v4751_v10 = vsel %vm1802_vm8, %v4735_v43, %v4462_v49 }
 0x99d   :  { %v4767_v20 = vsel %vm1819_vm9, %v4751_v10, %v4526_v33 }
 0x99e   :  { %v4783_v63 = vsel %vm1836_vm10, %v4767_v20, %v12481_v62  ;;  %v6659_v62 = vld [vmem:[%s14191_s4 + $0x1] ss:$0 sm:$0xff] }
 0x99f   :  { %v4656_v34 = vpop.permute.xlu1 %4655  ;;  %v4654_v28 = vpop.permute.xlu0 %4653 }
 0x9a0   :  { %v4800_v12 = vsel %vm1853_vm11, %v4784_v40, %v4656_v34  ;;  %v4799_v59 = vsel %vm1853_vm11, %v4783_v63, %v4654_v28 }
 0x9a1   :  { %7102 = vmatprep.mubr.msk.f32.mxu1 %vm1886_vm12, %v4799_v59 }
 0x9a2   :  { %7103 = vmatmul.mubr.msk.f32.gmra.mrb[78].mxu1 %vm1886_vm12, %v4800_v12 }
 0x9a3   :  { %7137 = vmatprep.mubr.msk.f32.mxu1 %vm3105_vm1, %v15549_v26 }
 0xa56   :  { %v7083_v25 = vpop.f32.mrb[64].mxu1 }
 0xa57   :  { %v4939_v4 = vadd.f32 %v7083_v25, %v6659_v62  ;;  %v4933_v1 = vpop.f32.mrb[65].mxu1 }
 0xa58   :  { %v4934_v41 = vadd.f32 %v6659_v62, %v4933_v1 }
 0xa59   :  { %v5013_v44 = vmax.f32 %v4939_v4, 0.0 }
 0xa5a   :  { %v5012_v19 = vmax.f32 %v4934_v41, 0.0  ;;  %v7086_v8 = vpop.f32.mrb[66].mxu1 }
 0xa5b   :  { %v4949_v51 = vadd.f32 %v7086_v8, %v6659_v62  ;;  %v4943_v35 = vpop.f32.mrb[67].mxu1 }
 0xa5c   :  { %v4944_v42 = vadd.f32 %v6659_v62, %v4943_v35  ;;  %7109 = vmatprep.mubr.msk.f32.mxu0 %vm87_vm0, %v5012_v19 }
 0xa5d   :  { %7110 = vmatmul.mubr.msk.f32.vlgmr.msra.gmra.mrb[48].mxu0 %vm87_vm0, %v5013_v44  ;;  %v5015_v27 = vmax.f32 %v4949_v51, 0.0 }
 0xa5e   :  { %v5014_v37 = vmax.f32 %v4944_v42, 0.0  ;;  %v7089_v50 = vpop.f32.mrb[68].mxu1  ;;  %v15551_v42 = vld [vmem:[#allocation15_spill] sm:$0xff] }
 0xa5f   :  { %v4959_v38 = vadd.f32 %v7089_v50, %v6659_v62  ;;  %v4953_v47 = vpop.f32.mrb[69].mxu1 }
 0xa60   :  { %v4954_v53 = vadd.f32 %v6659_v62, %v4953_v47  ;;  %7112 = vmatprep.mubr.msk.f32.mxu0 %vm87_vm0, %v5014_v37  ;;  %v15552_v47 = vld [vmem:[#allocation14_spill] sm:$0xff] }
 0xa61   :  { %7113 = vmatmul.mubr.msk.f32.gmra.mrb[50].mxu0 %vm87_vm0, %v5015_v27  ;;  %v5017_v30 = vmax.f32 %v4959_v38, 0.0 }
 0xa62   :  { %v5016_v9 = vmax.f32 %v4954_v53, 0.0  ;;  %v7092_v0 = vpop.f32.mrb[70].mxu1 }
 0xa63   :  { %v4969_v60 = vadd.f32 %v7092_v0, %v6659_v62  ;;  %v4963_v17 = vpop.f32.mrb[71].mxu1  ;;  %v15553_v0 = vld [vmem:[#allocation26_spill] sm:$0xff] }
 0xa64   :  { %v4964_v5 = vadd.f32 %v6659_v62, %v4963_v17  ;;  %7115 = vmatprep.mubr.msk.f32.mxu0 %vm87_vm0, %v5016_v9 }
 0xa65   :  { %7116 = vmatmul.mubr.msk.f32.gmra.mrb[52].mxu0 %vm87_vm0, %v5017_v30  ;;  %v5019_v15 = vmax.f32 %v4969_v60, 0.0  ;;  %v15554_v60 = vld [vmem:[#allocation33_spill] sm:$0xff] }
 0xa66   :  { %v5018_v58 = vmax.f32 %v4964_v5, 0.0  ;;  %v7095_v46 = vpop.f32.mrb[72].mxu1  ;;  %v15555_v5 = vld [vmem:[#allocation31_spill] sm:$0xff] }
 0xa67   :  { %v4979_v7 = vadd.f32 %v7095_v46, %v6659_v62  ;;  %v4973_v61 = vpop.f32.mrb[73].mxu1 }
 0xa68   :  { %v4974_v24 = vadd.f32 %v6659_v62, %v4973_v61  ;;  %7118 = vmatprep.mubr.msk.f32.mxu0 %vm87_vm0, %v5018_v58  ;;  %v15721_v61 = vld [vmem:[#allocation84_spill] sm:$0xff] }
 0xa69   :  { %7119 = vmatmul.mubr.msk.f32.gmra.mrb[54].mxu0 %vm87_vm0, %v5019_v15  ;;  %v5021_v56 = vmax.f32 %v4979_v7, 0.0 }
 0xa6a   :  { %v5020_v39 = vmax.f32 %v4974_v24, 0.0  ;;  %v7098_v6 = vpop.f32.mrb[74].mxu1 }
 0xa6b   :  { %v4989_v16 = vadd.f32 %v7098_v6, %v6659_v62  ;;  %v4983_v55 = vpop.f32.mrb[75].mxu1 }
 0xa6c   :  { %v4984_v29 = vadd.f32 %v6659_v62, %v4983_v55  ;;  %7121 = vmatprep.mubr.msk.f32.mxu0 %vm87_vm0, %v5020_v39 }
 0xa6d   :  { %7122 = vmatmul.mubr.msk.f32.gmra.mrb[56].mxu0 %vm87_vm0, %v5021_v56  ;;  %v5023_v43 = vmax.f32 %v4989_v16, 0.0 }
 0xa6e   :  { %v5022_v31 = vmax.f32 %v4984_v29, 0.0  ;;  %v7101_v45 = vpop.f32.mrb[76].mxu1  ;;  %v15559_v29 = vld [vmem:[#allocation20_spill] sm:$0xff] }
 0xa6f   :  { %v4999_v49 = vadd.f32 %v7101_v45, %v6659_v62  ;;  %v4993_v33 = vpop.f32.mrb[77].mxu1 }
 0xa70   :  { %v4994_v10 = vadd.f32 %v6659_v62, %v4993_v33  ;;  %7124 = vmatprep.mubr.msk.f32.mxu0 %vm87_vm0, %v5022_v31  ;;  %v15560_v33 = vld [vmem:[#allocation137_spill] sm:$0xff] }
 0xa71   :  { %7125 = vmatmul.mubr.msk.f32.gmra.mrb[58].mxu0 %vm87_vm0, %v5023_v43  ;;  %v5025_v20 = vmax.f32 %v4999_v49, 0.0 }
 0xa72   :  { %v5024_v3 = vmax.f32 %v4994_v10, 0.0 }
 0xa74   :  { %7127 = vmatprep.mubr.msk.f32.mxu0 %vm87_vm0, %v5024_v3 }
 0xa75   :  { %v7104_v63 = vpop.f32.mrb[78].mxu1  ;;  %7128 = vmatmul.mubr.msk.f32.gmra.mrb[60].mxu0 %vm87_vm0, %v5025_v20  ;;  %v15561_v20 = vld [vmem:[#allocation35_spill] sm:$0xff] }
 0xa76   :  { %v5009_v34 = vadd.f32 %v7104_v63, %v6659_v62  ;;  %v5003_v40 = vpop.f32.mrb[79].mxu1 }
 0xa77   :  { %v5004_v28 = vadd.f32 %v6659_v62, %v5003_v40 }
 0xa78   :  { %v5027_v59 = vmax.f32 %v5009_v34, 0.0  ;;  %v15562_v34 = vld [vmem:[#allocation28_spill] sm:$0xff] }
 0xa79   :  { %v5026_v12 = vmax.f32 %v5004_v28, 0.0  ;;  %v15563_v28 = vld [vmem:[#allocation21_spill] sm:$0xff] }
 0xa7b   :  { %7130 = vmatprep.mubr.msk.f32.mxu0 %vm87_vm0, %v5026_v12 }
 0xa7c   :  { %7131 = vmatmul.mubr.msk.f32.gmra.mrb[62].mxu0 %vm87_vm0, %v5027_v59 }
 0xb30   :  { %v7111_v26 = vpop.f32.mrb[48].mxu0 }
 0xb31   :  { %v5159_v25 = vadd.f32 %v7111_v26, %v12690_v11  ;;  %v5153_v4 = vpop.f32.mrb[49].mxu0 }
 0xb32   :  { %v5154_v1 = vadd.f32 %v12690_v11, %v5153_v4 }
 0xb33   :  { %v5233_v41 = vmax.f32 %v5159_v25, 0.0 }
 0xb34   :  { %v12694_v19 = vmax.f32 %v5154_v1, 0.0  ;;  %v7114_v62 = vpop.f32.mrb[50].mxu0 }
 0xb35   :  { %v5249_v8 = vrot.slane %v5233_v41, 7  ;;  %v5313_v44 = vrot.slane %v5233_v41, 1  ;;  %v5169_v51 = vadd.f32 %v7114_v62, %v12690_v11  ;;  %v5163_v35 = vpop.f32.mrb[51].mxu0  ;;  %v5377_v37 = vmul.f32 %v5233_v41, %v15551_v42 }
 0xb36   :  { %15550 = vst [vmem:[#allocation177_spill] sm:$0xff] %v12694_v19  ;;  %v14622_v50 = vrot.slane %v12694_v19, 7  ;;  %v14623_v27 = vrot.slane %v12694_v19, 1  ;;  %v5164_v38 = vadd.f32 %v12690_v11, %v5163_v35  ;;  %v5376_v53 = vmul.f32 %v12694_v19, %v15552_v47 }
 0xb37   :  { %v12703_v9 = vmax.f32 %v5169_v51, 0.0  ;;  %v5424_v30 = vmul.f32 %v5233_v41, %v15553_v0  ;;  %v5298_v17 = vmul.f32 %v5233_v41, %v15554_v60  ;;  %v12709_v58 = vmul.f32 %v12694_v19, %v15555_v5  ;;  %v15567_v5 = vld [vmem:[#allocation17_spill] sm:$0xff] }
 0xb38   :  { %v5234_v46 = vmax.f32 %v5164_v38, 0.0  ;;  %v7117_v15 = vpop.f32.mrb[52].mxu0  ;;  %v7654_v7 = vpack.i.bf16 %v5377_v37, %v5376_v53  ;;  %v12715_v24 = vsel %vm437_vm4, %v14622_v50, %v5249_v8  ;;  %v12721_v39 = vsel %vm646_vm3, %v14623_v27, %v5313_v44 }
 0xb39   :  { %15557 = vst [vmem:[#allocation179_spill] sm:$0xff] %v12715_v24  ;;  %15558 = vst [vmem:[#allocation195_spill] sm:$0xff] %v12721_v39  ;;  %v5251_v6 = vrot.slane %v12703_v9, 7  ;;  %v5315_v56 = vrot.slane %v12703_v9, 1  ;;  %v5179_v16 = vadd.f32 %v7117_v15, %v12690_v11  ;;  %v5173_v55 = vpop.f32.mrb[53].mxu0  ;;  %v5379_v31 = vmul.f32 %v12703_v9, %v15559_v29  ;;  %v15570_v29 = vld [vmem:[#allocation57_spill] sm:$0xff] }
 0xb3a   :  { %v5250_v45 = vrot.slane %v5234_v46, 7  ;;  %v5314_v43 = vrot.slane %v5234_v46, 1  ;;  %v5174_v49 = vadd.f32 %v12690_v11, %v5173_v55  ;;  %7655 = vrot.lane.b32.xlu1 %v7654_v7, %s8021_s22  ;;  %v5425_v10 = vmul.f32 %v5234_v46, %v15560_v33  ;;  %v15568_v7 = vld [vmem:[#allocation75_spill] sm:$0xff] }
 0xb3b   :  { %v12731_v3 = vmax.f32 %v5179_v16, 0.0  ;;  %v5299_v63 = vmul.f32 %v5234_v46, %v15561_v20  ;;  %v5378_v40 = vmul.f32 %v5234_v46, %v15562_v34  ;;  %v5408_v12 = vmul.f32 %v12715_v24, %v15563_v28 }
 0xb3c   :  { %v12737_v59 = vmax.f32 %v5174_v49, 0.0  ;;  %v7120_v26 = vpop.f32.mrb[54].mxu0  ;;  %v7659_v25 = vpack.i.bf16 %v5425_v10, %v5424_v30  ;;  %v5341_v4 = vsel %vm646_vm3, %v5313_v44, %v5314_v43  ;;  %v12743_v1 = vsel %vm437_vm4, %v5249_v8, %v5250_v45  ;;  %v15565_v44 = vld [vmem:[#allocation30_spill] sm:$0xff]  ;;  %v15566_v30 = vld [vmem:[#allocation25_spill] sm:$0xff] }
 0xb3d   :  { %15564 = vst [vmem:[#allocation91_spill] sm:$0xff] %v12743_v1  ;;  %v5253_v41 = vrot.slane %v12731_v3, 7  ;;  %v5317_v62 = vrot.slane %v12731_v3, 1  ;;  %v5189_v51 = vadd.f32 %v7120_v26, %v12690_v11  ;;  %v5183_v35 = vpop.f32.mrb[55].mxu0  ;;  %v7664_v42 = vpack.i.bf16 %v5299_v63, %v5298_v17 }
 0xb3e   :  { %v5252_v37 = vrot.slane %v12737_v59, 7  ;;  %v5316_v38 = vrot.slane %v12737_v59, 1  ;;  %v5184_v47 = vadd.f32 %v12690_v11, %v5183_v35  ;;  %7660 = vrot.lane.b32.xlu0 %v7659_v25, %s8022_s29  ;;  %v5440_v53 = vmul.f32 %v5341_v4, %v15565_v44  ;;  %v15571_v25 = vld [vmem:[#allocation60_spill] sm:$0xff]  ;;  %v15573_v35 = vld [vmem:[#allocation19_spill] sm:$0xff] }
 0xb3f   :  { %v12753_v8 = vmax.f32 %v5189_v51, 0.0  ;;  %7665 = vrot.lane.b32.xlu1 %v7664_v42, %s8015_s28  ;;  %v7669_v0 = vpack.i.bf16 %v5379_v31, %v5378_v40  ;;  %v5409_v60 = vmul.f32 %v12743_v1, %v15566_v30  ;;  %v5392_v17 = vmul.f32 %v12721_v39, %v15567_v5  ;;  %v15575_v30 = vld [vmem:[#allocation45_spill] sm:$0xff]  ;;  %v15576_v5 = vld [vmem:[#allocation48_spill] sm:$0xff] }
 0xb40   :  { %v12760_v46 = vmax.f32 %v5184_v47, 0.0  ;;  %6733 = vmatprep.mubr.msk.f32.mxu0 %vm87_vm0, %v5440_v53  ;;  %v7123_v15 = vpop.f32.mrb[56].mxu0  ;;  %v5393_v16 = vmul.f32 %v5341_v4, %v15568_v7  ;;  %v12768_v55 = vsel %vm437_vm4, %v5250_v45, %v5251_v6  ;;  %v5362_v31 = vmul.f32 %v12743_v1, %v15570_v29  ;;  %v15574_v53 = vld [vmem:[#allocation23_spill] sm:$0xff] }
 0xb41   :  { %15569 = vst [vmem:[#allocation94_spill] sm:$0xff] %v12768_v55  ;;  %v5255_v49 = vrot.slane %v12753_v8, 7  ;;  %v5319_v33 = vrot.slane %v12753_v8, 1  ;;  %v5199_v10 = vadd.f32 %v7123_v15, %v12690_v11  ;;  %v5193_v20 = vpop.f32.mrb[57].mxu0  ;;  %v7679_v63 = vpack.i.bf16 %v5409_v60, %v5408_v12  ;;  %v15580_v15 = vld [vmem:[#allocation52_spill] sm:$0xff]  ;;  %v15712_v1 = vld [vmem:[#allocation163_spill] sm:$0xff] }
 0xb42   :  { %v5254_v34 = vrot.slane %v12760_v46, 7  ;;  %v5318_v40 = vrot.slane %v12760_v46, 1  ;;  %v5194_v28 = vadd.f32 %v12690_v11, %v5193_v20  ;;  %7670 = vrot.lane.b32.xlu0 %v7669_v0, %s8021_s22  ;;  %v7674_v45 = vpack.i.bf16 %v5393_v16, %v5392_v17 }
 0xb43   :  { %v12779_v26 = vmax.f32 %v5199_v10, 0.0  ;;  %7680 = vrot.lane.b32.xlu1 %v7679_v63, %s8023_s30  ;;  %v5363_v51 = vmul.f32 %v12768_v55, %v15571_v25  ;;  %v12788_v12 = vsel %vm646_vm3, %v5314_v43, %v5315_v56  ;;  %v5346_v42 = vmul.f32 %v5341_v4, %v15573_v35  ;;  %v15577_v35 = vld [vmem:[#allocation32_spill] sm:$0xff] }
 0xb44   :  { %15572 = vst [vmem:[#allocation199_spill] sm:$0xff] %v12788_v12  ;;  %v12791_v47 = vmax.f32 %v5194_v28, 0.0  ;;  %v7126_v44 = vpop.f32.mrb[58].mxu0  ;;  %v5347_v0 = vmul.f32 %v12788_v12, %v15574_v53  ;;  %v5426_v60 = vmul.f32 %v12703_v9, %v15575_v30  ;;  %v5427_v17 = vmul.f32 %v12737_v59, %v15576_v5  ;;  %v15579_v5 = vld [vmem:[#allocation47_spill] sm:$0xff] }
 0xb45   :  { %v5209_v43 = vadd.f32 %v7126_v44, %v12690_v11  ;;  %v5203_v16 = vpop.f32.mrb[59].mxu0  ;;  %v7689_v4 = vpack.i.bf16 %v5363_v51, %v5362_v31  ;;  %v5300_v53 = vmul.f32 %v12703_v9, %v15577_v35  ;;  %v15578_v44 = vld [vmem:[#allocation38_spill] sm:$0xff]  ;;  %v15592_v9 = vld [vmem:[#allocation63_spill] sm:$0xff]  ;;  %v15638_v54 = vrot.slane %v12779_v26, 7 }
 0xb46   :  { %v5320_v10 = vrot.slane %v12791_v47, 1  ;;  %v5204_v20 = vadd.f32 %v12690_v11, %v5203_v16  ;;  %7675 = vrot.lane.b32.xlu0 %v7674_v45, %s8024_s13  ;;  %v7684_v63 = vpack.i.bf16 %v5347_v0, %v5346_v42  ;;  %v7694_v25 = vpack.i.bf16 %v5427_v17, %v5426_v60  ;;  %v15583_v0 = vld [vmem:[#allocation93_spill] sm:$0xff] }
 0xb47   :  { %v12806_v28 = vmax.f32 %v5209_v43, 0.0  ;;  %7690 = vrot.lane.b32.xlu1 %v7689_v4, %s8018_s15  ;;  %v5301_v31 = vmul.f32 %v12737_v59, %v15578_v44  ;;  %v5380_v16 = vmul.f32 %v12737_v59, %v15579_v5  ;;  %v5381_v45 = vmul.f32 %v12731_v3, %v15580_v15  ;;  %v15589_v15 = vld [vmem:[#allocation62_spill] sm:$0xff] }
 0xb48   :  { %v12813_v51 = vmax.f32 %v5204_v20, 0.0  ;;  %v7129_v30 = vpop.f32.mrb[60].mxu0  ;;  %v12825_v42 = vsel %vm437_vm4, %v5251_v6, %v5252_v37  ;;  %v15582_v6 = vld [vmem:[#allocation89_spill] sm:$0xff] }
 0xb49   :  { %15581 = vst [vmem:[#allocation180_spill] sm:$0xff] %v12825_v42  ;;  %v5219_v17 = vadd.f32 %v7129_v30, %v12690_v11  ;;  %v5213_v43 = vpop.f32.mrb[61].mxu0  ;;  %v7699_v4 = vpack.i.bf16 %v5301_v31, %v5300_v53  ;;  %v7704_v44 = vpack.i.bf16 %v5381_v45, %v5380_v16  ;;  %v5410_v60 = vmul.f32 %v12768_v55, %v15582_v6  ;;  %v15585_v31 = vld [vmem:[#allocation34_spill] sm:$0xff] }
 0xb4a   :  { %v5214_v35 = vadd.f32 %v12690_v11, %v5213_v43  ;;  %7685 = vrot.lane.b32.xlu0 %v7684_v63, %s8016_s12  ;;  %v5411_v30 = vmul.f32 %v12825_v42, %v15583_v0  ;;  %v12847_v53 = vsel %vm646_vm3, %v5315_v56, %v5316_v38  ;;  %v5394_v16 = vmul.f32 %v12788_v12, %v15585_v31  ;;  %v15588_v43 = vld [vmem:[#allocation43_spill] sm:$0xff]  ;;  %v15594_v56 = vld [vmem:[#allocation41_spill] sm:$0xff]  ;;  %v15595_v31 = vld [vmem:[#allocation50_spill] sm:$0xff] }
 0xb4b   :  { %v12834_v5 = vmax.f32 %v5219_v17, 0.0  ;;  %7695 = vrot.lane.b32.xlu1 %v7694_v25, %s8022_s29  ;;  %15584 = vst [vmem:[#allocation105_spill] sm:$0xff] %v12847_v53  ;;  %v15586_v25 = vld [vmem:[#allocation39_spill] sm:$0xff]  ;;  %v12861_v0 = vsel %vm437_vm4, %v5252_v37, %v5253_v41  ;;  %v15655_v21 = vrot.slane %v12813_v51, 7 }
 0xb4c   :  { %v12849_v63 = vmax.f32 %v5214_v35, 0.0  ;;  %v5395_v45 = vmul.f32 %v12847_v53, %v15586_v25  ;;  %15587 = vst [vmem:[#allocation103_spill] sm:$0xff] %v12861_v0  ;;  %v7714_v17 = vpack.i.bf16 %v5411_v30, %v5410_v60  ;;  %v5364_v35 = vmul.f32 %v12825_v42, %v15588_v43  ;;  %v15591_v30 = vld [vmem:[#allocation37_spill] sm:$0xff] }
 0xb4d   :  { %v5365_v20 = vmul.f32 %v12861_v0, %v15589_v15  ;;  %v12879_v60 = vsel %vm646_vm3, %v5316_v38, %v5317_v62  ;;  %v5348_v43 = vmul.f32 %v12847_v53, %v15591_v30  ;;  %v5302_v38 = vmul.f32 %v12731_v3, %v15595_v31  ;;  %v15596_v30 = vld [vmem:[#allocation56_spill] sm:$0xff] }
 0xb4e   :  { %7700 = vrot.lane.b32.xlu0 %v7699_v4, %s8015_s28  ;;  %v7709_v25 = vpack.i.bf16 %v5395_v45, %v5394_v16  ;;  %15590 = vst [vmem:[#allocation97_spill] sm:$0xff] %v12879_v60  ;;  %v5428_v4 = vmul.f32 %v12731_v3, %v15592_v9  ;;  %v15593_v16 = vld [vmem:[#allocation67_spill] sm:$0xff]  ;;  %v5349_v59 = vmul.f32 %v12879_v60, %v15594_v56  ;;  %v15597_v9 = vld [vmem:[#allocation22_spill] sm:$0xff]  ;;  %v15680_v12 = vrot.slane %v12849_v63, 7 }
 0xb4f   :  { %7705 = vrot.lane.b32.xlu1 %v7704_v44, %s8021_s22  ;;  %v7132_v37 = vpop.f32.mrb[62].mxu0  ;;  %v5429_v15 = vmul.f32 %v12760_v46, %v15593_v16  ;;  %v7724_v6 = vpack.i.bf16 %v5365_v20, %v5364_v35  ;;  %v5303_v27 = vmul.f32 %v12760_v46, %v15596_v30  ;;  %v5382_v29 = vmul.f32 %v12760_v46, %v15597_v9  ;;  %v15598_v35 = vld [vmem:[#allocation70_spill] sm:$0xff] }
 0xb50   :  { %v5229_v44 = vadd.f32 %v7132_v37, %v12690_v11  ;;  %v5223_v45 = vpop.f32.mrb[63].mxu0  ;;  %v7719_v20 = vpack.i.bf16 %v5349_v59, %v5348_v43  ;;  %v5383_v56 = vmul.f32 %v12753_v8, %v15598_v35  ;;  %v15601_v43 = vld [vmem:[#allocation102_spill] sm:$0xff]  ;;  %v12940_v3 = vsel %vm437_vm4, %v5254_v34, %v5255_v49 }
 0xb51   :  { %v5224_v50 = vadd.f32 %v12690_v11, %v5223_v45  ;;  %v7729_v7 = vpack.i.bf16 %v5429_v15, %v5428_v4  ;;  %v12908_v11 = vsel %vm437_vm4, %v5253_v41, %v5254_v34  ;;  %v7734_v37 = vpack.i.bf16 %v5303_v27, %v5302_v38  ;;  %v15600_v4 = vld [vmem:[#allocation59_spill] sm:$0xff]  ;;  %v15603_v38 = vld [vmem:[#allocation77_spill] sm:$0xff]  ;;  %v15604_v9 = vld [vmem:[#allocation58_spill] sm:$0xff]  ;;  %15605 = vst [vmem:[#allocation108_spill] sm:$0xff] %v12940_v3 }
 0xb52   :  { %v12897_v16 = vmax.f32 %v5229_v44, 0.0  ;;  %7715 = vrot.lane.b32.xlu0 %v7714_v17, %s8023_s30  ;;  %15599 = vst [vmem:[#allocation98_spill] sm:$0xff] %v12908_v11  ;;  %v5412_v17 = vmul.f32 %v12861_v0, %v15600_v4  ;;  %v5413_v15 = vmul.f32 %v12908_v11, %v15601_v43  ;;  %v7739_v59 = vpack.i.bf16 %v5383_v56, %v5382_v29  ;;  %v15608_v56 = vld [vmem:[#allocation65_spill] sm:$0xff] }
 0xb53   :  { %v12910_v31 = vmax.f32 %v5224_v50, 0.0  ;;  %7710 = vrot.lane.b32.xlu1 %v7709_v25, %s8024_s13  ;;  %v12925_v50 = vsel %vm646_vm3, %v5317_v62, %v5318_v40  ;;  %v5396_v30 = vmul.f32 %v12879_v60, %v15603_v38  ;;  %v15606_v62 = vld [vmem:[#allocation61_spill] sm:$0xff]  ;;  %v5367_v4 = vmul.f32 %v12940_v3, %v15608_v56 }
 0xb54   :  { %v14626_v44 = vrot.slane %v12897_v16, 7  ;;  %v14624_v45 = vrot.slane %v12897_v16, 1  ;;  %15602 = vst [vmem:[#allocation92_spill] sm:$0xff] %v12925_v50  ;;  %v7749_v25 = vpack.i.bf16 %v5413_v15, %v5412_v17  ;;  %v5397_v29 = vmul.f32 %v12925_v50, %v15604_v9  ;;  %v15609_v17 = vld [vmem:[#allocation11_spill] sm:$0xff]  ;;  %v15610_v43 = vld [vmem:[#allocation13_spill] sm:$0xff] }
 0xb55   :  { %v5366_v35 = vmul.f32 %v12908_v11, %v15606_v62  ;;  %v12957_v34 = vmul.f32 %v12925_v50, %v15609_v17  ;;  %v12969_v46 = vsel %vm646_vm3, %v5319_v33, %v5320_v10  ;;  %v15613_v9 = vld [vmem:[#allocation79_spill] sm:$0xff]  ;;  %v15614_v56 = vrot.slane %v12791_v47, 7  ;;  %v15660_v50 = vld [vmem:[#allocation138_spill] sm:$0xff] }
 0xb56   :  { %7725 = vrot.lane.b32.xlu0 %v7724_v6, %s8018_s15  ;;  %v12950_v6 = vsel %vm646_vm3, %v5318_v40, %v5319_v33  ;;  %15611 = vst [vmem:[#allocation122_spill] sm:$0xff] %v12969_v46  ;;  %v7744_v40 = vpack.i.bf16 %v5397_v29, %v5396_v30  ;;  %v12977_v62 = vmul.f32 %v12969_v46, %v15613_v9  ;;  %v15616_v30 = vld [vmem:[#allocation78_spill] sm:$0xff]  ;;  %v15681_v42 = vrot.slane %v12806_v28, 7 }
 0xb57   :  { %15607 = vst [vmem:[#allocation190_spill] sm:$0xff] %v12950_v6  ;;  %7720 = vrot.lane.b32.xlu1 %v7719_v20, %s8016_s12  ;;  %v12961_v15 = vmul.f32 %v12950_v6, %v15610_v43  ;;  %v15612_v20 = vld [vmem:[#allocation72_spill] sm:$0xff]  ;;  %v12985_v17 = vsel %vm437_vm4, %v5255_v49, %v15614_v56  ;;  %v7759_v43 = vpack.i.bf16 %v5367_v4, %v5366_v35  ;;  %v15618_v49 = vrot.slane %v12694_v19, 1  ;;  %v15620_v4 = vld [vmem:[#allocation9_spill] sm:$0xff] }
 0xb58   :  { %v12973_v38 = vmul.f32 %v12950_v6, %v15612_v20  ;;  %15615 = vst [vmem:[#allocation100_spill] sm:$0xff] %v12985_v17  ;;  %v12991_v29 = vmul.f32 %v12940_v3, %v15616_v30  ;;  %v15617_v20 = vld [vmem:[#allocation81_spill] sm:$0xff]  ;;  %v15623_v30 = vld [vmem:[#allocation83_spill] sm:$0xff]  ;;  %v15654_v3 = vrot.slane %v12806_v28, 7  ;;  %v13181_v60 = vmul.f32 %v12813_v51, %v15660_v50 }
 0xb59   :  { %v7754_v33 = vpack.i.bf16 %v12961_v15, %v12957_v34  ;;  %v12995_v9 = vmul.f32 %v12985_v17, %v15617_v20  ;;  %v13006_v35 = vsel %vm646_vm3, %v14624_v45, %v15618_v49  ;;  %v13010_v34 = vmul.f32 %v12721_v39, %v15620_v4  ;;  %v15621_v15 = vld [vmem:[#allocation29_spill] sm:$0xff]  ;;  %v15667_v50 = vld [vmem:[#allocation107_spill] sm:$0xff] }
 0xb5a   :  { %7730 = vrot.lane.b32.xlu0 %v7729_v7, %s8022_s29  ;;  %v7764_v41 = vpack.i.bf16 %v12977_v62, %v12973_v38  ;;  %15619 = vst [vmem:[#allocation124_spill] sm:$0xff] %v13006_v35  ;;  %v13014_v56 = vmul.f32 %v12897_v16, %v15621_v15  ;;  %v15622_v38 = vld [vmem:[#allocation8_spill] sm:$0xff]  ;;  %v13025_v20 = vmul.f32 %v12753_v8, %v15623_v30  ;;  %v15624_v49 = vld [vmem:[#allocation149_spill] sm:$0xff]  ;;  %v15628_v30 = vrot.slane %v12694_v19, 7 }
 0xb5b   :  { %7735 = vrot.lane.b32.xlu1 %v7734_v37, %s8015_s28  ;;  %v13021_v62 = vmul.f32 %v13006_v35, %v15622_v38  ;;  %v13029_v4 = vmul.f32 %v12791_v47, %v15624_v49  ;;  %v15625_v37 = vrot.slane %v12779_v26, 1  ;;  %v15627_v38 = vld [vmem:[#allocation76_spill] sm:$0xff]  ;;  %v13076_v7 = vmul.f32 %v12779_v26, %v15634_v18 }
 0xb5c   :  { %v13043_v27 = vmul.f32 %v12969_v46, %v15627_v38  ;;  %v13051_v49 = vsel %vm437_vm4, %v14626_v44, %v15628_v30  ;;  %v15631_v38 = vld [vmem:[#allocation55_spill] sm:$0xff]  ;;  %v13068_v30 = vmul.f32 %v12715_v24, %v15632_v48  ;;  %v15633_v44 = vld [vmem:[#allocation85_spill] sm:$0xff]  ;;  %v13393_v23 = vmul.f32 %v12897_v16, %v15712_v1 }
 0xb5d   :  { %v13039_v45 = vsel %vm646_vm3, %v5320_v10, %v15625_v37  ;;  %15629 = vst [vmem:[#allocation216_spill] sm:$0xff] %v13051_v49  ;;  %v15630_v10 = vld [vmem:[#allocation80_spill] sm:$0xff]  ;;  %v13063_v39 = vmul.f32 %v13051_v49, %v15631_v38  ;;  %v13072_v15 = vmul.f32 %v12791_v47, %v15633_v44  ;;  %v15636_v38 = vld [vmem:[#allocation74_spill] sm:$0xff]  ;;  %v15637_v44 = vrot.slane %v12813_v51, 7 }
 0xb5e   :  { %15626 = vst [vmem:[#allocation130_spill] sm:$0xff] %v13039_v45  ;;  %v13059_v37 = vmul.f32 %v13039_v45, %v15630_v10  ;;  %7740 = vrot.lane.b32.xlu0 %v7739_v59, %s8021_s22  ;;  %v15635_v10 = vld [vmem:[#allocation40_spill] sm:$0xff]  ;;  %v13087_v48 = vmul.f32 %v12791_v47, %v15636_v38  ;;  %v15647_v59 = vld [vmem:[#allocation90_spill] sm:$0xff]  ;;  %v15716_v19 = vrot.slane %v12834_v5, 1  ;;  %v15726_v35 = vmov 0.0|0.0  }
 0xb5f   :  { %v13080_v13 = vmul.f32 %v12753_v8, %v15635_v10  ;;  %7750 = vrot.lane.b32.xlu1 %v7749_v25, %s8023_s30  ;;  %v13095_v18 = vsel %vm437_vm4, %v15638_v54, %v15637_v44  ;;  %v15640_v8 = vmov %v15638_v54  ;;  %v15641_v10 = vrot.slane %v12791_v47, 7  ;;  %v15644_v54 = vld [vmem:[#allocation119_spill] sm:$0xff]  ;;  %v6700_v49 = vld [vmem:[%s14194_s7 + $0xb0] sm:$0xff] }
 0xb60   :  { %15639 = vst [vmem:[#allocation222_spill] sm:$0xff] %v13095_v18  ;;  %v13115_v44 = vmul.f32 %v13095_v18, %v15644_v54  ;;  %v13129_v46 = vmul.f32 %v12779_v26, %v15647_v59  ;;  %v15648_v54 = vld [vmem:[#allocation42_spill] sm:$0xff] }
 0xb61   :  { %v13103_v25 = vsel %vm437_vm4, %v15641_v10, %v15640_v8  ;;  %v13121_v8 = vmul.f32 %v12985_v17, %v15645_v2  ;;  %v15646_v10 = vld [vmem:[#allocation66_spill] sm:$0xff]  ;;  %v13136_v47 = vmul.f32 %v12813_v51, %v15648_v54  ;;  %v15649_v2 = vrot.slane %v12813_v51, 1 }
 0xb62   :  { %15642 = vst [vmem:[#allocation237_spill] sm:$0xff] %v13103_v25  ;;  %v13111_v57 = vmul.f32 %v13103_v25, %v15643_v14  ;;  %v13125_v38 = vmul.f32 %v13103_v25, %v15646_v10  ;;  %7745 = vrot.lane.b32.xlu0 %v7744_v40, %s8024_s13  ;;  %v15650_v17 = vrot.slane %v12779_v26, 1  ;;  %v15652_v25 = vld [vmem:[#allocation96_spill] sm:$0xff]  ;;  %v15653_v14 = vld [vmem:[#allocation114_spill] sm:$0xff] }
 0xb63   :  { %v13148_v59 = vmul.f32 %v13039_v45, %v15652_v25  ;;  %7760 = vrot.lane.b32.xlu1 %v7759_v43, %s8018_s15  ;;  %v15658_v40 = vld [vmem:[#allocation68_spill] sm:$0xff] }
 0xb64   :  { %v13144_v10 = vsel %vm646_vm3, %v15650_v17, %v15649_v2  ;;  %v13163_v17 = vsel %vm437_vm4, %v15655_v21, %v15654_v3  ;;  %v15657_v2 = vld [vmem:[#allocation131_spill] sm:$0xff]  ;;  %v15661_v3 = vrot.slane %v12849_v63, 1 }
 0xb65   :  { %15651 = vst [vmem:[#allocation110_spill] sm:$0xff] %v13144_v10  ;;  %v13155_v54 = vmul.f32 %v13144_v10, %v15653_v14  ;;  %15656 = vst [vmem:[#allocation116_spill] sm:$0xff] %v13163_v17  ;;  %v13167_v25 = vmul.f32 %v13095_v18, %v15657_v2  ;;  %v13173_v45 = vmul.f32 %v13163_v17, %v15658_v40  ;;  %v15659_v14 = vld [vmem:[#allocation134_spill] sm:$0xff]  ;;  %v15662_v2 = vrot.slane %v12806_v28, 1 }
 0xb66   :  { %v13177_v6 = vmul.f32 %v12779_v26, %v15659_v14  ;;  %v15665_v26 = vrot.slane %v12813_v51, 1  ;;  %v13203_v18 = vmul.f32 %v13144_v10, %v15667_v50  ;;  %7755 = vrot.lane.b32.xlu0 %v7754_v33, %s8016_s12  ;;  %v15671_v33 = vld [vmem:[#allocation146_spill] sm:$0xff]  ;;  %v15672_v10 = vld [vmem:[#allocation148_spill] sm:$0xff] }
 0xb67   :  { %v13191_v43 = vsel %vm646_vm3, %v15662_v2, %v15661_v3  ;;  %v15664_v40 = vmov %v15662_v2  ;;  %v15668_v2 = vld [vmem:[#allocation82_spill] sm:$0xff]  ;;  %7765 = vrot.lane.b32.xlu1 %v7764_v41, %s8024_s13  ;;  %v13225_v21 = vmul.f32 %v12806_v28, %v15671_v33  ;;  %v13229_v3 = vmul.f32 %v12849_v63, %v15672_v10  ;;  %v15674_v41 = vld [vmem:[#allocation140_spill] sm:$0xff] }
 0xb68   :  { %15663 = vst [vmem:[#allocation217_spill] sm:$0xff] %v13191_v43  ;;  %v13199_v14 = vsel %vm646_vm3, %v15665_v26, %v15664_v40  ;;  %v13216_v40 = vmul.f32 %v13191_v43, %v15669_v32  ;;  %v15670_v26 = vld [vmem:[#allocation123_spill] sm:$0xff]  ;;  %v13239_v52 = vmul.f32 %v12806_v28, %v15674_v41  ;;  %v15676_v33 = vrot.slane %v12849_v63, 1  ;;  %v15678_v10 = vld [vmem:[#allocation16_spill] sm:$0xff]  ;;  %v15679_v41 = vld [vmem:[#allocation18_spill] sm:$0xff] }
 0xb69   :  { %15666 = vst [vmem:[#allocation239_spill] sm:$0xff] %v13199_v14  ;;  %v13212_v11 = vmul.f32 %v13199_v14, %v15668_v2  ;;  %v13221_v50 = vmul.f32 %v13199_v14, %v15670_v26  ;;  %v15673_v2 = vld [vmem:[#allocation136_spill] sm:$0xff]  ;;  %v15675_v26 = vrot.slane %v12834_v5, 1  ;;  %v13251_v53 = vmul.f32 %v13191_v43, %v15678_v10  ;;  %v15690_v10 = vld [vmem:[#allocation142_spill] sm:$0xff] }
 0xb6a   :  { %v13233_v0 = vmul.f32 %v12813_v51, %v15673_v2  ;;  %v15684_v2 = vld [vmem:[#allocation144_spill] sm:$0xff] }
 0xb6b   :  { %v13247_v14 = vsel %vm646_vm3, %v15676_v33, %v15675_v26  ;;  %v13267_v26 = vsel %vm437_vm4, %v15681_v42, %v15680_v12  ;;  %v15683_v33 = vpack.i.bf16 %v12995_v9, %v12991_v29  ;;  %v15685_v51 = vld [vmem:[#allocation128_spill] sm:$0xff]  ;;  %v13285_v12 = vmul.f32 %v12849_v63, %v15686_v36 }
 0xb6c   :  { %15677 = vst [vmem:[#allocation214_spill] sm:$0xff] %v13247_v14  ;;  %v13259_v32 = vmul.f32 %v13247_v14, %v15679_v41  ;;  %15682 = vst [vmem:[#allocation215_spill] sm:$0xff] %v13267_v26  ;;  %v13277_v41 = vmul.f32 %v13163_v17, %v15684_v2  ;;  %v13281_v43 = vmul.f32 %v13267_v26, %v15685_v51  ;;  %v15688_v9 = vld [vmem:[#allocation152_spill] sm:$0xff]  ;;  %v15702_v17 = vld [vmem:[#allocation133_spill] sm:$0xff] }
 0xb6d   :  { %7770 = vrot.lane.b32.xlu0 %v15683_v33, %s8023_s30  ;;  %v15687_v42 = vpack.i.bf16 %v13010_v34, %v13021_v62  ;;  %v13295_v2 = vmul.f32 %v12834_v5, %v15688_v9  ;;  %v15689_v33 = vld [vmem:[#allocation139_spill] sm:$0xff]  ;;  %v13303_v36 = vmul.f32 %v12849_v63, %v15690_v10  ;;  %v15691_v34 = vld [vmem:[#allocation44_spill] sm:$0xff]  ;;  %v15693_v9 = vrot.slane %v12834_v5, 7 }
 0xb6e   :  { %v13299_v51 = vmul.f32 %v12806_v28, %v15689_v33  ;;  %v13309_v62 = vmul.f32 %v12834_v5, %v15691_v34  ;;  %v15694_v28 = vrot.slane %v12849_v63, 7  ;;  %v15696_v34 = vld [vmem:[#allocation145_spill] sm:$0xff]  ;;  %v15698_v63 = vpack.i.bf16 %v12709_v58, %v13014_v56  ;;  %v15711_v56 = vld [vmem:[#allocation162_spill] sm:$0xff] }
 0xb6f   :  { %7780 = vrot.lane.b32.xlu1 %v15687_v42, %s8016_s12  ;;  %v15692_v42 = vld [vmem:[#allocation156_spill] sm:$0xff]  ;;  %v13329_v22 = vmul.f32 %v13267_v26, %v15696_v34  ;;  %v15700_v10 = vmov %v15693_v9  ;;  %v15703_v26 = vld [vmem:[#allocation161_spill] sm:$0xff]  ;;  %v15704_v58 = vpack.i.bf16 %v13029_v4, %v13025_v20  ;;  %v15709_v20 = vld [vmem:[#allocation71_spill] sm:$0xff] }
 0xb70   :  { %v13313_v29 = vmul.f32 %v12910_v31, %v15692_v42  ;;  %v13321_v33 = vsel %vm437_vm4, %v15694_v28, %v15693_v9  ;;  %v15697_v42 = vld [vmem:[#allocation147_spill] sm:$0xff]  ;;  %v15699_v28 = vrot.slane %v12910_v31, 7  ;;  %v13355_v24 = vmul.f32 %v12834_v5, %v15703_v26  ;;  %v15720_v5 = vld [vmem:[#allocation154_spill] sm:$0xff] }
 0xb71   :  { %15695 = vst [vmem:[#allocation221_spill] sm:$0xff] %v13321_v33  ;;  %v13333_v55 = vmul.f32 %v13321_v33, %v15697_v42  ;;  %7775 = vrot.lane.b32.xlu0 %v15698_v63, %s8015_s28  ;;  %v13351_v42 = vmul.f32 %v13321_v33, %v15702_v17  ;;  %v15705_v63 = vld [vmem:[#allocation113_spill] sm:$0xff]  ;;  %v15707_v9 = vrot.slane %v12897_v16, 7  ;;  %v15708_v26 = vrot.slane %v12910_v31, 7 }
 0xb72   :  { %v13347_v34 = vsel %vm437_vm4, %v15700_v10, %v15699_v28  ;;  %v15706_v28 = vld [vmem:[#allocation151_spill] sm:$0xff] }
 0xb73   :  { %15701 = vst [vmem:[#allocation189_spill] sm:$0xff] %v13347_v34  ;;  %7785 = vrot.lane.b32.xlu1 %v15704_v58, %s8022_s29  ;;  %v13365_v10 = vmul.f32 %v13347_v34, %v15705_v63  ;;  %v13369_v17 = vmul.f32 %v12910_v31, %v15706_v28  ;;  %v13377_v33 = vsel %vm437_vm4, %v15708_v26, %v15707_v9  ;;  %v15710_v58 = vld [vmem:[#allocation73_spill] sm:$0xff]  ;;  %vm15803_vm4 = vcmask 916480  }
 0xb74   :  { %v13381_v4 = vmul.f32 %v13347_v34, %v15709_v20  ;;  %v13385_v63 = vmul.f32 %v13377_v33, %v15710_v58  ;;  %v13389_v28 = vmul.f32 %v12910_v31, %v15711_v56  ;;  %v15713_v20 = vrot.slane %v12897_v16, 1  ;;  %v6699_v26 = vld [vmem:[%s14194_s7 + $0xa8] sm:$0xff]  ;;  %vm15807_vm8 = vmmov %vm15803_vm4 }
 0xb75   :  { %v15714_v34 = vrot.slane %v12910_v31, 1  ;;  %v15718_v9 = vpack.i.bf16 %v13068_v30, %v13063_v39  ;;  %v15719_v31 = vpack.i.bf16 %v13059_v37, %v13043_v27  ;;  %v15722_v39 = vld [vmem:[#allocation158_spill] sm:$0xff]  ;;  %vm15813_vm12 = vmmov %vm15803_vm4 }
 0xb76   :  { %v6696_v27 = vld [vmem:[%s14194_s7 + $0x90] sm:$0xff]  ;;  %v6697_v37 = vld [vmem:[%s14194_s7 + $0x98] sm:$0xff] }
 0xb77   :  { %v13405_v58 = vsel %vm646_vm3, %v15714_v34, %v15713_v20  ;;  %v15715_v56 = vmov %v15714_v34  ;;  %7790 = vrot.lane.b32.xlu0 %v15718_v9, %s8018_s15  ;;  %7800 = vrot.lane.b32.xlu1 %v15719_v31, %s8016_s12  ;;  %v15723_v9 = vld [vmem:[#allocation160_spill] sm:$0xff]  ;;  %v6714_v31 = vld [vmem:[%s14196_s9 + $0x10] sm:$0xff]  ;;  %v15724_v34 = vpack.i.bf16 %v13087_v48, %v13080_v13  ;;  %v6701_v13 = vld [vmem:[%s14194_s7 + $0xb8] sm:$0xff] }
 0xb78   :  { %v13413_v1 = vsel %vm646_vm3, %v15716_v19, %v15715_v56  ;;  %v13429_v19 = vmul.f32 %v13247_v14, %v15720_v5  ;;  %v13441_v56 = vmul.f32 %v13405_v58, %v15723_v9  ;;  %v6715_v5 = vld [vmem:[%s14196_s9 + $0x18] sm:$0x1]  ;;  %v6698_v9 = vld [vmem:[%s14194_s7 + $0xa0] sm:$0xff]  ;;  %vm15802_vm3 = vcmask 785408  }
 0xb79   :  { %15717 = vst [vmem:[#allocation219_spill] sm:$0xff] %v13413_v1  ;;  %v13433_v20 = vmul.f32 %v13413_v1, %v15721_v61  ;;  %v13437_v30 = vmul.f32 %v13413_v1, %v15722_v39  ;;  %v7249_v1 = vpack.c.bf16 %v6697_v37, %v6696_v27  ;;  %v15725_v61 = vpack.i.bf16 %v13076_v7, %v13072_v15  ;;  %v6704_v37 = vld [vmem:[%s14194_s7 + $0xd0] sm:$0xff]  ;;  %vm15804_vm6 = vmmov %vm15802_vm3 }
 0xb7a   :  { %v7242_v39 = vpack.c.bf16 %v6715_v5, %v6714_v31  ;;  %v7252_v14 = vpack.c.bf16 %v6699_v26, %v6698_v9  ;;  %v15728_v7 = vpack.i.bf16 %v13125_v38, %v13121_v8  ;;  %v15729_v15 = vpack.i.bf16 %v13115_v44, %v13111_v57  ;;  %v6703_v38 = vld [vmem:[%s14194_s7 + $0xc8] sm:$0xff]  ;;  %v15730_v8 = vld [vmem:[#allocation203_spill] sm:$0xff]  ;;  %vm15808_vm10 = vmmov %vm15802_vm3 }
 0xb7b   :  { %7795 = vrot.lane.b32.xlu0 %v15724_v34, %s8015_s28  ;;  %7810 = vrot.lane.b32.xlu1 %v15725_v61, %s8021_s22  ;;  %v7255_v26 = vpack.c.bf16 %v6701_v13, %v6700_v49  ;;  %v15731_v34 = vsub.f32 1.0, %v15730_v8  ;;  %v15732_v57 = vpack.i.bf16 %v13155_v54, %v13148_v59  ;;  %v15733_v49 = vld [vmem:[#allocation204_spill] sm:$0xff]  ;;  %v6705_v59 = vld [vmem:[%s14194_s7 + $0xd8] sm:$0xff]  ;;  %v15736_v54 = vld [vmem:[#allocation205_spill] sm:$0xff]  ;;  %v15741_v61 = vpack.i.bf16 %v13173_v45, %v13167_v25 }
 0xb7c   :  { %7250 = vmatpush1.bf16.msra.mxu0 %v7249_v1  ;;  %7244 = vmatprep.subr.msk.bf16.mxu1 %vm10631_vm15, %v7242_v39  ;;  %v6702_v1 = vld [vmem:[%s14194_s7 + $0xc0] sm:$0xff]  ;;  %v15734_v44 = vsub.f32 1.0, %v15733_v49  ;;  %v15737_v31 = vsub.f32 1.0, %v15736_v54  ;;  %v15744_v45 = vpack.i.bf16 %v13221_v50, %v13203_v18  ;;  %v6709_v18 = vld [vmem:[%s14194_s7 + $0xf8] sm:$0xff]  ;;  %v15748_v50 = vld [vmem:[#allocation209_spill] sm:$0xff]  ;;  %v15753_v8 = vpack.i.bf16 %v13229_v3, %v13225_v21 }
 0xb7d   :  { %7251 = vmatprep.subr.bf16.mxu0 %v15726_v35  ;;  %7247 = vmatpush3.bf16.msk.msra.mxu1 %vm10631_vm15, %v7242_v39  ;;  %v7258_v27 = vpack.c.bf16 %v6703_v38, %v6702_v1  ;;  %v7261_v39 = vpack.c.bf16 %v6705_v59, %v6704_v37  ;;  %v6706_v9 = vld [vmem:[%s14194_s7 + $0xe0] sm:$0xff]  ;;  %v15749_v1 = vsub.f32 1.0, %v15748_v50  ;;  %v15756_v21 = vpack.i.bf16 %v13281_v43, %v13277_v41  ;;  %v6712_v37 = vld [vmem:[%s14194_s7 + $0x110] sm:$0xff]  ;;  %v6713_v43 = vld [vmem:[%s14194_s7 + $0x118] sm:$0xff] }
 0xb7e   :  { %v15745_v25 = vld [vmem:[#allocation208_spill] sm:$0xff]  ;;  %v15760_v41 = vld [vmem:[#allocation213_spill] sm:$0xff]  ;;  %vm15816_vm15 = vmmov %vm15802_vm3 }
 0xb7f   :  { %7805 = vrot.lane.b32.xlu0 %v15728_v7, %s8018_s15  ;;  %7820 = vrot.lane.b32.xlu1 %v15729_v15, %s8023_s30  ;;  %v15746_v48 = vsub.f32 1.0, %v15745_v25  ;;  %v15747_v7 = vpack.i.bf16 %v13216_v40, %v13212_v11  ;;  %v15750_v11 = vpack.i.bf16 %v13239_v52, %v13233_v0  ;;  %v15751_v40 = vld [vmem:[#allocation210_spill] sm:$0xff]  ;;  %v6711_v52 = vld [vmem:[%s14194_s7 + $0x108] sm:$0xff]  ;;  %v15754_v0 = vld [vmem:[#allocation211_spill] sm:$0xff]  ;;  %v15761_v59 = vsub.f32 1.0, %v15760_v41 }
 0xb80   :  { %7253 = vmatpush1.bf16.msra.mxu0 %v7252_v14  ;;  %7138 = vmatmul.mubr.msk.f32.vlgmr.msra.gmra.mrb[80].mxu1 %vm3105_vm1, %v15731_v34  ;;  %v15735_v14 = vpack.i.bf16 %v13136_v47, %v13129_v46  ;;  %v15738_v46 = vpack.i.bf16 %v13181_v60, %v13177_v6  ;;  %v15739_v47 = vld [vmem:[#allocation206_spill] sm:$0xff]  ;;  %v6707_v60 = vld [vmem:[%s14194_s7 + $0xe8] sm:$0xff]  ;;  %v15742_v6 = vld [vmem:[#allocation207_spill] sm:$0xff]  ;;  %v15752_v38 = vsub.f32 1.0, %v15751_v40  ;;  %v15755_v49 = vsub.f32 1.0, %v15754_v0 }
 0xb81   :  { %7254 = vmatprep.subr.bf16.mxu0 %v15726_v35  ;;  %7140 = vmatprep.mubr.msk.f32.mxu1 %vm3105_vm1, %v15734_v44  ;;  %v15740_v5 = vsub.f32 1.0, %v15739_v47  ;;  %v15743_v13 = vsub.f32 1.0, %v15742_v6  ;;  %v7264_v15 = vpack.c.bf16 %v6707_v60, %v6706_v9  ;;  %v15757_v3 = vld [vmem:[#allocation212_spill] sm:$0xff]  ;;  %vm15820_vm13 = vmmov %vm15802_vm3 }
 0xb82   :  { %v15758_v44 = vsub.f32 1.0, %v15757_v3  ;;  %v15766_v47 = vld [vmem:[#allocation196_spill] sm:$0xff] }
 0xb83   :  { %7815 = vrot.lane.b32.xlu0 %v15732_v57, %s8024_s13  ;;  %7830 = vrot.lane.b32.xlu1 %v15735_v14, %s8015_s28  ;;  %v6710_v57 = vld [vmem:[%s14194_s7 + $0x100] sm:$0xff]  ;;  %v15759_v14 = vpack.i.bf16 %v13259_v32, %v13251_v53  ;;  %v15762_v53 = vpack.i.bf16 %v13303_v36, %v13299_v51  ;;  %v15763_v32 = vld [vmem:[#allocation197_spill] sm:$0xff]  ;;  %v15768_v51 = vpack.i.bf16 %v13333_v55, %v13329_v22 }
 0xb84   :  { %7256 = vmatpush1.bf16.msra.mxu0 %v7255_v26  ;;  %7141 = vmatmul.mubr.msk.f32.gmra.mrb[82].mxu1 %vm3105_vm1, %v15737_v31  ;;  %v6708_v26 = vld [vmem:[%s14194_s7 + $0xf0] sm:$0xff]  ;;  %v15764_v54 = vsub.f32 1.0, %v15763_v32  ;;  %v15765_v31 = vpack.i.bf16 %v13295_v2, %v13285_v12  ;;  %v15769_v36 = vld [vmem:[#allocation191_spill] sm:$0xff]  ;;  %v15771_v12 = vpack.i.bf16 %v13313_v29, %v13309_v62  ;;  %v15775_v22 = vpack.i.bf16 %v13365_v10, %v13351_v42  ;;  %v15780_v42 = vld [vmem:[#allocation168_spill] sm:$0xff] }
 0xb85   :  { %7257 = vmatprep.subr.bf16.mxu0 %v15726_v35  ;;  %7143 = vmatprep.mubr.msk.f32.mxu1 %vm3105_vm1, %v15740_v5  ;;  %v7267_v34 = vpack.c.bf16 %v6709_v18, %v6708_v26  ;;  %v15767_v5 = vsub.f32 1.0, %v15766_v47  ;;  %v15776_v55 = vpack.i.bf16 %v13393_v23, %v13389_v28  ;;  %v15777_v29 = vpack.i.bf16 %v13385_v63, %v13381_v4  ;;  %v15778_v62 = vld [vmem:[#allocation86_spill] sm:$0xff]  ;;  %v15783_v63 = vld [vmem:[#allocation125_spill] sm:$0xff]  ;;  %v15784_v28 = vld [vmem:[#allocation216_spill] sm:$0xff] }
 0xb86   :  { %v5406_v9 = vmul.f32 %v13405_v58, %v15778_v62  ;;  %v5438_v10 = vmul.f32 %v12897_v16, %v15780_v42  ;;  %v15781_v23 = vpack.i.bf16 %v13441_v56, %v13437_v30  ;;  %v5423_v60 = vmul.f32 %v15784_v28, %v15783_v63  ;;  %v15785_v16 = vld [vmem:[#allocation167_spill] sm:$0xff]  ;;  %v15787_v56 = vld [vmem:[#allocation153_spill] sm:$0xff]  ;;  %v15789_v18 = vld [vmem:[#allocation198_spill] sm:$0xff] }
 0xb87   :  { %7825 = vrot.lane.b32.xlu0 %v15738_v46, %s8022_s29  ;;  %7840 = vrot.lane.b32.xlu1 %v15741_v61, %s8018_s15  ;;  %v7273_v46 = vpack.c.bf16 %v6713_v43, %v6712_v37  ;;  %v15770_v61 = vsub.f32 1.0, %v15769_v36  ;;  %v3750_v50 = vand.u32 2147483647, %v15789_v18  ;;  %v15793_v36 = vld [vmem:[#allocation179_spill] sm:$0xff]  ;;  %v15799_v63 = vld [vmem:[#allocation180_spill] sm:$0xff] }
 0xb88   :  { %7259 = vmatpush1.bf16.msra.mxu0 %v7258_v27  ;;  %7144 = vmatmul.mubr.msk.f32.gmra.mrb[84].mxu1 %vm3105_vm1, %v15743_v13  ;;  %v7270_v27 = vpack.c.bf16 %v6711_v52, %v6710_v57  ;;  %v15788_v13 = vld [vmem:[#allocation177_spill] sm:$0xff] }
 0xb89   :  { %7260 = vmatprep.subr.bf16.mxu0 %v15726_v35  ;;  %7146 = vmatprep.mubr.msk.f32.mxu1 %vm3105_vm1, %v15746_v48  ;;  %7928 = vlog2.f32 %v3750_v50 }
 0xb8b   :  { %7835 = vrot.lane.b32.xlu0 %v15744_v45, %s8016_s12  ;;  %7850 = vrot.lane.b32.xlu1 %v15747_v7, %s8024_s13  ;;  %v5439_v45 = vmul.f32 %v15788_v13, %v15787_v56 }
 0xb8c   :  { %7262 = vmatpush1.bf16.msra.mxu0 %v7261_v39  ;;  %7147 = vmatmul.mubr.msk.f32.gmra.mrb[86].mxu1 %vm3105_vm1, %v15749_v1  ;;  %v15774_v39 = vpack.i.bf16 %v13369_v17, %v13355_v24  ;;  %v15779_v24 = vpack.i.bf16 %v13433_v20, %v13429_v19  ;;  %v15782_v17 = vld [vmem:[#allocation135_spill] sm:$0xff]  ;;  %v15786_v20 = vld [vmem:[#allocation124_spill] sm:$0xff] }
 0xb8d   :  { %7263 = vmatprep.subr.bf16.mxu0 %v15726_v35  ;;  %7149 = vmatprep.mubr.msk.f32.mxu1 %vm3105_vm1, %v15752_v38  ;;  %v5422_v4 = vmul.f32 %v13377_v33, %v15782_v17  ;;  %v5407_v6 = vmul.f32 %v15786_v20, %v15785_v16  ;;  %v15800_v16 = vld [vmem:[#allocation36_spill] sm:$0xff] }
 0xb8f   :  { %7845 = vrot.lane.b32.xlu0 %v15750_v11, %s8021_s22  ;;  %7860 = vrot.lane.b32.xlu1 %v15753_v8, %s8022_s29 }
 0xb90   :  { %7265 = vmatpush1.bf16.msra.mxu0 %v7264_v15  ;;  %7150 = vmatmul.mubr.msk.f32.gmra.mrb[88].mxu1 %vm3105_vm1, %v15755_v49 }
 0xb91   :  { %7266 = vmatprep.subr.bf16.mxu0 %v15726_v35  ;;  %7152 = vmatprep.mubr.msk.f32.mxu1 %vm3105_vm1, %v15758_v44 }
 0xb93   :  { %7855 = vrot.lane.b32.xlu0 %v15756_v21, %s8023_s30  ;;  %7870 = vrot.lane.b32.xlu1 %v15759_v14, %s8016_s12  ;;  %v7929_v57 = vpop.eup %7928 }
 0xb94   :  { %7268 = vmatpush1.bf16.msra.mxu0 %v7267_v34  ;;  %7153 = vmatmul.mubr.msk.f32.gmra.mrb[90].mxu1 %vm3105_vm1, %v15761_v59  ;;  %v3752_v49 = vmul.f32 0.6931472, %v7929_v57 }
 0xb95   :  { %7269 = vmatprep.subr.bf16.mxu0 %v15726_v35  ;;  %7155 = vmatprep.mubr.msk.f32.mxu1 %vm3105_vm1, %v15764_v54  ;;  %v15790_v54 = vld [vmem:[#allocation157_spill] sm:$0xff] }
 0xb96   :  { %v3753_v44 = vsel %vm87_vm0, %v3752_v49, 0.0 }
 0xb97   :  { %7865 = vrot.lane.b32.xlu0 %v15762_v53, %s8015_s28  ;;  %7880 = vrot.lane.b32.xlu1 %v15765_v31, %s8021_s22  ;;  %v15791_v31 = vld [vmem:[#allocation91_spill] sm:$0xff] }
 0xb98   :  { %7271 = vmatpush1.bf16.msra.mxu0 %v7270_v27  ;;  %7156 = vmatmul.mubr.msk.f32.gmra.mrb[92].mxu1 %vm3105_vm1, %v15767_v5 }
 0xb99   :  { %7272 = vmatprep.subr.bf16.mxu0 %v15726_v35  ;;  %7158 = vmatprep.mubr.msk.f32.mxu1 %vm3105_vm1, %v15770_v61  ;;  %v15772_v35 = vld [vmem:[#allocation192_spill] sm:$0xff] }
 0xb9a   :  { %v15773_v2 = vsub.f32 1.0, %v15772_v35  ;;  %v15795_v35 = vld [vmem:[#allocation94_spill] sm:$0xff] }
 0xb9b   :  { %7875 = vrot.lane.b32.xlu0 %v15768_v51, %s8018_s15  ;;  %7890 = vrot.lane.b32.xlu1 %v15771_v12, %s8015_s28  ;;  %v15792_v51 = vld [vmem:[#allocation173_spill] sm:$0xff]  ;;  %v15794_v12 = vld [vmem:[#allocation174_spill] sm:$0xff] }
 0xb9c   :  { %7274 = vmatpush1.bf16.msra.mxu0 %v7273_v46  ;;  %7159 = vmatmul.mubr.msk.f32.gmra.mrb[94].mxu1 %vm3105_vm1, %v15773_v2  ;;  %v5283_v46 = vmul.f32 %v15791_v31, %v15790_v54  ;;  %v5282_v61 = vmul.f32 %v15793_v36, %v15792_v51  ;;  %v5284_v2 = vmul.f32 %v15795_v35, %v15794_v12  ;;  %vm15817_vm1 = vmmov %vm15803_vm4 }
 0xb9d   :  { %vm15823_vm14 = vmmov %vm15817_vm1 }
 0xb9f   :  { %7885 = vrot.lane.b32.xlu0 %v15774_v39, %s8022_s29  ;;  %7905 = vrot.lane.b32.xlu1 %v15775_v22, %s8023_s30  ;;  %v15796_v39 = vld [vmem:[#allocation155_spill] sm:$0xff] }
 0xba0   :  { %v5280_v22 = vmul.f32 %v13377_v33, %v15796_v39 }
 0xba3   :  { %7895 = vrot.lane.b32.xlu0 %v15776_v55, %s8021_s22  ;;  %7915 = vrot.lane.b32.xlu1 %v15777_v29, %s8018_s15 }
 0xba7   :  { %7900 = vrot.lane.b32.xlu0 %v15779_v24, %s8024_s13  ;;  %5756 = vrot.lane.b32.xlu1 %v5406_v9, %s8024_s13  ;;  %v15797_v24 = vld [vmem:[#allocation118_spill] sm:$0xff] }
 0xba8   :  { %v5281_v42 = vmul.f32 %v15784_v28, %v15797_v24 }
 0xbab   :  { %7910 = vrot.lane.b32.xlu0 %v15781_v23, %s8016_s12  ;;  %5884 = vrot.lane.b32.xlu1 %v5438_v10, %s8022_s29 }
 0xbac   :  { %v13672_v19 = vpop.permute.xlu1 %7655 }
 0xbad   :  { %v7658_v23 = vunpack.i.h.bf16 %v13672_v19  ;;  %v7657_v17 = vunpack.i.l.bf16 %v13672_v19 }
 0xbaf   :  { %5820 = vrot.lane.b32.xlu0 %v5422_v4, %s8023_s30  ;;  %5822 = vrot.lane.b32.xlu1 %v5423_v60, %s8023_s30  ;;  %v15798_v4 = vld [vmem:[#allocation159_spill] sm:$0xff] }
 0xbb0   :  { %v13677_v30 = vpop.permute.xlu0 %7660  ;;  %v5285_v60 = vmul.f32 %v15799_v63, %v15798_v4 }
 0xbb1   :  { %v7666_v25 = vpop.permute.xlu1 %7665  ;;  %v7662_v56 = vunpack.i.l.bf16 %v13677_v30 }
 0xbb2   :  { %v7668_v47 = vunpack.i.h.bf16 %v7666_v25  ;;  %v7667_v5 = vunpack.i.l.bf16 %v7666_v25 }
 0xbb3   :  { %5758 = vrot.lane.b32.xlu0 %v5407_v6, %s8024_s13  ;;  %v15801_v6 = vld [vmem:[#allocation199_spill] sm:$0xff] }
 0xbb4   :  { %v13682_v48 = vpop.permute.xlu0 %7670  ;;  %v5441_v33 = vmul.f32 %v15801_v6, %v15800_v16  ;;  %v5907_v13 = vsel %vm87_vm0, %v5283_v46, %v7668_v47  ;;  %v5906_v25 = vsel %vm87_vm0, %v5282_v61, %v7667_v5 }
 0xbb5   :  { %v13684_v7 = vpop.permute.xlu1 %7680 }
 0xbb6   :  { %v7682_v49 = vunpack.i.l.bf16 %v13684_v7  ;;  %v7683_v4 = vunpack.i.h.bf16 %v13684_v7 }
 0xbb7   :  { %5886 = vrot.lane.b32.xlu0 %v5439_v45, %s8022_s29 }
 0xbb8   :  { %v13686_v15 = vpop.permute.xlu0 %7675 }
 0xbb9   :  { %v13688_v26 = vpop.permute.xlu1 %7690  ;;  %v7678_v46 = vunpack.i.h.bf16 %v13686_v15 }
 0xbba   :  { %v7692_v47 = vunpack.i.l.bf16 %v13688_v26 }
 0xbbc   :  { %v13691_v1 = vpop.permute.xlu0 %7685 }
 0xbbd   :  { %v13693_v11 = vpop.permute.xlu1 %7695  ;;  %v7687_v29 = vunpack.i.l.bf16 %v13691_v1  ;;  %v7688_v18 = vunpack.i.h.bf16 %v13691_v1  ;;  %v7677_v1 = vunpack.i.l.bf16 %v13686_v15 }
 0xbbf   :  { %v5923_v35 = vsel %vm1785_vm7, %v5907_v13, %v7688_v18 }
 0xbc0   :  { %v13695_v40 = vpop.permute.xlu0 %7700 }
 0xbc1   :  { %v13697_v38 = vpop.permute.xlu1 %7705  ;;  %v7703_v6 = vunpack.i.h.bf16 %v13695_v40 }
 0xbc4   :  { %v13699_v8 = vpop.permute.xlu0 %7715 }
 0xbc5   :  { %v13701_v34 = vpop.permute.xlu1 %7710 }
 0xbc6   :  { %v7712_v15 = vunpack.i.l.bf16 %v13701_v34 }
 0xbc8   :  { %v13703_v52 = vpop.permute.xlu0 %7725 }
 0xbc9   :  { %v13705_v0 = vpop.permute.xlu1 %7720 }
 0xbcc   :  { %v13707_v21 = vpop.permute.xlu0 %7730 }
 0xbcd   :  { %v13709_v3 = vpop.permute.xlu1 %7735 }
 0xbd0   :  { %v13712_v14 = vpop.permute.xlu0 %7740 }
 0xbd1   :  { %v13714_v27 = vpop.permute.xlu1 %7750 }
 0xbd3   :  { %3754 = vadd.xlane.f32.xlu1 %v3753_v44  ;;  %v5922_v44 = vsel %vm1785_vm7, %v5906_v25, %v7687_v29 }
 0xbd4   :  { %v13716_v37 = vpop.permute.xlu0 %7745  ;;  %v5938_v39 = vsel %vm1819_vm9, %v5922_v44, %v7692_v47  ;;  %v15806_v44 = vld [vmem:[#allocation105_spill] sm:$0xff]  ;;  %v7718_v47 = vunpack.i.h.bf16 %v13699_v8 }
 0xbd5   :  { %v13718_v43 = vpop.permute.xlu1 %7760 }
 0xbd8   :  { %v13720_v41 = vpop.permute.xlu0 %7755 }
 0xbd9   :  { %v13722_v59 = vpop.permute.xlu1 %7765 }
 0xbdf   :  { %v13724_v53 = vpop.permute.xlu0 %7770 }
 0xbe1   :  { %v7781_v32 = vpop.permute.xlu1 %7780 }
 0xbe2   :  { %v7783_v50 = vunpack.i.h.bf16 %v7781_v32  ;;  %v7782_v19 = vunpack.i.l.bf16 %v7781_v32  ;;  %v7693_v32 = vunpack.i.h.bf16 %v13688_v26 }
 0xbe3   :  { %v7776_v55 = vpop.permute.xlu0 %7775 }
 0xbe4   :  { %v7778_v62 = vunpack.i.h.bf16 %v7776_v55  ;;  %v7777_v9 = vunpack.i.l.bf16 %v7776_v55  ;;  %v5939_v16 = vsel %vm1819_vm9, %v5923_v35, %v7693_v32 }
 0xbe5   :  { %v13737_v10 = vpop.permute.xlu1 %7785 }
 0xbe6   :  { %v5904_v45 = vsel %vm87_vm0, %v5280_v22, %v7777_v9  ;;  %v5905_v28 = vsel %vm87_vm0, %v5281_v42, %v7778_v62  ;;  %v7702_v62 = vunpack.i.l.bf16 %v13695_v40  ;;  %v7672_v42 = vunpack.i.l.bf16 %v13682_v48 }
 0xbe7   :  { %v5920_v36 = vsel %vm1785_vm7, %v5904_v45, %v7782_v19  ;;  %v5921_v5 = vsel %vm1785_vm7, %v5905_v28, %v7783_v50  ;;  %v7717_v45 = vunpack.i.l.bf16 %v13699_v8  ;;  %v7713_v28 = vunpack.i.h.bf16 %v13701_v34 }
 0xbe8   :  { %v5954_v18 = vsel %vm1853_vm11, %v5938_v39, %v7672_v42  ;;  %v7673_v50 = vunpack.i.h.bf16 %v13682_v48  ;;  %v7727_v19 = vunpack.i.l.bf16 %v13703_v52  ;;  %v7723_v34 = vunpack.i.h.bf16 %v13705_v0  ;;  %v15809_v39 = vld [vmem:[#allocation117_spill] sm:$0xff] }
 0xbe9   :  { %v7791_v57 = vpop.permute.xlu0 %7790  ;;  %v13753_v54 = vpop.permute.xlu1 %7800  ;;  %v5909_v48 = vsel %vm87_vm0, %v5285_v60, %v7703_v6  ;;  %v7747_v60 = vunpack.i.l.bf16 %v13716_v37  ;;  %v7707_v8 = vunpack.i.l.bf16 %v13697_v38 }
 0xbea   :  { %v7793_v31 = vunpack.i.h.bf16 %v7791_v57  ;;  %v7792_v51 = vunpack.i.l.bf16 %v7791_v57  ;;  %v5925_v35 = vsel %vm1785_vm7, %v5909_v48, %v7723_v34  ;;  %v15818_v34 = vld [vmem:[#allocation69_spill] sm:$0xff]  ;;  %v7732_v48 = vunpack.i.l.bf16 %v13707_v21 }
 0xbec   :  { %v5937_v61 = vsel %vm1819_vm9, %v5921_v5, %v7793_v31  ;;  %v5936_v12 = vsel %vm1819_vm9, %v5920_v36, %v7792_v51  ;;  %v7697_v51 = vunpack.i.l.bf16 %v13693_v11 }
 0xbed   :  { %v5952_v22 = vsel %vm1853_vm11, %v5936_v12, %v7657_v17  ;;  %v13766_v55 = vpop.permute.xlu0 %7795  ;;  %v5953_v29 = vsel %vm1853_vm11, %v5937_v61, %v7658_v23  ;;  %v13771_v9 = vpop.permute.xlu1 %7810  ;;  %v7722_v17 = vunpack.i.l.bf16 %v13705_v0  ;;  %v7663_v23 = vunpack.i.h.bf16 %v13677_v30 }
 0xbee   :  { %v5968_v26 = vsel %vm3034_vm2, %v5952_v22, %v7677_v1  ;;  %v5969_v24 = vsel %vm3034_vm2, %v5953_v29, %v7678_v46  ;;  %v5908_v30 = vsel %vm87_vm0, %v5284_v2, %v7702_v62  ;;  %v5955_v46 = vsel %vm1853_vm11, %v5939_v16, %v7673_v50  ;;  %v15810_v22 = vld [vmem:[#allocation103_spill] sm:$0xff] }
 0xbef   :  { %v5984_v63 = vsel %vm15802_vm3, %v5968_v26, %v7682_v49  ;;  %v5985_v7 = vsel %vm15804_vm6, %v5969_v24, %v7683_v4  ;;  %v5924_v57 = vsel %vm1785_vm7, %v5908_v30, %v7722_v17  ;;  %v15805_v49 = vld [vmem:[#allocation46_spill] sm:$0xff]  ;;  %v5971_v5 = vsel %vm3034_vm2, %v5955_v46, %v7713_v28  ;;  %v15811_v62 = vld [vmem:[#allocation175_spill] sm:$0xff]  ;;  %v15815_v17 = vld [vmem:[#allocation97_spill] sm:$0xff] }
 0xbf0   :  { %v6000_v13 = vsel %vm15803_vm4, %v5984_v63, %v7662_v56  ;;  %v5970_v56 = vsel %vm3034_vm2, %v5954_v18, %v7712_v15  ;;  %v5442_v31 = vmul.f32 %v15806_v44, %v15805_v49  ;;  %v6001_v2 = vsel %vm15807_vm8, %v5985_v7, %v7663_v23  ;;  %v15812_v15 = vld [vmem:[#allocation98_spill] sm:$0xff]  ;;  %vm15828_vm4 = vmmov %vm15817_vm1 }
 0xbf1   :  { %v13785_v25 = vpop.permute.xlu0 %7805  ;;  %6299 = vmatmul.mubr.f32.vlgmr.msra.gmra.mrb[64].mxu0 %v6000_v13  ;;  %v13792_v40 = vpop.permute.xlu1 %7820  ;;  %v5986_v0 = vsel %vm15808_vm10, %v5970_v56, %v7717_v45  ;;  %v7728_v1 = vunpack.i.h.bf16 %v13703_v52  ;;  %v5940_v32 = vsel %vm1819_vm9, %v5924_v57, %v7727_v19  ;;  %v7757_v61 = vunpack.i.l.bf16 %v13720_v41  ;;  %v15814_v4 = vld [vmem:[#allocation54_spill] sm:$0xff]  ;;  %vm15831_vm6 = vmmov %vm15802_vm3 }
 0xbf2   :  { %6734 = vmatprep.mubr.msk.f32.mxu0 %vm87_vm0, %v5441_v33  ;;  %v7737_v33 = vunpack.i.l.bf16 %v13709_v3  ;;  %v5286_v29 = vmul.f32 %v15810_v22, %v15809_v39  ;;  %v5287_v52 = vmul.f32 %v15812_v15, %v15811_v62  ;;  %v7698_v26 = vunpack.i.h.bf16 %v13693_v11  ;;  %v15824_v15 = vld [vmem:[#allocation182_spill] sm:$0xff]  ;;  %vm15834_vm8 = vmmov %vm15817_vm1 }
 0xbf3   :  { %v7738_v24 = vunpack.i.h.bf16 %v13709_v3  ;;  %v6002_v42 = vsel %vm15813_vm12, %v5986_v0, %v7697_v51  ;;  %v5443_v63 = vmul.f32 %v15815_v17, %v15814_v4  ;;  %v7758_v16 = vunpack.i.h.bf16 %v13720_v41  ;;  %vm15837_vm10 = vmmov %vm15802_vm3 }
 0xbf4   :  { %v5910_v23 = vsel %vm87_vm0, %v5286_v29, %v7737_v33  ;;  %v5987_v13 = vsel %vm15816_vm15, %v5971_v5, %v7718_v47  ;;  %v5956_v45 = vsel %vm1853_vm11, %v5940_v32, %v7707_v8  ;;  %v5941_v11 = vsel %vm1819_vm9, %v5925_v35, %v7728_v1  ;;  %v15821_v5 = vld [vmem:[#allocation49_spill] sm:$0xff]  ;;  %v15822_v1 = vld [vmem:[#allocation190_spill] sm:$0xff]  ;;  %vm15840_vm12 = vmmov %vm15817_vm1 }
 0xbf5   :  { %v13806_v36 = vpop.permute.xlu0 %7815  ;;  %6304 = vmatmul.mubr.f32.gmra.mrb[66].mxu0 %v6001_v2  ;;  %v13814_v12 = vpop.permute.xlu1 %7830  ;;  %v7748_v3 = vunpack.i.h.bf16 %v13716_v37  ;;  %v5926_v28 = vsel %vm1785_vm7, %v5910_v23, %v7757_v61  ;;  %v5972_v18 = vsel %vm3034_vm2, %v5956_v45, %v7747_v60  ;;  %v7708_v41 = vunpack.i.h.bf16 %v13697_v38  ;;  %v15819_v37 = vld [vmem:[#allocation92_spill] sm:$0xff]  ;;  %vm15847_vm15 = vmmov %vm15802_vm3 }
 0xbf6   :  { %6735 = vmatprep.mubr.msk.f32.mxu0 %vm87_vm0, %v5442_v31  ;;  %v7752_v50 = vunpack.i.l.bf16 %v13714_v27  ;;  %v7762_v30 = vunpack.i.l.bf16 %v13718_v43  ;;  %v5911_v19 = vsel %vm87_vm0, %v5287_v52, %v7738_v24  ;;  %v6003_v56 = vsel %vm15817_vm1, %v5987_v13, %v7698_v26  ;;  %v15825_v52 = vld [vmem:[#allocation108_spill] sm:$0xff] }
 0xbf7   :  { %v5444_v57 = vmul.f32 %v15819_v37, %v15818_v34  ;;  %v5927_v49 = vsel %vm1785_vm7, %v5911_v19, %v7758_v16  ;;  %v5957_v51 = vsel %vm1853_vm11, %v5941_v11, %v7708_v41  ;;  %v7742_v2 = vunpack.i.l.bf16 %v13712_v14  ;;  %v15830_v41 = vld [vmem:[#allocation100_spill] sm:$0xff]  ;;  %v15833_v34 = vld [vmem:[#allocation130_spill] sm:$0xff] }
 0xbf8   :  { %v5942_v44 = vsel %vm1819_vm9, %v5926_v28, %v7762_v30  ;;  %v5988_v38 = vsel %vm15820_vm13, %v5972_v18, %v7752_v50  ;;  %v7763_v46 = vunpack.i.h.bf16 %v13718_v43  ;;  %v5973_v33 = vsel %vm3034_vm2, %v5957_v51, %v7748_v3  ;;  %v15829_v18 = vld [vmem:[#allocation129_spill] sm:$0xff]  ;;  %vm15848_vm13 = vmmov %vm15802_vm3 }
 0xbf9   :  { %v13830_v6 = vpop.permute.xlu0 %7825  ;;  %6309 = vmatmul.mubr.f32.gmra.mrb[68].mxu0 %v6002_v42  ;;  %v13837_v7 = vpop.permute.xlu1 %7840  ;;  %v7753_v0 = vunpack.i.h.bf16 %v13714_v27  ;;  %v5445_v32 = vmul.f32 %v15822_v1, %v15821_v5  ;;  %v7797_v61 = vunpack.i.l.bf16 %v13766_v55  ;;  %v6004_v8 = vsel %vm15823_vm14, %v5988_v38, %v7732_v48  ;;  %v15826_v42 = vld [vmem:[#allocation87_spill] sm:$0xff]  ;;  %vm15851_vm14 = vmmov %vm15817_vm1 }
 0xbfa   :  { %6736 = vmatprep.mubr.msk.f32.mxu0 %vm87_vm0, %v5443_v63  ;;  %v5943_v60 = vsel %vm1819_vm9, %v5927_v49, %v7763_v46  ;;  %v5958_v35 = vsel %vm1853_vm11, %v5942_v44, %v7742_v2  ;;  %v7743_v43 = vunpack.i.h.bf16 %v13712_v14  ;;  %v7767_v39 = vunpack.i.l.bf16 %v13722_v59  ;;  %v15827_v14 = vld [vmem:[#allocation122_spill] sm:$0xff] }
 0xbfb   :  { %v5989_v27 = vsel %vm15802_vm3, %v5973_v33, %v7753_v0  ;;  %v7733_v29 = vunpack.i.h.bf16 %v13707_v21  ;;  %v7772_v62 = vunpack.i.l.bf16 %v13724_v53  ;;  %v5288_v26 = vmul.f32 %v15825_v52, %v15824_v15  ;;  %v15835_v33 = vld [vmem:[#allocation164_spill] sm:$0xff]  ;;  %v15836_v0 = vld [vmem:[#allocation237_spill] sm:$0xff] }
 0xbfc   :  { %v5446_v4 = vmul.f32 %v15827_v14, %v15826_v42  ;;  %v7787_v17 = vunpack.i.l.bf16 %v13737_v10  ;;  %v7798_v63 = vunpack.i.h.bf16 %v13766_v55  ;;  %v5974_v23 = vsel %vm3034_vm2, %v5958_v35, %v7767_v39  ;;  %v15841_v39 = vld [vmem:[#allocation51_spill] sm:$0xff] }
 0xbfd   :  { %v13850_v31 = vpop.permute.xlu0 %7835  ;;  %6314 = vmatmul.mubr.f32.gmra.mrb[70].mxu0 %v6003_v56  ;;  %v13857_v47 = vpop.permute.xlu1 %7850  ;;  %v5959_v21 = vsel %vm1853_vm11, %v5943_v60, %v7743_v43  ;;  %v7768_v16 = vunpack.i.h.bf16 %v13722_v59  ;;  %v5912_v13 = vsel %vm87_vm0, %v5288_v26, %v7797_v61  ;;  %v7807_v45 = vunpack.i.l.bf16 %v13785_v25  ;;  %v15832_v56 = vld [vmem:[#allocation101_spill] sm:$0xff]  ;;  %v15838_v60 = vld [vmem:[#allocation178_spill] sm:$0xff] }
 0xbfe   :  { %6737 = vmatprep.mubr.msk.f32.mxu0 %vm87_vm0, %v5444_v57  ;;  %v6005_v11 = vsel %vm15828_vm4, %v5989_v27, %v7733_v29  ;;  %v7773_v3 = vunpack.i.h.bf16 %v13724_v53  ;;  %v7802_v28 = vunpack.i.l.bf16 %v13753_v54  ;;  %v5289_v50 = vmul.f32 %v15830_v41, %v15829_v18  ;;  %v15839_v61 = vld [vmem:[#allocation222_spill] sm:$0xff]  ;;  %vm15854_vm4 = vmmov %vm15817_vm1 }
 0xbff   :  { %v7788_v30 = vunpack.i.h.bf16 %v13737_v10  ;;  %v5990_v59 = vsel %vm15831_vm6, %v5974_v23, %v7772_v62  ;;  %v5447_v37 = vmul.f32 %v15833_v34, %v15832_v56  ;;  %v5975_v53 = vsel %vm3034_vm2, %v5959_v21, %v7768_v16  ;;  %v15842_v27 = vld [vmem:[#allocation110_spill] sm:$0xff]  ;;  %vm15857_vm6 = vmmov %vm15802_vm3 }
 0xc00   :  { %v5913_v57 = vsel %vm87_vm0, %v5289_v50, %v7798_v63  ;;  %v7808_v49 = vunpack.i.h.bf16 %v13785_v25  ;;  %v5928_v44 = vsel %vm1785_vm7, %v5912_v13, %v7802_v28  ;;  %v6006_v38 = vsel %vm15834_vm8, %v5990_v59, %v7787_v17  ;;  %v15843_v13 = vld [vmem:[#allocation126_spill] sm:$0xff]  ;;  %v15846_v28 = vld [vmem:[#allocation239_spill] sm:$0xff]  ;;  %vm15858_vm8 = vmmov %vm15817_vm1 }
 0xc01   :  { %v13870_v22 = vpop.permute.xlu0 %7845  ;;  %6319 = vmatmul.mubr.f32.gmra.mrb[72].mxu0 %v6004_v8  ;;  %v13877_v24 = vpop.permute.xlu1 %7860  ;;  %v7803_v10 = vunpack.i.h.bf16 %v13753_v54  ;;  %v5944_v51 = vsel %vm1819_vm9, %v5928_v44, %v7807_v45  ;;  %v7832_v48 = vunpack.i.l.bf16 %v13814_v12  ;;  %v7817_v2 = vunpack.i.l.bf16 %v13806_v36 }
 0xc02   :  { %6738 = vmatprep.mubr.msk.f32.mxu0 %vm87_vm0, %v5445_v32  ;;  %v7812_v46 = vunpack.i.l.bf16 %v13771_v9  ;;  %v5290_v5 = vmul.f32 %v15836_v0, %v15835_v33  ;;  %v7837_v1 = vunpack.i.l.bf16 %v13850_v31  ;;  %v5991_v32 = vsel %vm15837_vm10, %v5975_v53, %v7773_v3  ;;  %v15845_v3 = vld [vmem:[#allocation141_spill] sm:$0xff]  ;;  %vm15865_vm10 = vmmov %vm15802_vm3 }
 0xc03   :  { %v5929_v54 = vsel %vm1785_vm7, %v5913_v57, %v7803_v10  ;;  %v5291_v8 = vmul.f32 %v15839_v61, %v15838_v60  ;;  %v6007_v43 = vsel %vm15840_vm12, %v5991_v32, %v7788_v30  ;;  %v5448_v29 = vmul.f32 %v15842_v27, %v15841_v39  ;;  %vm15867_vm12 = vmmov %vm15817_vm1 }
 0xc04   :  { %v7813_v62 = vunpack.i.h.bf16 %v13771_v9  ;;  %v5945_v15 = vsel %vm1819_vm9, %v5929_v54, %v7808_v49  ;;  %v7818_v52 = vunpack.i.h.bf16 %v13806_v36  ;;  %v5960_v26 = vsel %vm1853_vm11, %v5944_v51, %v7812_v46  ;;  %v15850_v46 = vld [vmem:[#allocation215_spill] sm:$0xff] }
 0xc05   :  { %v13894_v55 = vpop.permute.xlu0 %7855  ;;  %6324 = vmatmul.mubr.f32.gmra.mrb[74].mxu0 %v6005_v11  ;;  %v13897_v19 = vpop.permute.xlu1 %7870  ;;  %v7833_v42 = vunpack.i.h.bf16 %v13814_v12  ;;  %v5914_v14 = vsel %vm87_vm0, %v5290_v5, %v7832_v48  ;;  %v5976_v17 = vsel %vm3034_vm2, %v5960_v26, %v7817_v2  ;;  %v7822_v63 = vunpack.i.l.bf16 %v13792_v40  ;;  %v15844_v12 = vld [vmem:[#allocation116_spill] sm:$0xff]  ;;  %v15852_v5 = vld [vmem:[#allocation150_spill] sm:$0xff] }
 0xc06   :  { %6739 = vmatprep.mubr.msk.f32.mxu0 %vm87_vm0, %v5446_v4  ;;  %v7827_v4 = vunpack.i.l.bf16 %v13830_v6  ;;  %v7838_v23 = vunpack.i.h.bf16 %v13850_v31  ;;  %v5930_v9 = vsel %vm1785_vm7, %v5914_v14, %v7837_v1  ;;  %v7847_v21 = vunpack.i.l.bf16 %v13870_v22  ;;  %v15853_v1 = vld [vmem:[#allocation217_spill] sm:$0xff] }
 0xc07   :  { %v7842_v36 = vunpack.i.l.bf16 %v13837_v7  ;;  %v5292_v45 = vmul.f32 %v15844_v12, %v15843_v13  ;;  %v5449_v18 = vmul.f32 %v15846_v28, %v15845_v3  ;;  %v5961_v31 = vsel %vm1853_vm11, %v5945_v15, %v7813_v62 }
 0xc08   :  { %v7823_v41 = vunpack.i.h.bf16 %v13792_v40  ;;  %v7828_v50 = vunpack.i.h.bf16 %v13830_v6  ;;  %v5992_v30 = vsel %vm15847_vm15, %v5976_v17, %v7822_v63  ;;  %v5977_v59 = vsel %vm3034_vm2, %v5961_v31, %v7818_v52  ;;  %v15855_v17 = vld [vmem:[#allocation53_spill] sm:$0xff]  ;;  %v15856_v63 = vld [vmem:[#allocation214_spill] sm:$0xff]  ;;  %vm15868_vm15 = vmmov %vm15802_vm3 }
 0xc09   :  { %v13916_v25 = vpop.permute.xlu0 %7865  ;;  %6329 = vmatmul.mubr.f32.gmra.mrb[76].mxu0 %v6006_v38  ;;  %v13922_v35 = vpop.permute.xlu1 %7880  ;;  %v5915_v56 = vsel %vm87_vm0, %v5291_v8, %v7833_v42  ;;  %v5946_v34 = vsel %vm1819_vm9, %v5930_v9, %v7842_v36  ;;  %v6008_v53 = vsel %vm15817_vm1, %v5992_v30, %v7827_v4  ;;  %v7848_v49 = vunpack.i.h.bf16 %v13870_v22  ;;  %v15849_v22 = vld [vmem:[#allocation183_spill] sm:$0xff]  ;;  %v15859_v30 = vld [vmem:[#allocation10_spill] sm:$0xff] }
 0xc0a   :  { %6740 = vmatprep.mubr.msk.f32.mxu0 %vm87_vm0, %v5447_v37  ;;  %v7867_v37 = vunpack.i.l.bf16 %v13916_v25  ;;  %v5931_v57 = vsel %vm1785_vm7, %v5915_v56, %v7838_v23  ;;  %v5962_v40 = vsel %vm1853_vm11, %v5946_v34, %v7847_v21  ;;  %v7857_v6 = vunpack.i.l.bf16 %v13894_v55  ;;  %v15861_v34 = vld [vmem:[#allocation166_spill] sm:$0xff] }
 0xc0b   :  { %v7843_v38 = vunpack.i.h.bf16 %v13837_v7  ;;  %v7852_v10 = vunpack.i.l.bf16 %v13857_v47  ;;  %v7868_v51 = vunpack.i.h.bf16 %v13916_v25  ;;  %v5993_v2 = vsel %vm15848_vm13, %v5977_v59, %v7823_v41  ;;  %vm15871_vm13 = vmmov %vm15817_vm1 }
 0xc0c   :  { %v5293_v33 = vmul.f32 %v15850_v46, %v15849_v22  ;;  %v6009_v0 = vsel %vm15851_vm14, %v5993_v2, %v7828_v50  ;;  %v5450_v32 = vmul.f32 %v15853_v1, %v15852_v5  ;;  %v5916_v54 = vsel %vm87_vm0, %v5292_v45, %v7867_v37  ;;  %v15862_v37 = vld [vmem:[#allocation221_spill] sm:$0xff]  ;;  %vm15875_vm14 = vmmov %vm15817_vm1 }
 0xc0d   :  { %v7876_v16 = vpop.permute.xlu0 %7875  ;;  %6334 = vmatmul.mubr.f32.gmra.mrb[78].mxu0 %v6007_v43  ;;  %v13943_v11 = vpop.permute.xlu1 %7890  ;;  %v5947_v7 = vsel %vm1819_vm9, %v5931_v57, %v7843_v38  ;;  %v5978_v25 = vsel %vm3034_vm2, %v5962_v40, %v7852_v10  ;;  %v7872_v8 = vunpack.i.l.bf16 %v13897_v19  ;;  %v7858_v43 = vunpack.i.h.bf16 %v13894_v55  ;;  %v15863_v57 = vld [vmem:[#allocation95_spill] sm:$0xff]  ;;  %v15866_v5 = vld [vmem:[#allocation165_spill] sm:$0xff] }
 0xc0e   :  { %6741 = vmatprep.mubr.msk.f32.mxu0 %vm87_vm0, %v5448_v29  ;;  %v7877_v60 = vunpack.i.l.bf16 %v7876_v16  ;;  %v5963_v61 = vsel %vm1853_vm11, %v5947_v7, %v7848_v49  ;;  %v5994_v27 = vsel %vm15802_vm3, %v5978_v25, %v7857_v6  ;;  %v7853_v29 = vunpack.i.h.bf16 %v13857_v47 }
 0xc0f   :  { %v7862_v62 = vunpack.i.l.bf16 %v13877_v24  ;;  %v5917_v15 = vsel %vm87_vm0, %v5293_v33, %v7868_v51  ;;  %v7878_v52 = vunpack.i.h.bf16 %v7876_v16  ;;  %v7873_v26 = vunpack.i.h.bf16 %v13897_v19 }
 0xc10   :  { %v5932_v42 = vsel %vm1785_vm7, %v5916_v54, %v7872_v8  ;;  %v5451_v23 = vmul.f32 %v15856_v63, %v15855_v17  ;;  %v5979_v47 = vsel %vm3034_vm2, %v5963_v61, %v7853_v29  ;;  %v7882_v9 = vunpack.i.l.bf16 %v13922_v35 }
 0xc11   :  { %v13961_v44 = vpop.permute.xlu0 %7885  ;;  %6339 = vmatmul.mubr.f32.gmra.mrb[80].mxu0 %v6008_v53  ;;  %v13966_v48 = vpop.permute.xlu1 %7905  ;;  %v5948_v55 = vsel %vm1819_vm9, %v5932_v42, %v7877_v60  ;;  %v6010_v4 = vsel %vm15854_vm4, %v5994_v27, %v7862_v62  ;;  %v5933_v21 = vsel %vm1785_vm7, %v5917_v15, %v7873_v26  ;;  %v5995_v19 = vsel %vm15857_vm6, %v5979_v47, %v7858_v43  ;;  %v15869_v26 = vld [vmem:[#allocation169_spill] sm:$0xff]  ;;  %v15873_v47 = vld [vmem:[#allocation195_spill] sm:$0xff] }
 0xc12   :  { %6742 = vmatprep.mubr.msk.f32.mxu0 %vm87_vm0, %v5449_v18  ;;  %v7863_v36 = vunpack.i.h.bf16 %v13877_v24  ;;  %v5949_v13 = vsel %vm1819_vm9, %v5933_v21, %v7878_v52  ;;  %v7883_v3 = vunpack.i.h.bf16 %v13922_v35  ;;  %v7892_v28 = vunpack.i.l.bf16 %v13943_v11  ;;  %v15860_v24 = vld [vmem:[#allocation219_spill] sm:$0xff]  ;;  %v15864_v35 = vld [vmem:[#allocation189_spill] sm:$0xff] }
 0xc13   :  { %v7907_v18 = vunpack.i.l.bf16 %v13966_v48  ;;  %v5964_v31 = vsel %vm1853_vm11, %v5948_v55, %v7882_v9  ;;  %v7893_v41 = vunpack.i.h.bf16 %v13943_v11  ;;  %v5452_v59 = vmul.f32 %v15860_v24, %v15859_v30 }
 0xc14   :  { %v6011_v50 = vsel %vm15858_vm8, %v5995_v19, %v7863_v36  ;;  %v5294_v53 = vmul.f32 %v15862_v37, %v15861_v34  ;;  %v5295_v49 = vmul.f32 %v15864_v35, %v15863_v57  ;;  %v5965_v38 = vsel %vm1853_vm11, %v5949_v13, %v7883_v3  ;;  %v14060_v35 = vld [vmem:[%s14195_s8 + $0x1] ss:$0 sm:$0xff]  ;;  %s8027_s8 = smov [#allocation4]  }
 0xc15   :  { %v13981_v39 = vpop.permute.xlu0 %7895  ;;  %6344 = vmatmul.mubr.f32.gmra.mrb[82].mxu0 %v6009_v0  ;;  %v7916_v14 = vpop.permute.xlu1 %7915  ;;  %v7887_v11 = vunpack.i.l.bf16 %v13961_v44  ;;  %v7908_v33 = vunpack.i.h.bf16 %v13966_v48  ;;  %v5453_v1 = vmul.f32 %v13405_v58, %v15866_v5  ;;  %v7888_v43 = vunpack.i.h.bf16 %v13961_v44  ;;  %s6535_s12 = sshll.u32 %s8027_s8, 4  ;;  %s6536_s12 = int_to_ptr.vmem [resolvable:$true] %s6535_s12 }
 0xc16   :  { %6743 = vmatprep.mubr.msk.f32.mxu0 %vm87_vm0, %v5450_v32  ;;  %v5918_v46 = vsel %vm87_vm0, %v5294_v53, %v7892_v28  ;;  %v7917_v0 = vunpack.i.l.bf16 %v7916_v14  ;;  %v5919_v32 = vsel %vm87_vm0, %v5295_v49, %v7893_v41  ;;  %v7897_v7 = vunpack.i.l.bf16 %v13981_v39  ;;  %s7957_s15 = scalar_lea.vmem %s6536_s12, 16  ;;  %s7961_s22 = scalar_lea.vmem %s6536_s12, 32 }
 0xc17   :  { %v7918_v27 = vunpack.i.h.bf16 %v7916_v14  ;;  %v5454_v42 = vmul.f32 %v15786_v20, %v15869_v26  ;;  %v7898_v55 = vunpack.i.h.bf16 %v13981_v39  ;;  %p7958_p0 = scmp.ne.s32.totalorder %s6536_s12, %s7957_s15  ;;  %p7962_p1 = scmp.lt.s32.totalorder %s6536_s12, %s6536_s12 }
 0xc18   :  { %p7963_p2 = scmp.lt.s32.totalorder %s7961_s22, %s7957_s15 }
 0xc19   :  { %v7901_v16 = vpop.permute.xlu0 %7900  ;;  %6349 = vmatmul.mubr.f32.gmra.mrb[84].mxu0 %v6010_v4  ;;  %v5757_v10 = vpop.permute.xlu1 %5756 }
 0xc1a   :  { %v7903_v12 = vunpack.i.h.bf16 %v7901_v16  ;;  %v7902_v45 = vunpack.i.l.bf16 %v7901_v16  ;;  %6744 = vmatprep.mubr.msk.f32.mxu0 %vm87_vm0, %v5451_v23  ;;  %v15872_v23 = vld [vmem:[#allocation171_spill] sm:$0xff]  ;;  %p7964_p3 = por %p7963_p2, %p7962_p1 }
 0xc1b   :  { %v5455_v9 = vmul.f32 %v15873_v47, %v15872_v23 }
 0xc1c   :  { %v5980_v56 = vsel %vm3034_vm2, %v5964_v31, %v7902_v45  ;;  %v5981_v22 = vsel %vm3034_vm2, %v5965_v38, %v7903_v12  ;;  %p7965_p4 = pnand %p7964_p3, %p7958_p0 }
 0xc1d   :  { %v7911_v40 = vpop.permute.xlu0 %7910  ;;  %6354 = vmatmul.mubr.f32.gmra.mrb[86].mxu0 %v6011_v50  ;;  %v5996_v6 = vsel %vm15865_vm10, %v5980_v56, %v7907_v18  ;;  %v5997_v48 = vsel %vm15868_vm15, %v5981_v22, %v7908_v33  ;;  %v5885_v62 = vpop.permute.xlu1 %5884 }
 0xc1e   :  { %v7913_v51 = vunpack.i.h.bf16 %v7911_v40  ;;  %v7912_v2 = vunpack.i.l.bf16 %v7911_v40  ;;  %6745 = vmatprep.mubr.msk.f32.mxu0 %vm87_vm0, %v5452_v59  ;;  %v6012_v60 = vsel %vm15867_vm12, %v5996_v6, %v7887_v11  ;;  %v6013_v52 = vsel %vm15817_vm1, %v5997_v48, %v7888_v43 }
 0xc20   :  { %v5934_v54 = vsel %vm1785_vm7, %v5918_v46, %v7912_v2  ;;  %v5935_v25 = vsel %vm1785_vm7, %v5919_v32, %v7913_v51  ;;  %vm15870_vm7 = vmmov %vm15802_vm3 }
 0xc21   :  { %v5821_v61 = vpop.permute.xlu0 %5820  ;;  %v5950_v8 = vsel %vm1819_vm9, %v5934_v54, %v7917_v0  ;;  %6359 = vmatmul.mubr.f32.gmra.mrb[88].mxu0 %v6012_v60  ;;  %v5951_v15 = vsel %vm1819_vm9, %v5935_v25, %v7918_v27  ;;  %v5823_v20 = vpop.permute.xlu1 %5822  ;;  %vm15874_vm9 = vmmov %vm15802_vm3 }
 0xc22   :  { %v5966_v58 = vsel %vm1853_vm11, %v5950_v8, %v7897_v7  ;;  %6746 = vmatprep.mubr.msk.f32.mxu0 %vm87_vm0, %v5453_v1  ;;  %v5967_v14 = vsel %vm1853_vm11, %v5951_v15, %v7898_v55  ;;  %vm6515_vm11 = vcmask 0  }
 0xc23   :  { %v5982_v29 = vsel %vm3034_vm2, %v5966_v58, %v5757_v10 }
 0xc24   :  { %v5998_v4 = vsel %vm15870_vm7, %v5982_v29, %v5821_v61 }
 0xc25   :  { %v5759_v44 = vpop.permute.xlu0 %5758  ;;  %6364 = vmatmul.mubr.f32.gmra.mrb[90].mxu0 %v6013_v52  ;;  %v6014_v63 = vsel %vm15871_vm13, %v5998_v4, %v5885_v62 }
 0xc26   :  { %6747 = vmatprep.mubr.msk.f32.mxu0 %vm87_vm0, %v5454_v42  ;;  %v5983_v17 = vsel %vm3034_vm2, %v5967_v14, %v5759_v44 }
 0xc27   :  { %v5999_v39 = vsel %vm15874_vm9, %v5983_v17, %v5823_v20 }
 0xc29   :  { %v5887_v21 = vpop.permute.xlu0 %5886  ;;  %6369 = vmatmul.mubr.f32.gmra.mrb[92].mxu0 %v6014_v63 }
 0xc2a   :  { %6748 = vmatprep.mubr.msk.f32.mxu0 %vm87_vm0, %v5455_v9  ;;  %v6015_v16 = vsel %vm15875_vm14, %v5999_v39, %v5887_v21 }
 0xc2d   :  { %6374 = vmatmul.mubr.f32.gmra.mrb[94].mxu0 %v6015_v16 }
 0xc53   :  { %v7139_v19 = vpop.f32.mrb[80].mxu1 }
 0xc54   :  { %v6107_v36 = vpop.f32.mrb[81].mxu1 }
 0xc57   :  { %v7142_v13 = vpop.f32.mrb[82].mxu1 }
 0xc58   :  { %v6117_v12 = vpop.f32.mrb[83].mxu1 }
 0xc5b   :  { %v7145_v45 = vpop.f32.mrb[84].mxu1 }
 0xc5c   :  { %v6127_v3 = vpop.f32.mrb[85].mxu1 }
 0xc5f   :  { %v7148_v18 = vpop.f32.mrb[86].mxu1 }
 0xc60   :  { %v3755_v28 = vpop.xlane.xlu1 %3754  ;;  %v6137_v41 = vpop.f32.mrb[87].mxu1 }
 0xc61   :  { %v3756_v31 = vmul.f32 64.0, %v3755_v28 }
 0xc63   :  { %6516 = vst.msk [vmem:[#allocation4] sm:$0x1] %vm6515_vm11, %v3756_v31  ;;  %v7151_v50 = vpop.f32.mrb[88].mxu1 }
 0xc64   :  { %v6147_v30 = vpop.f32.mrb[89].mxu1 }
 0xc67   :  { %v7154_v24 = vpop.f32.mrb[90].mxu1 }
 0xc68   :  { %v6157_v59 = vpop.f32.mrb[91].mxu1 }
 0xc6b   :  { %v14049_v56 = vpop.f32.mrb[92].mxu1 }
 0xc6c   :  { %v14051_v34 = vpop.f32.mrb[93].mxu1 }
 0xc6f   :  { %v14053_v37 = vpop.f32.mrb[94].mxu1 }
 0xc70   :  { %v14055_v53 = vpop.f32.mrb[95].mxu1 }
 0xcc4   :  { %v6300_v57 = vpop.f32.mrb[64].mxu0 }
 0xcc5   :  { %v6301_v49 = vadd.f32 %v6300_v57, %v6107_v36  ;;  %v6302_v40 = vpop.f32.mrb[65].mxu0 }
 0xcc7   :  { %v6387_v6 = vadd.f32 %v14060_v35, %v6301_v49 }
 0xcc8   :  { %v6305_v38 = vpop.f32.mrb[66].mxu0 }
 0xcc9   :  { %v6306_v11 = vadd.f32 %v7139_v19, %v6305_v38  ;;  %v6307_v10 = vpop.f32.mrb[67].mxu0  ;;  %6419 = vrot.lane.b32.xlu0 %v6387_v6, %s8014_s27 }
 0xccb   :  { %v6388_v51 = vadd.f32 %v14060_v35, %v6306_v11 }
 0xccc   :  { %v6310_v2 = vpop.f32.mrb[68].mxu0 }
 0xccd   :  { %v6311_v22 = vadd.f32 %v6310_v2, %v6117_v12  ;;  %6421 = vrot.lane.b32.xlu0 %v6388_v51, %s8014_s27  ;;  %v6312_v46 = vpop.f32.mrb[69].mxu0 }
 0xccf   :  { %v6389_v33 = vadd.f32 %v14060_v35, %v6311_v22 }
 0xcd0   :  { %v6315_v0 = vpop.f32.mrb[70].mxu0 }
 0xcd1   :  { %v6316_v5 = vadd.f32 %v7142_v13, %v6315_v0  ;;  %v6317_v1 = vpop.f32.mrb[71].mxu0  ;;  %6423 = vrot.lane.b32.xlu0 %v6389_v33, %s8014_s27 }
 0xcd3   :  { %v6390_v32 = vadd.f32 %v14060_v35, %v6316_v5 }
 0xcd4   :  { %v6320_v7 = vpop.f32.mrb[72].mxu0 }
 0xcd5   :  { %v6321_v54 = vadd.f32 %v6320_v7, %v6127_v3  ;;  %v6322_v60 = vpop.f32.mrb[73].mxu0  ;;  %6425 = vrot.lane.b32.xlu0 %v6390_v32, %s8014_s27 }
 0xcd7   :  { %v6391_v25 = vadd.f32 %v14060_v35, %v6321_v54 }
 0xcd8   :  { %v6325_v61 = vpop.f32.mrb[74].mxu0 }
 0xcd9   :  { %v6326_v8 = vadd.f32 %v7145_v45, %v6325_v61  ;;  %v6327_v48 = vpop.f32.mrb[75].mxu0  ;;  %6427 = vrot.lane.b32.xlu0 %v6391_v25, %s8014_s27 }
 0xcdb   :  { %v6392_v43 = vadd.f32 %v14060_v35, %v6326_v8 }
 0xcdc   :  { %v6330_v27 = vpop.f32.mrb[76].mxu0 }
 0xcdd   :  { %v6331_v58 = vadd.f32 %v6330_v27, %v6137_v41  ;;  %v6332_v29 = vpop.f32.mrb[77].mxu0  ;;  %6429 = vrot.lane.b32.xlu0 %v6392_v43, %s8014_s27 }
 0xcdf   :  { %v6393_v62 = vadd.f32 %v14060_v35, %v6331_v58 }
 0xce0   :  { %v6335_v15 = vpop.f32.mrb[78].mxu0 }
 0xce1   :  { %v6336_v52 = vadd.f32 %v7148_v18, %v6335_v15  ;;  %v6337_v26 = vpop.f32.mrb[79].mxu0  ;;  %6431 = vrot.lane.b32.xlu0 %v6393_v62, %s8014_s27 }
 0xce3   :  { %v6394_v42 = vadd.f32 %v14060_v35, %v6336_v52 }
 0xce4   :  { %v6340_v55 = vpop.f32.mrb[80].mxu0 }
 0xce5   :  { %v6341_v4 = vadd.f32 %v6340_v55, %v6147_v30  ;;  %v6342_v44 = vpop.f32.mrb[81].mxu0  ;;  %6433 = vrot.lane.b32.xlu0 %v6394_v42, %s8014_s27 }
 0xce7   :  { %v6395_v14 = vadd.f32 %v14060_v35, %v6341_v4 }
 0xce8   :  { %v6345_v17 = vpop.f32.mrb[82].mxu0 }
 0xce9   :  { %v6346_v63 = vadd.f32 %v7151_v50, %v6345_v17  ;;  %v6347_v23 = vpop.f32.mrb[83].mxu0  ;;  %6435 = vrot.lane.b32.xlu0 %v6395_v14, %s8014_s27 }
 0xceb   :  { %v6396_v47 = vadd.f32 %v14060_v35, %v6346_v63 }
 0xcec   :  { %v6350_v9 = vpop.f32.mrb[84].mxu0 }
 0xced   :  { %v6351_v21 = vadd.f32 %v6350_v9, %v6157_v59  ;;  %v6352_v20 = vpop.f32.mrb[85].mxu0  ;;  %6437 = vrot.lane.b32.xlu1 %v6396_v47, %s8014_s27 }
 0xcef   :  { %v6397_v39 = vadd.f32 %v14060_v35, %v6351_v21 }
 0xcf0   :  { %v6355_v16 = vpop.f32.mrb[86].mxu0 }
 0xcf1   :  { %v6356_v19 = vadd.f32 %v7154_v24, %v6355_v16  ;;  %v6357_v36 = vpop.f32.mrb[87].mxu0  ;;  %6439 = vrot.lane.b32.xlu0 %v6397_v39, %s8014_s27 }
 0xcf3   :  { %v6398_v13 = vadd.f32 %v14060_v35, %v6356_v19 }
 0xcf4   :  { %v6360_v12 = vpop.f32.mrb[88].mxu0 }
 0xcf5   :  { %v6361_v45 = vadd.f32 %v6360_v12, %v14051_v34  ;;  %v6362_v3 = vpop.f32.mrb[89].mxu0  ;;  %6441 = vrot.lane.b32.xlu0 %v6398_v13, %s8014_s27 }
 0xcf7   :  { %v6399_v28 = vadd.f32 %v14060_v35, %v6361_v45 }
 0xcf8   :  { %v6365_v18 = vpop.f32.mrb[90].mxu0 }
 0xcf9   :  { %v6366_v31 = vadd.f32 %v14049_v56, %v6365_v18  ;;  %v6367_v41 = vpop.f32.mrb[91].mxu0  ;;  %6443 = vrot.lane.b32.xlu0 %v6399_v28, %s8014_s27 }
 0xcfb   :  { %v6400_v50 = vadd.f32 %v14060_v35, %v6366_v31 }
 0xcfc   :  { %v6370_v30 = vpop.f32.mrb[92].mxu0 }
 0xcfd   :  { %v6371_v24 = vadd.f32 %v6370_v30, %v14055_v53  ;;  %v6372_v59 = vpop.f32.mrb[93].mxu0  ;;  %6445 = vrot.lane.b32.xlu0 %v6400_v50, %s8014_s27 }
 0xcff   :  { %v6401_v34 = vadd.f32 %v14060_v35, %v6371_v24 }
 0xd00   :  { %7968 = shalt.err (!%p7965_p4)
}
 0xd01   :  { %s7969_s13 = scalar_lea.hbm %s14198_s11, 16 }
 0xd02   :  { %p7970_p5 = scmp.ne.s32.totalorder %s14198_s11, %s7969_s13  ;;  %p7973_p6 = scmp.lt.u32.totalorder %s7969_s13, %s14198_s11 }
 0xd04   :  { %p7975_p7 = pnand %p7973_p6, %p7970_p5 }
 0xd06   :  { %7978 = shalt.err (!%p7975_p7)
}
 0xd07   :  { %6538 = dma.vmem_to_hbm [thread:$0]  %s6536_s12, 16, %s14198_s11, [#allocation5]   ;;  %v6375_v56 = vpop.f32.mrb[94].mxu0  ;;  %6447 = vrot.lane.b32.xlu1 %v6401_v34, %s8014_s27  ;;  %v15876_v6 = vld [vmem:[#allocation176_spill] sm:$0xff]  ;;  %v15877_v51 = vld [vmem:[#allocation170_spill] sm:$0xff]  ;;  %v15879_v5 = vld [vmem:[#allocation99_spill] sm:$0xff] }
 0xd08   :  { %v6376_v53 = vadd.f32 %v14053_v37, %v6375_v56  ;;  %v6377_v57 = vpop.f32.mrb[95].mxu0  ;;  %v15880_v54 = vld [vmem:[#allocation106_spill] sm:$0xff]  ;;  %v15881_v8 = vld [vmem:[#allocation132_spill] sm:$0xff]  ;;  %v15882_v58 = vld [vmem:[#allocation181_spill] sm:$0xff]  ;;  %s8028_s11 = smov [#allocation2]  }
 0xd09   :  { %v15883_v52 = vld [vmem:[#allocation111_spill] sm:$0xff]  ;;  %v15884_v4 = vld [vmem:[#allocation120_spill] sm:$0xff]  ;;  %v15886_v21 = vld [vmem:[#allocation121_spill] sm:$0xff]  ;;  %s6522_s1 = sshll.u32 %s8028_s11, 4  ;;  %s6523_s1 = int_to_ptr.vmem [resolvable:$true] %s6522_s1 }
 0xd0a   :  { %v6402_v49 = vadd.f32 %v14060_v35, %v6376_v53  ;;  %v15878_v35 = vld [vmem:[#allocation172_spill] sm:$0xff]  ;;  %v15888_v45 = vld [vmem:[#allocation186_spill] sm:$0xff]  ;;  %v15889_v31 = vld [vmem:[#allocation185_spill] sm:$0xff]  ;;  %s7979_s0 = scalar_lea.vmem %s6523_s1, 2048  ;;  %p7984_p9 = scmp.lt.s32.totalorder %s6523_s1, %s6523_s1 }
 0xd0b   :  { %v15885_v63 = vld [vmem:[#allocation112_spill] sm:$0xff]  ;;  %v15890_v24 = vld [vmem:[#allocation187_spill] sm:$0xff]  ;;  %p7980_p8 = scmp.ne.s32.totalorder %s6523_s1, %s7979_s0  ;;  %p7985_p10 = scmp.lt.s32.totalorder %s7979_s0, %s7979_s0 }
 0xd0c   :  { %6449 = vrot.lane.b32.xlu0 %v6402_v49, %s8014_s27  ;;  %v15887_v19 = vld [vmem:[#allocation184_spill] sm:$0xff] }
 0xd0d   :  { %v15891_v53 = vld [vmem:[#allocation188_spill] sm:$0xff]  ;;  %p7986_p11 = por %p7985_p10, %p7984_p9 }
 0xd0f   :  { %p7987_p12 = pnand %p7986_p11, %p7980_p8 }
 0xd3b   :  { %v6420_v40 = vpop.permute.xlu0 %6419 }
 0xd3c   :  { %v6467_v38 = vsub.f32 %v15876_v6, %v6420_v40 }
 0xd3e   :  { %v6483_v11 = vsel %vm1735_vm5, %v15876_v6, %v6467_v38 }
 0xd3f   :  { %6499 = vst.msk [vmem:[#allocation2] sm:$0xff] %vm87_vm0, %v6483_v11  ;;  %v6422_v10 = vpop.permute.xlu0 %6421 }
 0xd40   :  { %v6468_v2 = vsub.f32 %v15877_v51, %v6422_v10 }
 0xd42   :  { %v6484_v37 = vsel %vm1735_vm5, %v15877_v51, %v6468_v2 }
 0xd43   :  { %6500 = vst.msk [vmem:[#allocation2 + $0x8] sm:$0xff] %vm87_vm0, %v6484_v37  ;;  %v6424_v22 = vpop.permute.xlu0 %6423 }
 0xd44   :  { %v6469_v46 = vsub.f32 %v15878_v35, %v6424_v22 }
 0xd46   :  { %v6485_v33 = vsel %vm1735_vm5, %v15878_v35, %v6469_v46 }
 0xd47   :  { %6501 = vst.msk [vmem:[#allocation2 + $0x10] sm:$0xff] %vm87_vm0, %v6485_v33  ;;  %v6426_v0 = vpop.permute.xlu0 %6425 }
 0xd48   :  { %v6470_v1 = vsub.f32 %v15879_v5, %v6426_v0 }
 0xd4a   :  { %v6486_v32 = vsel %vm1735_vm5, %v15879_v5, %v6470_v1 }
 0xd4b   :  { %6502 = vst.msk [vmem:[#allocation2 + $0x18] sm:$0xff] %vm87_vm0, %v6486_v32  ;;  %v6428_v7 = vpop.permute.xlu0 %6427 }
 0xd4c   :  { %v6471_v60 = vsub.f32 %v15880_v54, %v6428_v7 }
 0xd4e   :  { %v6487_v25 = vsel %vm1735_vm5, %v15880_v54, %v6471_v60 }
 0xd4f   :  { %6503 = vst.msk [vmem:[#allocation2 + $0x20] sm:$0xff] %vm87_vm0, %v6487_v25  ;;  %v6430_v61 = vpop.permute.xlu0 %6429 }
 0xd50   :  { %v6472_v48 = vsub.f32 %v15881_v8, %v6430_v61 }
 0xd52   :  { %v6488_v43 = vsel %vm1735_vm5, %v15881_v8, %v6472_v48 }
 0xd53   :  { %6504 = vst.msk [vmem:[#allocation2 + $0x28] sm:$0xff] %vm87_vm0, %v6488_v43  ;;  %v6432_v27 = vpop.permute.xlu0 %6431 }
 0xd54   :  { %v6473_v29 = vsub.f32 %v15882_v58, %v6432_v27 }
 0xd56   :  { %v6489_v62 = vsel %vm1735_vm5, %v15882_v58, %v6473_v29 }
 0xd57   :  { %6505 = vst.msk [vmem:[#allocation2 + $0x30] sm:$0xff] %vm87_vm0, %v6489_v62  ;;  %v6434_v15 = vpop.permute.xlu0 %6433 }
 0xd58   :  { %v6474_v26 = vsub.f32 %v15883_v52, %v6434_v15 }
 0xd5a   :  { %v6490_v42 = vsel %vm1735_vm5, %v15883_v52, %v6474_v26 }
 0xd5b   :  { %6506 = vst.msk [vmem:[#allocation2 + $0x38] sm:$0xff] %vm87_vm0, %v6490_v42  ;;  %v6436_v55 = vpop.permute.xlu0 %6435 }
 0xd5c   :  { %v6475_v44 = vsub.f32 %v15884_v4, %v6436_v55 }
 0xd5e   :  { %v6491_v14 = vsel %vm1735_vm5, %v15884_v4, %v6475_v44 }
 0xd5f   :  { %6507 = vst.msk [vmem:[#allocation2 + $0x40] sm:$0xff] %vm87_vm0, %v6491_v14  ;;  %v6438_v17 = vpop.permute.xlu1 %6437 }
 0xd60   :  { %v6476_v23 = vsub.f32 %v15885_v63, %v6438_v17 }
 0xd62   :  { %v6492_v47 = vsel %vm1735_vm5, %v15885_v63, %v6476_v23 }
 0xd63   :  { %6508 = vst.msk [vmem:[#allocation2 + $0x48] sm:$0xff] %vm87_vm0, %v6492_v47  ;;  %v6440_v9 = vpop.permute.xlu0 %6439 }
 0xd64   :  { %v6477_v20 = vsub.f32 %v15886_v21, %v6440_v9 }
 0xd66   :  { %v6493_v39 = vsel %vm1735_vm5, %v15886_v21, %v6477_v20 }
 0xd67   :  { %6509 = vst.msk [vmem:[#allocation2 + $0x50] sm:$0xff] %vm87_vm0, %v6493_v39  ;;  %v6442_v16 = vpop.permute.xlu0 %6441 }
 0xd68   :  { %v6478_v36 = vsub.f32 %v15887_v19, %v6442_v16 }
 0xd6a   :  { %v6494_v13 = vsel %vm1735_vm5, %v15887_v19, %v6478_v36 }
 0xd6b   :  { %6510 = vst.msk [vmem:[#allocation2 + $0x58] sm:$0xff] %vm87_vm0, %v6494_v13  ;;  %v6444_v12 = vpop.permute.xlu0 %6443 }
 0xd6c   :  { %v6479_v3 = vsub.f32 %v15888_v45, %v6444_v12 }
 0xd6e   :  { %v6495_v28 = vsel %vm1735_vm5, %v15888_v45, %v6479_v3 }
 0xd6f   :  { %6511 = vst.msk [vmem:[#allocation2 + $0x60] sm:$0xff] %vm87_vm0, %v6495_v28  ;;  %v6446_v18 = vpop.permute.xlu0 %6445 }
 0xd70   :  { %v6480_v41 = vsub.f32 %v15889_v31, %v6446_v18 }
 0xd72   :  { %v6496_v50 = vsel %vm1735_vm5, %v15889_v31, %v6480_v41 }
 0xd73   :  { %6512 = vst.msk [vmem:[#allocation2 + $0x68] sm:$0xff] %vm87_vm0, %v6496_v50 }
 0xd79   :  { %v6448_v30 = vpop.permute.xlu1 %6447 }
 0xd7a   :  { %v6481_v59 = vsub.f32 %v15890_v24, %v6448_v30 }
 0xd7c   :  { %v6497_v34 = vsel %vm1735_vm5, %v15890_v24, %v6481_v59 }
 0xd7d   :  { %6513 = vst.msk [vmem:[#allocation2 + $0x70] sm:$0xff] %vm87_vm0, %v6497_v34 }
 0xd7e   :  { %v6450_v56 = vpop.permute.xlu0 %6449 }
 0xd7f   :  { %v6482_v57 = vsub.f32 %v15891_v53, %v6450_v56 }
 0xd81   :  { %v6498_v49 = vsel %vm1735_vm5, %v15891_v53, %v6482_v57 }
 0xd82   :  { %6514 = vst.msk [vmem:[#allocation2 + $0x78] sm:$0xff] %vm87_vm0, %v6498_v49 }
 0xd83   :  { %7990 = shalt.err (!%p7987_p12)
}
 0xd84   :  { %s7991_s9 = scalar_lea.hbm %s14197_s10, 2048 }
 0xd85   :  { %p7992_p13 = scmp.ne.s32.totalorder %s14197_s10, %s7991_s9  ;;  %p7995_p0 = scmp.lt.u32.totalorder %s7991_s9, %s14197_s10 }
 0xd87   :  { %p7997_p1 = pnand %p7995_p0, %p7992_p13 }
 0xd89   :  { %8000 = shalt.err (!%p7997_p1)
}
 0xd8a   :  { %s8029_s4 = smov 128  }
 0xd8b   :  { %6528 = dma.vmem_to_hbm [thread:$0]  %s6523_s1, 2048, %s14197_s10, [#allocation3], %s8029_s4, %s8029_s4, %s8014_s27  }
 0xd8c   :  { %8001 = dma.done.wait [#allocation3], 2048  }
 0xd8d   :  { %8002 = vsyncadd [#allocation3], 4294965248 }
 0xd8e   :  { %8003 = dma.done.wait [#allocation5], 16  }
 0xd8f   :  { %8004 = vsyncadd [#allocation5], 4294967280 }
 0xd90   :  { %6545 = vsyncpa [#allocation3], 1 }
 0xd91   :  { %6546 = vsyncpa [#allocation5], 1 }

</bundles_post_ra>
